<compile_context>
chip_gen: v6e
topology: v6e:2x2x1
jax: 0.10.0
libtpu: 0.0.40
codegen_flags: <defaults>
</compile_context>

<pallas_src>
import jax
import jax.numpy as jnp
from jax.experimental import pallas as pl
from jax.experimental.pallas import tpu as pltpu

_BN_EPS = 1e-5


def _block_kernel(x_ref, w_ref, xmid_ref, out_ref, xt_ref):
    """Fused conv3x3 -> x_mid -> maxpool2x2(p=1) -> BatchNorm(train) -> ReLU.

    x_ref   : VMEM f32[N, Cin, H, W]               input (NCHW)
    w_ref   : VMEM f32[Cin*9, Cout*(W+2)]           lane-replicated weights:
                                                    row t=(ci*3+kh)*3+kw holds
                                                    weight[co,ci,kh,kw] on lanes
                                                    [co*(W+2), (co+1)*(W+2))
    xmid_ref: VMEM f32[N, Cout, H, W]               conv output (x_mid)
    out_ref : VMEM f32[N, Cout, H/2+1, W/2+1]       pooled + BN + ReLU output
    xt_ref  : VMEM f32[Cin, N, H+2, Cout*(W+2)+2]   scratch: zero-padded input,
                                                    replicated Cout x on lanes
    """
    n, cin, h, w = x_ref.shape
    cout = xmid_ref.shape[1]
    ho, wo = out_ref.shape[2], out_ref.shape[3]
    blk = w + 2                       # per-output-channel lane block width
    acc_w = cout * blk                # useful accumulator lane width

    # ---- in-kernel zero padding + Cout-fold lane replication ---------------
    xt_ref[...] = jnp.zeros(xt_ref.shape, jnp.float32)
    for ci in range(cin):
        xc = x_ref[:, ci, :, :]                                   # (N, H, W)
        for co in range(cout):
            xt_ref[ci, :, 1:1 + h, co * blk + 1:co * blk + 1 + w] = xc

    # ---- 3x3 conv: 36-tap shift-and-accumulate on one lane-dense slab ------
    # acc[nn, hh, co*blk + ww] accumulates x_mid[nn, co, hh, ww] (ww < w);
    # lanes ww in {w, w+1} of each block are garbage and are discarded below.
    acc = jnp.zeros((n, h, acc_w), jnp.float32)
    for ci in range(cin):
        for kh in range(3):
            # one (N, H, acc_w+2) row slab per (ci, kh); the kw shift is a
            # cheap static lane-offset slice of this slab (done once per tap).
            slab = xt_ref[ci, :, kh:kh + h, :]
            for kw in range(3):
                t = (ci * 3 + kh) * 3 + kw
                w_row = w_ref[t:t + 1, :]                         # (1, acc_w)
                acc = acc + w_row * slab[:, :, kw:kw + acc_w]

    # ---- x_mid: unfold the Cout lane blocks back to NCHW and store ---------
    y = jnp.stack([acc[:, :, co * blk:co * blk + w] for co in range(cout)],
                  axis=1)                                         # (N, Cout, H, W)
    xmid_ref[...] = y

    # ---- maxpool 2x2, stride 2, padding 1 -----------------------------------
    # window j covers input columns {2j-1, 2j} ∩ [0, W-1]  (no -inf needed).
    cols = [y[:, :, :, 0:1]]                                      # j = 0
    for j in range(1, wo - 1):
        cols.append(jnp.maximum(y[:, :, :, 2 * j - 1:2 * j],
                                y[:, :, :, 2 * j:2 * j + 1]))
    cols.append(y[:, :, :, w - 1:w])                              # j = wo-1
    cm = jnp.concatenate(cols, axis=3)                            # (N, Cout, H, Wo)

    rows = [cm[:, :, 0:1, :]]                                     # i = 0
    for i in range(1, ho - 1):
        rows.append(jnp.maximum(cm[:, :, 2 * i - 1:2 * i, :],
                                cm[:, :, 2 * i:2 * i + 1, :]))
    rows.append(cm[:, :, h - 1:h, :])                             # i = ho-1
    pooled = jnp.concatenate(rows, axis=2)                        # (N, Cout, Ho, Wo)

    # ---- BatchNorm2d (training mode: batch stats, biased var) + ReLU -------
    cnt = n * ho * wo

    def _mean_nhw(t):                                             # -> (1, Cout, 1, 1)
        s = jnp.sum(t, axis=3, keepdims=True)
        s = jnp.sum(s, axis=2, keepdims=True)
        s = jnp.sum(s, axis=0, keepdims=True)
        return s * (1.0 / cnt)

    mean = _mean_nhw(pooled)
    var = _mean_nhw(jnp.square(pooled - mean))   # biased variance (training BN)
    inv = jax.lax.rsqrt(var + _BN_EPS)           # EUP rsqrt; gamma=1, beta=0
    out_ref[...] = jnp.maximum((pooled - mean) * inv, 0.0)


# -------------------------------------------------------------------- wrapper
@jax.jit
def block_forward(x, weight):
    """Pallas equivalent of block.forward.  Returns (out, x_mid)."""
    x = x.astype(jnp.float32)
    weight = weight.astype(jnp.float32)
    n, cin, h, w = x.shape
    cout = weight.shape[0]
    assert weight.shape == (cout, cin, 3, 3)
    assert h % 2 == 0 and w % 2 == 0
    ho, wo = h // 2 + 1, w // 2 + 1
    blk = w + 2
    acc_w = cout * blk

    # Tiny one-time weight re-layout (parameter prep on 288 floats): one row
    # per tap, each output channel's scalar replicated across its lane block.
    wt = weight.transpose(1, 2, 3, 0).reshape(cin * 9, cout)      # (Cin*9, Cout)
    w_lane = jnp.repeat(wt, blk, axis=1)                          # (Cin*9, Cout*(W+2))

    x_mid, out = pl.pallas_call(
        _block_kernel,
        out_shape=(jax.ShapeDtypeStruct((n, cout, h, w), jnp.float32),
                   jax.ShapeDtypeStruct((n, cout, ho, wo), jnp.float32)),
        in_specs=[pl.BlockSpec(memory_space=pltpu.VMEM),
                  pl.BlockSpec(memory_space=pltpu.VMEM)],
        out_specs=(pl.BlockSpec(memory_space=pltpu.VMEM),
                   pl.BlockSpec(memory_space=pltpu.VMEM)),
        scratch_shapes=[pltpu.VMEM((cin, n, h + 2, acc_w + 2), jnp.float32)],
    )(x, w_lane)
    return out, x_mid


if __name__ == "__main__":
    key = jax.random.PRNGKey(0)
    kx, kw = jax.random.split(key)
    input_dims, output_dims = 4, 8
    x = jax.random.normal(kx, (2, input_dims, 16, 16), dtype=jnp.float32)
    weight = 0.1 * jax.random.normal(kw, (output_dims, input_dims, 3, 3),
                                     dtype=jnp.float32)

    out, x_mid = block_forward(x, weight)
    out = jax.block_until_ready(out)
    x_mid = jax.block_until_ready(x_mid)

    # ---- pure-JAX reference (f32, highest precision) ------------------------
    y_ref = jax.lax.conv_general_dilated(
        x, weight, window_strides=(1, 1), padding=((1, 1), (1, 1)),
        dimension_numbers=("NCHW", "OIHW", "NCHW"),
        precision=jax.lax.Precision.HIGHEST)
    p_ref = jax.lax.reduce_window(
        y_ref, -jnp.inf, jax.lax.max,
        window_dimensions=(1, 1, 2, 2), window_strides=(1, 1, 2, 2),
        padding=((0, 0), (0, 0), (1, 1), (1, 1)))
    mean = jnp.mean(p_ref, axis=(0, 2, 3), keepdims=True)
    var = jnp.mean(jnp.square(p_ref - mean), axis=(0, 2, 3), keepdims=True)
    out_ref = jnp.maximum((p_ref - mean) * jax.lax.rsqrt(var + _BN_EPS), 0.0)

    assert x_mid.shape == (2, output_dims, 16, 16)
    assert out.shape == (2, output_dims, 9, 9)
    assert jnp.allclose(x_mid, y_ref, atol=2e-4, rtol=2e-4), \
        float(jnp.max(jnp.abs(x_mid - y_ref)))
    assert jnp.allclose(out, out_ref, atol=2e-4, rtol=2e-4), \
        float(jnp.max(jnp.abs(out - out_ref)))
    print("KERNEL_OK")
</pallas_src>

<mosaic_0001>
module attributes {stable_mosaic.version = 11 : i64} {
  func.func @_block_kernel(%arg0: memref<2x4x16x16xf32, #tpu.memory_space<vmem>>, %arg1: memref<36x144xf32, #tpu.memory_space<vmem>>, %arg2: memref<2x8x16x16xf32, #tpu.memory_space<vmem>>, %arg3: memref<2x8x9x9xf32, #tpu.memory_space<vmem>>, %arg4: memref<4x2x18x146xf32, #tpu.memory_space<vmem>>) attributes {dimension_semantics = [], scalar_prefetch = 0 : i64, scratch_operands = 1 : i64, tpu.core_type = #tpu.core_type<tc>} {
    %cst = arith.constant 0.000000e+00 : f32
    %0 = vector.broadcast %cst : f32 to vector<4x2x18x146xf32>
    %c0 = arith.constant 0 : index
    %c0_0 = arith.constant 0 : index
    %c0_1 = arith.constant 0 : index
    %c0_2 = arith.constant 0 : index
    %1 = vector.load %arg4[%c0, %c0_0, %c0_1, %c0_2] : memref<4x2x18x146xf32, #tpu.memory_space<vmem>>, vector<4x2x18x146xf32>
    tpu.vector_store %arg4[%c0, %c0_0, %c0_1, %c0_2], %0 {strides = array<i32>} : memref<4x2x18x146xf32, #tpu.memory_space<vmem>>, vector<4x2x18x146xf32>,
    %c0_3 = arith.constant 0 : index
    %c0_4 = arith.constant 0 : index
    %c0_5 = arith.constant 0 : index
    %c0_6 = arith.constant 0 : index
    %2 = vector.load %arg0[%c0_3, %c0_4, %c0_5, %c0_6] : memref<2x4x16x16xf32, #tpu.memory_space<vmem>>, vector<2x1x16x16xf32>
    %3 = vector.shape_cast %2 : vector<2x1x16x16xf32> to vector<2x16x16xf32>
    %c0_7 = arith.constant 0 : index
    %c0_8 = arith.constant 0 : index
    %c1 = arith.constant 1 : index
    %c1_9 = arith.constant 1 : index
    %4 = vector.load %arg4[%c0_7, %c0_8, %c1, %c1_9] : memref<4x2x18x146xf32, #tpu.memory_space<vmem>>, vector<1x2x16x16xf32>
    %5 = vector.shape_cast %4 : vector<1x2x16x16xf32> to vector<2x16x16xf32>
    %6 = vector.shape_cast %3 : vector<2x16x16xf32> to vector<1x2x16x16xf32>
    tpu.vector_store %arg4[%c0_7, %c0_8, %c1, %c1_9], %6 {strides = array<i32>} : memref<4x2x18x146xf32, #tpu.memory_space<vmem>>, vector<1x2x16x16xf32>,
    %c0_10 = arith.constant 0 : index
    %c0_11 = arith.constant 0 : index
    %c1_12 = arith.constant 1 : index
    %c19 = arith.constant 19 : index
    %7 = vector.load %arg4[%c0_10, %c0_11, %c1_12, %c19] : memref<4x2x18x146xf32, #tpu.memory_space<vmem>>, vector<1x2x16x16xf32>
    %8 = vector.shape_cast %7 : vector<1x2x16x16xf32> to vector<2x16x16xf32>
    %9 = vector.shape_cast %3 : vector<2x16x16xf32> to vector<1x2x16x16xf32>
    tpu.vector_store %arg4[%c0_10, %c0_11, %c1_12, %c19], %9 {strides = array<i32>} : memref<4x2x18x146xf32, #tpu.memory_space<vmem>>, vector<1x2x16x16xf32>,
    %c0_13 = arith.constant 0 : index
    %c0_14 = arith.constant 0 : index
    %c1_15 = arith.constant 1 : index
    %c37 = arith.constant 37 : index
    %10 = vector.load %arg4[%c0_13, %c0_14, %c1_15, %c37] : memref<4x2x18x146xf32, #tpu.memory_space<vmem>>, vector<1x2x16x16xf32>
    %11 = vector.shape_cast %10 : vector<1x2x16x16xf32> to vector<2x16x16xf32>
    %12 = vector.shape_cast %3 : vector<2x16x16xf32> to vector<1x2x16x16xf32>
    tpu.vector_store %arg4[%c0_13, %c0_14, %c1_15, %c37], %12 {strides = array<i32>} : memref<4x2x18x146xf32, #tpu.memory_space<vmem>>, vector<1x2x16x16xf32>,
    %c0_16 = arith.constant 0 : index
    %c0_17 = arith.constant 0 : index
    %c1_18 = arith.constant 1 : index
    %c55 = arith.constant 55 : index
    %13 = vector.load %arg4[%c0_16, %c0_17, %c1_18, %c55] : memref<4x2x18x146xf32, #tpu.memory_space<vmem>>, vector<1x2x16x16xf32>
    %14 = vector.shape_cast %13 : vector<1x2x16x16xf32> to vector<2x16x16xf32>
    %15 = vector.shape_cast %3 : vector<2x16x16xf32> to vector<1x2x16x16xf32>
    tpu.vector_store %arg4[%c0_16, %c0_17, %c1_18, %c55], %15 {strides = array<i32>} : memref<4x2x18x146xf32, #tpu.memory_space<vmem>>, vector<1x2x16x16xf32>,
    %c0_19 = arith.constant 0 : index
    %c0_20 = arith.constant 0 : index
    %c1_21 = arith.constant 1 : index
    %c73 = arith.constant 73 : index
    %16 = vector.load %arg4[%c0_19, %c0_20, %c1_21, %c73] : memref<4x2x18x146xf32, #tpu.memory_space<vmem>>, vector<1x2x16x16xf32>
    %17 = vector.shape_cast %16 : vector<1x2x16x16xf32> to vector<2x16x16xf32>
    %18 = vector.shape_cast %3 : vector<2x16x16xf32> to vector<1x2x16x16xf32>
    tpu.vector_store %arg4[%c0_19, %c0_20, %c1_21, %c73], %18 {strides = array<i32>} : memref<4x2x18x146xf32, #tpu.memory_space<vmem>>, vector<1x2x16x16xf32>,
    %c0_22 = arith.constant 0 : index
    %c0_23 = arith.constant 0 : index
    %c1_24 = arith.constant 1 : index
    %c91 = arith.constant 91 : index
    %19 = vector.load %arg4[%c0_22, %c0_23, %c1_24, %c91] : memref<4x2x18x146xf32, #tpu.memory_space<vmem>>, vector<1x2x16x16xf32>
    %20 = vector.shape_cast %19 : vector<1x2x16x16xf32> to vector<2x16x16xf32>
    %21 = vector.shape_cast %3 : vector<2x16x16xf32> to vector<1x2x16x16xf32>
    tpu.vector_store %arg4[%c0_22, %c0_23, %c1_24, %c91], %21 {strides = array<i32>} : memref<4x2x18x146xf32, #tpu.memory_space<vmem>>, vector<1x2x16x16xf32>,
    %c0_25 = arith.constant 0 : index
    %c0_26 = arith.constant 0 : index
    %c1_27 = arith.constant 1 : index
    %c109 = arith.constant 109 : index
    %22 = vector.load %arg4[%c0_25, %c0_26, %c1_27, %c109] : memref<4x2x18x146xf32, #tpu.memory_space<vmem>>, vector<1x2x16x16xf32>
    %23 = vector.shape_cast %22 : vector<1x2x16x16xf32> to vector<2x16x16xf32>
    %24 = vector.shape_cast %3 : vector<2x16x16xf32> to vector<1x2x16x16xf32>
    tpu.vector_store %arg4[%c0_25, %c0_26, %c1_27, %c109], %24 {strides = array<i32>} : memref<4x2x18x146xf32, #tpu.memory_space<vmem>>, vector<1x2x16x16xf32>,
    %c0_28 = arith.constant 0 : index
    %c0_29 = arith.constant 0 : index
    %c1_30 = arith.constant 1 : index
    %c127 = arith.constant 127 : index
    %25 = vector.load %arg4[%c0_28, %c0_29, %c1_30, %c127] : memref<4x2x18x146xf32, #tpu.memory_space<vmem>>, vector<1x2x16x16xf32>
    %26 = vector.shape_cast %25 : vector<1x2x16x16xf32> to vector<2x16x16xf32>
    %27 = vector.shape_cast %3 : vector<2x16x16xf32> to vector<1x2x16x16xf32>
    tpu.vector_store %arg4[%c0_28, %c0_29, %c1_30, %c127], %27 {strides = array<i32>} : memref<4x2x18x146xf32, #tpu.memory_space<vmem>>, vector<1x2x16x16xf32>,
    %c0_31 = arith.constant 0 : index
    %c1_32 = arith.constant 1 : index
    %c0_33 = arith.constant 0 : index
    %c0_34 = arith.constant 0 : index
    %28 = vector.load %arg0[%c0_31, %c1_32, %c0_33, %c0_34] : memref<2x4x16x16xf32, #tpu.memory_space<vmem>>, vector<2x1x16x16xf32>
    %29 = vector.shape_cast %28 : vector<2x1x16x16xf32> to vector<2x16x16xf32>
    %c1_35 = arith.constant 1 : index
    %c0_36 = arith.constant 0 : index
    %c1_37 = arith.constant 1 : index
    %c1_38 = arith.constant 1 : index
    %30 = vector.load %arg4[%c1_35, %c0_36, %c1_37, %c1_38] : memref<4x2x18x146xf32, #tpu.memory_space<vmem>>, vector<1x2x16x16xf32>
    %31 = vector.shape_cast %30 : vector<1x2x16x16xf32> to vector<2x16x16xf32>
    %32 = vector.shape_cast %29 : vector<2x16x16xf32> to vector<1x2x16x16xf32>
    tpu.vector_store %arg4[%c1_35, %c0_36, %c1_37, %c1_38], %32 {strides = array<i32>} : memref<4x2x18x146xf32, #tpu.memory_space<vmem>>, vector<1x2x16x16xf32>,
    %c1_39 = arith.constant 1 : index
    %c0_40 = arith.constant 0 : index
    %c1_41 = arith.constant 1 : index
    %c19_42 = arith.constant 19 : index
    %33 = vector.load %arg4[%c1_39, %c0_40, %c1_41, %c19_42] : memref<4x2x18x146xf32, #tpu.memory_space<vmem>>, vector<1x2x16x16xf32>
    %34 = vector.shape_cast %33 : vector<1x2x16x16xf32> to vector<2x16x16xf32>
    %35 = vector.shape_cast %29 : vector<2x16x16xf32> to vector<1x2x16x16xf32>
    tpu.vector_store %arg4[%c1_39, %c0_40, %c1_41, %c19_42], %35 {strides = array<i32>} : memref<4x2x18x146xf32, #tpu.memory_space<vmem>>, vector<1x2x16x16xf32>,
    %c1_43 = arith.constant 1 : index
    %c0_44 = arith.constant 0 : index
    %c1_45 = arith.constant 1 : index
    %c37_46 = arith.constant 37 : index
    %36 = vector.load %arg4[%c1_43, %c0_44, %c1_45, %c37_46] : memref<4x2x18x146xf32, #tpu.memory_space<vmem>>, vector<1x2x16x16xf32>
    %37 = vector.shape_cast %36 : vector<1x2x16x16xf32> to vector<2x16x16xf32>
    %38 = vector.shape_cast %29 : vector<2x16x16xf32> to vector<1x2x16x16xf32>
    tpu.vector_store %arg4[%c1_43, %c0_44, %c1_45, %c37_46], %38 {strides = array<i32>} : memref<4x2x18x146xf32, #tpu.memory_space<vmem>>, vector<1x2x16x16xf32>,
    %c1_47 = arith.constant 1 : index
    %c0_48 = arith.constant 0 : index
    %c1_49 = arith.constant 1 : index
    %c55_50 = arith.constant 55 : index
    %39 = vector.load %arg4[%c1_47, %c0_48, %c1_49, %c55_50] : memref<4x2x18x146xf32, #tpu.memory_space<vmem>>, vector<1x2x16x16xf32>
    %40 = vector.shape_cast %39 : vector<1x2x16x16xf32> to vector<2x16x16xf32>
    %41 = vector.shape_cast %29 : vector<2x16x16xf32> to vector<1x2x16x16xf32>
    tpu.vector_store %arg4[%c1_47, %c0_48, %c1_49, %c55_50], %41 {strides = array<i32>} : memref<4x2x18x146xf32, #tpu.memory_space<vmem>>, vector<1x2x16x16xf32>,
    %c1_51 = arith.constant 1 : index
    %c0_52 = arith.constant 0 : index
    %c1_53 = arith.constant 1 : index
    %c73_54 = arith.constant 73 : index
    %42 = vector.load %arg4[%c1_51, %c0_52, %c1_53, %c73_54] : memref<4x2x18x146xf32, #tpu.memory_space<vmem>>, vector<1x2x16x16xf32>
    %43 = vector.shape_cast %42 : vector<1x2x16x16xf32> to vector<2x16x16xf32>
    %44 = vector.shape_cast %29 : vector<2x16x16xf32> to vector<1x2x16x16xf32>
    tpu.vector_store %arg4[%c1_51, %c0_52, %c1_53, %c73_54], %44 {strides = array<i32>} : memref<4x2x18x146xf32, #tpu.memory_space<vmem>>, vector<1x2x16x16xf32>,
    %c1_55 = arith.constant 1 : index
    %c0_56 = arith.constant 0 : index
    %c1_57 = arith.constant 1 : index
    %c91_58 = arith.constant 91 : index
    %45 = vector.load %arg4[%c1_55, %c0_56, %c1_57, %c91_58] : memref<4x2x18x146xf32, #tpu.memory_space<vmem>>, vector<1x2x16x16xf32>
    %46 = vector.shape_cast %45 : vector<1x2x16x16xf32> to vector<2x16x16xf32>
    %47 = vector.shape_cast %29 : vector<2x16x16xf32> to vector<1x2x16x16xf32>
    tpu.vector_store %arg4[%c1_55, %c0_56, %c1_57, %c91_58], %47 {strides = array<i32>} : memref<4x2x18x146xf32, #tpu.memory_space<vmem>>, vector<1x2x16x16xf32>,
    %c1_59 = arith.constant 1 : index
    %c0_60 = arith.constant 0 : index
    %c1_61 = arith.constant 1 : index
    %c109_62 = arith.constant 109 : index
    %48 = vector.load %arg4[%c1_59, %c0_60, %c1_61, %c109_62] : memref<4x2x18x146xf32, #tpu.memory_space<vmem>>, vector<1x2x16x16xf32>
    %49 = vector.shape_cast %48 : vector<1x2x16x16xf32> to vector<2x16x16xf32>
    %50 = vector.shape_cast %29 : vector<2x16x16xf32> to vector<1x2x16x16xf32>
    tpu.vector_store %arg4[%c1_59, %c0_60, %c1_61, %c109_62], %50 {strides = array<i32>} : memref<4x2x18x146xf32, #tpu.memory_space<vmem>>, vector<1x2x16x16xf32>,
    %c1_63 = arith.constant 1 : index
    %c0_64 = arith.constant 0 : index
    %c1_65 = arith.constant 1 : index
    %c127_66 = arith.constant 127 : index
    %51 = vector.load %arg4[%c1_63, %c0_64, %c1_65, %c127_66] : memref<4x2x18x146xf32, #tpu.memory_space<vmem>>, vector<1x2x16x16xf32>
    %52 = vector.shape_cast %51 : vector<1x2x16x16xf32> to vector<2x16x16xf32>
    %53 = vector.shape_cast %29 : vector<2x16x16xf32> to vector<1x2x16x16xf32>
    tpu.vector_store %arg4[%c1_63, %c0_64, %c1_65, %c127_66], %53 {strides = array<i32>} : memref<4x2x18x146xf32, #tpu.memory_space<vmem>>, vector<1x2x16x16xf32>,
    %c0_67 = arith.constant 0 : index
    %c2 = arith.constant 2 : index
    %c0_68 = arith.constant 0 : index
    %c0_69 = arith.constant 0 : index
    %54 = vector.load %arg0[%c0_67, %c2, %c0_68, %c0_69] : memref<2x4x16x16xf32, #tpu.memory_space<vmem>>, vector<2x1x16x16xf32>
    %55 = vector.shape_cast %54 : vector<2x1x16x16xf32> to vector<2x16x16xf32>
    %c2_70 = arith.constant 2 : index
    %c0_71 = arith.constant 0 : index
    %c1_72 = arith.constant 1 : index
    %c1_73 = arith.constant 1 : index
    %56 = vector.load %arg4[%c2_70, %c0_71, %c1_72, %c1_73] : memref<4x2x18x146xf32, #tpu.memory_space<vmem>>, vector<1x2x16x16xf32>
    %57 = vector.shape_cast %56 : vector<1x2x16x16xf32> to vector<2x16x16xf32>
    %58 = vector.shape_cast %55 : vector<2x16x16xf32> to vector<1x2x16x16xf32>
    tpu.vector_store %arg4[%c2_70, %c0_71, %c1_72, %c1_73], %58 {strides = array<i32>} : memref<4x2x18x146xf32, #tpu.memory_space<vmem>>, vector<1x2x16x16xf32>,
    %c2_74 = arith.constant 2 : index
    %c0_75 = arith.constant 0 : index
    %c1_76 = arith.constant 1 : index
    %c19_77 = arith.constant 19 : index
    %59 = vector.load %arg4[%c2_74, %c0_75, %c1_76, %c19_77] : memref<4x2x18x146xf32, #tpu.memory_space<vmem>>, vector<1x2x16x16xf32>
    %60 = vector.shape_cast %59 : vector<1x2x16x16xf32> to vector<2x16x16xf32>
    %61 = vector.shape_cast %55 : vector<2x16x16xf32> to vector<1x2x16x16xf32>
    tpu.vector_store %arg4[%c2_74, %c0_75, %c1_76, %c19_77], %61 {strides = array<i32>} : memref<4x2x18x146xf32, #tpu.memory_space<vmem>>, vector<1x2x16x16xf32>,
    %c2_78 = arith.constant 2 : index
    %c0_79 = arith.constant 0 : index
    %c1_80 = arith.constant 1 : index
    %c37_81 = arith.constant 37 : index
    %62 = vector.load %arg4[%c2_78, %c0_79, %c1_80, %c37_81] : memref<4x2x18x146xf32, #tpu.memory_space<vmem>>, vector<1x2x16x16xf32>
    %63 = vector.shape_cast %62 : vector<1x2x16x16xf32> to vector<2x16x16xf32>
    %64 = vector.shape_cast %55 : vector<2x16x16xf32> to vector<1x2x16x16xf32>
    tpu.vector_store %arg4[%c2_78, %c0_79, %c1_80, %c37_81], %64 {strides = array<i32>} : memref<4x2x18x146xf32, #tpu.memory_space<vmem>>, vector<1x2x16x16xf32>,
    %c2_82 = arith.constant 2 : index
    %c0_83 = arith.constant 0 : index
    %c1_84 = arith.constant 1 : index
    %c55_85 = arith.constant 55 : index
    %65 = vector.load %arg4[%c2_82, %c0_83, %c1_84, %c55_85] : memref<4x2x18x146xf32, #tpu.memory_space<vmem>>, vector<1x2x16x16xf32>
    %66 = vector.shape_cast %65 : vector<1x2x16x16xf32> to vector<2x16x16xf32>
    %67 = vector.shape_cast %55 : vector<2x16x16xf32> to vector<1x2x16x16xf32>
    tpu.vector_store %arg4[%c2_82, %c0_83, %c1_84, %c55_85], %67 {strides = array<i32>} : memref<4x2x18x146xf32, #tpu.memory_space<vmem>>, vector<1x2x16x16xf32>,
    %c2_86 = arith.constant 2 : index
    %c0_87 = arith.constant 0 : index
    %c1_88 = arith.constant 1 : index
    %c73_89 = arith.constant 73 : index
    %68 = vector.load %arg4[%c2_86, %c0_87, %c1_88, %c73_89] : memref<4x2x18x146xf32, #tpu.memory_space<vmem>>, vector<1x2x16x16xf32>
    %69 = vector.shape_cast %68 : vector<1x2x16x16xf32> to vector<2x16x16xf32>
    %70 = vector.shape_cast %55 : vector<2x16x16xf32> to vector<1x2x16x16xf32>
    tpu.vector_store %arg4[%c2_86, %c0_87, %c1_88, %c73_89], %70 {strides = array<i32>} : memref<4x2x18x146xf32, #tpu.memory_space<vmem>>, vector<1x2x16x16xf32>,
    %c2_90 = arith.constant 2 : index
    %c0_91 = arith.constant 0 : index
    %c1_92 = arith.constant 1 : index
    %c91_93 = arith.constant 91 : index
    %71 = vector.load %arg4[%c2_90, %c0_91, %c1_92, %c91_93] : memref<4x2x18x146xf32, #tpu.memory_space<vmem>>, vector<1x2x16x16xf32>
    %72 = vector.shape_cast %71 : vector<1x2x16x16xf32> to vector<2x16x16xf32>
    %73 = vector.shape_cast %55 : vector<2x16x16xf32> to vector<1x2x16x16xf32>
    tpu.vector_store %arg4[%c2_90, %c0_91, %c1_92, %c91_93], %73 {strides = array<i32>} : memref<4x2x18x146xf32, #tpu.memory_space<vmem>>, vector<1x2x16x16xf32>,
    %c2_94 = arith.constant 2 : index
    %c0_95 = arith.constant 0 : index
    %c1_96 = arith.constant 1 : index
    %c109_97 = arith.constant 109 : index
    %74 = vector.load %arg4[%c2_94, %c0_95, %c1_96, %c109_97] : memref<4x2x18x146xf32, #tpu.memory_space<vmem>>, vector<1x2x16x16xf32>
    %75 = vector.shape_cast %74 : vector<1x2x16x16xf32> to vector<2x16x16xf32>
    %76 = vector.shape_cast %55 : vector<2x16x16xf32> to vector<1x2x16x16xf32>
    tpu.vector_store %arg4[%c2_94, %c0_95, %c1_96, %c109_97], %76 {strides = array<i32>} : memref<4x2x18x146xf32, #tpu.memory_space<vmem>>, vector<1x2x16x16xf32>,
    %c2_98 = arith.constant 2 : index
    %c0_99 = arith.constant 0 : index
    %c1_100 = arith.constant 1 : index
    %c127_101 = arith.constant 127 : index
    %77 = vector.load %arg4[%c2_98, %c0_99, %c1_100, %c127_101] : memref<4x2x18x146xf32, #tpu.memory_space<vmem>>, vector<1x2x16x16xf32>
    %78 = vector.shape_cast %77 : vector<1x2x16x16xf32> to vector<2x16x16xf32>
    %79 = vector.shape_cast %55 : vector<2x16x16xf32> to vector<1x2x16x16xf32>
    tpu.vector_store %arg4[%c2_98, %c0_99, %c1_100, %c127_101], %79 {strides = array<i32>} : memref<4x2x18x146xf32, #tpu.memory_space<vmem>>, vector<1x2x16x16xf32>,
    %c0_102 = arith.constant 0 : index
    %c3 = arith.constant 3 : index
    %c0_103 = arith.constant 0 : index
    %c0_104 = arith.constant 0 : index
    %80 = vector.load %arg0[%c0_102, %c3, %c0_103, %c0_104] : memref<2x4x16x16xf32, #tpu.memory_space<vmem>>, vector<2x1x16x16xf32>
    %81 = vector.shape_cast %80 : vector<2x1x16x16xf32> to vector<2x16x16xf32>
    %c3_105 = arith.constant 3 : index
    %c0_106 = arith.constant 0 : index
    %c1_107 = arith.constant 1 : index
    %c1_108 = arith.constant 1 : index
    %82 = vector.load %arg4[%c3_105, %c0_106, %c1_107, %c1_108] : memref<4x2x18x146xf32, #tpu.memory_space<vmem>>, vector<1x2x16x16xf32>
    %83 = vector.shape_cast %82 : vector<1x2x16x16xf32> to vector<2x16x16xf32>
    %84 = vector.shape_cast %81 : vector<2x16x16xf32> to vector<1x2x16x16xf32>
    tpu.vector_store %arg4[%c3_105, %c0_106, %c1_107, %c1_108], %84 {strides = array<i32>} : memref<4x2x18x146xf32, #tpu.memory_space<vmem>>, vector<1x2x16x16xf32>,
    %c3_109 = arith.constant 3 : index
    %c0_110 = arith.constant 0 : index
    %c1_111 = arith.constant 1 : index
    %c19_112 = arith.constant 19 : index
    %85 = vector.load %arg4[%c3_109, %c0_110, %c1_111, %c19_112] : memref<4x2x18x146xf32, #tpu.memory_space<vmem>>, vector<1x2x16x16xf32>
    %86 = vector.shape_cast %85 : vector<1x2x16x16xf32> to vector<2x16x16xf32>
    %87 = vector.shape_cast %81 : vector<2x16x16xf32> to vector<1x2x16x16xf32>
    tpu.vector_store %arg4[%c3_109, %c0_110, %c1_111, %c19_112], %87 {strides = array<i32>} : memref<4x2x18x146xf32, #tpu.memory_space<vmem>>, vector<1x2x16x16xf32>,
    %c3_113 = arith.constant 3 : index
    %c0_114 = arith.constant 0 : index
    %c1_115 = arith.constant 1 : index
    %c37_116 = arith.constant 37 : index
    %88 = vector.load %arg4[%c3_113, %c0_114, %c1_115, %c37_116] : memref<4x2x18x146xf32, #tpu.memory_space<vmem>>, vector<1x2x16x16xf32>
    %89 = vector.shape_cast %88 : vector<1x2x16x16xf32> to vector<2x16x16xf32>
    %90 = vector.shape_cast %81 : vector<2x16x16xf32> to vector<1x2x16x16xf32>
    tpu.vector_store %arg4[%c3_113, %c0_114, %c1_115, %c37_116], %90 {strides = array<i32>} : memref<4x2x18x146xf32, #tpu.memory_space<vmem>>, vector<1x2x16x16xf32>,
    %c3_117 = arith.constant 3 : index
    %c0_118 = arith.constant 0 : index
    %c1_119 = arith.constant 1 : index
    %c55_120 = arith.constant 55 : index
    %91 = vector.load %arg4[%c3_117, %c0_118, %c1_119, %c55_120] : memref<4x2x18x146xf32, #tpu.memory_space<vmem>>, vector<1x2x16x16xf32>
    %92 = vector.shape_cast %91 : vector<1x2x16x16xf32> to vector<2x16x16xf32>
    %93 = vector.shape_cast %81 : vector<2x16x16xf32> to vector<1x2x16x16xf32>
    tpu.vector_store %arg4[%c3_117, %c0_118, %c1_119, %c55_120], %93 {strides = array<i32>} : memref<4x2x18x146xf32, #tpu.memory_space<vmem>>, vector<1x2x16x16xf32>,
    %c3_121 = arith.constant 3 : index
    %c0_122 = arith.constant 0 : index
    %c1_123 = arith.constant 1 : index
    %c73_124 = arith.constant 73 : index
    %94 = vector.load %arg4[%c3_121, %c0_122, %c1_123, %c73_124] : memref<4x2x18x146xf32, #tpu.memory_space<vmem>>, vector<1x2x16x16xf32>
    %95 = vector.shape_cast %94 : vector<1x2x16x16xf32> to vector<2x16x16xf32>
    %96 = vector.shape_cast %81 : vector<2x16x16xf32> to vector<1x2x16x16xf32>
    tpu.vector_store %arg4[%c3_121, %c0_122, %c1_123, %c73_124], %96 {strides = array<i32>} : memref<4x2x18x146xf32, #tpu.memory_space<vmem>>, vector<1x2x16x16xf32>,
    %c3_125 = arith.constant 3 : index
    %c0_126 = arith.constant 0 : index
    %c1_127 = arith.constant 1 : index
    %c91_128 = arith.constant 91 : index
    %97 = vector.load %arg4[%c3_125, %c0_126, %c1_127, %c91_128] : memref<4x2x18x146xf32, #tpu.memory_space<vmem>>, vector<1x2x16x16xf32>
    %98 = vector.shape_cast %97 : vector<1x2x16x16xf32> to vector<2x16x16xf32>
    %99 = vector.shape_cast %81 : vector<2x16x16xf32> to vector<1x2x16x16xf32>
    tpu.vector_store %arg4[%c3_125, %c0_126, %c1_127, %c91_128], %99 {strides = array<i32>} : memref<4x2x18x146xf32, #tpu.memory_space<vmem>>, vector<1x2x16x16xf32>,
    %c3_129 = arith.constant 3 : index
    %c0_130 = arith.constant 0 : index
    %c1_131 = arith.constant 1 : index
    %c109_132 = arith.constant 109 : index
    %100 = vector.load %arg4[%c3_129, %c0_130, %c1_131, %c109_132] : memref<4x2x18x146xf32, #tpu.memory_space<vmem>>, vector<1x2x16x16xf32>
    %101 = vector.shape_cast %100 : vector<1x2x16x16xf32> to vector<2x16x16xf32>
    %102 = vector.shape_cast %81 : vector<2x16x16xf32> to vector<1x2x16x16xf32>
    tpu.vector_store %arg4[%c3_129, %c0_130, %c1_131, %c109_132], %102 {strides = array<i32>} : memref<4x2x18x146xf32, #tpu.memory_space<vmem>>, vector<1x2x16x16xf32>,
    %c3_133 = arith.constant 3 : index
    %c0_134 = arith.constant 0 : index
    %c1_135 = arith.constant 1 : index
    %c127_136 = arith.constant 127 : index
    %103 = vector.load %arg4[%c3_133, %c0_134, %c1_135, %c127_136] : memref<4x2x18x146xf32, #tpu.memory_space<vmem>>, vector<1x2x16x16xf32>
    %104 = vector.shape_cast %103 : vector<1x2x16x16xf32> to vector<2x16x16xf32>
    %105 = vector.shape_cast %81 : vector<2x16x16xf32> to vector<1x2x16x16xf32>
    tpu.vector_store %arg4[%c3_133, %c0_134, %c1_135, %c127_136], %105 {strides = array<i32>} : memref<4x2x18x146xf32, #tpu.memory_space<vmem>>, vector<1x2x16x16xf32>,
    %cst_137 = arith.constant 0.000000e+00 : f32
    %106 = vector.broadcast %cst_137 : f32 to vector<2x16x144xf32>
    %c0_138 = arith.constant 0 : index
    %c0_139 = arith.constant 0 : index
    %c0_140 = arith.constant 0 : index
    %c0_141 = arith.constant 0 : index
    %107 = vector.load %arg4[%c0_138, %c0_139, %c0_140, %c0_141] : memref<4x2x18x146xf32, #tpu.memory_space<vmem>>, vector<1x2x16x146xf32>
    %108 = vector.shape_cast %107 : vector<1x2x16x146xf32> to vector<2x16x146xf32>
    %c0_142 = arith.constant 0 : index
    %c0_143 = arith.constant 0 : index
    %109 = vector.load %arg1[%c0_142, %c0_143] : memref<36x144xf32, #tpu.memory_space<vmem>>, vector<1x144xf32>
    %110 = vector.extract_strided_slice %108 {offsets = [0, 0, 0], sizes = [2, 16, 144], strides = [1, 1, 1]} : vector<2x16x146xf32> to vector<2x16x144xf32>
    %111 = vector.shape_cast %109 : vector<1x144xf32> to vector<1x1x144xf32>
    %112 = vector.broadcast %111 : vector<1x1x144xf32> to vector<2x16x144xf32>
    %113 = arith.mulf %112, %110 : vector<2x16x144xf32>
    %114 = arith.addf %106, %113 : vector<2x16x144xf32>
    %c1_144 = arith.constant 1 : index
    %c0_145 = arith.constant 0 : index
    %115 = vector.load %arg1[%c1_144, %c0_145] : memref<36x144xf32, #tpu.memory_space<vmem>>, vector<1x144xf32>
    %116 = vector.extract_strided_slice %108 {offsets = [0, 0, 1], sizes = [2, 16, 144], strides = [1, 1, 1]} : vector<2x16x146xf32> to vector<2x16x144xf32>
    %117 = vector.shape_cast %115 : vector<1x144xf32> to vector<1x1x144xf32>
    %118 = vector.broadcast %117 : vector<1x1x144xf32> to vector<2x16x144xf32>
    %119 = arith.mulf %118, %116 : vector<2x16x144xf32>
    %120 = arith.addf %114, %119 : vector<2x16x144xf32>
    %c2_146 = arith.constant 2 : index
    %c0_147 = arith.constant 0 : index
    %121 = vector.load %arg1[%c2_146, %c0_147] : memref<36x144xf32, #tpu.memory_space<vmem>>, vector<1x144xf32>
    %122 = vector.extract_strided_slice %108 {offsets = [0, 0, 2], sizes = [2, 16, 144], strides = [1, 1, 1]} : vector<2x16x146xf32> to vector<2x16x144xf32>
    %123 = vector.shape_cast %121 : vector<1x144xf32> to vector<1x1x144xf32>
    %124 = vector.broadcast %123 : vector<1x1x144xf32> to vector<2x16x144xf32>
    %125 = arith.mulf %124, %122 : vector<2x16x144xf32>
    %126 = arith.addf %120, %125 : vector<2x16x144xf32>
    %c0_148 = arith.constant 0 : index
    %c0_149 = arith.constant 0 : index
    %c1_150 = arith.constant 1 : index
    %c0_151 = arith.constant 0 : index
    %127 = vector.load %arg4[%c0_148, %c0_149, %c1_150, %c0_151] : memref<4x2x18x146xf32, #tpu.memory_space<vmem>>, vector<1x2x16x146xf32>
    %128 = vector.shape_cast %127 : vector<1x2x16x146xf32> to vector<2x16x146xf32>
    %c3_152 = arith.constant 3 : index
    %c0_153 = arith.constant 0 : index
    %129 = vector.load %arg1[%c3_152, %c0_153] : memref<36x144xf32, #tpu.memory_space<vmem>>, vector<1x144xf32>
    %130 = vector.extract_strided_slice %128 {offsets = [0, 0, 0], sizes = [2, 16, 144], strides = [1, 1, 1]} : vector<2x16x146xf32> to vector<2x16x144xf32>
    %131 = vector.shape_cast %129 : vector<1x144xf32> to vector<1x1x144xf32>
    %132 = vector.broadcast %131 : vector<1x1x144xf32> to vector<2x16x144xf32>
    %133 = arith.mulf %132, %130 : vector<2x16x144xf32>
    %134 = arith.addf %126, %133 : vector<2x16x144xf32>
    %c4 = arith.constant 4 : index
    %c0_154 = arith.constant 0 : index
    %135 = vector.load %arg1[%c4, %c0_154] : memref<36x144xf32, #tpu.memory_space<vmem>>, vector<1x144xf32>
    %136 = vector.extract_strided_slice %128 {offsets = [0, 0, 1], sizes = [2, 16, 144], strides = [1, 1, 1]} : vector<2x16x146xf32> to vector<2x16x144xf32>
    %137 = vector.shape_cast %135 : vector<1x144xf32> to vector<1x1x144xf32>
    %138 = vector.broadcast %137 : vector<1x1x144xf32> to vector<2x16x144xf32>
    %139 = arith.mulf %138, %136 : vector<2x16x144xf32>
    %140 = arith.addf %134, %139 : vector<2x16x144xf32>
    %c5 = arith.constant 5 : index
    %c0_155 = arith.constant 0 : index
    %141 = vector.load %arg1[%c5, %c0_155] : memref<36x144xf32, #tpu.memory_space<vmem>>, vector<1x144xf32>
    %142 = vector.extract_strided_slice %128 {offsets = [0, 0, 2], sizes = [2, 16, 144], strides = [1, 1, 1]} : vector<2x16x146xf32> to vector<2x16x144xf32>
    %143 = vector.shape_cast %141 : vector<1x144xf32> to vector<1x1x144xf32>
    %144 = vector.broadcast %143 : vector<1x1x144xf32> to vector<2x16x144xf32>
    %145 = arith.mulf %144, %142 : vector<2x16x144xf32>
    %146 = arith.addf %140, %145 : vector<2x16x144xf32>
    %c0_156 = arith.constant 0 : index
    %c0_157 = arith.constant 0 : index
    %c2_158 = arith.constant 2 : index
    %c0_159 = arith.constant 0 : index
    %147 = vector.load %arg4[%c0_156, %c0_157, %c2_158, %c0_159] : memref<4x2x18x146xf32, #tpu.memory_space<vmem>>, vector<1x2x16x146xf32>
    %148 = vector.shape_cast %147 : vector<1x2x16x146xf32> to vector<2x16x146xf32>
    %c6 = arith.constant 6 : index
    %c0_160 = arith.constant 0 : index
    %149 = vector.load %arg1[%c6, %c0_160] : memref<36x144xf32, #tpu.memory_space<vmem>>, vector<1x144xf32>
    %150 = vector.extract_strided_slice %148 {offsets = [0, 0, 0], sizes = [2, 16, 144], strides = [1, 1, 1]} : vector<2x16x146xf32> to vector<2x16x144xf32>
    %151 = vector.shape_cast %149 : vector<1x144xf32> to vector<1x1x144xf32>
    %152 = vector.broadcast %151 : vector<1x1x144xf32> to vector<2x16x144xf32>
    %153 = arith.mulf %152, %150 : vector<2x16x144xf32>
    %154 = arith.addf %146, %153 : vector<2x16x144xf32>
    %c7 = arith.constant 7 : index
    %c0_161 = arith.constant 0 : index
    %155 = vector.load %arg1[%c7, %c0_161] : memref<36x144xf32, #tpu.memory_space<vmem>>, vector<1x144xf32>
    %156 = vector.extract_strided_slice %148 {offsets = [0, 0, 1], sizes = [2, 16, 144], strides = [1, 1, 1]} : vector<2x16x146xf32> to vector<2x16x144xf32>
    %157 = vector.shape_cast %155 : vector<1x144xf32> to vector<1x1x144xf32>
    %158 = vector.broadcast %157 : vector<1x1x144xf32> to vector<2x16x144xf32>
    %159 = arith.mulf %158, %156 : vector<2x16x144xf32>
    %160 = arith.addf %154, %159 : vector<2x16x144xf32>
    %c8 = arith.constant 8 : index
    %c0_162 = arith.constant 0 : index
    %161 = vector.load %arg1[%c8, %c0_162] : memref<36x144xf32, #tpu.memory_space<vmem>>, vector<1x144xf32>
    %162 = vector.extract_strided_slice %148 {offsets = [0, 0, 2], sizes = [2, 16, 144], strides = [1, 1, 1]} : vector<2x16x146xf32> to vector<2x16x144xf32>
    %163 = vector.shape_cast %161 : vector<1x144xf32> to vector<1x1x144xf32>
    %164 = vector.broadcast %163 : vector<1x1x144xf32> to vector<2x16x144xf32>
    %165 = arith.mulf %164, %162 : vector<2x16x144xf32>
    %166 = arith.addf %160, %165 : vector<2x16x144xf32>
    %c1_163 = arith.constant 1 : index
    %c0_164 = arith.constant 0 : index
    %c0_165 = arith.constant 0 : index
    %c0_166 = arith.constant 0 : index
    %167 = vector.load %arg4[%c1_163, %c0_164, %c0_165, %c0_166] : memref<4x2x18x146xf32, #tpu.memory_space<vmem>>, vector<1x2x16x146xf32>
    %168 = vector.shape_cast %167 : vector<1x2x16x146xf32> to vector<2x16x146xf32>
    %c9 = arith.constant 9 : index
    %c0_167 = arith.constant 0 : index
    %169 = vector.load %arg1[%c9, %c0_167] : memref<36x144xf32, #tpu.memory_space<vmem>>, vector<1x144xf32>
    %170 = vector.extract_strided_slice %168 {offsets = [0, 0, 0], sizes = [2, 16, 144], strides = [1, 1, 1]} : vector<2x16x146xf32> to vector<2x16x144xf32>
    %171 = vector.shape_cast %169 : vector<1x144xf32> to vector<1x1x144xf32>
    %172 = vector.broadcast %171 : vector<1x1x144xf32> to vector<2x16x144xf32>
    %173 = arith.mulf %172, %170 : vector<2x16x144xf32>
    %174 = arith.addf %166, %173 : vector<2x16x144xf32>
    %c10 = arith.constant 10 : index
    %c0_168 = arith.constant 0 : index
    %175 = vector.load %arg1[%c10, %c0_168] : memref<36x144xf32, #tpu.memory_space<vmem>>, vector<1x144xf32>
    %176 = vector.extract_strided_slice %168 {offsets = [0, 0, 1], sizes = [2, 16, 144], strides = [1, 1, 1]} : vector<2x16x146xf32> to vector<2x16x144xf32>
    %177 = vector.shape_cast %175 : vector<1x144xf32> to vector<1x1x144xf32>
    %178 = vector.broadcast %177 : vector<1x1x144xf32> to vector<2x16x144xf32>
    %179 = arith.mulf %178, %176 : vector<2x16x144xf32>
    %180 = arith.addf %174, %179 : vector<2x16x144xf32>
    %c11 = arith.constant 11 : index
    %c0_169 = arith.constant 0 : index
    %181 = vector.load %arg1[%c11, %c0_169] : memref<36x144xf32, #tpu.memory_space<vmem>>, vector<1x144xf32>
    %182 = vector.extract_strided_slice %168 {offsets = [0, 0, 2], sizes = [2, 16, 144], strides = [1, 1, 1]} : vector<2x16x146xf32> to vector<2x16x144xf32>
    %183 = vector.shape_cast %181 : vector<1x144xf32> to vector<1x1x144xf32>
    %184 = vector.broadcast %183 : vector<1x1x144xf32> to vector<2x16x144xf32>
    %185 = arith.mulf %184, %182 : vector<2x16x144xf32>
    %186 = arith.addf %180, %185 : vector<2x16x144xf32>
    %c1_170 = arith.constant 1 : index
    %c0_171 = arith.constant 0 : index
    %c1_172 = arith.constant 1 : index
    %c0_173 = arith.constant 0 : index
    %187 = vector.load %arg4[%c1_170, %c0_171, %c1_172, %c0_173] : memref<4x2x18x146xf32, #tpu.memory_space<vmem>>, vector<1x2x16x146xf32>
    %188 = vector.shape_cast %187 : vector<1x2x16x146xf32> to vector<2x16x146xf32>
    %c12 = arith.constant 12 : index
    %c0_174 = arith.constant 0 : index
    %189 = vector.load %arg1[%c12, %c0_174] : memref<36x144xf32, #tpu.memory_space<vmem>>, vector<1x144xf32>
    %190 = vector.extract_strided_slice %188 {offsets = [0, 0, 0], sizes = [2, 16, 144], strides = [1, 1, 1]} : vector<2x16x146xf32> to vector<2x16x144xf32>
    %191 = vector.shape_cast %189 : vector<1x144xf32> to vector<1x1x144xf32>
    %192 = vector.broadcast %191 : vector<1x1x144xf32> to vector<2x16x144xf32>
    %193 = arith.mulf %192, %190 : vector<2x16x144xf32>
    %194 = arith.addf %186, %193 : vector<2x16x144xf32>
    %c13 = arith.constant 13 : index
    %c0_175 = arith.constant 0 : index
    %195 = vector.load %arg1[%c13, %c0_175] : memref<36x144xf32, #tpu.memory_space<vmem>>, vector<1x144xf32>
    %196 = vector.extract_strided_slice %188 {offsets = [0, 0, 1], sizes = [2, 16, 144], strides = [1, 1, 1]} : vector<2x16x146xf32> to vector<2x16x144xf32>
    %197 = vector.shape_cast %195 : vector<1x144xf32> to vector<1x1x144xf32>
    %198 = vector.broadcast %197 : vector<1x1x144xf32> to vector<2x16x144xf32>
    %199 = arith.mulf %198, %196 : vector<2x16x144xf32>
    %200 = arith.addf %194, %199 : vector<2x16x144xf32>
    %c14 = arith.constant 14 : index
    %c0_176 = arith.constant 0 : index
    %201 = vector.load %arg1[%c14, %c0_176] : memref<36x144xf32, #tpu.memory_space<vmem>>, vector<1x144xf32>
    %202 = vector.extract_strided_slice %188 {offsets = [0, 0, 2], sizes = [2, 16, 144], strides = [1, 1, 1]} : vector<2x16x146xf32> to vector<2x16x144xf32>
    %203 = vector.shape_cast %201 : vector<1x144xf32> to vector<1x1x144xf32>
    %204 = vector.broadcast %203 : vector<1x1x144xf32> to vector<2x16x144xf32>
    %205 = arith.mulf %204, %202 : vector<2x16x144xf32>
    %206 = arith.addf %200, %205 : vector<2x16x144xf32>
    %c1_177 = arith.constant 1 : index
    %c0_178 = arith.constant 0 : index
    %c2_179 = arith.constant 2 : index
    %c0_180 = arith.constant 0 : index
    %207 = vector.load %arg4[%c1_177, %c0_178, %c2_179, %c0_180] : memref<4x2x18x146xf32, #tpu.memory_space<vmem>>, vector<1x2x16x146xf32>
    %208 = vector.shape_cast %207 : vector<1x2x16x146xf32> to vector<2x16x146xf32>
    %c15 = arith.constant 15 : index
    %c0_181 = arith.constant 0 : index
    %209 = vector.load %arg1[%c15, %c0_181] : memref<36x144xf32, #tpu.memory_space<vmem>>, vector<1x144xf32>
    %210 = vector.extract_strided_slice %208 {offsets = [0, 0, 0], sizes = [2, 16, 144], strides = [1, 1, 1]} : vector<2x16x146xf32> to vector<2x16x144xf32>
    %211 = vector.shape_cast %209 : vector<1x144xf32> to vector<1x1x144xf32>
    %212 = vector.broadcast %211 : vector<1x1x144xf32> to vector<2x16x144xf32>
    %213 = arith.mulf %212, %210 : vector<2x16x144xf32>
    %214 = arith.addf %206, %213 : vector<2x16x144xf32>
    %c16 = arith.constant 16 : index
    %c0_182 = arith.constant 0 : index
    %215 = vector.load %arg1[%c16, %c0_182] : memref<36x144xf32, #tpu.memory_space<vmem>>, vector<1x144xf32>
    %216 = vector.extract_strided_slice %208 {offsets = [0, 0, 1], sizes = [2, 16, 144], strides = [1, 1, 1]} : vector<2x16x146xf32> to vector<2x16x144xf32>
    %217 = vector.shape_cast %215 : vector<1x144xf32> to vector<1x1x144xf32>
    %218 = vector.broadcast %217 : vector<1x1x144xf32> to vector<2x16x144xf32>
    %219 = arith.mulf %218, %216 : vector<2x16x144xf32>
    %220 = arith.addf %214, %219 : vector<2x16x144xf32>
    %c17 = arith.constant 17 : index
    %c0_183 = arith.constant 0 : index
    %221 = vector.load %arg1[%c17, %c0_183] : memref<36x144xf32, #tpu.memory_space<vmem>>, vector<1x144xf32>
    %222 = vector.extract_strided_slice %208 {offsets = [0, 0, 2], sizes = [2, 16, 144], strides = [1, 1, 1]} : vector<2x16x146xf32> to vector<2x16x144xf32>
    %223 = vector.shape_cast %221 : vector<1x144xf32> to vector<1x1x144xf32>
    %224 = vector.broadcast %223 : vector<1x1x144xf32> to vector<2x16x144xf32>
    %225 = arith.mulf %224, %222 : vector<2x16x144xf32>
    %226 = arith.addf %220, %225 : vector<2x16x144xf32>
    %c2_184 = arith.constant 2 : index
    %c0_185 = arith.constant 0 : index
    %c0_186 = arith.constant 0 : index
    %c0_187 = arith.constant 0 : index
    %227 = vector.load %arg4[%c2_184, %c0_185, %c0_186, %c0_187] : memref<4x2x18x146xf32, #tpu.memory_space<vmem>>, vector<1x2x16x146xf32>
    %228 = vector.shape_cast %227 : vector<1x2x16x146xf32> to vector<2x16x146xf32>
    %c18 = arith.constant 18 : index
    %c0_188 = arith.constant 0 : index
    %229 = vector.load %arg1[%c18, %c0_188] : memref<36x144xf32, #tpu.memory_space<vmem>>, vector<1x144xf32>
    %230 = vector.extract_strided_slice %228 {offsets = [0, 0, 0], sizes = [2, 16, 144], strides = [1, 1, 1]} : vector<2x16x146xf32> to vector<2x16x144xf32>
    %231 = vector.shape_cast %229 : vector<1x144xf32> to vector<1x1x144xf32>
    %232 = vector.broadcast %231 : vector<1x1x144xf32> to vector<2x16x144xf32>
    %233 = arith.mulf %232, %230 : vector<2x16x144xf32>
    %234 = arith.addf %226, %233 : vector<2x16x144xf32>
    %c19_189 = arith.constant 19 : index
    %c0_190 = arith.constant 0 : index
    %235 = vector.load %arg1[%c19_189, %c0_190] : memref<36x144xf32, #tpu.memory_space<vmem>>, vector<1x144xf32>
    %236 = vector.extract_strided_slice %228 {offsets = [0, 0, 1], sizes = [2, 16, 144], strides = [1, 1, 1]} : vector<2x16x146xf32> to vector<2x16x144xf32>
    %237 = vector.shape_cast %235 : vector<1x144xf32> to vector<1x1x144xf32>
    %238 = vector.broadcast %237 : vector<1x1x144xf32> to vector<2x16x144xf32>
    %239 = arith.mulf %238, %236 : vector<2x16x144xf32>
    %240 = arith.addf %234, %239 : vector<2x16x144xf32>
    %c20 = arith.constant 20 : index
    %c0_191 = arith.constant 0 : index
    %241 = vector.load %arg1[%c20, %c0_191] : memref<36x144xf32, #tpu.memory_space<vmem>>, vector<1x144xf32>
    %242 = vector.extract_strided_slice %228 {offsets = [0, 0, 2], sizes = [2, 16, 144], strides = [1, 1, 1]} : vector<2x16x146xf32> to vector<2x16x144xf32>
    %243 = vector.shape_cast %241 : vector<1x144xf32> to vector<1x1x144xf32>
    %244 = vector.broadcast %243 : vector<1x1x144xf32> to vector<2x16x144xf32>
    %245 = arith.mulf %244, %242 : vector<2x16x144xf32>
    %246 = arith.addf %240, %245 : vector<2x16x144xf32>
    %c2_192 = arith.constant 2 : index
    %c0_193 = arith.constant 0 : index
    %c1_194 = arith.constant 1 : index
    %c0_195 = arith.constant 0 : index
    %247 = vector.load %arg4[%c2_192, %c0_193, %c1_194, %c0_195] : memref<4x2x18x146xf32, #tpu.memory_space<vmem>>, vector<1x2x16x146xf32>
    %248 = vector.shape_cast %247 : vector<1x2x16x146xf32> to vector<2x16x146xf32>
    %c21 = arith.constant 21 : index
    %c0_196 = arith.constant 0 : index
    %249 = vector.load %arg1[%c21, %c0_196] : memref<36x144xf32, #tpu.memory_space<vmem>>, vector<1x144xf32>
    %250 = vector.extract_strided_slice %248 {offsets = [0, 0, 0], sizes = [2, 16, 144], strides = [1, 1, 1]} : vector<2x16x146xf32> to vector<2x16x144xf32>
    %251 = vector.shape_cast %249 : vector<1x144xf32> to vector<1x1x144xf32>
    %252 = vector.broadcast %251 : vector<1x1x144xf32> to vector<2x16x144xf32>
    %253 = arith.mulf %252, %250 : vector<2x16x144xf32>
    %254 = arith.addf %246, %253 : vector<2x16x144xf32>
    %c22 = arith.constant 22 : index
    %c0_197 = arith.constant 0 : index
    %255 = vector.load %arg1[%c22, %c0_197] : memref<36x144xf32, #tpu.memory_space<vmem>>, vector<1x144xf32>
    %256 = vector.extract_strided_slice %248 {offsets = [0, 0, 1], sizes = [2, 16, 144], strides = [1, 1, 1]} : vector<2x16x146xf32> to vector<2x16x144xf32>
    %257 = vector.shape_cast %255 : vector<1x144xf32> to vector<1x1x144xf32>
    %258 = vector.broadcast %257 : vector<1x1x144xf32> to vector<2x16x144xf32>
    %259 = arith.mulf %258, %256 : vector<2x16x144xf32>
    %260 = arith.addf %254, %259 : vector<2x16x144xf32>
    %c23 = arith.constant 23 : index
    %c0_198 = arith.constant 0 : index
    %261 = vector.load %arg1[%c23, %c0_198] : memref<36x144xf32, #tpu.memory_space<vmem>>, vector<1x144xf32>
    %262 = vector.extract_strided_slice %248 {offsets = [0, 0, 2], sizes = [2, 16, 144], strides = [1, 1, 1]} : vector<2x16x146xf32> to vector<2x16x144xf32>
    %263 = vector.shape_cast %261 : vector<1x144xf32> to vector<1x1x144xf32>
    %264 = vector.broadcast %263 : vector<1x1x144xf32> to vector<2x16x144xf32>
    %265 = arith.mulf %264, %262 : vector<2x16x144xf32>
    %266 = arith.addf %260, %265 : vector<2x16x144xf32>
    %c2_199 = arith.constant 2 : index
    %c0_200 = arith.constant 0 : index
    %c2_201 = arith.constant 2 : index
    %c0_202 = arith.constant 0 : index
    %267 = vector.load %arg4[%c2_199, %c0_200, %c2_201, %c0_202] : memref<4x2x18x146xf32, #tpu.memory_space<vmem>>, vector<1x2x16x146xf32>
    %268 = vector.shape_cast %267 : vector<1x2x16x146xf32> to vector<2x16x146xf32>
    %c24 = arith.constant 24 : index
    %c0_203 = arith.constant 0 : index
    %269 = vector.load %arg1[%c24, %c0_203] : memref<36x144xf32, #tpu.memory_space<vmem>>, vector<1x144xf32>
    %270 = vector.extract_strided_slice %268 {offsets = [0, 0, 0], sizes = [2, 16, 144], strides = [1, 1, 1]} : vector<2x16x146xf32> to vector<2x16x144xf32>
    %271 = vector.shape_cast %269 : vector<1x144xf32> to vector<1x1x144xf32>
    %272 = vector.broadcast %271 : vector<1x1x144xf32> to vector<2x16x144xf32>
    %273 = arith.mulf %272, %270 : vector<2x16x144xf32>
    %274 = arith.addf %266, %273 : vector<2x16x144xf32>
    %c25 = arith.constant 25 : index
    %c0_204 = arith.constant 0 : index
    %275 = vector.load %arg1[%c25, %c0_204] : memref<36x144xf32, #tpu.memory_space<vmem>>, vector<1x144xf32>
    %276 = vector.extract_strided_slice %268 {offsets = [0, 0, 1], sizes = [2, 16, 144], strides = [1, 1, 1]} : vector<2x16x146xf32> to vector<2x16x144xf32>
    %277 = vector.shape_cast %275 : vector<1x144xf32> to vector<1x1x144xf32>
    %278 = vector.broadcast %277 : vector<1x1x144xf32> to vector<2x16x144xf32>
    %279 = arith.mulf %278, %276 : vector<2x16x144xf32>
    %280 = arith.addf %274, %279 : vector<2x16x144xf32>
    %c26 = arith.constant 26 : index
    %c0_205 = arith.constant 0 : index
    %281 = vector.load %arg1[%c26, %c0_205] : memref<36x144xf32, #tpu.memory_space<vmem>>, vector<1x144xf32>
    %282 = vector.extract_strided_slice %268 {offsets = [0, 0, 2], sizes = [2, 16, 144], strides = [1, 1, 1]} : vector<2x16x146xf32> to vector<2x16x144xf32>
    %283 = vector.shape_cast %281 : vector<1x144xf32> to vector<1x1x144xf32>
    %284 = vector.broadcast %283 : vector<1x1x144xf32> to vector<2x16x144xf32>
    %285 = arith.mulf %284, %282 : vector<2x16x144xf32>
    %286 = arith.addf %280, %285 : vector<2x16x144xf32>
    %c3_206 = arith.constant 3 : index
    %c0_207 = arith.constant 0 : index
    %c0_208 = arith.constant 0 : index
    %c0_209 = arith.constant 0 : index
    %287 = vector.load %arg4[%c3_206, %c0_207, %c0_208, %c0_209] : memref<4x2x18x146xf32, #tpu.memory_space<vmem>>, vector<1x2x16x146xf32>
    %288 = vector.shape_cast %287 : vector<1x2x16x146xf32> to vector<2x16x146xf32>
    %c27 = arith.constant 27 : index
    %c0_210 = arith.constant 0 : index
    %289 = vector.load %arg1[%c27, %c0_210] : memref<36x144xf32, #tpu.memory_space<vmem>>, vector<1x144xf32>
    %290 = vector.extract_strided_slice %288 {offsets = [0, 0, 0], sizes = [2, 16, 144], strides = [1, 1, 1]} : vector<2x16x146xf32> to vector<2x16x144xf32>
    %291 = vector.shape_cast %289 : vector<1x144xf32> to vector<1x1x144xf32>
    %292 = vector.broadcast %291 : vector<1x1x144xf32> to vector<2x16x144xf32>
    %293 = arith.mulf %292, %290 : vector<2x16x144xf32>
    %294 = arith.addf %286, %293 : vector<2x16x144xf32>
    %c28 = arith.constant 28 : index
    %c0_211 = arith.constant 0 : index
    %295 = vector.load %arg1[%c28, %c0_211] : memref<36x144xf32, #tpu.memory_space<vmem>>, vector<1x144xf32>
    %296 = vector.extract_strided_slice %288 {offsets = [0, 0, 1], sizes = [2, 16, 144], strides = [1, 1, 1]} : vector<2x16x146xf32> to vector<2x16x144xf32>
    %297 = vector.shape_cast %295 : vector<1x144xf32> to vector<1x1x144xf32>
    %298 = vector.broadcast %297 : vector<1x1x144xf32> to vector<2x16x144xf32>
    %299 = arith.mulf %298, %296 : vector<2x16x144xf32>
    %300 = arith.addf %294, %299 : vector<2x16x144xf32>
    %c29 = arith.constant 29 : index
    %c0_212 = arith.constant 0 : index
    %301 = vector.load %arg1[%c29, %c0_212] : memref<36x144xf32, #tpu.memory_space<vmem>>, vector<1x144xf32>
    %302 = vector.extract_strided_slice %288 {offsets = [0, 0, 2], sizes = [2, 16, 144], strides = [1, 1, 1]} : vector<2x16x146xf32> to vector<2x16x144xf32>
    %303 = vector.shape_cast %301 : vector<1x144xf32> to vector<1x1x144xf32>
    %304 = vector.broadcast %303 : vector<1x1x144xf32> to vector<2x16x144xf32>
    %305 = arith.mulf %304, %302 : vector<2x16x144xf32>
    %306 = arith.addf %300, %305 : vector<2x16x144xf32>
    %c3_213 = arith.constant 3 : index
    %c0_214 = arith.constant 0 : index
    %c1_215 = arith.constant 1 : index
    %c0_216 = arith.constant 0 : index
    %307 = vector.load %arg4[%c3_213, %c0_214, %c1_215, %c0_216] : memref<4x2x18x146xf32, #tpu.memory_space<vmem>>, vector<1x2x16x146xf32>
    %308 = vector.shape_cast %307 : vector<1x2x16x146xf32> to vector<2x16x146xf32>
    %c30 = arith.constant 30 : index
    %c0_217 = arith.constant 0 : index
    %309 = vector.load %arg1[%c30, %c0_217] : memref<36x144xf32, #tpu.memory_space<vmem>>, vector<1x144xf32>
    %310 = vector.extract_strided_slice %308 {offsets = [0, 0, 0], sizes = [2, 16, 144], strides = [1, 1, 1]} : vector<2x16x146xf32> to vector<2x16x144xf32>
    %311 = vector.shape_cast %309 : vector<1x144xf32> to vector<1x1x144xf32>
    %312 = vector.broadcast %311 : vector<1x1x144xf32> to vector<2x16x144xf32>
    %313 = arith.mulf %312, %310 : vector<2x16x144xf32>
    %314 = arith.addf %306, %313 : vector<2x16x144xf32>
    %c31 = arith.constant 31 : index
    %c0_218 = arith.constant 0 : index
    %315 = vector.load %arg1[%c31, %c0_218] : memref<36x144xf32, #tpu.memory_space<vmem>>, vector<1x144xf32>
    %316 = vector.extract_strided_slice %308 {offsets = [0, 0, 1], sizes = [2, 16, 144], strides = [1, 1, 1]} : vector<2x16x146xf32> to vector<2x16x144xf32>
    %317 = vector.shape_cast %315 : vector<1x144xf32> to vector<1x1x144xf32>
    %318 = vector.broadcast %317 : vector<1x1x144xf32> to vector<2x16x144xf32>
    %319 = arith.mulf %318, %316 : vector<2x16x144xf32>
    %320 = arith.addf %314, %319 : vector<2x16x144xf32>
    %c32 = arith.constant 32 : index
    %c0_219 = arith.constant 0 : index
    %321 = vector.load %arg1[%c32, %c0_219] : memref<36x144xf32, #tpu.memory_space<vmem>>, vector<1x144xf32>
    %322 = vector.extract_strided_slice %308 {offsets = [0, 0, 2], sizes = [2, 16, 144], strides = [1, 1, 1]} : vector<2x16x146xf32> to vector<2x16x144xf32>
    %323 = vector.shape_cast %321 : vector<1x144xf32> to vector<1x1x144xf32>
    %324 = vector.broadcast %323 : vector<1x1x144xf32> to vector<2x16x144xf32>
    %325 = arith.mulf %324, %322 : vector<2x16x144xf32>
    %326 = arith.addf %320, %325 : vector<2x16x144xf32>
    %c3_220 = arith.constant 3 : index
    %c0_221 = arith.constant 0 : index
    %c2_222 = arith.constant 2 : index
    %c0_223 = arith.constant 0 : index
    %327 = vector.load %arg4[%c3_220, %c0_221, %c2_222, %c0_223] : memref<4x2x18x146xf32, #tpu.memory_space<vmem>>, vector<1x2x16x146xf32>
    %328 = vector.shape_cast %327 : vector<1x2x16x146xf32> to vector<2x16x146xf32>
    %c33 = arith.constant 33 : index
    %c0_224 = arith.constant 0 : index
    %329 = vector.load %arg1[%c33, %c0_224] : memref<36x144xf32, #tpu.memory_space<vmem>>, vector<1x144xf32>
    %330 = vector.extract_strided_slice %328 {offsets = [0, 0, 0], sizes = [2, 16, 144], strides = [1, 1, 1]} : vector<2x16x146xf32> to vector<2x16x144xf32>
    %331 = vector.shape_cast %329 : vector<1x144xf32> to vector<1x1x144xf32>
    %332 = vector.broadcast %331 : vector<1x1x144xf32> to vector<2x16x144xf32>
    %333 = arith.mulf %332, %330 : vector<2x16x144xf32>
    %334 = arith.addf %326, %333 : vector<2x16x144xf32>
    %c34 = arith.constant 34 : index
    %c0_225 = arith.constant 0 : index
    %335 = vector.load %arg1[%c34, %c0_225] : memref<36x144xf32, #tpu.memory_space<vmem>>, vector<1x144xf32>
    %336 = vector.extract_strided_slice %328 {offsets = [0, 0, 1], sizes = [2, 16, 144], strides = [1, 1, 1]} : vector<2x16x146xf32> to vector<2x16x144xf32>
    %337 = vector.shape_cast %335 : vector<1x144xf32> to vector<1x1x144xf32>
    %338 = vector.broadcast %337 : vector<1x1x144xf32> to vector<2x16x144xf32>
    %339 = arith.mulf %338, %336 : vector<2x16x144xf32>
    %340 = arith.addf %334, %339 : vector<2x16x144xf32>
    %c35 = arith.constant 35 : index
    %c0_226 = arith.constant 0 : index
    %341 = vector.load %arg1[%c35, %c0_226] : memref<36x144xf32, #tpu.memory_space<vmem>>, vector<1x144xf32>
    %342 = vector.extract_strided_slice %328 {offsets = [0, 0, 2], sizes = [2, 16, 144], strides = [1, 1, 1]} : vector<2x16x146xf32> to vector<2x16x144xf32>
    %343 = vector.shape_cast %341 : vector<1x144xf32> to vector<1x1x144xf32>
    %344 = vector.broadcast %343 : vector<1x1x144xf32> to vector<2x16x144xf32>
    %345 = arith.mulf %344, %342 : vector<2x16x144xf32>
    %346 = arith.addf %340, %345 : vector<2x16x144xf32>
    %347 = vector.extract_strided_slice %346 {offsets = [0, 0, 0], sizes = [2, 16, 16], strides = [1, 1, 1]} : vector<2x16x144xf32> to vector<2x16x16xf32>
    %348 = vector.extract_strided_slice %346 {offsets = [0, 0, 18], sizes = [2, 16, 16], strides = [1, 1, 1]} : vector<2x16x144xf32> to vector<2x16x16xf32>
    %349 = vector.extract_strided_slice %346 {offsets = [0, 0, 36], sizes = [2, 16, 16], strides = [1, 1, 1]} : vector<2x16x144xf32> to vector<2x16x16xf32>
    %350 = vector.extract_strided_slice %346 {offsets = [0, 0, 54], sizes = [2, 16, 16], strides = [1, 1, 1]} : vector<2x16x144xf32> to vector<2x16x16xf32>
    %351 = vector.extract_strided_slice %346 {offsets = [0, 0, 72], sizes = [2, 16, 16], strides = [1, 1, 1]} : vector<2x16x144xf32> to vector<2x16x16xf32>
    %352 = vector.extract_strided_slice %346 {offsets = [0, 0, 90], sizes = [2, 16, 16], strides = [1, 1, 1]} : vector<2x16x144xf32> to vector<2x16x16xf32>
    %353 = vector.extract_strided_slice %346 {offsets = [0, 0, 108], sizes = [2, 16, 16], strides = [1, 1, 1]} : vector<2x16x144xf32> to vector<2x16x16xf32>
    %354 = vector.extract_strided_slice %346 {offsets = [0, 0, 126], sizes = [2, 16, 16], strides = [1, 1, 1]} : vector<2x16x144xf32> to vector<2x16x16xf32>
    %355 = vector.shape_cast %347 : vector<2x16x16xf32> to vector<2x1x16x16xf32>
    %356 = vector.shape_cast %348 : vector<2x16x16xf32> to vector<2x1x16x16xf32>
    %357 = vector.shape_cast %349 : vector<2x16x16xf32> to vector<2x1x16x16xf32>
    %358 = vector.shape_cast %350 : vector<2x16x16xf32> to vector<2x1x16x16xf32>
    %359 = vector.shape_cast %351 : vector<2x16x16xf32> to vector<2x1x16x16xf32>
    %360 = vector.shape_cast %352 : vector<2x16x16xf32> to vector<2x1x16x16xf32>
    %361 = vector.shape_cast %353 : vector<2x16x16xf32> to vector<2x1x16x16xf32>
    %362 = vector.shape_cast %354 : vector<2x16x16xf32> to vector<2x1x16x16xf32>
    %363 = tpu.concatenate %355, %356, %357, %358, %359, %360, %361, %362 in 1 : vector<2x1x16x16xf32>, vector<2x1x16x16xf32>, vector<2x1x16x16xf32>, vector<2x1x16x16xf32>, vector<2x1x16x16xf32>, vector<2x1x16x16xf32>, vector<2x1x16x16xf32>, vector<2x1x16x16xf32> -> vector<2x8x16x16xf32>
    %c0_227 = arith.constant 0 : index
    %c0_228 = arith.constant 0 : index
    %c0_229 = arith.constant 0 : index
    %c0_230 = arith.constant 0 : index
    %364 = vector.load %arg2[%c0_227, %c0_228, %c0_229, %c0_230] : memref<2x8x16x16xf32, #tpu.memory_space<vmem>>, vector<2x8x16x16xf32>
    tpu.vector_store %arg2[%c0_227, %c0_228, %c0_229, %c0_230], %363 {strides = array<i32>} : memref<2x8x16x16xf32, #tpu.memory_space<vmem>>, vector<2x8x16x16xf32>,
    %365 = vector.extract_strided_slice %363 {offsets = [0, 0, 0, 0], sizes = [2, 8, 16, 1], strides = [1, 1, 1, 1]} : vector<2x8x16x16xf32> to vector<2x8x16x1xf32>
    %366 = vector.extract_strided_slice %363 {offsets = [0, 0, 0, 1], sizes = [2, 8, 16, 1], strides = [1, 1, 1, 1]} : vector<2x8x16x16xf32> to vector<2x8x16x1xf32>
    %367 = vector.extract_strided_slice %363 {offsets = [0, 0, 0, 2], sizes = [2, 8, 16, 1], strides = [1, 1, 1, 1]} : vector<2x8x16x16xf32> to vector<2x8x16x1xf32>
    %368 = arith.maximumf %366, %367 : vector<2x8x16x1xf32>
    %369 = vector.extract_strided_slice %363 {offsets = [0, 0, 0, 3], sizes = [2, 8, 16, 1], strides = [1, 1, 1, 1]} : vector<2x8x16x16xf32> to vector<2x8x16x1xf32>
    %370 = vector.extract_strided_slice %363 {offsets = [0, 0, 0, 4], sizes = [2, 8, 16, 1], strides = [1, 1, 1, 1]} : vector<2x8x16x16xf32> to vector<2x8x16x1xf32>
    %371 = arith.maximumf %369, %370 : vector<2x8x16x1xf32>
    %372 = vector.extract_strided_slice %363 {offsets = [0, 0, 0, 5], sizes = [2, 8, 16, 1], strides = [1, 1, 1, 1]} : vector<2x8x16x16xf32> to vector<2x8x16x1xf32>
    %373 = vector.extract_strided_slice %363 {offsets = [0, 0, 0, 6], sizes = [2, 8, 16, 1], strides = [1, 1, 1, 1]} : vector<2x8x16x16xf32> to vector<2x8x16x1xf32>
    %374 = arith.maximumf %372, %373 : vector<2x8x16x1xf32>
    %375 = vector.extract_strided_slice %363 {offsets = [0, 0, 0, 7], sizes = [2, 8, 16, 1], strides = [1, 1, 1, 1]} : vector<2x8x16x16xf32> to vector<2x8x16x1xf32>
    %376 = vector.extract_strided_slice %363 {offsets = [0, 0, 0, 8], sizes = [2, 8, 16, 1], strides = [1, 1, 1, 1]} : vector<2x8x16x16xf32> to vector<2x8x16x1xf32>
    %377 = arith.maximumf %375, %376 : vector<2x8x16x1xf32>
    %378 = vector.extract_strided_slice %363 {offsets = [0, 0, 0, 9], sizes = [2, 8, 16, 1], strides = [1, 1, 1, 1]} : vector<2x8x16x16xf32> to vector<2x8x16x1xf32>
    %379 = vector.extract_strided_slice %363 {offsets = [0, 0, 0, 10], sizes = [2, 8, 16, 1], strides = [1, 1, 1, 1]} : vector<2x8x16x16xf32> to vector<2x8x16x1xf32>
    %380 = arith.maximumf %378, %379 : vector<2x8x16x1xf32>
    %381 = vector.extract_strided_slice %363 {offsets = [0, 0, 0, 11], sizes = [2, 8, 16, 1], strides = [1, 1, 1, 1]} : vector<2x8x16x16xf32> to vector<2x8x16x1xf32>
    %382 = vector.extract_strided_slice %363 {offsets = [0, 0, 0, 12], sizes = [2, 8, 16, 1], strides = [1, 1, 1, 1]} : vector<2x8x16x16xf32> to vector<2x8x16x1xf32>
    %383 = arith.maximumf %381, %382 : vector<2x8x16x1xf32>
    %384 = vector.extract_strided_slice %363 {offsets = [0, 0, 0, 13], sizes = [2, 8, 16, 1], strides = [1, 1, 1, 1]} : vector<2x8x16x16xf32> to vector<2x8x16x1xf32>
    %385 = vector.extract_strided_slice %363 {offsets = [0, 0, 0, 14], sizes = [2, 8, 16, 1], strides = [1, 1, 1, 1]} : vector<2x8x16x16xf32> to vector<2x8x16x1xf32>
    %386 = arith.maximumf %384, %385 : vector<2x8x16x1xf32>
    %387 = vector.extract_strided_slice %363 {offsets = [0, 0, 0, 15], sizes = [2, 8, 16, 1], strides = [1, 1, 1, 1]} : vector<2x8x16x16xf32> to vector<2x8x16x1xf32>
    %388 = tpu.concatenate %365, %368, %371, %374, %377, %380, %383, %386, %387 in 3 : vector<2x8x16x1xf32>, vector<2x8x16x1xf32>, vector<2x8x16x1xf32>, vector<2x8x16x1xf32>, vector<2x8x16x1xf32>, vector<2x8x16x1xf32>, vector<2x8x16x1xf32>, vector<2x8x16x1xf32>, vector<2x8x16x1xf32> -> vector<2x8x16x9xf32>
    %389 = vector.extract_strided_slice %388 {offsets = [0, 0, 0, 0], sizes = [2, 8, 1, 9], strides = [1, 1, 1, 1]} : vector<2x8x16x9xf32> to vector<2x8x1x9xf32>
    %390 = vector.extract_strided_slice %388 {offsets = [0, 0, 1, 0], sizes = [2, 8, 1, 9], strides = [1, 1, 1, 1]} : vector<2x8x16x9xf32> to vector<2x8x1x9xf32>
    %391 = vector.extract_strided_slice %388 {offsets = [0, 0, 2, 0], sizes = [2, 8, 1, 9], strides = [1, 1, 1, 1]} : vector<2x8x16x9xf32> to vector<2x8x1x9xf32>
    %392 = arith.maximumf %390, %391 : vector<2x8x1x9xf32>
    %393 = vector.extract_strided_slice %388 {offsets = [0, 0, 3, 0], sizes = [2, 8, 1, 9], strides = [1, 1, 1, 1]} : vector<2x8x16x9xf32> to vector<2x8x1x9xf32>
    %394 = vector.extract_strided_slice %388 {offsets = [0, 0, 4, 0], sizes = [2, 8, 1, 9], strides = [1, 1, 1, 1]} : vector<2x8x16x9xf32> to vector<2x8x1x9xf32>
    %395 = arith.maximumf %393, %394 : vector<2x8x1x9xf32>
    %396 = vector.extract_strided_slice %388 {offsets = [0, 0, 5, 0], sizes = [2, 8, 1, 9], strides = [1, 1, 1, 1]} : vector<2x8x16x9xf32> to vector<2x8x1x9xf32>
    %397 = vector.extract_strided_slice %388 {offsets = [0, 0, 6, 0], sizes = [2, 8, 1, 9], strides = [1, 1, 1, 1]} : vector<2x8x16x9xf32> to vector<2x8x1x9xf32>
    %398 = arith.maximumf %396, %397 : vector<2x8x1x9xf32>
    %399 = vector.extract_strided_slice %388 {offsets = [0, 0, 7, 0], sizes = [2, 8, 1, 9], strides = [1, 1, 1, 1]} : vector<2x8x16x9xf32> to vector<2x8x1x9xf32>
    %400 = vector.extract_strided_slice %388 {offsets = [0, 0, 8, 0], sizes = [2, 8, 1, 9], strides = [1, 1, 1, 1]} : vector<2x8x16x9xf32> to vector<2x8x1x9xf32>
    %401 = arith.maximumf %399, %400 : vector<2x8x1x9xf32>
    %402 = vector.extract_strided_slice %388 {offsets = [0, 0, 9, 0], sizes = [2, 8, 1, 9], strides = [1, 1, 1, 1]} : vector<2x8x16x9xf32> to vector<2x8x1x9xf32>
    %403 = vector.extract_strided_slice %388 {offsets = [0, 0, 10, 0], sizes = [2, 8, 1, 9], strides = [1, 1, 1, 1]} : vector<2x8x16x9xf32> to vector<2x8x1x9xf32>
    %404 = arith.maximumf %402, %403 : vector<2x8x1x9xf32>
    %405 = vector.extract_strided_slice %388 {offsets = [0, 0, 11, 0], sizes = [2, 8, 1, 9], strides = [1, 1, 1, 1]} : vector<2x8x16x9xf32> to vector<2x8x1x9xf32>
    %406 = vector.extract_strided_slice %388 {offsets = [0, 0, 12, 0], sizes = [2, 8, 1, 9], strides = [1, 1, 1, 1]} : vector<2x8x16x9xf32> to vector<2x8x1x9xf32>
    %407 = arith.maximumf %405, %406 : vector<2x8x1x9xf32>
    %408 = vector.extract_strided_slice %388 {offsets = [0, 0, 13, 0], sizes = [2, 8, 1, 9], strides = [1, 1, 1, 1]} : vector<2x8x16x9xf32> to vector<2x8x1x9xf32>
    %409 = vector.extract_strided_slice %388 {offsets = [0, 0, 14, 0], sizes = [2, 8, 1, 9], strides = [1, 1, 1, 1]} : vector<2x8x16x9xf32> to vector<2x8x1x9xf32>
    %410 = arith.maximumf %408, %409 : vector<2x8x1x9xf32>
    %411 = vector.extract_strided_slice %388 {offsets = [0, 0, 15, 0], sizes = [2, 8, 1, 9], strides = [1, 1, 1, 1]} : vector<2x8x16x9xf32> to vector<2x8x1x9xf32>
    %412 = tpu.concatenate %389, %392, %395, %398, %401, %404, %407, %410, %411 in 2 : vector<2x8x1x9xf32>, vector<2x8x1x9xf32>, vector<2x8x1x9xf32>, vector<2x8x1x9xf32>, vector<2x8x1x9xf32>, vector<2x8x1x9xf32>, vector<2x8x1x9xf32>, vector<2x8x1x9xf32>, vector<2x8x1x9xf32> -> vector<2x8x9x9xf32>
    %cst_231 = arith.constant dense<0.000000e+00> : vector<2x8x9xf32>
    %413 = vector.multi_reduction <add>, %412, %cst_231 [3] : vector<2x8x9x9xf32> to vector<2x8x9xf32>
    %414 = vector.shape_cast %413 : vector<2x8x9xf32> to vector<2x8x9x1xf32>
    %cst_232 = arith.constant dense<0.000000e+00> : vector<2x8x1xf32>
    %415 = vector.multi_reduction <add>, %414, %cst_232 [2] : vector<2x8x9x1xf32> to vector<2x8x1xf32>
    %416 = vector.shape_cast %415 : vector<2x8x1xf32> to vector<2x8x1x1xf32>
    %cst_233 = arith.constant dense<0.000000e+00> : vector<8x1x1xf32>
    %417 = vector.multi_reduction <add>, %416, %cst_233 [0] : vector<2x8x1x1xf32> to vector<8x1x1xf32>
    %418 = vector.shape_cast %417 : vector<8x1x1xf32> to vector<1x8x1x1xf32>
    %cst_234 = arith.constant 0.00617283955 : f32
    %419 = vector.broadcast %cst_234 : f32 to vector<1x8x1x1xf32>
    %420 = arith.mulf %418, %419 : vector<1x8x1x1xf32>
    %421 = vector.broadcast %420 : vector<1x8x1x1xf32> to vector<2x8x9x9xf32>
    %422 = arith.subf %412, %421 : vector<2x8x9x9xf32>
    %423 = arith.mulf %422, %422 : vector<2x8x9x9xf32>
    %cst_235 = arith.constant dense<0.000000e+00> : vector<2x8x9xf32>
    %424 = vector.multi_reduction <add>, %423, %cst_235 [3] : vector<2x8x9x9xf32> to vector<2x8x9xf32>
    %425 = vector.shape_cast %424 : vector<2x8x9xf32> to vector<2x8x9x1xf32>
    %cst_236 = arith.constant dense<0.000000e+00> : vector<2x8x1xf32>
    %426 = vector.multi_reduction <add>, %425, %cst_236 [2] : vector<2x8x9x1xf32> to vector<2x8x1xf32>
    %427 = vector.shape_cast %426 : vector<2x8x1xf32> to vector<2x8x1x1xf32>
    %cst_237 = arith.constant dense<0.000000e+00> : vector<8x1x1xf32>
    %428 = vector.multi_reduction <add>, %427, %cst_237 [0] : vector<2x8x1x1xf32> to vector<8x1x1xf32>
    %429 = vector.shape_cast %428 : vector<8x1x1xf32> to vector<1x8x1x1xf32>
    %cst_238 = arith.constant 0.00617283955 : f32
    %430 = vector.broadcast %cst_238 : f32 to vector<1x8x1x1xf32>
    %431 = arith.mulf %429, %430 : vector<1x8x1x1xf32>
    %cst_239 = arith.constant 9.99999974E-6 : f32
    %432 = vector.broadcast %cst_239 : f32 to vector<1x8x1x1xf32>
    %433 = arith.addf %431, %432 : vector<1x8x1x1xf32>
    %434 = math.rsqrt %433 : vector<1x8x1x1xf32>
    %435 = vector.broadcast %420 : vector<1x8x1x1xf32> to vector<2x8x9x9xf32>
    %436 = arith.subf %412, %435 : vector<2x8x9x9xf32>
    %437 = vector.broadcast %434 : vector<1x8x1x1xf32> to vector<2x8x9x9xf32>
    %438 = arith.mulf %436, %437 : vector<2x8x9x9xf32>
    %cst_240 = arith.constant 0.000000e+00 : f32
    %439 = vector.broadcast %cst_240 : f32 to vector<2x8x9x9xf32>
    %440 = arith.maximumf %438, %439 : vector<2x8x9x9xf32>
    %c0_241 = arith.constant 0 : index
    %c0_242 = arith.constant 0 : index
    %c0_243 = arith.constant 0 : index
    %c0_244 = arith.constant 0 : index
    %441 = vector.load %arg3[%c0_241, %c0_242, %c0_243, %c0_244] : memref<2x8x9x9xf32, #tpu.memory_space<vmem>>, vector<2x8x9x9xf32>
    tpu.vector_store %arg3[%c0_241, %c0_242, %c0_243, %c0_244], %440 {strides = array<i32>} : memref<2x8x9x9xf32, #tpu.memory_space<vmem>>, vector<2x8x9x9xf32>,
    return
  }
}

</mosaic_0001>

<bundles_post_ra>
// kernel: block_forward.1
= control target key start
LH: loop header
LB: loop body
LE: loop exit
PB: predicated region body
PF: predicated region fallthrough
CT: control target
= control target key end

     0   :  { %vm72_vm0 = vcmask 1040384   ;;  %s5934_s20 = smov 1   ;;  %s12109_s0 = inlined_call_operand.vmem [shape: f32[2,4,16,16], index: 0, kind: input, shape index: {}]   ;;  %s12110_s1 = inlined_call_operand.vmem [shape: f32[36,144], index: 1, kind: input, shape index: {}]   ;;  %s12111_s2 = inlined_call_operand.hbm [shape: f32[2,8,16,16], index: 2, kind: output, shape index: {0}]   ;;  %s12112_s3 = inlined_call_operand.vmem [shape: f32[2,8,9,9], index: 3, kind: output, shape index: {1}]  }
   0x1   :  { %v65_v0 = vld [vmem:[%s12109_s0 + $0x8] sm:$0xff]  ;;  %v64_v1 = vld [vmem:[%s12109_s0] sm:$0xff] }
   0x2   :  { %v66_v2 = vld [vmem:[%s12109_s0 + $0x40] sm:$0xff]  ;;  %v5988_v3 = vrot.slane %v65_v0, 7  ;;  %v5990_v4 = vrot.slane %v64_v1, 7  ;;  %v67_v5 = vld [vmem:[%s12109_s0 + $0x48] sm:$0xff] }
   0x3   :  { %v5999_v6 = vrot.slane %v66_v2, 7  ;;  %v6006_v8 = vrot.slane %v67_v5, 7 }
   0x4   :  { %83 = vrot.lane.b32.xlu1 %v5988_v3, %s5934_s20  ;;  %79 = vrot.lane.b32.xlu0 %v5990_v4, %s5934_s20  ;;  %v6004_v7 = vsel %vm72_vm0, %v5990_v4, %v5988_v3 }
   0x5   :  { %9 = vsyncpa [#allocation4], 0  ;;  %v5935_v9 = vmov 0.0   ;;  %v6039_v10 = vsel %vm72_vm0, %v5999_v6, %v6006_v8  ;;  %s5936_s21 = smov 19   ;;  %s5937_s22 = smov 37   ;;  %vm15_vm1 = vcmask 146432  }
   0x6   :  { %19 = vst [vmem:[#allocation2 + $0x20] sm:$0x3] %v5935_v9  ;;  %14 = vst [vmem:[#allocation2] sm:$0xff] %v5935_v9  ;;  %s5938_s23 = smov 55   ;;  %s5939_s24 = smov 73   ;;  %vm20_vm2 = vcmask 140288  }
   0x7   :  { %17 = vst [vmem:[#allocation2 + $0x10] sm:$0xff] %v5935_v9  ;;  %22 = vst [vmem:[#allocation2 + $0x30] sm:$0xff] %v5935_v9  ;;  %s5940_s25 = smov 91   ;;  %s5941_s26 = smov 109   ;;  %v5812_v11 = vld [vmem:[%s12109_s0 + $0x10] sm:$0xff]  ;;  %v5813_v12 = vld [vmem:[%s12109_s0 + $0x18] sm:$0xff] }
   0x8   :  { %24 = vst [vmem:[#allocation2 + $0x40] sm:$0xff] %v5935_v9  ;;  %26 = vst [vmem:[#allocation2 + $0x50] sm:$0x3] %v5935_v9  ;;  %85 = vrot.lane.b32.xlu1 %v5999_v6, %s5934_s20  ;;  %81 = vrot.lane.b32.xlu0 %v6004_v7, %s5934_s20  ;;  %s5942_s27 = smov 127   ;;  %v6171_v13 = vrot.slane %v5812_v11, 7  ;;  %v6173_v14 = vrot.slane %v5813_v12, 7 }
   0x9   :  { %28 = vst [vmem:[#allocation2 + $0x60] sm:$0xff] %v5935_v9  ;;  %30 = vst [vmem:[#allocation2 + $0x70] sm:$0xff] %v5935_v9  ;;  %v5814_v16 = vld [vmem:[%s12109_s0 + $0x50] sm:$0xff]  ;;  %v5815_v17 = vld [vmem:[%s12109_s0 + $0x58] sm:$0xff]  ;;  %vm101_vm3 = vcmask 131080   ;;  %vm97_vm4 = vcmask 138249  }
   0xa   :  { %32 = vst [vmem:[#allocation2 + $0x80] sm:$0x3] %v5935_v9  ;;  %34 = vst [vmem:[#allocation2 + $0x90] sm:$0xff] %v5935_v9  ;;  %v6182_v15 = vsel %vm72_vm0, %v6171_v13, %v6173_v14  ;;  %v6194_v18 = vrot.slane %v5814_v16, 7  ;;  %v6196_v19 = vrot.slane %v5815_v17, 7  ;;  %vm99_vm5 = vcmask 138248  }
   0xb   :  { %36 = vst [vmem:[#allocation2 + $0xa0] sm:$0xff] %v5935_v9  ;;  %38 = vst [vmem:[#allocation2 + $0xb0] sm:$0x3] %v5935_v9  ;;  %vm126_vm6 = vcmask 285848   ;;  %vm124_vm7 = vcmask 285849   ;;  %vm12126_vm8 = vcmask 278680  }
   0xc   :  { %40 = vst [vmem:[#allocation2 + $0xc0] sm:$0xff] %v5935_v9  ;;  %42 = vst [vmem:[#allocation2 + $0xd0] sm:$0xff] %v5935_v9  ;;  %89 = vrot.lane.b32.xlu1 %v6006_v8, %s5934_s20  ;;  %87 = vrot.lane.b32.xlu0 %v6039_v10, %s5934_s20  ;;  %v6205_v20 = vsel %vm72_vm0, %v6194_v18, %v6196_v19  ;;  %vm12128_vm9 = vcmask 433448   ;;  %vm12125_vm10 = vcmask 433449   ;;  %vm12127_vm11 = vcmask 426280   ;;  %v5816_v57 = vld [vmem:[%s12109_s0 + $0x20] sm:$0xff] }
   0xd   :  { %44 = vst [vmem:[#allocation2 + $0xe0] sm:$0x3] %v5935_v9  ;;  %46 = vst [vmem:[#allocation2 + $0xf0] sm:$0xff] %v5935_v9  ;;  %vm12122_vm12 = vcmask 581048   ;;  %vm12121_vm13 = vcmask 581049   ;;  %vm12114_vm14 = vcmask 573880  }
   0xe   :  { %48 = vst [vmem:[#allocation2 + $0x100] sm:$0xff] %v5935_v9  ;;  %50 = vst [vmem:[#allocation2 + $0x110] sm:$0x3] %v5935_v9  ;;  %vm12117_vm15 = vcmask 728648   ;;  %v5817_v58 = vld [vmem:[%s12109_s0 + $0x28] sm:$0xff]  ;;  %v6333_v59 = vrot.slane %v5816_v57, 7 }
   0xf   :  { %52 = vst [vmem:[#allocation2 + $0x120] sm:$0xff] %v5935_v9  ;;  %54 = vst [vmem:[#allocation2 + $0x130] sm:$0xff] %v5935_v9  ;;  %v6335_v60 = vrot.slane %v5817_v58, 7  ;;  %v5818_v0 = vld [vmem:[%s12109_s0 + $0x60] sm:$0xff]  ;;  %v5822_v58 = vld [vmem:[%s12109_s0 + $0x70] sm:$0xff]  ;;  %s5945_s19 = smov 92  }
  0x10   :  { %56 = vst [vmem:[#allocation2 + $0x140] sm:$0x3] %v5935_v9  ;;  %58 = vst [vmem:[#allocation2 + $0x150] sm:$0xff] %v5935_v9  ;;  %108 = vrot.lane.b32.xlu1 %v6004_v7, %s5936_s21  ;;  %106 = vrot.lane.b32.xlu0 %v5990_v4, %s5936_s21  ;;  %s5946_s28 = smov 74   ;;  %s5947_s29 = smov 56  }
  0x11   :  { %60 = vst [vmem:[#allocation2 + $0x160] sm:$0xff] %v5935_v9  ;;  %62 = vst [vmem:[#allocation2 + $0x170] sm:$0x3] %v5935_v9  ;;  %v6346_v63 = vsel %vm72_vm0, %v6333_v59, %v6335_v60  ;;  %s5948_s30 = smov 38   ;;  %s5949_s4 = smov 20  }
  0x12   :  { %18 = vst.msk [vmem:[#allocation2 + $0x18] sm:$0xff] %vm15_vm1, %v5935_v9  ;;  %16 = vst.msk [vmem:[#allocation2 + $0x8] sm:$0xff] %vm15_vm1, %v5935_v9  ;;  %s5950_s5 = smov 2  }
  0x13   :  { %23 = vst.msk [vmem:[#allocation2 + $0x38] sm:$0xff] %vm15_vm1, %v5935_v9  ;;  %25 = vst.msk [vmem:[#allocation2 + $0x48] sm:$0xff] %vm15_vm1, %v5935_v9 }
  0x14   :  { %112 = vrot.lane.b32.xlu1 %v5999_v6, %s5936_s21  ;;  %110 = vrot.lane.b32.xlu0 %v5988_v3, %s5936_s21  ;;  %29 = vst.msk [vmem:[#allocation2 + $0x68] sm:$0xff] %vm15_vm1, %v5935_v9  ;;  %31 = vst.msk [vmem:[#allocation2 + $0x78] sm:$0xff] %vm15_vm1, %v5935_v9 }
  0x15   :  { %35 = vst.msk [vmem:[#allocation2 + $0x98] sm:$0xff] %vm15_vm1, %v5935_v9  ;;  %37 = vst.msk [vmem:[#allocation2 + $0xa8] sm:$0xff] %vm15_vm1, %v5935_v9 }
  0x16   :  { %41 = vst.msk [vmem:[#allocation2 + $0xc8] sm:$0xff] %vm15_vm1, %v5935_v9  ;;  %43 = vst.msk [vmem:[#allocation2 + $0xd8] sm:$0xff] %vm15_vm1, %v5935_v9 }
  0x17   :  { %47 = vst.msk [vmem:[#allocation2 + $0xf8] sm:$0xff] %vm15_vm1, %v5935_v9  ;;  %49 = vst.msk [vmem:[#allocation2 + $0x108] sm:$0xff] %vm15_vm1, %v5935_v9 }
  0x18   :  { %116 = vrot.lane.b32.xlu1 %v6006_v8, %s5936_s21  ;;  %114 = vrot.lane.b32.xlu0 %v6039_v10, %s5936_s21  ;;  %53 = vst.msk [vmem:[#allocation2 + $0x128] sm:$0xff] %vm15_vm1, %v5935_v9  ;;  %55 = vst.msk [vmem:[#allocation2 + $0x138] sm:$0xff] %vm15_vm1, %v5935_v9 }
  0x19   :  { %59 = vst.msk [vmem:[#allocation2 + $0x158] sm:$0xff] %vm15_vm1, %v5935_v9  ;;  %61 = vst.msk [vmem:[#allocation2 + $0x168] sm:$0xff] %vm15_vm1, %v5935_v9  ;;  %vm12113_vm1 = vcmask 728649  }
  0x1a   :  { %21 = vst.msk [vmem:[#allocation2 + $0x28] sm:$0x3] %vm20_vm2, %v5935_v9  ;;  %27 = vst.msk [vmem:[#allocation2 + $0x58] sm:$0x3] %vm20_vm2, %v5935_v9 }
  0x1b   :  { %33 = vst.msk [vmem:[#allocation2 + $0x88] sm:$0x3] %vm20_vm2, %v5935_v9  ;;  %39 = vst.msk [vmem:[#allocation2 + $0xb8] sm:$0x3] %vm20_vm2, %v5935_v9 }
  0x1c   :  { %135 = vrot.lane.b32.xlu1 %v6004_v7, %s5937_s22  ;;  %133 = vrot.lane.b32.xlu0 %v5990_v4, %s5937_s22  ;;  %45 = vst.msk [vmem:[#allocation2 + $0xe8] sm:$0x3] %vm20_vm2, %v5935_v9  ;;  %51 = vst.msk [vmem:[#allocation2 + $0x118] sm:$0x3] %vm20_vm2, %v5935_v9 }
  0x1d   :  { %57 = vst.msk [vmem:[#allocation2 + $0x148] sm:$0x3] %vm20_vm2, %v5935_v9  ;;  %63 = vst.msk [vmem:[#allocation2 + $0x178] sm:$0x3] %vm20_vm2, %v5935_v9  ;;  %vm12115_vm2 = vcmask 721480  }
  0x20   :  { %139 = vrot.lane.b32.xlu1 %v5999_v6, %s5937_s22  ;;  %137 = vrot.lane.b32.xlu0 %v5988_v3, %s5937_s22 }
  0x24   :  { %143 = vrot.lane.b32.xlu1 %v6006_v8, %s5937_s22  ;;  %141 = vrot.lane.b32.xlu0 %v6039_v10, %s5937_s22 }
  0x28   :  { %162 = vrot.lane.b32.xlu1 %v6004_v7, %s5938_s23  ;;  %160 = vrot.lane.b32.xlu0 %v5990_v4, %s5938_s23 }
  0x2c   :  { %166 = vrot.lane.b32.xlu1 %v5999_v6, %s5938_s23  ;;  %164 = vrot.lane.b32.xlu0 %v5988_v3, %s5938_s23 }
  0x30   :  { %170 = vrot.lane.b32.xlu1 %v6006_v8, %s5938_s23  ;;  %168 = vrot.lane.b32.xlu0 %v6039_v10, %s5938_s23 }
  0x34   :  { %189 = vrot.lane.b32.xlu1 %v6004_v7, %s5939_s24  ;;  %187 = vrot.lane.b32.xlu0 %v5990_v4, %s5939_s24 }
  0x38   :  { %193 = vrot.lane.b32.xlu1 %v5999_v6, %s5939_s24  ;;  %191 = vrot.lane.b32.xlu0 %v5988_v3, %s5939_s24 }
  0x3c   :  { %197 = vrot.lane.b32.xlu1 %v6006_v8, %s5939_s24  ;;  %195 = vrot.lane.b32.xlu0 %v6039_v10, %s5939_s24 }
  0x40   :  { %216 = vrot.lane.b32.xlu1 %v6004_v7, %s5940_s25  ;;  %214 = vrot.lane.b32.xlu0 %v5990_v4, %s5940_s25 }
  0x44   :  { %220 = vrot.lane.b32.xlu1 %v5999_v6, %s5940_s25  ;;  %218 = vrot.lane.b32.xlu0 %v5988_v3, %s5940_s25 }
  0x48   :  { %224 = vrot.lane.b32.xlu1 %v6006_v8, %s5940_s25  ;;  %222 = vrot.lane.b32.xlu0 %v6039_v10, %s5940_s25 }
  0x4c   :  { %243 = vrot.lane.b32.xlu1 %v6004_v7, %s5941_s26  ;;  %241 = vrot.lane.b32.xlu0 %v5990_v4, %s5941_s26 }
  0x50   :  { %247 = vrot.lane.b32.xlu1 %v5999_v6, %s5941_s26  ;;  %245 = vrot.lane.b32.xlu0 %v5988_v3, %s5941_s26 }
  0x54   :  { %251 = vrot.lane.b32.xlu1 %v6006_v8, %s5941_s26  ;;  %249 = vrot.lane.b32.xlu0 %v6039_v10, %s5941_s26 }
  0x58   :  { %270 = vrot.lane.b32.xlu1 %v6004_v7, %s5942_s27  ;;  %268 = vrot.lane.b32.xlu0 %v5990_v4, %s5942_s27  ;;  %v6360_v4 = vrot.slane %v5818_v0, 7 }
  0x5c   :  { %274 = vrot.lane.b32.xlu1 %v5999_v6, %s5942_s27  ;;  %272 = vrot.lane.b32.xlu0 %v5988_v3, %s5942_s27  ;;  %v5819_v3 = vld [vmem:[%s12109_s0 + $0x68] sm:$0xff] }
  0x5d   :  { %v6362_v5 = vrot.slane %v5819_v3, 7 }
  0x60   :  { %278 = vrot.lane.b32.xlu1 %v6006_v8, %s5942_s27  ;;  %276 = vrot.lane.b32.xlu0 %v6039_v10, %s5942_s27  ;;  %v6373_v8 = vsel %vm72_vm0, %v6360_v4, %v6362_v5 }
  0x64   :  { %321 = vrot.lane.b32.xlu1 %v6182_v15, %s5934_s20  ;;  %319 = vrot.lane.b32.xlu0 %v6171_v13, %s5934_s20 }
  0x68   :  { %325 = vrot.lane.b32.xlu1 %v6194_v18, %s5934_s20  ;;  %323 = vrot.lane.b32.xlu0 %v6173_v14, %s5934_s20 }
  0x6c   :  { %329 = vrot.lane.b32.xlu1 %v6196_v19, %s5934_s20  ;;  %327 = vrot.lane.b32.xlu0 %v6205_v20, %s5934_s20 }
  0x70   :  { %346 = vrot.lane.b32.xlu1 %v6182_v15, %s5936_s21  ;;  %344 = vrot.lane.b32.xlu0 %v6171_v13, %s5936_s21 }
  0x74   :  { %350 = vrot.lane.b32.xlu1 %v6194_v18, %s5936_s21  ;;  %348 = vrot.lane.b32.xlu0 %v6173_v14, %s5936_s21 }
  0x76   :  { %v84_v21 = vpop.permute.xlu1 %83  ;;  %v80_v22 = vpop.permute.xlu0 %79 }
  0x77   :  { %102 = vst.msk [vmem:[#allocation2 + $0x20] sm:$0x1] %vm101_vm3, %v84_v21 }
  0x78   :  { %98 = vst.msk [vmem:[#allocation2] sm:$0xfe] %vm97_vm4, %v80_v22  ;;  %354 = vrot.lane.b32.xlu1 %v6196_v19, %s5936_s21  ;;  %352 = vrot.lane.b32.xlu0 %v6205_v20, %s5936_s21 }
  0x7a   :  { %v86_v23 = vpop.permute.xlu1 %85  ;;  %v82_v24 = vpop.permute.xlu0 %81 }
  0x7b   :  { %103 = vst.msk [vmem:[#allocation2 + $0x30] sm:$0xfe] %vm97_vm4, %v86_v23 }
  0x7c   :  { %100 = vst.msk [vmem:[#allocation2 + $0x10] sm:$0xff] %vm99_vm5, %v82_v24  ;;  %370 = vrot.lane.b32.xlu1 %v6182_v15, %s5937_s22  ;;  %368 = vrot.lane.b32.xlu0 %v6171_v13, %s5937_s22 }
  0x7e   :  { %v90_v25 = vpop.permute.xlu1 %89  ;;  %v88_v26 = vpop.permute.xlu0 %87 }
  0x7f   :  { %105 = vst.msk [vmem:[#allocation2 + $0x50] sm:$0x1] %vm101_vm3, %v90_v25 }
  0x80   :  { %104 = vst.msk [vmem:[#allocation2 + $0x40] sm:$0xff] %vm99_vm5, %v88_v26  ;;  %374 = vrot.lane.b32.xlu1 %v6194_v18, %s5937_s22  ;;  %372 = vrot.lane.b32.xlu0 %v6173_v14, %s5937_s22 }
  0x82   :  { %v109_v27 = vpop.permute.xlu1 %108  ;;  %v107_v28 = vpop.permute.xlu0 %106 }
  0x83   :  { %127 = vst.msk [vmem:[#allocation2 + $0x10] sm:$0xff] %vm126_vm6, %v109_v27 }
  0x84   :  { %125 = vst.msk [vmem:[#allocation2] sm:$0xfe] %vm124_vm7, %v107_v28  ;;  %378 = vrot.lane.b32.xlu1 %v6196_v19, %s5937_s22  ;;  %376 = vrot.lane.b32.xlu0 %v6205_v20, %s5937_s22 }
  0x86   :  { %v113_v29 = vpop.permute.xlu1 %112  ;;  %v111_v30 = vpop.permute.xlu0 %110 }
  0x87   :  { %130 = vst.msk [vmem:[#allocation2 + $0x30] sm:$0xfe] %vm124_vm7, %v113_v29 }
  0x88   :  { %129 = vst.msk [vmem:[#allocation2 + $0x20] sm:$0x1] %vm12126_vm8, %v111_v30  ;;  %394 = vrot.lane.b32.xlu1 %v6182_v15, %s5938_s23  ;;  %392 = vrot.lane.b32.xlu0 %v6171_v13, %s5938_s23 }
  0x8a   :  { %v117_v31 = vpop.permute.xlu1 %116  ;;  %v115_v32 = vpop.permute.xlu0 %114 }
  0x8b   :  { %132 = vst.msk [vmem:[#allocation2 + $0x50] sm:$0x1] %vm12126_vm8, %v117_v31 }
  0x8c   :  { %131 = vst.msk [vmem:[#allocation2 + $0x40] sm:$0xff] %vm126_vm6, %v115_v32  ;;  %398 = vrot.lane.b32.xlu1 %v6194_v18, %s5938_s23  ;;  %396 = vrot.lane.b32.xlu0 %v6173_v14, %s5938_s23 }
  0x8e   :  { %v136_v33 = vpop.permute.xlu1 %135  ;;  %v134_v34 = vpop.permute.xlu0 %133 }
  0x8f   :  { %154 = vst.msk [vmem:[#allocation2 + $0x10] sm:$0xff] %vm12128_vm9, %v136_v33 }
  0x90   :  { %152 = vst.msk [vmem:[#allocation2] sm:$0xfe] %vm12125_vm10, %v134_v34  ;;  %402 = vrot.lane.b32.xlu1 %v6196_v19, %s5938_s23  ;;  %400 = vrot.lane.b32.xlu0 %v6205_v20, %s5938_s23 }
  0x92   :  { %v140_v35 = vpop.permute.xlu1 %139  ;;  %v138_v36 = vpop.permute.xlu0 %137 }
  0x93   :  { %157 = vst.msk [vmem:[#allocation2 + $0x30] sm:$0xfe] %vm12125_vm10, %v140_v35 }
  0x94   :  { %156 = vst.msk [vmem:[#allocation2 + $0x20] sm:$0x1] %vm12127_vm11, %v138_v36  ;;  %418 = vrot.lane.b32.xlu1 %v6182_v15, %s5939_s24  ;;  %416 = vrot.lane.b32.xlu0 %v6171_v13, %s5939_s24 }
  0x96   :  { %v144_v37 = vpop.permute.xlu1 %143  ;;  %v142_v38 = vpop.permute.xlu0 %141 }
  0x97   :  { %159 = vst.msk [vmem:[#allocation2 + $0x50] sm:$0x1] %vm12127_vm11, %v144_v37 }
  0x98   :  { %158 = vst.msk [vmem:[#allocation2 + $0x40] sm:$0xff] %vm12128_vm9, %v142_v38  ;;  %422 = vrot.lane.b32.xlu1 %v6194_v18, %s5939_s24  ;;  %420 = vrot.lane.b32.xlu0 %v6173_v14, %s5939_s24 }
  0x9a   :  { %v163_v39 = vpop.permute.xlu1 %162  ;;  %v161_v40 = vpop.permute.xlu0 %160 }
  0x9b   :  { %181 = vst.msk [vmem:[#allocation2 + $0x10] sm:$0xff] %vm12122_vm12, %v163_v39 }
  0x9c   :  { %179 = vst.msk [vmem:[#allocation2] sm:$0xfe] %vm12121_vm13, %v161_v40  ;;  %426 = vrot.lane.b32.xlu1 %v6196_v19, %s5939_s24  ;;  %424 = vrot.lane.b32.xlu0 %v6205_v20, %s5939_s24 }
  0x9e   :  { %v167_v41 = vpop.permute.xlu1 %166  ;;  %v165_v42 = vpop.permute.xlu0 %164 }
  0x9f   :  { %184 = vst.msk [vmem:[#allocation2 + $0x30] sm:$0xfe] %vm12121_vm13, %v167_v41  ;;  %vm286_vm13 = vcmask 1048569  }
  0xa0   :  { %183 = vst.msk [vmem:[#allocation2 + $0x20] sm:$0x1] %vm12114_vm14, %v165_v42  ;;  %442 = vrot.lane.b32.xlu1 %v6182_v15, %s5940_s25  ;;  %440 = vrot.lane.b32.xlu0 %v6171_v13, %s5940_s25 }
  0xa2   :  { %v171_v43 = vpop.permute.xlu1 %170  ;;  %v169_v44 = vpop.permute.xlu0 %168 }
  0xa3   :  { %186 = vst.msk [vmem:[#allocation2 + $0x50] sm:$0x1] %vm12114_vm14, %v171_v43  ;;  %vm12116_vm14 = vcmask 876249  }
  0xa4   :  { %185 = vst.msk [vmem:[#allocation2 + $0x40] sm:$0xff] %vm12122_vm12, %v169_v44  ;;  %446 = vrot.lane.b32.xlu1 %v6194_v18, %s5940_s25  ;;  %444 = vrot.lane.b32.xlu0 %v6173_v14, %s5940_s25  ;;  %vm288_vm12 = vcmask 121857  }
  0xa6   :  { %v190_v45 = vpop.permute.xlu1 %189  ;;  %v188_v46 = vpop.permute.xlu0 %187 }
  0xa7   :  { %208 = vst.msk [vmem:[#allocation2 + $0x10] sm:$0xff] %vm12117_vm15, %v190_v45 }
  0xa8   :  { %206 = vst.msk [vmem:[#allocation2] sm:$0xfe] %vm12113_vm1, %v188_v46  ;;  %450 = vrot.lane.b32.xlu1 %v6196_v19, %s5940_s25  ;;  %448 = vrot.lane.b32.xlu0 %v6205_v20, %s5940_s25 }
  0xaa   :  { %v194_v47 = vpop.permute.xlu1 %193  ;;  %v192_v48 = vpop.permute.xlu0 %191 }
  0xab   :  { %211 = vst.msk [vmem:[#allocation2 + $0x30] sm:$0xfe] %vm12113_vm1, %v194_v47  ;;  %vm12120_vm1 = vcmask 876248  }
  0xac   :  { %210 = vst.msk [vmem:[#allocation2 + $0x20] sm:$0x1] %vm12115_vm2, %v192_v48  ;;  %466 = vrot.lane.b32.xlu1 %v6182_v15, %s5941_s26  ;;  %464 = vrot.lane.b32.xlu0 %v6171_v13, %s5941_s26 }
  0xae   :  { %v198_v49 = vpop.permute.xlu1 %197  ;;  %v196_v50 = vpop.permute.xlu0 %195 }
  0xaf   :  { %213 = vst.msk [vmem:[#allocation2 + $0x50] sm:$0x1] %vm12115_vm2, %v198_v49  ;;  %vm12118_vm2 = vcmask 869080  }
  0xb0   :  { %212 = vst.msk [vmem:[#allocation2 + $0x40] sm:$0xff] %vm12117_vm15, %v196_v50  ;;  %470 = vrot.lane.b32.xlu1 %v6194_v18, %s5941_s26  ;;  %468 = vrot.lane.b32.xlu0 %v6173_v14, %s5941_s26  ;;  %vm12119_vm15 = vcmask 1023849  }
  0xb2   :  { %v217_v51 = vpop.permute.xlu1 %216  ;;  %v215_v52 = vpop.permute.xlu0 %214 }
  0xb3   :  { %235 = vst.msk [vmem:[#allocation2 + $0x10] sm:$0xff] %vm12120_vm1, %v217_v51  ;;  %v5820_v51 = vld [vmem:[%s12109_s0 + $0x30] sm:$0xff] }
  0xb4   :  { %233 = vst.msk [vmem:[#allocation2] sm:$0xfe] %vm12116_vm14, %v215_v52  ;;  %474 = vrot.lane.b32.xlu1 %v6196_v19, %s5941_s26  ;;  %472 = vrot.lane.b32.xlu0 %v6205_v20, %s5941_s26  ;;  %v5821_v52 = vld [vmem:[%s12109_s0 + $0x38] sm:$0xff] }
  0xb6   :  { %v221_v53 = vpop.permute.xlu1 %220  ;;  %v219_v54 = vpop.permute.xlu0 %218 }
  0xb7   :  { %238 = vst.msk [vmem:[#allocation2 + $0x30] sm:$0xfe] %vm12116_vm14, %v221_v53  ;;  %vm12124_vm14 = vcmask 1023848   ;;  %v6513_v53 = vrot.slane %v5820_v51, 7 }
  0xb8   :  { %237 = vst.msk [vmem:[#allocation2 + $0x20] sm:$0x1] %vm12118_vm2, %v219_v54  ;;  %490 = vrot.lane.b32.xlu1 %v6182_v15, %s5942_s27  ;;  %488 = vrot.lane.b32.xlu0 %v6171_v13, %s5942_s27  ;;  %v6515_v54 = vrot.slane %v5821_v52, 7 }
  0xba   :  { %v225_v55 = vpop.permute.xlu1 %224  ;;  %v223_v56 = vpop.permute.xlu0 %222  ;;  %v6526_v57 = vsel %vm72_vm0, %v6513_v53, %v6515_v54 }
  0xbb   :  { %240 = vst.msk [vmem:[#allocation2 + $0x50] sm:$0x1] %vm12118_vm2, %v225_v55  ;;  %vm12123_vm2 = vcmask 1016680  }
  0xbc   :  { %239 = vst.msk [vmem:[#allocation2 + $0x40] sm:$0xff] %vm12120_vm1, %v223_v56  ;;  %494 = vrot.lane.b32.xlu1 %v6194_v18, %s5942_s27  ;;  %492 = vrot.lane.b32.xlu0 %v6173_v14, %s5942_s27  ;;  %vm292_vm1 = vcmask 121856  }
  0xbe   :  { %v244_v61 = vpop.permute.xlu1 %243  ;;  %v242_v62 = vpop.permute.xlu0 %241 }
  0xbf   :  { %262 = vst.msk [vmem:[#allocation2 + $0x10] sm:$0xff] %vm12124_vm14, %v244_v61  ;;  %v5823_v61 = vld [vmem:[%s12109_s0 + $0x78] sm:$0xff]  ;;  %s5943_s0 = smov 126  }
  0xc0   :  { %260 = vst.msk [vmem:[#allocation2] sm:$0xfe] %vm12119_vm15, %v242_v62  ;;  %498 = vrot.lane.b32.xlu1 %v6196_v19, %s5942_s27  ;;  %496 = vrot.lane.b32.xlu0 %v6205_v20, %s5942_s27  ;;  %v6540_v62 = vrot.slane %v5822_v58, 7 }
  0xc2   :  { %v248_v1 = vpop.permute.xlu1 %247  ;;  %v246_v2 = vpop.permute.xlu0 %245 }
  0xc3   :  { %265 = vst.msk [vmem:[#allocation2 + $0x30] sm:$0xfe] %vm12119_vm15, %v248_v1  ;;  %vm290_vm15 = vcmask 1048568  }
  0xc4   :  { %264 = vst.msk [vmem:[#allocation2 + $0x20] sm:$0x1] %vm12123_vm2, %v246_v2  ;;  %535 = vrot.lane.b32.xlu1 %v6346_v63, %s5934_s20  ;;  %533 = vrot.lane.b32.xlu0 %v6333_v59, %s5934_s20 }
  0xc6   :  { %v252_v6 = vpop.permute.xlu1 %251  ;;  %v250_v7 = vpop.permute.xlu0 %249 }
  0xc7   :  { %267 = vst.msk [vmem:[#allocation2 + $0x50] sm:$0x1] %vm12123_vm2, %v252_v6  ;;  %vm294_vm2 = vcmask 1041400  }
  0xc8   :  { %266 = vst.msk [vmem:[#allocation2 + $0x40] sm:$0xff] %vm12124_vm14, %v250_v7  ;;  %539 = vrot.lane.b32.xlu1 %v6360_v4, %s5934_s20  ;;  %537 = vrot.lane.b32.xlu0 %v6335_v60, %s5934_s20  ;;  %vm296_vm14 = vcmask 114688  }
  0xca   :  { %v271_v9 = vpop.permute.xlu1 %270  ;;  %v269_v10 = vpop.permute.xlu0 %268 }
  0xcb   :  { %291 = vst.msk [vmem:[#allocation2 + $0x10] sm:$0xff] %vm290_vm15, %v271_v9 }
  0xcc   :  { %293 = vst.msk [vmem:[#allocation2 + $0x18] sm:$0xff] %vm292_vm1, %v271_v9  ;;  %543 = vrot.lane.b32.xlu1 %v6362_v5, %s5934_s20  ;;  %541 = vrot.lane.b32.xlu0 %v6373_v8, %s5934_s20 }
  0xcd   :  { %287 = vst.msk [vmem:[#allocation2] sm:$0xfe] %vm286_vm13, %v269_v10 }
  0xce   :  { %289 = vst.msk [vmem:[#allocation2 + $0x8] sm:$0xfe] %vm288_vm12, %v269_v10  ;;  %v275_v11 = vpop.permute.xlu1 %274  ;;  %v273_v12 = vpop.permute.xlu0 %272 }
  0xcf   :  { %298 = vst.msk [vmem:[#allocation2 + $0x30] sm:$0xfe] %vm286_vm13, %v275_v11 }
  0xd0   :  { %299 = vst.msk [vmem:[#allocation2 + $0x38] sm:$0xfe] %vm288_vm12, %v275_v11  ;;  %560 = vrot.lane.b32.xlu1 %v6346_v63, %s5936_s21  ;;  %558 = vrot.lane.b32.xlu0 %v6333_v59, %s5936_s21 }
  0xd1   :  { %295 = vst.msk [vmem:[#allocation2 + $0x20] sm:$0x1] %vm294_vm2, %v273_v12 }
  0xd2   :  { %297 = vst.msk [vmem:[#allocation2 + $0x28] sm:$0x1] %vm296_vm14, %v273_v12  ;;  %v279_v13 = vpop.permute.xlu1 %278  ;;  %v277_v14 = vpop.permute.xlu0 %276 }
  0xd3   :  { %302 = vst.msk [vmem:[#allocation2 + $0x50] sm:$0x1] %vm294_vm2, %v279_v13 }
  0xd4   :  { %303 = vst.msk [vmem:[#allocation2 + $0x58] sm:$0x1] %vm296_vm14, %v279_v13  ;;  %564 = vrot.lane.b32.xlu1 %v6360_v4, %s5936_s21  ;;  %562 = vrot.lane.b32.xlu0 %v6335_v60, %s5936_s21 }
  0xd5   :  { %300 = vst.msk [vmem:[#allocation2 + $0x40] sm:$0xff] %vm290_vm15, %v277_v14 }
  0xd6   :  { %301 = vst.msk [vmem:[#allocation2 + $0x48] sm:$0xff] %vm292_vm1, %v277_v14  ;;  %v322_v15 = vpop.permute.xlu1 %321  ;;  %v320_v16 = vpop.permute.xlu0 %319  ;;  %v6719_v58 = vld [vmem:[#allocation2 + $0x30] sm:$0xff] }
  0xd7   :  { %339 = vst.msk [vmem:[#allocation2 + $0x70] sm:$0xff] %vm99_vm5, %v322_v15 }
  0xd8   :  { %338 = vst.msk [vmem:[#allocation2 + $0x60] sm:$0xfe] %vm97_vm4, %v320_v16  ;;  %568 = vrot.lane.b32.xlu1 %v6362_v5, %s5936_s21  ;;  %566 = vrot.lane.b32.xlu0 %v6373_v8, %s5936_s21 }
  0xda   :  { %v326_v17 = vpop.permute.xlu1 %325  ;;  %v324_v18 = vpop.permute.xlu0 %323 }
  0xdb   :  { %341 = vst.msk [vmem:[#allocation2 + $0x90] sm:$0xfe] %vm97_vm4, %v326_v17 }
  0xdc   :  { %340 = vst.msk [vmem:[#allocation2 + $0x80] sm:$0x1] %vm101_vm3, %v324_v18  ;;  %584 = vrot.lane.b32.xlu1 %v6346_v63, %s5937_s22  ;;  %582 = vrot.lane.b32.xlu0 %v6333_v59, %s5937_s22 }
  0xde   :  { %v330_v19 = vpop.permute.xlu1 %329  ;;  %v328_v20 = vpop.permute.xlu0 %327 }
  0xdf   :  { %343 = vst.msk [vmem:[#allocation2 + $0xb0] sm:$0x1] %vm101_vm3, %v330_v19 }
  0xe0   :  { %342 = vst.msk [vmem:[#allocation2 + $0xa0] sm:$0xff] %vm99_vm5, %v328_v20  ;;  %588 = vrot.lane.b32.xlu1 %v6360_v4, %s5937_s22  ;;  %586 = vrot.lane.b32.xlu0 %v6335_v60, %s5937_s22 }
  0xe2   :  { %v347_v21 = vpop.permute.xlu1 %346  ;;  %v345_v22 = vpop.permute.xlu0 %344 }
  0xe3   :  { %363 = vst.msk [vmem:[#allocation2 + $0x70] sm:$0xff] %vm126_vm6, %v347_v21 }
  0xe4   :  { %362 = vst.msk [vmem:[#allocation2 + $0x60] sm:$0xfe] %vm124_vm7, %v345_v22  ;;  %592 = vrot.lane.b32.xlu1 %v6362_v5, %s5937_s22  ;;  %590 = vrot.lane.b32.xlu0 %v6373_v8, %s5937_s22 }
  0xe6   :  { %v351_v23 = vpop.permute.xlu1 %350  ;;  %v349_v24 = vpop.permute.xlu0 %348 }
  0xe7   :  { %365 = vst.msk [vmem:[#allocation2 + $0x90] sm:$0xfe] %vm124_vm7, %v351_v23 }
  0xe8   :  { %364 = vst.msk [vmem:[#allocation2 + $0x80] sm:$0x1] %vm12126_vm8, %v349_v24  ;;  %608 = vrot.lane.b32.xlu1 %v6346_v63, %s5938_s23  ;;  %606 = vrot.lane.b32.xlu0 %v6333_v59, %s5938_s23 }
  0xea   :  { %v355_v25 = vpop.permute.xlu1 %354  ;;  %v353_v26 = vpop.permute.xlu0 %352 }
  0xeb   :  { %367 = vst.msk [vmem:[#allocation2 + $0xb0] sm:$0x1] %vm12126_vm8, %v355_v25  ;;  %vm12279_vm8 = vcmask 581049  }
  0xec   :  { %366 = vst.msk [vmem:[#allocation2 + $0xa0] sm:$0xff] %vm126_vm6, %v353_v26  ;;  %612 = vrot.lane.b32.xlu1 %v6360_v4, %s5938_s23  ;;  %610 = vrot.lane.b32.xlu0 %v6335_v60, %s5938_s23 }
  0xee   :  { %v371_v27 = vpop.permute.xlu1 %370  ;;  %v369_v28 = vpop.permute.xlu0 %368 }
  0xef   :  { %387 = vst.msk [vmem:[#allocation2 + $0x70] sm:$0xff] %vm12128_vm9, %v371_v27 }
  0xf0   :  { %386 = vst.msk [vmem:[#allocation2 + $0x60] sm:$0xfe] %vm12125_vm10, %v369_v28  ;;  %616 = vrot.lane.b32.xlu1 %v6362_v5, %s5938_s23  ;;  %614 = vrot.lane.b32.xlu0 %v6373_v8, %s5938_s23 }
  0xf2   :  { %v375_v29 = vpop.permute.xlu1 %374  ;;  %v373_v30 = vpop.permute.xlu0 %372 }
  0xf3   :  { %389 = vst.msk [vmem:[#allocation2 + $0x90] sm:$0xfe] %vm12125_vm10, %v375_v29  ;;  %vm12278_vm10 = vcmask 581048  }
  0xf4   :  { %388 = vst.msk [vmem:[#allocation2 + $0x80] sm:$0x1] %vm12127_vm11, %v373_v30  ;;  %632 = vrot.lane.b32.xlu1 %v6346_v63, %s5939_s24  ;;  %630 = vrot.lane.b32.xlu0 %v6333_v59, %s5939_s24 }
  0xf6   :  { %v379_v31 = vpop.permute.xlu1 %378  ;;  %v377_v32 = vpop.permute.xlu0 %376 }
  0xf7   :  { %391 = vst.msk [vmem:[#allocation2 + $0xb0] sm:$0x1] %vm12127_vm11, %v379_v31  ;;  %vm12280_vm11 = vmmov %vm12279_vm8 }
  0xf8   :  { %390 = vst.msk [vmem:[#allocation2 + $0xa0] sm:$0xff] %vm12128_vm9, %v377_v32  ;;  %636 = vrot.lane.b32.xlu1 %v6360_v4, %s5939_s24  ;;  %634 = vrot.lane.b32.xlu0 %v6335_v60, %s5939_s24  ;;  %vm12281_vm9 = vcmask 573880  }
  0xfa   :  { %v395_v33 = vpop.permute.xlu1 %394  ;;  %v393_v34 = vpop.permute.xlu0 %392 }
  0xfb   :  { %411 = vst.msk [vmem:[#allocation2 + $0x70] sm:$0xff] %vm12278_vm10, %v395_v33 }
  0xfc   :  { %410 = vst.msk [vmem:[#allocation2 + $0x60] sm:$0xfe] %vm12279_vm8, %v393_v34  ;;  %640 = vrot.lane.b32.xlu1 %v6362_v5, %s5939_s24  ;;  %638 = vrot.lane.b32.xlu0 %v6373_v8, %s5939_s24  ;;  %vm12282_vm8 = vmmov %vm12281_vm9 }
  0xfe   :  { %v399_v35 = vpop.permute.xlu1 %398  ;;  %v397_v36 = vpop.permute.xlu0 %396 }
  0xff   :  { %413 = vst.msk [vmem:[#allocation2 + $0x90] sm:$0xfe] %vm12280_vm11, %v399_v35  ;;  %vm12284_vm11 = vcmask 728649  }
 0x100   :  { %412 = vst.msk [vmem:[#allocation2 + $0x80] sm:$0x1] %vm12281_vm9, %v397_v36  ;;  %656 = vrot.lane.b32.xlu1 %v6346_v63, %s5940_s25  ;;  %654 = vrot.lane.b32.xlu0 %v6333_v59, %s5940_s25  ;;  %vm12283_vm9 = vcmask 728648  }
 0x102   :  { %v403_v37 = vpop.permute.xlu1 %402  ;;  %v401_v38 = vpop.permute.xlu0 %400 }
 0x103   :  { %415 = vst.msk [vmem:[#allocation2 + $0xb0] sm:$0x1] %vm12282_vm8, %v403_v37  ;;  %vm12285_vm8 = vmmov %vm12284_vm11 }
 0x104   :  { %414 = vst.msk [vmem:[#allocation2 + $0xa0] sm:$0xff] %vm12278_vm10, %v401_v38  ;;  %660 = vrot.lane.b32.xlu1 %v6360_v4, %s5940_s25  ;;  %658 = vrot.lane.b32.xlu0 %v6335_v60, %s5940_s25  ;;  %vm12286_vm10 = vcmask 721480  }
 0x106   :  { %v419_v39 = vpop.permute.xlu1 %418  ;;  %v417_v40 = vpop.permute.xlu0 %416 }
 0x107   :  { %435 = vst.msk [vmem:[#allocation2 + $0x70] sm:$0xff] %vm12283_vm9, %v419_v39  ;;  %vm12287_vm9 = vmmov %vm12286_vm10 }
 0x108   :  { %434 = vst.msk [vmem:[#allocation2 + $0x60] sm:$0xfe] %vm12284_vm11, %v417_v40  ;;  %664 = vrot.lane.b32.xlu1 %v6362_v5, %s5940_s25  ;;  %662 = vrot.lane.b32.xlu0 %v6373_v8, %s5940_s25  ;;  %vm12288_vm11 = vcmask 728648  }
 0x10a   :  { %v423_v41 = vpop.permute.xlu1 %422  ;;  %v421_v42 = vpop.permute.xlu0 %420 }
 0x10b   :  { %437 = vst.msk [vmem:[#allocation2 + $0x90] sm:$0xfe] %vm12285_vm8, %v423_v41  ;;  %vm12289_vm8 = vcmask 876248  }
 0x10c   :  { %436 = vst.msk [vmem:[#allocation2 + $0x80] sm:$0x1] %vm12286_vm10, %v421_v42  ;;  %680 = vrot.lane.b32.xlu1 %v6346_v63, %s5941_s26  ;;  %678 = vrot.lane.b32.xlu0 %v6333_v59, %s5941_s26  ;;  %vm12290_vm10 = vcmask 876249  }
 0x10e   :  { %v427_v43 = vpop.permute.xlu1 %426  ;;  %v425_v44 = vpop.permute.xlu0 %424 }
 0x10f   :  { %439 = vst.msk [vmem:[#allocation2 + $0xb0] sm:$0x1] %vm12287_vm9, %v427_v43  ;;  %vm12291_vm9 = vmmov %vm12290_vm10 }
 0x110   :  { %438 = vst.msk [vmem:[#allocation2 + $0xa0] sm:$0xff] %vm12288_vm11, %v425_v44  ;;  %684 = vrot.lane.b32.xlu1 %v6360_v4, %s5941_s26  ;;  %682 = vrot.lane.b32.xlu0 %v6335_v60, %s5941_s26  ;;  %vm12292_vm11 = vcmask 869080  }
 0x112   :  { %v443_v45 = vpop.permute.xlu1 %442  ;;  %v441_v46 = vpop.permute.xlu0 %440 }
 0x113   :  { %459 = vst.msk [vmem:[#allocation2 + $0x70] sm:$0xff] %vm12289_vm8, %v443_v45  ;;  %vm12293_vm8 = vmmov %vm12292_vm11 }
 0x114   :  { %458 = vst.msk [vmem:[#allocation2 + $0x60] sm:$0xfe] %vm12290_vm10, %v441_v46  ;;  %688 = vrot.lane.b32.xlu1 %v6362_v5, %s5941_s26  ;;  %686 = vrot.lane.b32.xlu0 %v6373_v8, %s5941_s26  ;;  %vm12294_vm10 = vcmask 876248  }
 0x116   :  { %v447_v47 = vpop.permute.xlu1 %446  ;;  %v445_v48 = vpop.permute.xlu0 %444 }
 0x117   :  { %461 = vst.msk [vmem:[#allocation2 + $0x90] sm:$0xfe] %vm12291_vm9, %v447_v47  ;;  %vm12295_vm9 = vcmask 1023848  }
 0x118   :  { %460 = vst.msk [vmem:[#allocation2 + $0x80] sm:$0x1] %vm12292_vm11, %v445_v48  ;;  %704 = vrot.lane.b32.xlu1 %v6346_v63, %s5942_s27  ;;  %702 = vrot.lane.b32.xlu0 %v6333_v59, %s5942_s27  ;;  %vm12296_vm11 = vcmask 1023849   ;;  %v6542_v63 = vrot.slane %v5823_v61, 7  ;;  %v6729_v61 = vld [vmem:[#allocation2 + $0x48] sm:$0xff] }
 0x11a   :  { %v451_v49 = vpop.permute.xlu1 %450  ;;  %v449_v50 = vpop.permute.xlu0 %448  ;;  %v6553_v2 = vsel %vm72_vm0, %v6540_v62, %v6542_v63 }
 0x11b   :  { %463 = vst.msk [vmem:[#allocation2 + $0xb0] sm:$0x1] %vm12293_vm8, %v451_v49  ;;  %vm12297_vm8 = vmmov %vm12296_vm11  ;;  %v6695_v49 = vld [vmem:[#allocation2 + $0x8] sm:$0xff] }
 0x11c   :  { %462 = vst.msk [vmem:[#allocation2 + $0xa0] sm:$0xff] %vm12294_vm10, %v449_v50  ;;  %708 = vrot.lane.b32.xlu1 %v6360_v4, %s5942_s27  ;;  %706 = vrot.lane.b32.xlu0 %v6335_v60, %s5942_s27  ;;  %vm12298_vm10 = vcmask 1016680   ;;  %v6697_v50 = vld [vmem:[#allocation2] sm:$0xff] }
 0x11e   :  { %v467_v55 = vpop.permute.xlu1 %466  ;;  %v465_v56 = vpop.permute.xlu0 %464 }
 0x11f   :  { %483 = vst.msk [vmem:[#allocation2 + $0x70] sm:$0xff] %vm12295_vm9, %v467_v55  ;;  %vm12299_vm9 = vmmov %vm12298_vm10 }
 0x120   :  { %482 = vst.msk [vmem:[#allocation2 + $0x60] sm:$0xfe] %vm12296_vm11, %v465_v56  ;;  %712 = vrot.lane.b32.xlu1 %v6362_v5, %s5942_s27  ;;  %710 = vrot.lane.b32.xlu0 %v6373_v8, %s5942_s27  ;;  %vm12300_vm11 = vcmask 1023848  }
 0x122   :  { %v471_v59 = vpop.permute.xlu1 %470  ;;  %v469_v60 = vpop.permute.xlu0 %468 }
 0x123   :  { %485 = vst.msk [vmem:[#allocation2 + $0x90] sm:$0xfe] %vm12297_vm8, %v471_v59  ;;  %vm12301_vm8 = vcmask 278680  }
 0x124   :  { %484 = vst.msk [vmem:[#allocation2 + $0x80] sm:$0x1] %vm12298_vm10, %v469_v60  ;;  %749 = vrot.lane.b32.xlu1 %v6526_v57, %s5934_s20  ;;  %747 = vrot.lane.b32.xlu0 %v6513_v53, %s5934_s20  ;;  %vm12302_vm10 = vmmov %vm12301_vm8 }
 0x126   :  { %v475_v0 = vpop.permute.xlu1 %474  ;;  %v473_v1 = vpop.permute.xlu0 %472 }
 0x127   :  { %487 = vst.msk [vmem:[#allocation2 + $0xb0] sm:$0x1] %vm12299_vm9, %v475_v0  ;;  %vm12303_vm9 = vcmask 433448  }
 0x128   :  { %486 = vst.msk [vmem:[#allocation2 + $0xa0] sm:$0xff] %vm12300_vm11, %v473_v1  ;;  %753 = vrot.lane.b32.xlu1 %v6540_v62, %s5934_s20  ;;  %751 = vrot.lane.b32.xlu0 %v6515_v54, %s5934_s20  ;;  %vm12304_vm11 = vcmask 433449  }
 0x12a   :  { %v491_v3 = vpop.permute.xlu1 %490  ;;  %v489_v4 = vpop.permute.xlu0 %488 }
 0x12b   :  { %508 = vst.msk [vmem:[#allocation2 + $0x70] sm:$0xff] %vm290_vm15, %v491_v3 }
 0x12c   :  { %509 = vst.msk [vmem:[#allocation2 + $0x78] sm:$0xff] %vm292_vm1, %v491_v3  ;;  %757 = vrot.lane.b32.xlu1 %v6542_v63, %s5934_s20  ;;  %755 = vrot.lane.b32.xlu0 %v6553_v2, %s5934_s20  ;;  %s5953_s20 = smov 123  }
 0x12d   :  { %506 = vst.msk [vmem:[#allocation2 + $0x60] sm:$0xfe] %vm286_vm13, %v489_v4 }
 0x12e   :  { %507 = vst.msk [vmem:[#allocation2 + $0x68] sm:$0xfe] %vm288_vm12, %v489_v4  ;;  %v495_v5 = vpop.permute.xlu1 %494  ;;  %v493_v6 = vpop.permute.xlu0 %492 }
 0x12f   :  { %512 = vst.msk [vmem:[#allocation2 + $0x90] sm:$0xfe] %vm286_vm13, %v495_v5 }
 0x130   :  { %513 = vst.msk [vmem:[#allocation2 + $0x98] sm:$0xfe] %vm288_vm12, %v495_v5  ;;  %774 = vrot.lane.b32.xlu1 %v6526_v57, %s5936_s21  ;;  %772 = vrot.lane.b32.xlu0 %v6513_v53, %s5936_s21  ;;  %v6757_v5 = vld [vmem:[#allocation2 + $0x8] sm:$0xfe] }
 0x131   :  { %510 = vst.msk [vmem:[#allocation2 + $0x80] sm:$0x1] %vm294_vm2, %v493_v6 }
 0x132   :  { %511 = vst.msk [vmem:[#allocation2 + $0x88] sm:$0x1] %vm296_vm14, %v493_v6  ;;  %v499_v7 = vpop.permute.xlu1 %498  ;;  %v497_v8 = vpop.permute.xlu0 %496  ;;  %v6759_v6 = vld [vmem:[#allocation2] sm:$0xfe] }
 0x133   :  { %516 = vst.msk [vmem:[#allocation2 + $0xb0] sm:$0x1] %vm294_vm2, %v499_v7 }
 0x134   :  { %517 = vst.msk [vmem:[#allocation2 + $0xb8] sm:$0x1] %vm296_vm14, %v499_v7  ;;  %778 = vrot.lane.b32.xlu1 %v6540_v62, %s5936_s21  ;;  %776 = vrot.lane.b32.xlu0 %v6515_v54, %s5936_s21 }
 0x135   :  { %514 = vst.msk [vmem:[#allocation2 + $0xa0] sm:$0xff] %vm290_vm15, %v497_v8 }
 0x136   :  { %515 = vst.msk [vmem:[#allocation2 + $0xa8] sm:$0xff] %vm292_vm1, %v497_v8  ;;  %v536_v9 = vpop.permute.xlu1 %535  ;;  %v534_v10 = vpop.permute.xlu0 %533 }
 0x137   :  { %553 = vst.msk [vmem:[#allocation2 + $0xd0] sm:$0xff] %vm99_vm5, %v536_v9  ;;  %v1212_v9 = vrot.slane %v6757_v5, 1 }
 0x138   :  { %552 = vst.msk [vmem:[#allocation2 + $0xc0] sm:$0xfe] %vm97_vm4, %v534_v10  ;;  %782 = vrot.lane.b32.xlu1 %v6542_v63, %s5936_s21  ;;  %780 = vrot.lane.b32.xlu0 %v6553_v2, %s5936_s21  ;;  %s5954_s21 = smov 122  }
 0x13a   :  { %v540_v11 = vpop.permute.xlu1 %539  ;;  %v538_v12 = vpop.permute.xlu0 %537 }
 0x13b   :  { %555 = vst.msk [vmem:[#allocation2 + $0xf0] sm:$0xfe] %vm97_vm4, %v540_v11  ;;  %v1209_v11 = vrot.slane %v6759_v6, 1 }
 0x13c   :  { %554 = vst.msk [vmem:[#allocation2 + $0xe0] sm:$0x1] %vm101_vm3, %v538_v12  ;;  %798 = vrot.lane.b32.xlu1 %v6526_v57, %s5937_s22  ;;  %796 = vrot.lane.b32.xlu0 %v6513_v53, %s5937_s22 }
 0x13e   :  { %v544_v13 = vpop.permute.xlu1 %543  ;;  %v542_v14 = vpop.permute.xlu0 %541 }
 0x13f   :  { %557 = vst.msk [vmem:[#allocation2 + $0x110] sm:$0x1] %vm101_vm3, %v544_v13  ;;  %v6771_v13 = vld [vmem:[#allocation2 + $0x28] sm:$0x1] }
 0x140   :  { %556 = vst.msk [vmem:[#allocation2 + $0x100] sm:$0xff] %vm99_vm5, %v542_v14  ;;  %802 = vrot.lane.b32.xlu1 %v6540_v62, %s5937_s22  ;;  %800 = vrot.lane.b32.xlu0 %v6515_v54, %s5937_s22  ;;  %v6773_v14 = vld [vmem:[#allocation2 + $0x20] sm:$0x1] }
 0x142   :  { %v561_v15 = vpop.permute.xlu1 %560  ;;  %v559_v16 = vpop.permute.xlu0 %558 }
 0x143   :  { %577 = vst.msk [vmem:[#allocation2 + $0xd0] sm:$0xff] %vm126_vm6, %v561_v15 }
 0x144   :  { %576 = vst.msk [vmem:[#allocation2 + $0xc0] sm:$0xfe] %vm124_vm7, %v559_v16  ;;  %806 = vrot.lane.b32.xlu1 %v6542_v63, %s5937_s22  ;;  %804 = vrot.lane.b32.xlu0 %v6553_v2, %s5937_s22  ;;  %s5955_s22 = smov 121  }
 0x146   :  { %v565_v17 = vpop.permute.xlu1 %564  ;;  %v563_v18 = vpop.permute.xlu0 %562 }
 0x147   :  { %579 = vst.msk [vmem:[#allocation2 + $0xf0] sm:$0xfe] %vm124_vm7, %v565_v17 }
 0x148   :  { %578 = vst.msk [vmem:[#allocation2 + $0xe0] sm:$0x1] %vm12301_vm8, %v563_v18  ;;  %822 = vrot.lane.b32.xlu1 %v6526_v57, %s5938_s23  ;;  %820 = vrot.lane.b32.xlu0 %v6513_v53, %s5938_s23  ;;  %vm12305_vm8 = vmmov %vm12304_vm11 }
 0x14a   :  { %v569_v19 = vpop.permute.xlu1 %568  ;;  %v567_v20 = vpop.permute.xlu0 %566 }
 0x14b   :  { %581 = vst.msk [vmem:[#allocation2 + $0x110] sm:$0x1] %vm12302_vm10, %v569_v19  ;;  %vm12306_vm10 = vcmask 426280   ;;  %v1217_v19 = vrot.slane %v6771_v13, 1 }
 0x14c   :  { %580 = vst.msk [vmem:[#allocation2 + $0x100] sm:$0xff] %vm126_vm6, %v567_v20  ;;  %826 = vrot.lane.b32.xlu1 %v6540_v62, %s5938_s23  ;;  %824 = vrot.lane.b32.xlu0 %v6515_v54, %s5938_s23  ;;  %v1215_v20 = vrot.slane %v6773_v14, 1 }
 0x14e   :  { %v585_v21 = vpop.permute.xlu1 %584  ;;  %v583_v22 = vpop.permute.xlu0 %582 }
 0x14f   :  { %601 = vst.msk [vmem:[#allocation2 + $0xd0] sm:$0xff] %vm12303_vm9, %v585_v21  ;;  %vm12307_vm9 = vmmov %vm12306_vm10 }
 0x150   :  { %600 = vst.msk [vmem:[#allocation2 + $0xc0] sm:$0xfe] %vm12304_vm11, %v583_v22  ;;  %830 = vrot.lane.b32.xlu1 %v6542_v63, %s5938_s23  ;;  %828 = vrot.lane.b32.xlu0 %v6553_v2, %s5938_s23  ;;  %vm12308_vm11 = vcmask 433448   ;;  %s5956_s23 = smov [#allocation3]  }
 0x152   :  { %v589_v23 = vpop.permute.xlu1 %588  ;;  %v587_v24 = vpop.permute.xlu0 %586 }
 0x153   :  { %603 = vst.msk [vmem:[#allocation2 + $0xf0] sm:$0xfe] %vm12305_vm8, %v589_v23  ;;  %vm12309_vm8 = vcmask 581048   ;;  %v6783_v23 = vld [vmem:[#allocation2 + $0x38] sm:$0xfe] }
 0x154   :  { %602 = vst.msk [vmem:[#allocation2 + $0xe0] sm:$0x1] %vm12306_vm10, %v587_v24  ;;  %846 = vrot.lane.b32.xlu1 %v6526_v57, %s5939_s24  ;;  %844 = vrot.lane.b32.xlu0 %v6513_v53, %s5939_s24  ;;  %vm12310_vm10 = vcmask 581049   ;;  %v6785_v24 = vld [vmem:[#allocation2 + $0x30] sm:$0xfe] }
 0x156   :  { %v593_v25 = vpop.permute.xlu1 %592  ;;  %v591_v26 = vpop.permute.xlu0 %590 }
 0x157   :  { %605 = vst.msk [vmem:[#allocation2 + $0x110] sm:$0x1] %vm12307_vm9, %v593_v25  ;;  %vm12311_vm9 = vmmov %vm12310_vm10 }
 0x158   :  { %604 = vst.msk [vmem:[#allocation2 + $0x100] sm:$0xff] %vm12308_vm11, %v591_v26  ;;  %850 = vrot.lane.b32.xlu1 %v6540_v62, %s5939_s24  ;;  %848 = vrot.lane.b32.xlu0 %v6515_v54, %s5939_s24  ;;  %vm12312_vm11 = vcmask 573880  }
 0x15a   :  { %v609_v27 = vpop.permute.xlu1 %608  ;;  %v607_v28 = vpop.permute.xlu0 %606 }
 0x15b   :  { %625 = vst.msk [vmem:[#allocation2 + $0xd0] sm:$0xff] %vm12309_vm8, %v609_v27  ;;  %vm12313_vm8 = vmmov %vm12312_vm11  ;;  %v1223_v27 = vrot.slane %v6729_v61, 1 }
 0x15c   :  { %624 = vst.msk [vmem:[#allocation2 + $0xc0] sm:$0xfe] %vm12310_vm10, %v607_v28  ;;  %854 = vrot.lane.b32.xlu1 %v6542_v63, %s5939_s24  ;;  %852 = vrot.lane.b32.xlu0 %v6553_v2, %s5939_s24  ;;  %vm12314_vm10 = vcmask 581048   ;;  %s5797_s24 = sshll.u32 %s5956_s23, 4  ;;  %s5798_s24 = int_to_ptr.vmem [resolvable:$true] %s5797_s24 }
 0x15d   :  { %p5917_p1 = scmp.lt.s32.totalorder %s5798_s24, %s5798_s24 }
 0x15e   :  { %v613_v29 = vpop.permute.xlu1 %612  ;;  %v611_v30 = vpop.permute.xlu0 %610 }
 0x15f   :  { %627 = vst.msk [vmem:[#allocation2 + $0xf0] sm:$0xfe] %vm12311_vm9, %v613_v29  ;;  %vm12315_vm9 = vcmask 728648   ;;  %v6795_v29 = vld [vmem:[#allocation2 + $0x58] sm:$0x1] }
 0x160   :  { %626 = vst.msk [vmem:[#allocation2 + $0xe0] sm:$0x1] %vm12312_vm11, %v611_v30  ;;  %870 = vrot.lane.b32.xlu1 %v6526_v57, %s5940_s25  ;;  %868 = vrot.lane.b32.xlu0 %v6513_v53, %s5940_s25  ;;  %vm12316_vm11 = vcmask 728649   ;;  %v6797_v30 = vld [vmem:[#allocation2 + $0x50] sm:$0x1] }
 0x162   :  { %v617_v31 = vpop.permute.xlu1 %616  ;;  %v615_v32 = vpop.permute.xlu0 %614 }
 0x163   :  { %629 = vst.msk [vmem:[#allocation2 + $0x110] sm:$0x1] %vm12313_vm8, %v617_v31  ;;  %vm12317_vm8 = vmmov %vm12316_vm11  ;;  %v1222_v31 = vrot.slane %v6783_v23, 1 }
 0x164   :  { %628 = vst.msk [vmem:[#allocation2 + $0x100] sm:$0xff] %vm12314_vm10, %v615_v32  ;;  %874 = vrot.lane.b32.xlu1 %v6540_v62, %s5940_s25  ;;  %872 = vrot.lane.b32.xlu0 %v6515_v54, %s5940_s25  ;;  %vm12318_vm10 = vcmask 721480   ;;  %v1219_v32 = vrot.slane %v6785_v24, 1 }
 0x166   :  { %v633_v33 = vpop.permute.xlu1 %632  ;;  %v631_v34 = vpop.permute.xlu0 %630 }
 0x167   :  { %649 = vst.msk [vmem:[#allocation2 + $0xd0] sm:$0xff] %vm12315_vm9, %v633_v33  ;;  %vm12319_vm9 = vmmov %vm12318_vm10 }
 0x168   :  { %648 = vst.msk [vmem:[#allocation2 + $0xc0] sm:$0xfe] %vm12316_vm11, %v631_v34  ;;  %878 = vrot.lane.b32.xlu1 %v6542_v63, %s5940_s25  ;;  %876 = vrot.lane.b32.xlu0 %v6553_v2, %s5940_s25  ;;  %vm12320_vm11 = vcmask 728648   ;;  %s5912_s25 = scalar_lea.vmem %s5798_s24, 4096 }
 0x169   :  { %p5913_p0 = scmp.ne.s32.totalorder %s5798_s24, %s5912_s25  ;;  %p5918_p2 = scmp.lt.s32.totalorder %s5912_s25, %s5912_s25 }
 0x16a   :  { %v637_v35 = vpop.permute.xlu1 %636  ;;  %v635_v36 = vpop.permute.xlu0 %634 }
 0x16b   :  { %651 = vst.msk [vmem:[#allocation2 + $0xf0] sm:$0xfe] %vm12317_vm8, %v637_v35  ;;  %vm12321_vm8 = vcmask 876248   ;;  %p5919_p3 = por %p5918_p2, %p5917_p1 }
 0x16c   :  { %650 = vst.msk [vmem:[#allocation2 + $0xe0] sm:$0x1] %vm12318_vm10, %v635_v36  ;;  %894 = vrot.lane.b32.xlu1 %v6526_v57, %s5941_s26  ;;  %892 = vrot.lane.b32.xlu0 %v6513_v53, %s5941_s26  ;;  %vm12322_vm10 = vcmask 876249  }
 0x16d   :  { %p5920_p4 = pnand %p5919_p3, %p5913_p0 }
 0x16e   :  { %v641_v37 = vpop.permute.xlu1 %640  ;;  %v639_v38 = vpop.permute.xlu0 %638 }
 0x16f   :  { %653 = vst.msk [vmem:[#allocation2 + $0x110] sm:$0x1] %vm12319_vm9, %v641_v37  ;;  %vm12323_vm9 = vmmov %vm12322_vm10  ;;  %v1227_v37 = vrot.slane %v6795_v29, 1 }
 0x170   :  { %652 = vst.msk [vmem:[#allocation2 + $0x100] sm:$0xff] %vm12320_vm11, %v639_v38  ;;  %898 = vrot.lane.b32.xlu1 %v6540_v62, %s5941_s26  ;;  %896 = vrot.lane.b32.xlu0 %v6515_v54, %s5941_s26  ;;  %vm12324_vm11 = vcmask 869080   ;;  %v1225_v38 = vrot.slane %v6797_v30, 1 }
 0x172   :  { %v657_v39 = vpop.permute.xlu1 %656  ;;  %v655_v40 = vpop.permute.xlu0 %654 }
 0x173   :  { %673 = vst.msk [vmem:[#allocation2 + $0xd0] sm:$0xff] %vm12321_vm8, %v657_v39  ;;  %vm12325_vm8 = vmmov %vm12324_vm11 }
 0x174   :  { %672 = vst.msk [vmem:[#allocation2 + $0xc0] sm:$0xfe] %vm12322_vm10, %v655_v40  ;;  %902 = vrot.lane.b32.xlu1 %v6542_v63, %s5941_s26  ;;  %900 = vrot.lane.b32.xlu0 %v6553_v2, %s5941_s26  ;;  %vm12326_vm10 = vcmask 876248  }
 0x176   :  { %v661_v41 = vpop.permute.xlu1 %660  ;;  %v659_v42 = vpop.permute.xlu0 %658 }
 0x177   :  { %675 = vst.msk [vmem:[#allocation2 + $0xf0] sm:$0xfe] %vm12323_vm9, %v661_v41  ;;  %vm12327_vm9 = vcmask 1023848  }
 0x178   :  { %674 = vst.msk [vmem:[#allocation2 + $0xe0] sm:$0x1] %vm12324_vm11, %v659_v42  ;;  %918 = vrot.lane.b32.xlu1 %v6526_v57, %s5942_s27  ;;  %916 = vrot.lane.b32.xlu0 %v6513_v53, %s5942_s27  ;;  %vm12328_vm11 = vcmask 1023849   ;;  %v6705_v53 = vld [vmem:[#allocation2 + $0x18] sm:$0xff] }
 0x179   :  { %v6717_v57 = vld [vmem:[#allocation2 + $0x38] sm:$0xff]  ;;  %v1213_v10 = vrot.slane %v6705_v53, 1 }
 0x17a   :  { %v665_v43 = vpop.permute.xlu1 %664  ;;  %v663_v44 = vpop.permute.xlu0 %662 }
 0x17b   :  { %677 = vst.msk [vmem:[#allocation2 + $0x110] sm:$0x1] %vm12325_vm8, %v665_v43  ;;  %vm12329_vm8 = vmmov %vm12328_vm11 }
 0x17c   :  { %676 = vst.msk [vmem:[#allocation2 + $0x100] sm:$0xff] %vm12326_vm10, %v663_v44  ;;  %922 = vrot.lane.b32.xlu1 %v6540_v62, %s5942_s27  ;;  %920 = vrot.lane.b32.xlu0 %v6515_v54, %s5942_s27  ;;  %vm12330_vm10 = vcmask 1016680   ;;  %v6707_v54 = vld [vmem:[#allocation2 + $0x10] sm:$0xff]  ;;  %v6731_v62 = vld [vmem:[#allocation2 + $0x40] sm:$0xff] }
 0x17d   :  { %v1210_v12 = vrot.slane %v6707_v54, 1  ;;  %v1220_v28 = vrot.slane %v6731_v62, 1 }
 0x17e   :  { %v681_v45 = vpop.permute.xlu1 %680  ;;  %v679_v46 = vpop.permute.xlu0 %678 }
 0x17f   :  { %697 = vst.msk [vmem:[#allocation2 + $0xd0] sm:$0xff] %vm12327_vm9, %v681_v45  ;;  %vm12331_vm9 = vmmov %vm12330_vm10 }
 0x180   :  { %696 = vst.msk [vmem:[#allocation2 + $0xc0] sm:$0xfe] %vm12328_vm11, %v679_v46  ;;  %926 = vrot.lane.b32.xlu1 %v6542_v63, %s5942_s27  ;;  %924 = vrot.lane.b32.xlu0 %v6553_v2, %s5942_s27  ;;  %vm12332_vm11 = vcmask 1023848  }
 0x182   :  { %v685_v47 = vpop.permute.xlu1 %684  ;;  %v683_v48 = vpop.permute.xlu0 %682 }
 0x183   :  { %699 = vst.msk [vmem:[#allocation2 + $0xf0] sm:$0xfe] %vm12329_vm8, %v685_v47  ;;  %vm12336_vm8 = vcmask 433449  }
 0x184   :  { %698 = vst.msk [vmem:[#allocation2 + $0xe0] sm:$0x1] %vm12330_vm10, %v683_v48  ;;  %1005 = vrot.lane.b32.xlu1 %v6695_v49, %s5942_s27  ;;  %1003 = vrot.lane.b32.xlu0 %v6697_v50, %s5942_s27  ;;  %vm12338_vm10 = vcmask 426280  }
 0x186   :  { %v689_v51 = vpop.permute.xlu1 %688  ;;  %v687_v52 = vpop.permute.xlu0 %686 }
 0x187   :  { %701 = vst.msk [vmem:[#allocation2 + $0x110] sm:$0x1] %vm12331_vm9, %v689_v51  ;;  %vm12339_vm9 = vmmov %vm12338_vm10  ;;  %v6827_v51 = vld [vmem:[#allocation2 + $0x8] sm:$0xfc] }
 0x188   :  { %700 = vst.msk [vmem:[#allocation2 + $0x100] sm:$0xff] %vm12332_vm11, %v687_v52  ;;  %1009 = vrot.lane.b32.xlu1 %v6705_v53, %s5942_s27  ;;  %1007 = vrot.lane.b32.xlu0 %v6707_v54, %s5942_s27  ;;  %v6829_v52 = vld [vmem:[#allocation2] sm:$0xfc] }
 0x18a   :  { %v705_v55 = vpop.permute.xlu1 %704  ;;  %v703_v56 = vpop.permute.xlu0 %702 }
 0x18b   :  { %722 = vst.msk [vmem:[#allocation2 + $0xd0] sm:$0xff] %vm290_vm15, %v705_v55 }
 0x18c   :  { %723 = vst.msk [vmem:[#allocation2 + $0xd8] sm:$0xff] %vm292_vm1, %v705_v55  ;;  %1013 = vrot.lane.b32.xlu1 %v6717_v57, %s5942_s27  ;;  %1011 = vrot.lane.b32.xlu0 %v6719_v58, %s5942_s27 }
 0x18d   :  { %720 = vst.msk [vmem:[#allocation2 + $0xc0] sm:$0xfe] %vm286_vm13, %v703_v56 }
 0x18e   :  { %721 = vst.msk [vmem:[#allocation2 + $0xc8] sm:$0xfe] %vm288_vm12, %v703_v56  ;;  %v709_v59 = vpop.permute.xlu1 %708  ;;  %v707_v60 = vpop.permute.xlu0 %706 }
 0x18f   :  { %726 = vst.msk [vmem:[#allocation2 + $0xf0] sm:$0xfe] %vm286_vm13, %v709_v59 }
 0x190   :  { %727 = vst.msk [vmem:[#allocation2 + $0xf8] sm:$0xfe] %vm288_vm12, %v709_v59  ;;  %1017 = vrot.lane.b32.xlu1 %v6729_v61, %s5942_s27  ;;  %1015 = vrot.lane.b32.xlu0 %v6731_v62, %s5942_s27  ;;  %v1436_v59 = vrot.slane %v6827_v51, 2 }
 0x191   :  { %724 = vst.msk [vmem:[#allocation2 + $0xe0] sm:$0x1] %vm294_vm2, %v707_v60 }
 0x192   :  { %725 = vst.msk [vmem:[#allocation2 + $0xe8] sm:$0x1] %vm296_vm14, %v707_v60  ;;  %v713_v63 = vpop.permute.xlu1 %712  ;;  %v711_v0 = vpop.permute.xlu0 %710  ;;  %v1437_v60 = vrot.slane %v6705_v53, 2 }
 0x193   :  { %730 = vst.msk [vmem:[#allocation2 + $0x110] sm:$0x1] %vm294_vm2, %v713_v63 }
 0x194   :  { %731 = vst.msk [vmem:[#allocation2 + $0x118] sm:$0x1] %vm296_vm14, %v713_v63  ;;  %1063 = vrot.lane.b32.xlu1 %v6695_v49, %s5943_s0  ;;  %1061 = vrot.lane.b32.xlu0 %v6697_v50, %s5943_s0  ;;  %v1433_v63 = vrot.slane %v6829_v52, 2 }
 0x195   :  { %728 = vst.msk [vmem:[#allocation2 + $0x100] sm:$0xff] %vm290_vm15, %v711_v0 }
 0x196   :  { %729 = vst.msk [vmem:[#allocation2 + $0x108] sm:$0xff] %vm292_vm1, %v711_v0  ;;  %v750_v1 = vpop.permute.xlu1 %749  ;;  %v748_v2 = vpop.permute.xlu0 %747  ;;  %v1434_v0 = vrot.slane %v6707_v54, 2 }
 0x197   :  { %767 = vst.msk [vmem:[#allocation2 + $0x130] sm:$0xff] %vm99_vm5, %v750_v1  ;;  %v6839_v1 = vld [vmem:[#allocation2 + $0x28] sm:$0x3] }
 0x198   :  { %766 = vst.msk [vmem:[#allocation2 + $0x120] sm:$0xfe] %vm97_vm4, %v748_v2  ;;  %1067 = vrot.lane.b32.xlu1 %v6705_v53, %s5943_s0  ;;  %1065 = vrot.lane.b32.xlu0 %v6707_v54, %s5943_s0  ;;  %v6841_v2 = vld [vmem:[#allocation2 + $0x20] sm:$0x3] }
 0x19a   :  { %v754_v3 = vpop.permute.xlu1 %753  ;;  %v752_v4 = vpop.permute.xlu0 %751 }
 0x19b   :  { %769 = vst.msk [vmem:[#allocation2 + $0x150] sm:$0xfe] %vm97_vm4, %v754_v3  ;;  %vm1151_vm4 = vcmask 1046528  }
 0x19c   :  { %768 = vst.msk [vmem:[#allocation2 + $0x140] sm:$0x1] %vm101_vm3, %v752_v4  ;;  %1071 = vrot.lane.b32.xlu1 %v6717_v57, %s5943_s0  ;;  %1069 = vrot.lane.b32.xlu0 %v6719_v58, %s5943_s0  ;;  %v1214_v17 = vsel %vm1151_vm4, %v1212_v9, %v1213_v10  ;;  %v1211_v18 = vsel %vm1151_vm4, %v1209_v11, %v1210_v12  ;;  %v1441_v9 = vrot.slane %v6839_v1, 2 }
 0x19d   :  { %v1218_v25 = vsel %vm1151_vm4, %v1213_v10, %v1217_v19  ;;  %v1216_v26 = vsel %vm1151_vm4, %v1210_v12, %v1215_v20  ;;  %v1224_v35 = vsel %vm1151_vm4, %v1222_v31, %v1223_v27  ;;  %v1221_v36 = vsel %vm1151_vm4, %v1219_v32, %v1220_v28 }
 0x19e   :  { %v758_v7 = vpop.permute.xlu1 %757  ;;  %v756_v8 = vpop.permute.xlu0 %755  ;;  %v1228_v41 = vsel %vm1151_vm4, %v1223_v27, %v1227_v37  ;;  %v1226_v42 = vsel %vm1151_vm4, %v1220_v28, %v1225_v38  ;;  %v1439_v10 = vrot.slane %v6841_v2, 2  ;;  %v1447_v19 = vrot.slane %v6729_v61, 2 }
 0x19f   :  { %771 = vst.msk [vmem:[#allocation2 + $0x170] sm:$0x1] %vm101_vm3, %v758_v7  ;;  %vm12333_vm3 = vcmask 278680   ;;  %v1444_v20 = vrot.slane %v6731_v62, 2 }
 0x1a0   :  { %770 = vst.msk [vmem:[#allocation2 + $0x160] sm:$0xff] %vm99_vm5, %v756_v8  ;;  %1075 = vrot.lane.b32.xlu1 %v6729_v61, %s5943_s0  ;;  %1073 = vrot.lane.b32.xlu0 %v6731_v62, %s5943_s0  ;;  %vm12334_vm5 = vmmov %vm12333_vm3 }
 0x1a2   :  { %v775_v15 = vpop.permute.xlu1 %774  ;;  %v773_v16 = vpop.permute.xlu0 %772 }
 0x1a3   :  { %791 = vst.msk [vmem:[#allocation2 + $0x130] sm:$0xff] %vm126_vm6, %v775_v15  ;;  %v6851_v15 = vld [vmem:[#allocation2 + $0x38] sm:$0xfc] }
 0x1a4   :  { %790 = vst.msk [vmem:[#allocation2 + $0x120] sm:$0xfe] %vm124_vm7, %v773_v16  ;;  %1231 = vrot.lane.b32.xlu1 %v1214_v17, %s5942_s27  ;;  %1229 = vrot.lane.b32.xlu0 %v1211_v18, %s5942_s27  ;;  %v6853_v16 = vld [vmem:[#allocation2 + $0x30] sm:$0xfc] }
 0x1a6   :  { %v779_v21 = vpop.permute.xlu1 %778  ;;  %v777_v22 = vpop.permute.xlu0 %776 }
 0x1a7   :  { %793 = vst.msk [vmem:[#allocation2 + $0x150] sm:$0xfe] %vm124_vm7, %v779_v21  ;;  %vm12335_vm7 = vcmask 433448   ;;  %v6863_v21 = vld [vmem:[#allocation2 + $0x58] sm:$0x3] }
 0x1a8   :  { %792 = vst.msk [vmem:[#allocation2 + $0x140] sm:$0x1] %vm12333_vm3, %v777_v22  ;;  %1235 = vrot.lane.b32.xlu1 %v1218_v25, %s5942_s27  ;;  %1233 = vrot.lane.b32.xlu0 %v1216_v26, %s5942_s27  ;;  %vm12340_vm11 = vmmov %vm12335_vm7  ;;  %vm12341_vm3 = vcmask 581048   ;;  %v6865_v22 = vld [vmem:[#allocation2 + $0x50] sm:$0x3] }
 0x1aa   :  { %v783_v33 = vpop.permute.xlu1 %782  ;;  %v781_v34 = vpop.permute.xlu0 %780 }
 0x1ab   :  { %795 = vst.msk [vmem:[#allocation2 + $0x170] sm:$0x1] %vm12334_vm5, %v783_v33  ;;  %vm12342_vm5 = vcmask 581049   ;;  %v1451_v33 = vrot.slane %v6863_v21, 2 }
 0x1ac   :  { %794 = vst.msk [vmem:[#allocation2 + $0x160] sm:$0xff] %vm126_vm6, %v781_v34  ;;  %1239 = vrot.lane.b32.xlu1 %v1224_v35, %s5942_s27  ;;  %1237 = vrot.lane.b32.xlu0 %v1221_v36, %s5942_s27  ;;  %vm12337_vm6 = vmmov %vm12336_vm8  ;;  %v1449_v34 = vrot.slane %v6865_v22, 2 }
 0x1ae   :  { %v799_v39 = vpop.permute.xlu1 %798  ;;  %v797_v40 = vpop.permute.xlu0 %796 }
 0x1af   :  { %815 = vst.msk [vmem:[#allocation2 + $0x130] sm:$0xff] %vm12335_vm7, %v799_v39  ;;  %vm12343_vm7 = vmmov %vm12342_vm5 }
 0x1b0   :  { %814 = vst.msk [vmem:[#allocation2 + $0x120] sm:$0xfe] %vm12336_vm8, %v797_v40  ;;  %1243 = vrot.lane.b32.xlu1 %v1228_v41, %s5942_s27  ;;  %1241 = vrot.lane.b32.xlu0 %v1226_v42, %s5942_s27  ;;  %vm12344_vm8 = vcmask 573880  }
 0x1b2   :  { %v803_v43 = vpop.permute.xlu1 %802  ;;  %v801_v44 = vpop.permute.xlu0 %800 }
 0x1b3   :  { %817 = vst.msk [vmem:[#allocation2 + $0x150] sm:$0xfe] %vm12337_vm6, %v803_v43  ;;  %vm1375_vm6 = vcmask 1045504  }
 0x1b4   :  { %816 = vst.msk [vmem:[#allocation2 + $0x140] sm:$0x1] %vm12338_vm10, %v801_v44  ;;  %1288 = vrot.lane.b32.xlu1 %v1214_v17, %s5943_s0  ;;  %1286 = vrot.lane.b32.xlu0 %v1211_v18, %s5943_s0  ;;  %vm12345_vm10 = vmmov %vm12344_vm8  ;;  %v1438_v7 = vsel %vm1375_vm6, %v1436_v59, %v1437_v60  ;;  %v1435_v8 = vsel %vm1375_vm6, %v1433_v63, %v1434_v0  ;;  %v6911_v63 = vld [vmem:[#allocation2 + $0x78] sm:$0xff] }
 0x1b5   :  { %v1442_v17 = vsel %vm1375_vm6, %v1437_v60, %v1441_v9  ;;  %v1440_v18 = vsel %vm1375_vm6, %v1434_v0, %v1439_v10  ;;  %v1452_v37 = vsel %vm1375_vm6, %v1447_v19, %v1451_v33  ;;  %v1450_v38 = vsel %vm1375_vm6, %v1444_v20, %v1449_v34  ;;  %12367 = vst [vmem:[#allocation8_spill] sm:$0xff] %v6911_v63  ;;  %v6913_v0 = vld [vmem:[#allocation2 + $0x70] sm:$0xff] }
 0x1b6   :  { %v807_v45 = vpop.permute.xlu1 %806  ;;  %v805_v46 = vpop.permute.xlu0 %804  ;;  %12368 = vst [vmem:[#allocation9_spill] sm:$0xff] %v6913_v0 }
 0x1b7   :  { %819 = vst.msk [vmem:[#allocation2 + $0x170] sm:$0x1] %vm12339_vm9, %v807_v45  ;;  %vm12346_vm9 = vmmov %vm12341_vm3 }
 0x1b8   :  { %818 = vst.msk [vmem:[#allocation2 + $0x160] sm:$0xff] %vm12340_vm11, %v805_v46  ;;  %1292 = vrot.lane.b32.xlu1 %v1218_v25, %s5943_s0  ;;  %1290 = vrot.lane.b32.xlu0 %v1216_v26, %s5943_s0  ;;  %vm12347_vm11 = vcmask 728648   ;;  %v1446_v25 = vrot.slane %v6851_v15, 2  ;;  %v1443_v26 = vrot.slane %v6853_v16, 2 }
 0x1ba   :  { %v823_v47 = vpop.permute.xlu1 %822  ;;  %v821_v48 = vpop.permute.xlu0 %820  ;;  %v1448_v31 = vsel %vm1375_vm6, %v1446_v25, %v1447_v19  ;;  %v1445_v32 = vsel %vm1375_vm6, %v1443_v26, %v1444_v20 }
 0x1bb   :  { %839 = vst.msk [vmem:[#allocation2 + $0x130] sm:$0xff] %vm12341_vm3, %v823_v47  ;;  %vm12348_vm3 = vcmask 728649  }
 0x1bc   :  { %838 = vst.msk [vmem:[#allocation2 + $0x120] sm:$0xfe] %vm12342_vm5, %v821_v48  ;;  %1296 = vrot.lane.b32.xlu1 %v1224_v35, %s5943_s0  ;;  %1294 = vrot.lane.b32.xlu0 %v1221_v36, %s5943_s0  ;;  %vm12349_vm5 = vmmov %vm12348_vm3 }
 0x1be   :  { %v827_v55 = vpop.permute.xlu1 %826  ;;  %v825_v56 = vpop.permute.xlu0 %824 }
 0x1bf   :  { %841 = vst.msk [vmem:[#allocation2 + $0x150] sm:$0xfe] %vm12343_vm7, %v827_v55  ;;  %vm12350_vm7 = vcmask 721480   ;;  %v6901_v55 = vld [vmem:[#allocation2 + $0x68] sm:$0xff] }
 0x1c0   :  { %840 = vst.msk [vmem:[#allocation2 + $0x140] sm:$0x1] %vm12344_vm8, %v825_v56  ;;  %1300 = vrot.lane.b32.xlu1 %v1228_v41, %s5943_s0  ;;  %1298 = vrot.lane.b32.xlu0 %v1226_v42, %s5943_s0  ;;  %vm12351_vm8 = vmmov %vm12350_vm7  ;;  %v6903_v56 = vld [vmem:[#allocation2 + $0x60] sm:$0xff] }
 0x1c1   :  { %12363 = vst [vmem:[#allocation6_spill] sm:$0xff] %v6901_v55  ;;  %12364 = vst [vmem:[#allocation7_spill] sm:$0xff] %v6903_v56 }
 0x1c2   :  { %v831_v3 = vpop.permute.xlu1 %830  ;;  %v829_v4 = vpop.permute.xlu0 %828 }
 0x1c3   :  { %843 = vst.msk [vmem:[#allocation2 + $0x170] sm:$0x1] %vm12345_vm10, %v831_v3  ;;  %vm12352_vm10 = vmmov %vm12347_vm11 }
 0x1c4   :  { %842 = vst.msk [vmem:[#allocation2 + $0x160] sm:$0xff] %vm12346_vm9, %v829_v4  ;;  %1455 = vrot.lane.b32.xlu1 %v1438_v7, %s5942_s27  ;;  %1453 = vrot.lane.b32.xlu0 %v1435_v8, %s5942_s27  ;;  %vm12353_vm9 = vcmask 876248  }
 0x1c6   :  { %v847_v11 = vpop.permute.xlu1 %846  ;;  %v845_v12 = vpop.permute.xlu0 %844 }
 0x1c7   :  { %863 = vst.msk [vmem:[#allocation2 + $0x130] sm:$0xff] %vm12347_vm11, %v847_v11  ;;  %vm12354_vm11 = vcmask 876249   ;;  %v6935_v11 = vld [vmem:[#allocation2 + $0xa8] sm:$0xff] }
 0x1c8   :  { %862 = vst.msk [vmem:[#allocation2 + $0x120] sm:$0xfe] %vm12348_vm3, %v845_v12  ;;  %1459 = vrot.lane.b32.xlu1 %v1442_v17, %s5942_s27  ;;  %1457 = vrot.lane.b32.xlu0 %v1440_v18, %s5942_s27  ;;  %vm12355_vm3 = vmmov %vm12354_vm11  ;;  %v6937_v12 = vld [vmem:[#allocation2 + $0xa0] sm:$0xff] }
 0x1c9   :  { %12371 = vst [vmem:[#allocation12_spill] sm:$0xff] %v6935_v11 }
 0x1ca   :  { %v851_v27 = vpop.permute.xlu1 %850  ;;  %v849_v28 = vpop.permute.xlu0 %848 }
 0x1cb   :  { %865 = vst.msk [vmem:[#allocation2 + $0x150] sm:$0xfe] %vm12349_vm5, %v851_v27  ;;  %vm12356_vm5 = vcmask 869080  }
 0x1cc   :  { %864 = vst.msk [vmem:[#allocation2 + $0x140] sm:$0x1] %vm12350_vm7, %v849_v28  ;;  %1463 = vrot.lane.b32.xlu1 %v1448_v31, %s5942_s27  ;;  %1461 = vrot.lane.b32.xlu0 %v1445_v32, %s5942_s27  ;;  %vm12357_vm7 = vmmov %vm12356_vm5 }
 0x1ce   :  { %v855_v35 = vpop.permute.xlu1 %854  ;;  %v853_v36 = vpop.permute.xlu0 %852 }
 0x1cf   :  { %867 = vst.msk [vmem:[#allocation2 + $0x170] sm:$0x1] %vm12351_vm8, %v855_v35  ;;  %vm12358_vm8 = vmmov %vm12353_vm9 }
 0x1d0   :  { %866 = vst.msk [vmem:[#allocation2 + $0x160] sm:$0xff] %vm12352_vm10, %v853_v36  ;;  %1467 = vrot.lane.b32.xlu1 %v1452_v37, %s5942_s27  ;;  %1465 = vrot.lane.b32.xlu0 %v1450_v38, %s5942_s27  ;;  %vm12359_vm10 = vcmask 1023848  }
 0x1d2   :  { %v871_v39 = vpop.permute.xlu1 %870  ;;  %v869_v40 = vpop.permute.xlu0 %868 }
 0x1d3   :  { %887 = vst.msk [vmem:[#allocation2 + $0x130] sm:$0xff] %vm12353_vm9, %v871_v39  ;;  %vm12360_vm9 = vcmask 1023849  }
 0x1d4   :  { %886 = vst.msk [vmem:[#allocation2 + $0x120] sm:$0xfe] %vm12354_vm11, %v869_v40  ;;  %1512 = vrot.lane.b32.xlu1 %v1438_v7, %s5943_s0  ;;  %1510 = vrot.lane.b32.xlu0 %v1435_v8, %s5943_s0  ;;  %vm12361_vm11 = vmmov %vm12360_vm9  ;;  %v6923_v7 = vld [vmem:[#allocation2 + $0x98] sm:$0xff]  ;;  %v6925_v8 = vld [vmem:[#allocation2 + $0x90] sm:$0xff] }
 0x1d5   :  { %12369 = vst [vmem:[#allocation10_spill] sm:$0xff] %v6923_v7  ;;  %12370 = vst [vmem:[#allocation11_spill] sm:$0xff] %v6925_v8  ;;  %v5829_v40 = vld [vmem:[%s12110_s1 + $0x6] ss:$8 sm:$0x3] }
 0x1d6   :  { %v875_v41 = vpop.permute.xlu1 %874  ;;  %v873_v42 = vpop.permute.xlu0 %872 }
 0x1d7   :  { %889 = vst.msk [vmem:[#allocation2 + $0x150] sm:$0xfe] %vm12355_vm3, %v875_v41  ;;  %vm12362_vm3 = vcmask 1016680  }
 0x1d8   :  { %888 = vst.msk [vmem:[#allocation2 + $0x140] sm:$0x1] %vm12356_vm5, %v873_v42  ;;  %1516 = vrot.lane.b32.xlu1 %v1442_v17, %s5943_s0  ;;  %1514 = vrot.lane.b32.xlu0 %v1440_v18, %s5943_s0  ;;  %vm12365_vm5 = vmmov %vm12362_vm3  ;;  %v956_v17 = vlaneseq }
 0x1da   :  { %v879_v43 = vpop.permute.xlu1 %878  ;;  %v877_v44 = vpop.permute.xlu0 %876  ;;  %v957_v20 = vshrl.u32 %v956_v17, 7 }
 0x1db   :  { %891 = vst.msk [vmem:[#allocation2 + $0x170] sm:$0x1] %vm12357_vm7, %v879_v43  ;;  %vm12366_vm7 = vmmov %vm12359_vm10 }
 0x1dc   :  { %890 = vst.msk [vmem:[#allocation2 + $0x160] sm:$0xff] %vm12358_vm8, %v877_v44  ;;  %1520 = vrot.lane.b32.xlu1 %v1448_v31, %s5943_s0  ;;  %1518 = vrot.lane.b32.xlu0 %v1445_v32, %s5943_s0  ;;  %v6955_v27 = vsub.s32 1, %v957_v20  ;;  %v6957_v28 = vsub.s32 0, %v957_v20  ;;  %v5826_v31 = vld [vmem:[%s12110_s1 + $0x3] ss:$8 sm:$0x3] }
 0x1dd   :  { %v954_v32 = vld [vmem:[%s12110_s1] ss:$8 sm:$0x3]  ;;  %vm4437_vm8 = vcmask 31744  }
 0x1de   :  { %v895_v45 = vpop.permute.xlu1 %894  ;;  %v893_v46 = vpop.permute.xlu0 %892  ;;  %v6974_v35 = vrot.slane %v5826_v31, %v6955_v27  ;;  %v6977_v36 = vrot.slane %v5826_v31, %v6957_v28  ;;  %v6988_v39 = vrot.slane %v954_v32, %v6955_v27  ;;  %v6994_v41 = vrot.slane %v954_v32, %v6957_v28  ;;  %v7104_v32 = vld [vmem:[#allocation2 + $0x98] sm:$0xfe] }
 0x1df   :  { %911 = vst.msk [vmem:[#allocation2 + $0x130] sm:$0xff] %vm12359_vm10, %v895_v45  ;;  %v1819_v45 = vrot.slane %v6911_v63, 1  ;;  %12382 = vst [vmem:[#allocation23_spill] sm:$0xff] %v7104_v32  ;;  %vm4470_vm10 = vcmask 39936  }
 0x1e0   :  { %910 = vst.msk [vmem:[#allocation2 + $0x120] sm:$0xfe] %vm12360_vm9, %v893_v46  ;;  %1524 = vrot.lane.b32.xlu1 %v1452_v37, %s5943_s0  ;;  %1522 = vrot.lane.b32.xlu0 %v1450_v38, %s5943_s0  ;;  %v6983_v37 = vld [vmem:[#allocation2 + $0x68] sm:$0xfe]  ;;  %v6985_v38 = vld [vmem:[#allocation2 + $0x60] sm:$0xfe]  ;;  %v7040_v17 = vmul.f32 %v6994_v41, %v6697_v50 }
 0x1e1   :  { %12372 = vst [vmem:[#allocation13_spill] sm:$0xff] %v6983_v37  ;;  %12373 = vst [vmem:[#allocation14_spill] sm:$0xff] %v6985_v38  ;;  %v1818_v44 = vrot.slane %v6983_v37, 1  ;;  %v1815_v46 = vrot.slane %v6985_v38, 1  ;;  %vm4503_vm9 = vcmask 48128  }
 0x1e2   :  { %v899_v47 = vpop.permute.xlu1 %898  ;;  %v897_v48 = vpop.permute.xlu0 %896  ;;  %12377 = vst [vmem:[#allocation18_spill] sm:$0xff] %v7040_v17 }
 0x1e3   :  { %913 = vst.msk [vmem:[#allocation2 + $0x150] sm:$0xfe] %vm12361_vm11, %v899_v47  ;;  %v1816_v47 = vrot.slane %v6913_v0, 1  ;;  %v7059_v20 = vsel %vm1151_vm4, %v1818_v44, %v1819_v45  ;;  %v7082_v44 = vmul.f32 %v6988_v39, %v6717_v57  ;;  %v7098_v57 = vmul.f32 %v6977_v36, %v6797_v30 }
 0x1e4   :  { %912 = vst.msk [vmem:[#allocation2 + $0x140] sm:$0x1] %vm12362_vm3, %v897_v48  ;;  %1614 = vrot.lane.b32.xlu1 %v6901_v55, %s5942_s27  ;;  %1612 = vrot.lane.b32.xlu0 %v6903_v56, %s5942_s27  ;;  %v7006_v48 = vmul.f32 %v6974_v35, %v6757_v5  ;;  %v7025_v5 = vmul.f32 %v6988_v39, %v6695_v49  ;;  %vm4536_vm11 = vcmask 56320   ;;  %vm4569_vm3 = vcmask 64512  }
 0x1e5   :  { %v7048_v49 = vmul.f32 %v6977_v36, %v6785_v24  ;;  %v7062_v50 = vsel %vm1151_vm4, %v1815_v46, %v1816_v47  ;;  %12379 = vst [vmem:[#allocation20_spill] sm:$0xff] %v7082_v44  ;;  %12381 = vst [vmem:[#allocation22_spill] sm:$0xff] %v7098_v57  ;;  %v1826_v24 = vrot.slane %v6937_v12, 1 }
 0x1e6   :  { %v903_v59 = vpop.permute.xlu1 %902  ;;  %v901_v60 = vpop.permute.xlu0 %900  ;;  %12376 = vst [vmem:[#allocation17_spill] sm:$0xff] %v7025_v5 }
 0x1e7   :  { %915 = vst.msk [vmem:[#allocation2 + $0x170] sm:$0x1] %vm12365_vm5, %v903_v59  ;;  %v7010_v59 = vmul.f32 %v6977_v36, %v6759_v6  ;;  %v7029_v6 = vmul.f32 %v6974_v35, %v6771_v13  ;;  %v7052_v13 = vmul.f32 %v6988_v39, %v6705_v53  ;;  %vm5034_vm5 = vcmask 1041408  }
 0x1e8   :  { %914 = vst.msk [vmem:[#allocation2 + $0x160] sm:$0xff] %vm12366_vm7, %v901_v60  ;;  %1618 = vrot.lane.b32.xlu1 %v6911_v63, %s5942_s27  ;;  %1616 = vrot.lane.b32.xlu0 %v6913_v0, %s5942_s27  ;;  %v7013_v60 = vrot.slane %v5829_v40, %v6955_v27  ;;  %vm5051_vm7 = vcmask 1042432  }
 0x1e9   :  { %12378 = vst [vmem:[#allocation19_spill] sm:$0xff] %v7052_v13 }
 0x1ea   :  { %v919_v3 = vpop.permute.xlu1 %918  ;;  %v917_v4 = vpop.permute.xlu0 %916 }
 0x1eb   :  { %936 = vst.msk [vmem:[#allocation2 + $0x130] sm:$0xff] %vm290_vm15, %v919_v3 }
 0x1ec   :  { %937 = vst.msk [vmem:[#allocation2 + $0x138] sm:$0xff] %vm292_vm1, %v919_v3  ;;  %1622 = vrot.lane.b32.xlu1 %v6923_v7, %s5942_s27  ;;  %1620 = vrot.lane.b32.xlu0 %v6925_v8, %s5942_s27  ;;  %v7019_v3 = vld [vmem:[#allocation2 + $0x88] sm:$0x1] }
 0x1ed   :  { %934 = vst.msk [vmem:[#allocation2 + $0x120] sm:$0xfe] %vm286_vm13, %v917_v4  ;;  %12374 = vst [vmem:[#allocation15_spill] sm:$0xff] %v7019_v3 }
 0x1ee   :  { %935 = vst.msk [vmem:[#allocation2 + $0x128] sm:$0xfe] %vm288_vm12, %v917_v4  ;;  %v923_v9 = vpop.permute.xlu1 %922  ;;  %v921_v10 = vpop.permute.xlu0 %920  ;;  %v7021_v4 = vld [vmem:[#allocation2 + $0x80] sm:$0x1] }
 0x1ef   :  { %940 = vst.msk [vmem:[#allocation2 + $0x150] sm:$0xfe] %vm286_vm13, %v923_v9  ;;  %12375 = vst [vmem:[#allocation16_spill] sm:$0xff] %v7021_v4  ;;  %v1821_v31 = vrot.slane %v7021_v4, 1  ;;  %vm1077_vm13 = vcmask 1031168  }
 0x1f0   :  { %941 = vst.msk [vmem:[#allocation2 + $0x158] sm:$0xfe] %vm288_vm12, %v923_v9  ;;  %1626 = vrot.lane.b32.xlu1 %v6935_v11, %s5942_s27  ;;  %1624 = vrot.lane.b32.xlu0 %v6937_v12, %s5942_s27  ;;  %v7033_v9 = vmul.f32 %v6977_v36, %v6773_v14  ;;  %vm1019_vm12 = vcmask 1039360  }
 0x1f1   :  { %938 = vst.msk [vmem:[#allocation2 + $0x140] sm:$0x1] %vm294_vm2, %v921_v10 }
 0x1f2   :  { %939 = vst.msk [vmem:[#allocation2 + $0x148] sm:$0x1] %vm296_vm14, %v921_v10  ;;  %v927_v18 = vpop.permute.xlu1 %926  ;;  %v925_v19 = vpop.permute.xlu0 %924  ;;  %v7036_v10 = vrot.slane %v5829_v40, %v6957_v28  ;;  %v7070_v40 = vmul.f32 %v6974_v35, %v6795_v29 }
 0x1f3   :  { %944 = vst.msk [vmem:[#allocation2 + $0x170] sm:$0x1] %vm294_vm2, %v927_v18  ;;  %vm4404_vm2 = vcmask 23552  }
 0x1f4   :  { %945 = vst.msk [vmem:[#allocation2 + $0x178] sm:$0x1] %vm296_vm14, %v927_v18  ;;  %1671 = vrot.lane.b32.xlu1 %v6901_v55, %s5943_s0  ;;  %1669 = vrot.lane.b32.xlu0 %v6903_v56, %s5943_s0  ;;  %v7044_v18 = vmul.f32 %v6974_v35, %v6783_v23  ;;  %v1823_v23 = vrot.slane %v7019_v3, 1  ;;  %v7088_v29 = vmul.f32 %v7036_v10, %v6829_v52  ;;  %v7106_v52 = vld [vmem:[#allocation2 + $0x90] sm:$0xfe]  ;;  %vm3474_vm14 = vcmask 130048  }
 0x1f5   :  { %942 = vst.msk [vmem:[#allocation2 + $0x160] sm:$0xff] %vm290_vm15, %v925_v19  ;;  %12383 = vst [vmem:[#allocation24_spill] sm:$0xff] %v7106_v52  ;;  %v7120_v3 = vmul.f32 %v7013_v60, %v6839_v1  ;;  %v7124_v38 = vmul.f32 %v7036_v10, %v6841_v2  ;;  %v1130_v1 = vmul.f32 %v6974_v35, %v6705_v53  ;;  %vm3465_vm15 = vcmask 15360  }
 0x1f6   :  { %943 = vst.msk [vmem:[#allocation2 + $0x168] sm:$0xff] %vm292_vm1, %v925_v19  ;;  %v6951_v25 = vpop.permute.xlu1 %1005  ;;  %v6953_v26 = vpop.permute.xlu0 %1003  ;;  %v7109_v55 = vsel %vm1151_vm4, %v1819_v45, %v1823_v23  ;;  %v7130_v45 = vld [vmem:[#allocation2 + $0xb8] sm:$0x1]  ;;  %v1828_v23 = vrot.slane %v7104_v32, 1  ;;  %v1129_v2 = vmul.f32 %v6977_v36, %v6707_v54  ;;  %v7149_v32 = vmul.f32 %v6977_v36, %v6731_v62 }
 0x1f7   :  { %12384 = vst [vmem:[#allocation25_spill] sm:$0xff] %v7130_v45  ;;  %v1833_v13 = vrot.slane %v7130_v45, 1  ;;  %v1382_v5 = vrot.slane %v7124_v38, 2  ;;  %v7167_v36 = vmul.f32 %v7013_v60, %v6851_v15  ;;  %v7181_v38 = vmul.f32 %v7013_v60, %v6863_v21 }
 0x1f8   :  { %1675 = vrot.lane.b32.xlu1 %v6911_v63, %s5943_s0  ;;  %1673 = vrot.lane.b32.xlu0 %v6913_v0, %s5943_s0  ;;  %12386 = vst [vmem:[#allocation27_spill] sm:$0xff] %v7149_v32  ;;  %v1153_v15 = vrot.slane %v1129_v2, 1  ;;  %v7193_v45 = vmul.f32 %v6988_v39, %v6729_v61  ;;  %v7208_v2 = vld [vmem:[#allocation2 + $0x60] sm:$0xfc]  ;;  %vm4339_vm1 = vcmask 7168  }
 0x1f9   :  { %12387 = vst [vmem:[#allocation28_spill] sm:$0xff] %v7167_v36  ;;  %12389 = vst [vmem:[#allocation30_spill] sm:$0xff] %v7181_v38  ;;  %v7199_v38 = vld [vmem:[#allocation2 + $0x68] sm:$0xfc] }
 0x1fa   :  { %v6969_v33 = vpop.permute.xlu1 %1009  ;;  %v6971_v34 = vpop.permute.xlu0 %1007  ;;  %12391 = vst [vmem:[#allocation32_spill] sm:$0xff] %v7199_v38  ;;  %12392 = vst [vmem:[#allocation33_spill] sm:$0xff] %v7208_v2 }
 0x1fc   :  { %1679 = vrot.lane.b32.xlu1 %v6923_v7, %s5943_s0  ;;  %1677 = vrot.lane.b32.xlu0 %v6925_v8, %s5943_s0  ;;  %v7074_v8 = vmul.f32 %v7013_v60, %v6827_v51  ;;  %v7092_v51 = vmul.f32 %v6994_v41, %v6719_v58  ;;  %v7112_v58 = vsel %vm1151_vm4, %v1816_v47, %v1821_v31  ;;  %v1829_v7 = vrot.slane %v6935_v11, 1  ;;  %v7132_v47 = vld [vmem:[#allocation2 + $0xb0] sm:$0x1] }
 0x1fd   :  { %12385 = vst [vmem:[#allocation26_spill] sm:$0xff] %v7132_v47  ;;  %v1825_v31 = vrot.slane %v7106_v52, 1  ;;  %v7153_v52 = vmul.f32 %v7013_v60, %v6705_v53  ;;  %v1831_v17 = vrot.slane %v7132_v47, 1  ;;  %v1353_v53 = vmul.f32 %v7036_v10, %v6707_v54 }
 0x1fe   :  { %v6996_v42 = vpop.permute.xlu1 %1013  ;;  %v6998_v43 = vpop.permute.xlu0 %1011  ;;  %12380 = vst [vmem:[#allocation21_spill] sm:$0xff] %v7092_v51  ;;  %v1136_v51 = vmul.f32 %v6974_v35, %v6729_v61  ;;  %v7156_v44 = vsel %vm1151_vm4, %v1828_v23, %v1829_v7  ;;  %v1384_v35 = vrot.slane %v7120_v3, 2  ;;  %v7177_v23 = vmul.f32 %v7036_v10, %v6853_v16 }
 0x1ff   :  { %v7159_v4 = vsel %vm1151_vm4, %v1825_v31, %v1826_v24  ;;  %v1156_v3 = vrot.slane %v1130_v1, 1  ;;  %v7185_v31 = vmul.f32 %v7036_v10, %v6865_v22  ;;  %v7189_v47 = vmul.f32 %v6994_v41, %v6707_v54 }
 0x200   :  { %1683 = vrot.lane.b32.xlu1 %v6935_v11, %s5943_s0  ;;  %1681 = vrot.lane.b32.xlu0 %v6937_v12, %s5943_s0  ;;  %12388 = vst [vmem:[#allocation29_spill] sm:$0xff] %v7177_v23  ;;  %v1166_v21 = vrot.slane %v1136_v51, 1  ;;  %v7202_v1 = vsel %vm1151_vm4, %v1829_v7, %v1833_v13  ;;  %v7205_v22 = vsel %vm1151_vm4, %v1826_v24, %v1831_v17  ;;  %v1380_v39 = vrot.slane %v7153_v52, 2 }
 0x201   :  { %12390 = vst [vmem:[#allocation31_spill] sm:$0xff] %v7185_v31  ;;  %v7213_v31 = vmul.f32 %v6994_v41, %v6731_v62  ;;  %v1377_v7 = vrot.slane %v1353_v53, 2  ;;  %v7221_v17 = vmul.f32 %v7013_v60, %v6729_v61  ;;  %v7225_v13 = vmul.f32 %v7036_v10, %v6731_v62  ;;  %v7239_v61 = vld [vmem:[#allocation2 + $0x88] sm:$0x3]  ;;  %v7241_v60 = vld [vmem:[#allocation2 + $0x80] sm:$0x3] }
 0x202   :  { %v7054_v14 = vpop.permute.xlu1 %1017  ;;  %v7056_v19 = vpop.permute.xlu0 %1015  ;;  %v12394_v24 = vrot.slane %v7006_v48, 1  ;;  %v12395_v51 = vrot.slane %v7010_v59, 1  ;;  %v2041_v53 = vrot.slane %v7199_v38, 2  ;;  %v2042_v54 = vrot.slane %v6911_v63, 2  ;;  %12396 = vst [vmem:[#allocation35_spill] sm:$0xff] %v7239_v61  ;;  %12397 = vst [vmem:[#allocation36_spill] sm:$0xff] %v7241_v60 }
 0x203   :  { %12393 = vst [vmem:[#allocation34_spill] sm:$0xff] %v7225_v13  ;;  %v12399_v48 = vrot.slane %v7029_v6, 1  ;;  %v12400_v59 = vrot.slane %v7033_v9, 1  ;;  %v2038_v38 = vrot.slane %v7208_v2, 2  ;;  %v2039_v63 = vrot.slane %v6913_v0, 2 }
 0x204   :  { %1837 = vrot.lane.b32.xlu1 %v7059_v20, %s5942_s27  ;;  %1835 = vrot.lane.b32.xlu0 %v7062_v50, %s5942_s27  ;;  %v7230_v41 = vsel %vm1151_vm4, %v12394_v24, %v1156_v3  ;;  %v7235_v52 = vsel %vm1151_vm4, %v12395_v51, %v1153_v15  ;;  %v5824_v13 = vld [vmem:[%s12110_s1 + $0x1] ss:$8 sm:$0x3]  ;;  %v12403_v9 = vrot.slane %v7048_v49, 1  ;;  %v7279_v2 = vld [vmem:[#allocation2 + $0x98] sm:$0xfc] }
 0x205   :  { %v7250_v24 = vsel %vm1151_vm4, %v1156_v3, %v12399_v48  ;;  %v7255_v51 = vsel %vm1151_vm4, %v1153_v15, %v12400_v59  ;;  %v12402_v3 = vrot.slane %v7149_v32, 1  ;;  %v12404_v48 = vrot.slane %v7070_v40, 1  ;;  %12406 = vst [vmem:[#allocation39_spill] sm:$0xff] %v7279_v2  ;;  %v7320_v32 = vld [vmem:[#allocation2 + $0x90] sm:$0xfc] }
 0x206   :  { %v7100_v56 = vpop.permute.xlu1 %1063  ;;  %v7102_v46 = vpop.permute.xlu0 %1061  ;;  %v12407_v0 = vrot.slane %v7074_v8, 2  ;;  %v2046_v49 = vrot.slane %v7239_v61, 2  ;;  %v2044_v40 = vrot.slane %v7241_v60, 2  ;;  %v7317_v61 = vsel %vm1375_vm6, %v2038_v38, %v2039_v63  ;;  %12411 = vst [vmem:[#allocation42_spill] sm:$0xff] %v7320_v32 }
 0x207   :  { %v7272_v15 = vsel %vm1151_vm4, %v12403_v9, %v12402_v3  ;;  %v7277_v59 = vsel %vm1151_vm4, %v1166_v21, %v12404_v48  ;;  %v7307_v3 = vsel %vm1375_vm6, %v1380_v39, %v1384_v35  ;;  %v7310_v9 = vsel %vm1375_vm6, %v1377_v7, %v1382_v5  ;;  %v5827_v38 = vld [vmem:[%s12110_s1 + $0x4] ss:$8 sm:$0x3] }
 0x208   :  { %1841 = vrot.lane.b32.xlu1 %v7109_v55, %s5942_s27  ;;  %1839 = vrot.lane.b32.xlu0 %v7112_v58, %s5942_s27  ;;  %12405 = vst [vmem:[#allocation38_spill] sm:$0xff] %v7277_v59  ;;  %12410 = vst [vmem:[#allocation41_spill] sm:$0xff] %v7310_v9  ;;  %v988_v48 = vrot.slane %v5824_v13, %v6957_v28  ;;  %v1020_v35 = vsel %vm1019_vm12, %v6953_v26, %v6951_v25 }
 0x209   :  { %v7339_v26 = vsel %vm1375_vm6, %v2042_v54, %v2046_v49  ;;  %v7342_v5 = vsel %vm1375_vm6, %v2039_v63, %v2044_v40  ;;  %v1078_v63 = vsel %vm1077_vm13, %v7102_v46, %v7100_v56 }
 0x20a   :  { %v7141_v30 = vpop.permute.xlu1 %1067  ;;  %v7143_v37 = vpop.permute.xlu0 %1065 }
 0x20b   :  { %v1079_v40 = vsel %vm1077_vm13, %v7143_v37, %v7141_v30 }
 0x20c   :  { %1845 = vrot.lane.b32.xlu1 %v7156_v44, %s5942_s27  ;;  %1843 = vrot.lane.b32.xlu0 %v7159_v4, %s5942_s27 }
 0x20e   :  { %v7195_v16 = vpop.permute.xlu1 %1071  ;;  %v7197_v23 = vpop.permute.xlu0 %1069 }
 0x210   :  { %1849 = vrot.lane.b32.xlu1 %v7202_v1, %s5942_s27  ;;  %1847 = vrot.lane.b32.xlu0 %v7205_v22, %s5942_s27 }
 0x212   :  { %v7243_v62 = vpop.permute.xlu1 %1075  ;;  %v7245_v10 = vpop.permute.xlu0 %1073 }
 0x213   :  { %12398 = vst [vmem:[#allocation37_spill] sm:$0xff] %v7245_v10  ;;  %v12401_v10 = vrot.slane %v7044_v18, 1  ;;  %v7284_v18 = vsel %vm1375_vm6, %v12407_v0, %v1380_v39  ;;  %v5825_v0 = vld [vmem:[%s12110_s1 + $0x2] ss:$8 sm:$0x3] }
 0x214   :  { %1894 = vrot.lane.b32.xlu1 %v7059_v20, %s5943_s0  ;;  %1892 = vrot.lane.b32.xlu0 %v7062_v50, %s5943_s0  ;;  %v7303_v20 = vsel %vm1375_vm6, %v2041_v53, %v2042_v54  ;;  %v2052_v50 = vrot.slane %v6935_v11, 2  ;;  %v2051_v53 = vrot.slane %v7279_v2, 2  ;;  %v1032_v11 = vmul.f32 %v1020_v35, %v988_v48 }
 0x215   :  { %v7265_v6 = vsel %vm1151_vm4, %v12401_v10, %v1166_v21  ;;  %v7292_v21 = vld [vmem:[#allocation2 + $0xb8] sm:$0x3]  ;;  %v12409_v10 = vrot.slane %v7088_v29, 2  ;;  %v992_v29 = vrot.slane %v5824_v13, %v6955_v27  ;;  %v7329_v13 = vrot.slane %v5825_v0, %v6955_v27 }
 0x216   :  { %12408 = vst [vmem:[#allocation40_spill] sm:$0xff] %v7292_v21  ;;  %v1230_v60 = vpop.permute.xlu0 %1229  ;;  %v2056_v39 = vrot.slane %v7292_v21, 2  ;;  %v7348_v21 = vrot.slane %v5825_v0, %v6957_v28  ;;  %v7351_v2 = vsel %vm1375_vm6, %v2051_v53, %v2052_v50  ;;  %v7365_v0 = vrot.slane %v5827_v38, %v6955_v27 }
 0x217   :  { %v7297_v8 = vsel %vm1375_vm6, %v12409_v10, %v1377_v7  ;;  %v7314_v10 = vpop.permute.xlu1 %1231  ;;  %v1021_v7 = vsel %vm1019_vm12, %v6971_v34, %v6969_v33  ;;  %v1035_v54 = vmul.f32 %v6969_v33, %v992_v29  ;;  %v12412_v53 = vrot.slane %v6937_v12, 2 }
 0x218   :  { %1898 = vrot.lane.b32.xlu1 %v7109_v55, %s5943_s0  ;;  %1896 = vrot.lane.b32.xlu0 %v7112_v58, %s5943_s0  ;;  %v2048_v55 = vrot.slane %v7320_v32, 2  ;;  %v1033_v58 = vmul.f32 %v6951_v25, %v992_v29  ;;  %v7373_v33 = vsel %vm1375_vm6, %v2052_v50, %v2056_v39  ;;  %v1034_v35 = vmul.f32 %v1021_v7, %v988_v48 }
 0x219   :  { %v1022_v32 = vsel %vm1019_vm12, %v6998_v43, %v6996_v42  ;;  %v1091_v37 = vmul.f32 %v7100_v56, %v7329_v13  ;;  %v1023_v50 = vsel %vm1019_vm12, %v7056_v19, %v7054_v14  ;;  %v1090_v39 = vmul.f32 %v1078_v63, %v7348_v21 }
 0x21a   :  { %v1234_v34 = vpop.permute.xlu0 %1233  ;;  %v7370_v25 = vsel %vm1375_vm6, %v2048_v55, %v12412_v53  ;;  %v1093_v7 = vmul.f32 %v7141_v30, %v7329_v13  ;;  %v7392_v43 = vrot.slane %v5827_v38, %v6957_v28  ;;  %v12413_v55 = vld [vmem:[#allocation17_spill] sm:$0xff]  ;;  %v12414_v53 = vld [vmem:[#allocation18_spill] sm:$0xff]  ;;  %v1037_v19 = vmul.f32 %v6996_v42, %v992_v29 }
 0x21b   :  { %v7359_v49 = vpop.permute.xlu1 %1235  ;;  %v1041_v56 = vadd.f32 %v1033_v58, %v12413_v55  ;;  %v1040_v46 = vadd.f32 %v1032_v11, %v12414_v53  ;;  %v1036_v9 = vmul.f32 %v1022_v32, %v988_v48  ;;  %v1039_v63 = vmul.f32 %v7054_v14, %v992_v29  ;;  %v5828_v38 = vld [vmem:[%s12110_s1 + $0x5] ss:$8 sm:$0x3]  ;;  %v12416_v11 = vld [vmem:[#allocation29_spill] sm:$0xff] }
 0x21c   :  { %1902 = vrot.lane.b32.xlu1 %v7156_v44, %s5943_s0  ;;  %1900 = vrot.lane.b32.xlu0 %v7159_v4, %s5943_s0  ;;  %v12415_v44 = vld [vmem:[#allocation19_spill] sm:$0xff]  ;;  %v1092_v4 = vmul.f32 %v1079_v40, %v7348_v21  ;;  %v1080_v30 = vsel %vm1077_vm13, %v7197_v23, %v7195_v16  ;;  %v1386_v58 = vrot.slane %v12416_v11, 2  ;;  %v1038_v40 = vmul.f32 %v1023_v50, %v988_v48 }
 0x21d   :  { %v1043_v36 = vadd.f32 %v1035_v54, %v12415_v44  ;;  %v1042_v54 = vadd.f32 %v1034_v35, %v7189_v47  ;;  %v1099_v55 = vadd.f32 %v1091_v37, %v1041_v56  ;;  %v1098_v42 = vadd.f32 %v1090_v39, %v1040_v46  ;;  %v12418_v46 = vld [vmem:[#allocation21_spill] sm:$0xff]  ;;  %v7442_v44 = vld [vmem:[#allocation2 + $0xb0] sm:$0x3] }
 0x21e   :  { %v1238_v59 = vpop.permute.xlu0 %1237  ;;  %v1095_v32 = vmul.f32 %v7195_v16, %v7329_v13  ;;  %v1245_v23 = vsel %vm1019_vm12, %v1230_v60, %v7314_v10  ;;  %v1094_v53 = vmul.f32 %v1080_v30, %v7348_v21  ;;  %v1258_v47 = vmul.f32 %v7314_v10, %v7365_v0  ;;  %12419 = vst [vmem:[#allocation17_spill] sm:$0xff] %v7442_v44 }
 0x21f   :  { %v1240_v57 = vpop.permute.xlu1 %1239  ;;  %v1101_v14 = vadd.f32 %v1093_v7, %v1043_v36  ;;  %v1100_v29 = vadd.f32 %v1092_v4, %v1042_v54  ;;  %v7422_v35 = vrot.slane %v5828_v38, %v6955_v27  ;;  %v1044_v37 = vadd.f32 %v1036_v9, %v12418_v46  ;;  %v12420_v4 = vld [vmem:[#allocation37_spill] sm:$0xff] }
 0x220   :  { %1906 = vrot.lane.b32.xlu1 %v7202_v1, %s5943_s0  ;;  %1904 = vrot.lane.b32.xlu0 %v7205_v22, %s5943_s0  ;;  %v12417_v22 = vld [vmem:[#allocation20_spill] sm:$0xff]  ;;  %v1047_v16 = vadd.f32 %v1039_v63, %v7193_v45  ;;  %v7428_v60 = vrot.slane %v5828_v38, %v6957_v28  ;;  %v1046_v50 = vadd.f32 %v1038_v40, %v7213_v31  ;;  %v1390_v7 = vrot.slane %v7221_v17, 2 }
 0x221   :  { %v1045_v36 = vadd.f32 %v1037_v19, %v12417_v22  ;;  %v1181_v39 = vadd.f32 %v7230_v41, %v1099_v55  ;;  %v1257_v10 = vmul.f32 %v1245_v23, %v7392_v43  ;;  %v1180_v45 = vadd.f32 %v7235_v52, %v1098_v42 }
 0x222   :  { %v1242_v1 = vpop.permute.xlu0 %1241  ;;  %v1183_v56 = vadd.f32 %v7250_v24, %v1101_v14  ;;  %v1246_v31 = vsel %vm1019_vm12, %v1234_v34, %v7359_v49  ;;  %v1102_v41 = vadd.f32 %v1094_v53, %v1044_v37  ;;  %v1081_v19 = vsel %vm1077_vm13, %v12420_v4, %v7243_v62 }
 0x223   :  { %v7419_v48 = vpop.permute.xlu1 %1243  ;;  %v1103_v9 = vadd.f32 %v1095_v32, %v1045_v36  ;;  %v1266_v63 = vadd.f32 %v1258_v47, %v1181_v39  ;;  %v1182_v30 = vadd.f32 %v7255_v51, %v1100_v29  ;;  %v1260_v52 = vmul.f32 %v7359_v49, %v7365_v0 }
 0x224   :  { %2060 = vrot.lane.b32.xlu1 %v7303_v20, %s5942_s27  ;;  %2058 = vrot.lane.b32.xlu0 %v7317_v61, %s5942_s27  ;;  %v1247_v24 = vsel %vm1019_vm12, %v1238_v59, %v1240_v57  ;;  %v1265_v55 = vadd.f32 %v1257_v10, %v1180_v45  ;;  %v1259_v42 = vmul.f32 %v1246_v31, %v7392_v43  ;;  %v2054_v51 = vrot.slane %v7442_v44, 2 }
 0x225   :  { %v1097_v59 = vmul.f32 %v7243_v62, %v7329_v13  ;;  %v1096_v49 = vmul.f32 %v1081_v19, %v7348_v21  ;;  %v1185_v32 = vadd.f32 %v7265_v6, %v1103_v9  ;;  %v1262_v29 = vmul.f32 %v1240_v57, %v7365_v0 }
 0x226   :  { %v1287_v54 = vpop.permute.xlu0 %1286  ;;  %v1184_v53 = vadd.f32 %v7272_v15, %v1102_v41  ;;  %v1261_v47 = vmul.f32 %v1247_v24, %v7392_v43  ;;  %v1268_v37 = vadd.f32 %v1260_v52, %v1183_v56  ;;  %v1267_v21 = vadd.f32 %v1259_v42, %v1182_v30  ;;  %v12421_v15 = vld [vmem:[#allocation34_spill] sm:$0xff] }
 0x227   :  { %v1289_v38 = vpop.permute.xlu1 %1288  ;;  %v1387_v13 = vrot.slane %v12421_v15, 2  ;;  %v1105_v9 = vadd.f32 %v1097_v59, %v1047_v16  ;;  %v1248_v45 = vsel %vm1019_vm12, %v1242_v1, %v7419_v48  ;;  %v12422_v56 = vrot.slane %v6937_v12, 2  ;;  %v12423_v52 = vld [vmem:[#allocation30_spill] sm:$0xff]  ;;  %v12429_v59 = vld [vmem:[#allocation27_spill] sm:$0xff] }
 0x228   :  { %v1315_v40 = vmul.f32 %v1289_v38, %v7422_v35  ;;  %v1302_v34 = vsel %vm1077_vm13, %v1287_v54, %v1289_v38  ;;  %2064 = vrot.lane.b32.xlu1 %v7339_v26, %s5942_s27  ;;  %2062 = vrot.lane.b32.xlu0 %v7342_v5, %s5942_s27  ;;  %v1104_v41 = vadd.f32 %v1096_v49, %v1046_v50  ;;  %v1394_v24 = vrot.slane %v12423_v52, 2  ;;  %v12426_v42 = vld [vmem:[#allocation38_spill] sm:$0xff] }
 0x229   :  { %v1314_v14 = vmul.f32 %v1302_v34, %v7428_v60  ;;  %v2055_v31 = vsel %vm1375_vm6, %v12422_v56, %v2054_v51  ;;  %v1270_v4 = vadd.f32 %v1262_v29, %v1185_v32  ;;  %v1269_v19 = vadd.f32 %v1261_v47, %v1184_v53  ;;  %v12424_v34 = vld [vmem:[#allocation41_spill] sm:$0xff] }
 0x22a   :  { %v1323_v23 = vadd.f32 %v1315_v40, %v1266_v63  ;;  %v1291_v46 = vpop.permute.xlu0 %1290  ;;  %v1263_v40 = vmul.f32 %v1248_v45, %v7392_v43  ;;  %v12430_v49 = vrot.slane %v12429_v59, 1  ;;  %v1395_v56 = vsel %vm1375_vm6, %v1390_v7, %v1394_v24 }
 0x22b   :  { %v1322_v22 = vadd.f32 %v1314_v14, %v1265_v55  ;;  %v1293_v36 = vpop.permute.xlu1 %1292  ;;  %v1187_v14 = vadd.f32 %v12426_v42, %v1105_v9  ;;  %v7604_v42 = vld [vmem:[#allocation2 + $0xf0] sm:$0xff] }
 0x22c   :  { %v1317_v39 = vmul.f32 %v1293_v36, %v7422_v35  ;;  %v1303_v10 = vsel %vm1077_vm13, %v1291_v46, %v1293_v36  ;;  %v7470_v62 = vadd.f32 %v7284_v18, %v1323_v23  ;;  %2068 = vrot.lane.b32.xlu1 %v7351_v2, %s5942_s27  ;;  %2066 = vrot.lane.b32.xlu0 %v7370_v25, %s5942_s27 }
 0x22d   :  { %v1316_v6 = vmul.f32 %v1303_v10, %v7428_v60  ;;  %v7478_v57 = vadd.f32 %v7297_v8, %v1322_v22  ;;  %v1264_v8 = vmul.f32 %v7419_v48, %v7365_v0  ;;  %v12425_v48 = vld [vmem:[#allocation31_spill] sm:$0xff]  ;;  %v12431_v22 = vld [vmem:[#allocation28_spill] sm:$0xff]  ;;  %12440 = vst [vmem:[#allocation37_spill] sm:$0xff] %v7604_v42 }
 0x22e   :  { %v1325_v18 = vadd.f32 %v1317_v39, %v1268_v37  ;;  %v1295_v38 = vpop.permute.xlu0 %1294  ;;  %v1392_v55 = vrot.slane %v12425_v48, 2  ;;  %v12432_v36 = vrot.slane %v12431_v22, 2  ;;  %v1388_v37 = vsel %vm1375_vm6, %v1386_v58, %v1387_v13 }
 0x22f   :  { %v1324_v63 = vadd.f32 %v1316_v6, %v1267_v21  ;;  %v1297_v30 = vpop.permute.xlu1 %1296  ;;  %v1272_v39 = vadd.f32 %v1264_v8, %v1187_v14  ;;  %v7587_v8 = vld [vmem:[#allocation2 + $0xd0] sm:$0xff]  ;;  %v12441_v14 = vld [vmem:[#allocation15_spill] sm:$0xff] }
 0x230   :  { %v1319_v54 = vmul.f32 %v1297_v30, %v7422_v35  ;;  %v1304_v16 = vsel %vm1077_vm13, %v1295_v38, %v1297_v30  ;;  %v7491_v1 = vadd.f32 %v7307_v3, %v1325_v18  ;;  %2072 = vrot.lane.b32.xlu1 %v7373_v33, %s5942_s27  ;;  %2070 = vrot.lane.b32.xlu0 %v2055_v31, %s5942_s27  ;;  %v12427_v3 = vld [vmem:[#allocation22_spill] sm:$0xff]  ;;  %v7585_v38 = vld [vmem:[#allocation2 + $0xd8] sm:$0xff] }
 0x231   :  { %v1318_v50 = vmul.f32 %v1304_v16, %v7428_v60  ;;  %v7500_v0 = vadd.f32 %v12424_v34, %v1324_v63  ;;  %v12428_v51 = vrot.slane %v12427_v3, 1  ;;  %v1391_v46 = vsel %vm1375_vm6, %v12432_v36, %v1390_v7  ;;  %12435 = vst [vmem:[#allocation29_spill] sm:$0xff] %v7585_v38  ;;  %12436 = vst [vmem:[#allocation20_spill] sm:$0xff] %v7587_v8  ;;  %v12438_v34 = vld [vmem:[#allocation14_spill] sm:$0xff] }
 0x232   :  { %v1327_v32 = vadd.f32 %v1319_v54, %v1270_v4  ;;  %v1299_v47 = vpop.permute.xlu0 %1298 }
 0x233   :  { %v1169_v43 = vsel %vm1151_vm4, %v12430_v49, %v12428_v51  ;;  %v1326_v29 = vadd.f32 %v1318_v50, %v1269_v19  ;;  %v1301_v53 = vpop.permute.xlu1 %1300  ;;  %v7565_v19 = vld [vmem:[#allocation2 + $0xc0] sm:$0xff]  ;;  %v12442_v51 = vld [vmem:[#allocation8_spill] sm:$0xff] }
 0x234   :  { %v1186_v23 = vadd.f32 %v1169_v43, %v1104_v41  ;;  %v1321_v10 = vmul.f32 %v1301_v53, %v7422_v35  ;;  %v1305_v21 = vsel %vm1077_vm13, %v1299_v47, %v1301_v53  ;;  %v7519_v6 = vadd.f32 %v1391_v46, %v1327_v32  ;;  %2117 = vrot.lane.b32.xlu1 %v7303_v20, %s5943_s0  ;;  %v12443_v49 = vld [vmem:[#allocation16_spill] sm:$0xff]  ;;  %v12444_v32 = vld [vmem:[#allocation9_spill] sm:$0xff]  ;;  %v12446_v47 = vld [vmem:[#allocation7_spill] sm:$0xff] }
 0x235   :  { %v1320_v9 = vmul.f32 %v1305_v21, %v7428_v60  ;;  %2115 = vrot.lane.b32.xlu0 %v7317_v61, %s5943_s0  ;;  %v7526_v45 = vadd.f32 %v1388_v37, %v1326_v29  ;;  %v1393_v60 = vsel %vm1375_vm6, %v1387_v13, %v1392_v55  ;;  %v7563_v13 = vld [vmem:[#allocation2 + $0xc8] sm:$0xff]  ;;  %12434 = vst [vmem:[#allocation19_spill] sm:$0xff] %v7565_v19  ;;  %v7602_v55 = vld [vmem:[#allocation2 + $0xf8] sm:$0xff]  ;;  %v12445_v29 = vld [vmem:[#allocation6_spill] sm:$0xff] }
 0x236   :  { %v1271_v15 = vadd.f32 %v1263_v40, %v1186_v23  ;;  %v1329_v11 = vadd.f32 %v1321_v10, %v1272_v39  ;;  %v7530_v35 = vpop.permute.xlu0 %1453  ;;  %12433 = vst [vmem:[#allocation18_spill] sm:$0xff] %v7563_v13  ;;  %v12437_v40 = vld [vmem:[#allocation13_spill] sm:$0xff]  ;;  %12439 = vst [vmem:[#allocation21_spill] sm:$0xff] %v7602_v55  ;;  %v7629_v39 = vld [vmem:[#allocation2 + $0xc8] sm:$0xfe] }
 0x237   :  { %v7528_v18 = vpop.permute.xlu1 %1455  ;;  %12447 = vst [vmem:[#allocation34_spill] sm:$0xff] %v7629_v39  ;;  %v12448_v10 = vld [vmem:[#allocation10_spill] sm:$0xff] }
 0x238   :  { %v1328_v58 = vadd.f32 %v1320_v9, %v1271_v15  ;;  %v7535_v41 = vadd.f32 %v1395_v56, %v1329_v11  ;;  %2121 = vrot.lane.b32.xlu1 %v7339_v26, %s5943_s0  ;;  %v12450_v15 = vld [vmem:[#allocation11_spill] sm:$0xff] }
 0x239   :  { %2119 = vrot.lane.b32.xlu0 %v7342_v5, %s5943_s0  ;;  %v7637_v56 = vld [vmem:[#allocation2 + $0x108] sm:$0xff] }
 0x23a   :  { %v7542_v61 = vadd.f32 %v1393_v60, %v1328_v58  ;;  %v7546_v4 = vpop.permute.xlu0 %1457  ;;  %v7639_v60 = vld [vmem:[#allocation2 + $0x100] sm:$0xff] }
 0x23b   :  { %v7544_v20 = vpop.permute.xlu1 %1459 }
 0x23c   :  { %2125 = vrot.lane.b32.xlu1 %v7351_v2, %s5943_s0  ;;  %v5835_v2 = vld [vmem:[%s12110_s1 + $0x14] ss:$8 sm:$0x3] }
 0x23d   :  { %2123 = vrot.lane.b32.xlu0 %v7370_v25, %s5943_s0  ;;  %v1731_v63 = vrot.slane %v5835_v2, %v6955_v27  ;;  %v7583_v30 = vrot.slane %v5835_v2, %v6957_v28  ;;  %v7641_v2 = vld [vmem:[#allocation2 + $0xc0] sm:$0xfe] }
 0x23e   :  { %v7554_v7 = vpop.permute.xlu0 %1461  ;;  %12452 = vst [vmem:[#allocation31_spill] sm:$0xff] %v7641_v2 }
 0x23f   :  { %v7552_v17 = vpop.permute.xlu1 %1463  ;;  %v1735_v50 = vmul.f32 %v1731_v63, %v12437_v40  ;;  %v1734_v48 = vmul.f32 %v7583_v30, %v12438_v34  ;;  %v1739_v3 = vmul.f32 %v1731_v63, %v12441_v14  ;;  %v1737_v59 = vmul.f32 %v1731_v63, %v12442_v51  ;;  %v12453_v40 = vld [vmem:[#allocation23_spill] sm:$0xff]  ;;  %v12454_v14 = vld [vmem:[#allocation24_spill] sm:$0xff] }
 0x240   :  { %2129 = vrot.lane.b32.xlu1 %v7373_v33, %s5943_s0  ;;  %v1738_v43 = vmul.f32 %v7583_v30, %v12443_v49  ;;  %v1736_v23 = vmul.f32 %v7583_v30, %v12444_v32  ;;  %v7644_v34 = vmul.f32 %v1731_v63, %v12453_v40  ;;  %v12456_v49 = vld [vmem:[#allocation25_spill] sm:$0xff] }
 0x241   :  { %2127 = vrot.lane.b32.xlu0 %v2055_v31, %s5943_s0  ;;  %v5832_v31 = vld [vmem:[%s12110_s1 + $0x11] ss:$8 sm:$0x3]  ;;  %v1761_v11 = vrot.slane %v1735_v50, 1  ;;  %v1758_v58 = vrot.slane %v1734_v48, 1  ;;  %v1762_v50 = vrot.slane %v1737_v59, 1 }
 0x242   :  { %v7561_v26 = vpop.permute.xlu0 %1465  ;;  %v1572_v54 = vrot.slane %v5832_v31, %v6955_v27  ;;  %v1568_v16 = vrot.slane %v5832_v31, %v6957_v28  ;;  %v1766_v31 = vrot.slane %v1739_v3, 1  ;;  %v1764_v48 = vrot.slane %v1738_v43, 1 }
 0x243   :  { %v7559_v5 = vpop.permute.xlu1 %1467  ;;  %v1759_v40 = vrot.slane %v1736_v23, 1  ;;  %v2424_v59 = vrot.slane %v7585_v38, 1  ;;  %v2420_v43 = vrot.slane %v7641_v2, 1  ;;  %v12462_v23 = vld [vmem:[#allocation12_spill] sm:$0xff] }
 0x244   :  { %2219 = vrot.lane.b32.xlu1 %v7563_v13, %s5942_s27  ;;  %v7617_v53 = vmul.f32 %v1572_v54, %v12445_v29  ;;  %v7620_v22 = vmul.f32 %v1568_v16, %v12446_v47  ;;  %v7627_v37 = vmul.f32 %v1572_v54, %v12442_v51  ;;  %v7632_v21 = vmul.f32 %v1572_v54, %v12448_v10  ;;  %v12458_v47 = vld [vmem:[#allocation26_spill] sm:$0xff]  ;;  %v7661_v10 = vld [vmem:[#allocation2 + $0xe8] sm:$0x1] }
 0x245   :  { %2217 = vrot.lane.b32.xlu0 %v7565_v19, %s5942_s27  ;;  %v7635_v9 = vmul.f32 %v1568_v16, %v12450_v15  ;;  %v7648_v51 = vmul.f32 %v7583_v30, %v12454_v14  ;;  %v7655_v29 = vmul.f32 %v1731_v63, %v12456_v49  ;;  %v7659_v3 = vmul.f32 %v7583_v30, %v12458_v47  ;;  %v7663_v15 = vld [vmem:[#allocation2 + $0xe0] sm:$0x1]  ;;  %v5830_v47 = vld [vmem:[%s12110_s1 + $0x7] ss:$8 sm:$0x3] }
 0x246   :  { %v7576_v33 = vpop.permute.xlu0 %1510  ;;  %12449 = vst [vmem:[#allocation30_spill] sm:$0xff] %v7632_v21  ;;  %12460 = vst [vmem:[#allocation28_spill] sm:$0xff] %v7661_v10  ;;  %v2421_v49 = vrot.slane %v7587_v8, 1  ;;  %v2428_v2 = vrot.slane %v7661_v10, 1  ;;  %v7694_v21 = vld [vmem:[#allocation2 + $0xf8] sm:$0xfe]  ;;  %v7716_v10 = vsel %vm1151_vm4, %v1759_v40, %v1764_v48  ;;  %v1470_v48 = vsel %vm1019_vm12, %v7546_v4, %v7544_v20 }
 0x247   :  { %v7574_v25 = vpop.permute.xlu1 %1512  ;;  %12451 = vst [vmem:[#allocation41_spill] sm:$0xff] %v7635_v9  ;;  %12455 = vst [vmem:[#allocation38_spill] sm:$0xff] %v7648_v51  ;;  %v2423_v51 = vrot.slane %v7629_v39, 1  ;;  %v7683_v9 = vmul.f32 %v1568_v16, %v6937_v12  ;;  %v7686_v39 = vmul.f32 %v1731_v63, %v12462_v23  ;;  %v7703_v63 = vmul.f32 %v7583_v30, %v6937_v12 }
 0x248   :  { %2223 = vrot.lane.b32.xlu1 %v7585_v38, %s5942_s27  ;;  %12457 = vst [vmem:[#allocation22_spill] sm:$0xff] %v7655_v29  ;;  %12459 = vst [vmem:[#allocation27_spill] sm:$0xff] %v7659_v3  ;;  %v7677_v3 = vmul.f32 %v1568_v16, %v12444_v32  ;;  %v7680_v29 = vmul.f32 %v1572_v54, %v12462_v23  ;;  %v2426_v32 = vrot.slane %v7663_v15, 1  ;;  %v7696_v54 = vld [vmem:[#allocation2 + $0x118] sm:$0x1] }
 0x249   :  { %2221 = vrot.lane.b32.xlu0 %v7587_v8, %s5942_s27  ;;  %12461 = vst [vmem:[#allocation13_spill] sm:$0xff] %v7663_v15  ;;  %12464 = vst [vmem:[#allocation15_spill] sm:$0xff] %v7683_v9  ;;  %v7699_v16 = vsel %vm1151_vm4, %v1761_v11, %v1762_v50  ;;  %v5831_v23 = vld [vmem:[%s12110_s1 + $0x10] ss:$8 sm:$0x3]  ;;  %v7713_v15 = vsel %vm1151_vm4, %v1762_v50, %v1766_v31  ;;  %v1422_v11 = vrot.slane %v5830_v47, %v6955_v27 }
 0x24a   :  { %v7597_v24 = vpop.permute.xlu0 %1514  ;;  %12463 = vst [vmem:[#allocation14_spill] sm:$0xff] %v7680_v29  ;;  %12465 = vst [vmem:[#allocation8_spill] sm:$0xff] %v7694_v21  ;;  %v1418_v12 = vrot.slane %v5830_v47, %v6957_v28  ;;  %v7721_v29 = vsel %vm1151_vm4, %v2423_v51, %v2424_v59  ;;  %v1469_v31 = vsel %vm1019_vm12, %v7530_v35, %v7528_v18  ;;  %v2433_v50 = vrot.slane %v7694_v21, 1  ;;  %v5833_v51 = vld [vmem:[%s12110_s1 + $0x12] ss:$8 sm:$0x3] }
 0x24b   :  { %v7595_v52 = vpop.permute.xlu1 %1516  ;;  %12466 = vst [vmem:[#allocation16_spill] sm:$0xff] %v7696_v54  ;;  %12467 = vst [vmem:[#allocation9_spill] sm:$0xff] %v7703_v63  ;;  %v7724_v63 = vsel %vm1151_vm4, %v2420_v43, %v2421_v49  ;;  %v7735_v47 = vrot.slane %v5831_v23, %v6955_v27  ;;  %v7745_v35 = vsel %vm1151_vm4, %v2424_v59, %v2428_v2 }
 0x24c   :  { %2227 = vrot.lane.b32.xlu1 %v7602_v55, %s5942_s27  ;;  %12468 = vst [vmem:[#allocation6_spill] sm:$0xff] %v7716_v10  ;;  %v7748_v43 = vsel %vm1151_vm4, %v2421_v49, %v2426_v32  ;;  %v1481_v10 = vmul.f32 %v1469_v31, %v1418_v12  ;;  %v1484_v2 = vmul.f32 %v7544_v20, %v1422_v11 }
 0x24d   :  { %2225 = vrot.lane.b32.xlu0 %v7604_v42, %s5942_s27  ;;  %v1526_v59 = vsel %vm1077_vm13, %v7576_v33, %v7574_v25  ;;  %v1527_v32 = vsel %vm1077_vm13, %v7597_v24, %v7595_v52  ;;  %v1483_v31 = vmul.f32 %v1470_v48, %v1418_v12  ;;  %v1471_v33 = vsel %vm1019_vm12, %v7554_v7, %v7552_v17 }
 0x24e   :  { %v7624_v46 = vpop.permute.xlu0 %1518  ;;  %v1541_v24 = vmul.f32 %v7595_v52, %v7735_v47  ;;  %v7797_v7 = vrot.slane %v5833_v51, %v6957_v28  ;;  %v1489_v48 = vadd.f32 %v1481_v10, %v7478_v57  ;;  %v1771_v57 = vrot.slane %v7644_v34, 1 }
 0x24f   :  { %v7622_v36 = vpop.permute.xlu1 %1520 }
 0x250   :  { %2231 = vrot.lane.b32.xlu1 %v7637_v56, %s5942_s27  ;;  %v1528_v52 = vsel %vm1077_vm13, %v7624_v46, %v7622_v36  ;;  %v1543_v46 = vmul.f32 %v7622_v36, %v7735_v47 }
 0x251   :  { %2229 = vrot.lane.b32.xlu0 %v7639_v60, %s5942_s27 }
 0x252   :  { %v7667_v44 = vpop.permute.xlu0 %1522 }
 0x253   :  { %v7665_v14 = vpop.permute.xlu1 %1524 }
 0x254   :  { %2276 = vrot.lane.b32.xlu1 %v7563_v13, %s5943_s0  ;;  %v7710_v13 = vsel %vm1151_vm4, %v1758_v58, %v1759_v40  ;;  %v7726_v58 = vld [vmem:[#allocation2 + $0xf0] sm:$0xfe]  ;;  %v2438_v40 = vrot.slane %v7696_v54, 1  ;;  %v7754_v54 = vrot.slane %v5831_v23, %v6957_v28  ;;  %v7771_v23 = vrot.slane %v5833_v51, %v6955_v27 }
 0x255   :  { %2274 = vrot.lane.b32.xlu0 %v7565_v19, %s5943_s0  ;;  %v2434_v19 = vrot.slane %v7637_v56, 1  ;;  %12469 = vst [vmem:[#allocation7_spill] sm:$0xff] %v7726_v58 }
 0x256   :  { %v1613_v9 = vpop.permute.xlu0 %1612 }
 0x257   :  { %v1615_v30 = vpop.permute.xlu1 %1614  ;;  %v7757_v21 = vsel %vm1151_vm4, %v2433_v50, %v2434_v19  ;;  %v12470_v50 = vrot.slane %v7639_v60, 1  ;;  %v7779_v20 = vsel %vm1151_vm4, %v2434_v19, %v2438_v40  ;;  %v1538_v19 = vmul.f32 %v1526_v59, %v7754_v54 }
 0x258   :  { %2280 = vrot.lane.b32.xlu1 %v7585_v38, %s5943_s0  ;;  %v2430_v38 = vrot.slane %v7726_v58, 1  ;;  %12471 = vst [vmem:[#allocation10_spill] sm:$0xff] %v7779_v20  ;;  %v1539_v58 = vmul.f32 %v7574_v25, %v7735_v47  ;;  %v1492_v40 = vadd.f32 %v1484_v2, %v7491_v1  ;;  %v1485_v20 = vmul.f32 %v1471_v33, %v1418_v12 }
 0x259   :  { %2278 = vrot.lane.b32.xlu0 %v7587_v8, %s5943_s0  ;;  %v1482_v8 = vmul.f32 %v7528_v18, %v1422_v11  ;;  %v1488_v59 = vmul.f32 %v7559_v5, %v1422_v11  ;;  %v1491_v1 = vadd.f32 %v1483_v31, %v7500_v0  ;;  %v1542_v2 = vmul.f32 %v1528_v52, %v7754_v54 }
 0x25a   :  { %v1617_v4 = vpop.permute.xlu0 %1616  ;;  %v7776_v18 = vsel %vm1151_vm4, %v2430_v38, %v12470_v50  ;;  %v1472_v38 = vsel %vm1019_vm12, %v7561_v26, %v7559_v5  ;;  %v1540_v50 = vmul.f32 %v1527_v32, %v7754_v54  ;;  %v1486_v26 = vmul.f32 %v7552_v17, %v1422_v11 }
 0x25b   :  { %v7765_v49 = vpop.permute.xlu1 %1618  ;;  %v1490_v25 = vadd.f32 %v1482_v8, %v7470_v62  ;;  %v5834_v62 = vld [vmem:[%s12110_s1 + $0x13] ss:$8 sm:$0x3]  ;;  %v1487_v8 = vmul.f32 %v1472_v38, %v1418_v12  ;;  %v1546_v17 = vadd.f32 %v1538_v19, %v1489_v48  ;;  %v1549_v5 = vadd.f32 %v1541_v24, %v1492_v40  ;;  %v7845_v24 = vld [vmem:[#allocation2 + $0x110] sm:$0x1] }
 0x25c   :  { %2284 = vrot.lane.b32.xlu1 %v7602_v55, %s5943_s0  ;;  %v1628_v11 = vsel %vm1019_vm12, %v1613_v9, %v1615_v30  ;;  %v1548_v51 = vadd.f32 %v1540_v50, %v1491_v1  ;;  %v1641_v0 = vmul.f32 %v1615_v30, %v7771_v23  ;;  %v7825_v32 = vrot.slane %v5834_v62, %v6955_v27 }
 0x25d   :  { %2282 = vrot.lane.b32.xlu0 %v7604_v42, %s5943_s0  ;;  %v1547_v10 = vadd.f32 %v1539_v58, %v1490_v25  ;;  %v1494_v31 = vadd.f32 %v1486_v26, %v7519_v6  ;;  %v1493_v33 = vadd.f32 %v1485_v20, %v7526_v45  ;;  %v1496_v38 = vadd.f32 %v1488_v59, %v7535_v41 }
 0x25e   :  { %v1621_v55 = vpop.permute.xlu0 %1620  ;;  %v7831_v36 = vrot.slane %v5834_v62, %v6957_v28  ;;  %v1495_v9 = vadd.f32 %v1487_v8, %v7542_v61  ;;  %v1640_v30 = vmul.f32 %v1628_v11, %v7797_v7  ;;  %v1772_v6 = vrot.slane %v7686_v39, 1 }
 0x25f   :  { %v1623_v42 = vpop.permute.xlu1 %1622  ;;  %v1584_v19 = vadd.f32 %v7617_v53, %v1547_v10  ;;  %v1551_v45 = vadd.f32 %v1543_v46, %v1494_v31  ;;  %v1583_v41 = vadd.f32 %v7620_v22, %v1546_v17  ;;  %v1586_v20 = vadd.f32 %v7627_v37, %v1549_v5  ;;  %v12473_v5 = vld [vmem:[#allocation41_spill] sm:$0xff] }
 0x260   :  { %2288 = vrot.lane.b32.xlu1 %v7637_v56, %s5943_s0  ;;  %v1629_v61 = vsel %vm1019_vm12, %v1617_v4, %v7765_v49  ;;  %v1550_v53 = vadd.f32 %v1542_v2, %v1493_v33  ;;  %v1529_v25 = vsel %vm1077_vm13, %v7667_v44, %v7665_v14  ;;  %v1585_v40 = vadd.f32 %v7677_v3, %v1548_v51 }
 0x261   :  { %2286 = vrot.lane.b32.xlu0 %v7639_v60, %s5943_s0  ;;  %v1649_v48 = vadd.f32 %v1641_v0, %v1584_v19  ;;  %v1643_v22 = vmul.f32 %v7765_v49, %v7771_v23  ;;  %v1630_v37 = vsel %vm1019_vm12, %v1621_v55, %v1623_v42  ;;  %v1648_v52 = vadd.f32 %v1640_v30, %v1583_v41  ;;  %v12472_v49 = vld [vmem:[#allocation30_spill] sm:$0xff]  ;;  %v12474_v30 = vld [vmem:[#allocation9_spill] sm:$0xff] }
 0x262   :  { %v1625_v58 = vpop.permute.xlu0 %1624  ;;  %v1642_v62 = vmul.f32 %v1629_v61, %v7797_v7  ;;  %v2436_v44 = vrot.slane %v7845_v24, 1  ;;  %v1545_v55 = vmul.f32 %v7665_v14, %v7735_v47  ;;  %v1544_v3 = vmul.f32 %v1529_v25, %v7754_v54 }
 0x263   :  { %v7822_v12 = vpop.permute.xlu1 %1626  ;;  %v1588_v8 = vadd.f32 %v12472_v49, %v1551_v45  ;;  %v1645_v17 = vmul.f32 %v1623_v42, %v7771_v23  ;;  %v1587_v46 = vadd.f32 %v12473_v5, %v1550_v53  ;;  %v1644_v11 = vmul.f32 %v1630_v37, %v7797_v7 }
 0x264   :  { %2442 = vrot.lane.b32.xlu1 %v7721_v29, %s5942_s27  ;;  %v1651_v31 = vadd.f32 %v1643_v22, %v1586_v20  ;;  %v1650_v54 = vadd.f32 %v1642_v62, %v1585_v40  ;;  %v1769_v45 = vrot.slane %v12474_v30, 1  ;;  %v1553_v41 = vadd.f32 %v1545_v55, %v1496_v38  ;;  %v12477_v62 = vld [vmem:[#allocation10_spill] sm:$0xff]  ;;  %v12480_v55 = vld [vmem:[#allocation27_spill] sm:$0xff] }
 0x265   :  { %2440 = vrot.lane.b32.xlu0 %v7724_v63, %s5942_s27  ;;  %v1631_v20 = vsel %vm1019_vm12, %v1625_v58, %v7822_v12  ;;  %v12475_v61 = vrot.slane %v7639_v60, 1  ;;  %v1552_v25 = vadd.f32 %v1544_v3, %v1495_v9  ;;  %v1652_v40 = vadd.f32 %v1644_v11, %v1587_v46  ;;  %v12481_v3 = vld [vmem:[#allocation14_spill] sm:$0xff] }
 0x266   :  { %v1670_v26 = vpop.permute.xlu0 %1669  ;;  %v1590_v49 = vadd.f32 %v12481_v3, %v1553_v41 }
 0x267   :  { %v1672_v50 = vpop.permute.xlu1 %1671  ;;  %v7889_v53 = vsel %vm1151_vm4, %v12475_v61, %v2436_v44 }
 0x268   :  { %v1698_v59 = vmul.f32 %v1672_v50, %v7825_v32  ;;  %v1685_v4 = vsel %vm1077_vm13, %v1670_v26, %v1672_v50  ;;  %2446 = vrot.lane.b32.xlu1 %v7745_v35, %s5942_s27 }
 0x269   :  { %v1697_v1 = vmul.f32 %v1685_v4, %v7831_v36  ;;  %2444 = vrot.lane.b32.xlu0 %v7748_v43, %s5942_s27 }
 0x26a   :  { %v1706_v10 = vadd.f32 %v1698_v59, %v1649_v48  ;;  %v1674_v0 = vpop.permute.xlu0 %1673  ;;  %v1653_v48 = vadd.f32 %v1645_v17, %v1588_v8  ;;  %v12476_v59 = vld [vmem:[#allocation38_spill] sm:$0xff] }
 0x26b   :  { %v1705_v51 = vadd.f32 %v1697_v1, %v1648_v52  ;;  %v1676_v2 = vpop.permute.xlu1 %1675  ;;  %v1768_v4 = vrot.slane %v12476_v59, 1  ;;  %v1646_v52 = vmul.f32 %v1631_v20, %v7797_v7  ;;  %v12479_v1 = vld [vmem:[#allocation22_spill] sm:$0xff]  ;;  %v5838_v7 = vld [vmem:[%s12110_s1 + $0x17] ss:$8 sm:$0x3]  ;;  %v12488_v59 = vld [vmem:[#allocation39_spill] sm:$0xff] }
 0x26c   :  { %v1700_v33 = vmul.f32 %v1676_v2, %v7825_v32  ;;  %v1686_v19 = vsel %vm1077_vm13, %v1674_v0, %v1676_v2  ;;  %v7873_v14 = vadd.f32 %v7699_v16, %v1706_v10  ;;  %2450 = vrot.lane.b32.xlu1 %v7757_v21, %s5942_s27  ;;  %v1776_v44 = vrot.slane %v12479_v1, 1  ;;  %v12482_v10 = vld [vmem:[#allocation15_spill] sm:$0xff] }
 0x26d   :  { %v1699_v47 = vmul.f32 %v1686_v19, %v7831_v36  ;;  %2448 = vrot.lane.b32.xlu0 %v7776_v18, %s5942_s27  ;;  %v7881_v42 = vadd.f32 %v7710_v13, %v1705_v51  ;;  %v1647_v13 = vmul.f32 %v7822_v12, %v7771_v23  ;;  %v12478_v23 = vld [vmem:[#allocation6_spill] sm:$0xff]  ;;  %v1589_v17 = vadd.f32 %v12482_v10, %v1552_v25  ;;  %v12483_v25 = vld [vmem:[#allocation32_spill] sm:$0xff] }
 0x26e   :  { %v1708_v16 = vadd.f32 %v1700_v33, %v1651_v31  ;;  %v1678_v22 = vpop.permute.xlu0 %1677  ;;  %v1773_v51 = vsel %vm1151_vm4, %v1771_v57, %v1772_v6  ;;  %v1770_v2 = vsel %vm1151_vm4, %v1768_v4, %v1769_v45  ;;  %v1954_v57 = vrot.slane %v5838_v7, %v6955_v27 }
 0x26f   :  { %v1707_v50 = vadd.f32 %v1699_v47, %v1650_v54  ;;  %v1680_v26 = vpop.permute.xlu1 %1679  ;;  %v1655_v0 = vadd.f32 %v1647_v13, %v1590_v49  ;;  %v1654_v54 = vadd.f32 %v1646_v52, %v1589_v17  ;;  %v1950_v30 = vrot.slane %v5838_v7, %v6957_v28  ;;  %v7968_v52 = vld [vmem:[#allocation2 + $0xc0] sm:$0xfc] }
 0x270   :  { %v1702_v38 = vmul.f32 %v1680_v26, %v7825_v32  ;;  %v1687_v37 = vsel %vm1077_vm13, %v1678_v22, %v1680_v26  ;;  %v7896_v58 = vadd.f32 %v7713_v15, %v1708_v16  ;;  %2454 = vrot.lane.b32.xlu1 %v12477_v62, %s5942_s27  ;;  %v1774_v15 = vrot.slane %v12480_v55, 1  ;;  %v12485_v26 = vld [vmem:[#allocation35_spill] sm:$0xff]  ;;  %12489 = vst [vmem:[#allocation23_spill] sm:$0xff] %v7968_v52 }
 0x271   :  { %v1701_v9 = vmul.f32 %v1687_v37, %v7831_v36  ;;  %2452 = vrot.lane.b32.xlu0 %v7889_v53, %s5942_s27  ;;  %v7906_v12 = vadd.f32 %v12478_v23, %v1707_v50  ;;  %v7949_v39 = vmul.f32 %v1954_v57, %v12485_v26  ;;  %v7959_v37 = vld [vmem:[#allocation2 + $0xc8] sm:$0xfc]  ;;  %v7962_v4 = vmul.f32 %v1954_v57, %v12488_v59 }
 0x272   :  { %v1710_v8 = vadd.f32 %v1702_v38, %v1653_v48  ;;  %v1682_v11 = vpop.permute.xlu0 %1681  ;;  %v1958_v48 = vmul.f32 %v1954_v57, %v12483_v25  ;;  %v5900_v38 = vld [vmem:[#allocation2 + $0x78] sm:$0xff]  ;;  %12487 = vst [vmem:[#allocation11_spill] sm:$0xff] %v7959_v37  ;;  %v2643_v17 = vrot.slane %v7968_v52, 2 }
 0x273   :  { %v1709_v5 = vadd.f32 %v1701_v9, %v1652_v40  ;;  %v1684_v46 = vpop.permute.xlu1 %1683  ;;  %v12484_v40 = vld [vmem:[#allocation33_spill] sm:$0xff]  ;;  %v5901_v9 = vld [vmem:[#allocation2 + $0x70] sm:$0xff]  ;;  %v1989_v55 = vrot.slane %v7949_v39, 2 }
 0x274   :  { %v1704_v31 = vmul.f32 %v1684_v46, %v7825_v32  ;;  %v1688_v33 = vsel %vm1077_vm13, %v1682_v11, %v1684_v46  ;;  %v7923_v19 = vadd.f32 %v1773_v51, %v1710_v8  ;;  %2499 = vrot.lane.b32.xlu1 %v7721_v29, %s5943_s0  ;;  %v1775_v29 = vsel %vm1151_vm4, %v1769_v45, %v1774_v15  ;;  %v7983_v11 = vld [vmem:[#allocation2 + $0xe8] sm:$0x3]  ;;  %v7985_v51 = vld [vmem:[#allocation2 + $0xe0] sm:$0x3]  ;;  %v12496_v25 = vld [vmem:[#allocation17_spill] sm:$0xff] }
 0x275   :  { %v1703_v47 = vmul.f32 %v1688_v33, %v7831_v36  ;;  %2497 = vrot.lane.b32.xlu0 %v7724_v63, %s5943_s0  ;;  %v7930_v34 = vadd.f32 %v1770_v2, %v1709_v5  ;;  %v1777_v36 = vsel %vm1151_vm4, %v1772_v6, %v1776_v44  ;;  %v1957_v50 = vmul.f32 %v1950_v30, %v12484_v40  ;;  %v12486_v6 = vld [vmem:[#allocation36_spill] sm:$0xff]  ;;  %v8057_v2 = vld [vmem:[#allocation2 + $0x118] sm:$0x3] }
 0x276   :  { %v1712_v32 = vadd.f32 %v1704_v31, %v1655_v0  ;;  %v1836_v16 = vpop.permute.xlu0 %1835  ;;  %v7952_v22 = vmul.f32 %v1950_v30, %v12486_v6  ;;  %v7970_v23 = vmul.f32 %v5901_v9, %v1950_v30  ;;  %v1984_v1 = vrot.slane %v1958_v48, 2  ;;  %v12491_v5 = vld [vmem:[#allocation20_spill] sm:$0xff]  ;;  %12492 = vst [vmem:[#allocation24_spill] sm:$0xff] %v7983_v11  ;;  %12493 = vst [vmem:[#allocation25_spill] sm:$0xff] %v7985_v51  ;;  %v8016_v6 = vld [vmem:[#allocation2 + $0xf8] sm:$0xfc] }
 0x277   :  { %v1711_v41 = vadd.f32 %v1703_v47, %v1654_v54  ;;  %v1838_v20 = vpop.permute.xlu1 %1837  ;;  %v1981_v44 = vrot.slane %v1957_v50, 2  ;;  %v2646_v8 = vrot.slane %v7959_v37, 2  ;;  %v2644_v46 = vrot.slane %v12491_v5, 2  ;;  %v5837_v31 = vld [vmem:[%s12110_s1 + $0x16] ss:$8 sm:$0x3] }
 0x278   :  { %v7937_v61 = vadd.f32 %v1777_v36, %v1712_v32  ;;  %2503 = vrot.lane.b32.xlu1 %v7745_v35, %s5943_s0  ;;  %v1960_v35 = vmul.f32 %v5900_v38, %v1954_v57  ;;  %v12175_v33 = vrot.slane %v7970_v23, 2  ;;  %v5902_v54 = vld [vmem:[#allocation2 + $0xa8] sm:$0xff]  ;;  %v12494_v32 = vld [vmem:[#allocation42_spill] sm:$0xff]  ;;  %v12495_v36 = vld [vmem:[#allocation40_spill] sm:$0xff]  ;;  %v2651_v26 = vrot.slane %v7983_v11, 2  ;;  %12497 = vst [vmem:[#allocation26_spill] sm:$0xff] %v8016_v6 }
 0x279   :  { %2501 = vrot.lane.b32.xlu0 %v7748_v43, %s5943_s0  ;;  %v7944_v63 = vadd.f32 %v1775_v29, %v1711_v41  ;;  %v5836_v43 = vld [vmem:[%s12110_s1 + $0x15] ss:$8 sm:$0x3]  ;;  %v7999_v47 = vmul.f32 %v5902_v54, %v1954_v57  ;;  %v8002_v41 = vmul.f32 %v1950_v30, %v12494_v32  ;;  %v8005_v29 = vmul.f32 %v1954_v57, %v12495_v36  ;;  %v5903_v38 = vld [vmem:[#allocation2 + $0xa0] sm:$0xff] }
 0x27a   :  { %v1840_v45 = vpop.permute.xlu0 %1839  ;;  %v7975_v3 = vrot.slane %v5836_v43, %v6955_v27  ;;  %v1985_v10 = vrot.slane %v1960_v35, 2  ;;  %v7989_v0 = vrot.slane %v5836_v43, %v6957_v28  ;;  %v2649_v39 = vrot.slane %v7985_v51, 2  ;;  %v8046_v32 = vld [vmem:[#allocation2 + $0xf0] sm:$0xfc]  ;;  %12499 = vst [vmem:[#allocation30_spill] sm:$0xff] %v8057_v2 }
 0x27b   :  { %v7954_v13 = vpop.permute.xlu1 %1841  ;;  %v8018_v35 = vmul.f32 %v5903_v38, %v1950_v30  ;;  %v8024_v43 = vsel %vm1375_vm6, %v2643_v17, %v2644_v46  ;;  %v1983_v9 = vsel %vm1375_vm6, %v1981_v44, %v12175_v33  ;;  %v2656_v17 = vrot.slane %v8016_v6, 2  ;;  %12498 = vst [vmem:[#allocation12_spill] sm:$0xff] %v8046_v32  ;;  %v8265_v6 = vld [vmem:[#allocation2 + $0x120] sm:$0xfe]  ;;  %v12526_v11 = vld [vmem:[#allocation8_spill] sm:$0xff] }
 0x27c   :  { %2507 = vrot.lane.b32.xlu1 %v7757_v21, %s5943_s0  ;;  %v1864_v48 = vmul.f32 %v1838_v20, %v7975_v3  ;;  %v2657_v54 = vrot.slane %v7637_v56, 2  ;;  %v1990_v36 = vsel %vm1375_vm6, %v1985_v10, %v1989_v55  ;;  %v8054_v44 = vsel %vm1375_vm6, %v2644_v46, %v2649_v39  ;;  %12525 = vst [vmem:[#allocation36_spill] sm:$0xff] %v8265_v6 }
 0x27d   :  { %2505 = vrot.lane.b32.xlu0 %v7776_v18, %s5943_s0  ;;  %v12490_v18 = vld [vmem:[#allocation29_spill] sm:$0xff]  ;;  %v1866_v33 = vmul.f32 %v7954_v13, %v7975_v3  ;;  %v2661_v39 = vrot.slane %v8057_v2, 2 }
 0x27e   :  { %v1844_v21 = vpop.permute.xlu0 %1843  ;;  %v2647_v7 = vrot.slane %v12490_v18, 2 }
 0x27f   :  { %v7977_v49 = vpop.permute.xlu1 %1845 }
 0x280   :  { %2511 = vrot.lane.b32.xlu1 %v12477_v62, %s5943_s0  ;;  %v8008_v62 = vmul.f32 %v1950_v30, %v12496_v25  ;;  %v8021_v57 = vsel %vm1375_vm6, %v2646_v8, %v2647_v7  ;;  %v8036_v30 = vrot.slane %v5837_v31, %v6957_v28  ;;  %v8051_v38 = vsel %vm1375_vm6, %v2647_v7, %v2651_v26  ;;  %v8059_v8 = vld [vmem:[#allocation2 + $0x110] sm:$0x3] }
 0x281   :  { %2509 = vrot.lane.b32.xlu0 %v7889_v53, %s5943_s0  ;;  %v1851_v53 = vsel %vm1019_vm12, %v1836_v16, %v1838_v20  ;;  %v8027_v20 = vrot.slane %v5837_v31, %v6955_v27  ;;  %v1986_v16 = vsel %vm1375_vm6, %v1984_v1, %v1985_v10  ;;  %v1852_v1 = vsel %vm1019_vm12, %v1840_v45, %v7954_v13 }
 0x282   :  { %v1848_v50 = vpop.permute.xlu0 %1847  ;;  %v1863_v59 = vmul.f32 %v1851_v53, %v7989_v0  ;;  %v1872_v31 = vadd.f32 %v1864_v48, %v7873_v14  ;;  %v2654_v45 = vrot.slane %v7639_v60, 2  ;;  %12500 = vst [vmem:[#allocation41_spill] sm:$0xff] %v8059_v8  ;;  %v1853_v14 = vsel %vm1019_vm12, %v1844_v21, %v7977_v49 }
 0x283   :  { %v8012_v40 = vpop.permute.xlu1 %1849  ;;  %v1865_v46 = vmul.f32 %v1852_v1, %v7989_v0  ;;  %v2653_v13 = vrot.slane %v8046_v32, 2  ;;  %v8076_v21 = vsel %vm1375_vm6, %v2656_v17, %v2657_v54  ;;  %v1867_v1 = vmul.f32 %v1853_v14, %v7989_v0 }
 0x284   :  { %2665 = vrot.lane.b32.xlu1 %v8021_v57, %s5942_s27  ;;  %v1871_v10 = vadd.f32 %v1863_v59, %v7881_v42  ;;  %v2659_v42 = vrot.slane %v8059_v8, 2  ;;  %v1868_v59 = vmul.f32 %v7977_v49, %v7975_v3  ;;  %v1874_v32 = vadd.f32 %v1866_v33, %v7896_v58 }
 0x285   :  { %2663 = vrot.lane.b32.xlu0 %v8024_v43, %s5942_s27  ;;  %v2655_v15 = vsel %vm1375_vm6, %v2653_v13, %v2654_v45  ;;  %v1873_v8 = vadd.f32 %v1865_v46, %v7906_v12  ;;  %v1992_v14 = vrot.slane %v8018_v35, 2  ;;  %v1854_v58 = vsel %vm1019_vm12, %v1848_v50, %v8012_v40 }
 0x286   :  { %v1893_v53 = vpop.permute.xlu0 %1892  ;;  %v12502_v12 = vrot.slane %v7970_v23, 2  ;;  %v1875_v13 = vadd.f32 %v1867_v1, %v7930_v34  ;;  %v2660_v35 = vsel %vm1375_vm6, %v2654_v45, %v2659_v42  ;;  %v1870_v50 = vmul.f32 %v8012_v40, %v7975_v3 }
 0x287   :  { %v1895_v25 = vpop.permute.xlu1 %1894  ;;  %v1991_v23 = vrot.slane %v8002_v41, 2  ;;  %v1999_v3 = vrot.slane %v8005_v29, 2  ;;  %v12503_v41 = vrot.slane %v7999_v47, 2 }
 0x288   :  { %v1921_v55 = vmul.f32 %v1895_v25, %v8027_v20  ;;  %v1908_v7 = vsel %vm1077_vm13, %v1893_v53, %v1895_v25  ;;  %2669 = vrot.lane.b32.xlu1 %v8051_v38, %s5942_s27  ;;  %v1878_v1 = vadd.f32 %v1870_v50, %v7937_v61 }
 0x289   :  { %v1920_v48 = vmul.f32 %v1908_v7, %v8036_v30  ;;  %2667 = vrot.lane.b32.xlu0 %v8054_v44, %s5942_s27 }
 0x28a   :  { %v1929_v26 = vadd.f32 %v1921_v55, %v1872_v31  ;;  %v1897_v7 = vpop.permute.xlu0 %1896 }
 0x28b   :  { %v1928_v25 = vadd.f32 %v1920_v48, %v1871_v10  ;;  %v1899_v53 = vpop.permute.xlu1 %1898  ;;  %v12501_v10 = vrot.slane %v7952_v22, 2  ;;  %v1876_v48 = vadd.f32 %v1868_v59, %v7923_v19  ;;  %v1869_v19 = vmul.f32 %v1854_v58, %v7989_v0 }
 0x28c   :  { %v1923_v31 = vmul.f32 %v1899_v53, %v8027_v20  ;;  %v1909_v17 = vsel %vm1077_vm13, %v1897_v7, %v1899_v53  ;;  %v8087_v55 = vadd.f32 %v1986_v16, %v1929_v26  ;;  %2673 = vrot.lane.b32.xlu1 %v8076_v21, %s5942_s27  ;;  %v2662_v16 = vsel %vm1375_vm6, %v2657_v54, %v2661_v39 }
 0x28d   :  { %v1922_v2 = vmul.f32 %v1909_v17, %v8036_v30  ;;  %2671 = vrot.lane.b32.xlu0 %v2655_v15, %s5942_s27  ;;  %v8094_v49 = vadd.f32 %v1983_v9, %v1928_v25  ;;  %v1988_v46 = vsel %vm1375_vm6, %v12502_v12, %v12501_v10  ;;  %v12504_v0 = vrot.slane %v7962_v4, 2 }
 0x28e   :  { %v1931_v33 = vadd.f32 %v1923_v31, %v1874_v32  ;;  %v1901_v25 = vpop.permute.xlu0 %1900  ;;  %v1993_v59 = vsel %vm1375_vm6, %v1991_v23, %v1992_v14 }
 0x28f   :  { %v1930_v9 = vadd.f32 %v1922_v2, %v1873_v8  ;;  %v1903_v26 = vpop.permute.xlu1 %1902  ;;  %v1997_v8 = vrot.slane %v8008_v62, 2  ;;  %v1996_v42 = vsel %vm1375_vm6, %v12504_v0, %v12503_v41  ;;  %v1877_v62 = vadd.f32 %v1869_v19, %v7944_v63  ;;  %v12510_v19 = vld [vmem:[#allocation34_spill] sm:$0xff] }
 0x290   :  { %v1925_v54 = vmul.f32 %v1903_v26, %v8027_v20  ;;  %v1910_v22 = vsel %vm1077_vm13, %v1901_v25, %v1903_v26  ;;  %v8112_v32 = vadd.f32 %v1990_v36, %v1931_v33  ;;  %2677 = vrot.lane.b32.xlu1 %v2662_v16, %s5942_s27  ;;  %v12505_v33 = vmov %v12503_v41  ;;  %v8194_v26 = vld [vmem:[#allocation2 + $0x138] sm:$0xff]  ;;  %v8196_v25 = vld [vmem:[#allocation2 + $0x130] sm:$0xff] }
 0x291   :  { %v1924_v34 = vmul.f32 %v1910_v22, %v8036_v30  ;;  %2675 = vrot.lane.b32.xlu0 %v2660_v35, %s5942_s27  ;;  %v8119_v2 = vadd.f32 %v1988_v46, %v1930_v9  ;;  %v2000_v63 = vsel %vm1375_vm6, %v12505_v33, %v1999_v3  ;;  %v8175_v46 = vld [vmem:[#allocation2 + $0x128] sm:$0xff]  ;;  %12508 = vst [vmem:[#allocation10_spill] sm:$0xff] %v8194_v26  ;;  %12509 = vst [vmem:[#allocation6_spill] sm:$0xff] %v8196_v25  ;;  %v8215_v3 = vld [vmem:[%s12110_s1 + $0x30] ss:$8 sm:$0x3] }
 0x292   :  { %v1933_v40 = vadd.f32 %v1925_v54, %v1876_v48  ;;  %v1905_v39 = vpop.permute.xlu0 %1904  ;;  %12506 = vst [vmem:[#allocation9_spill] sm:$0xff] %v8175_v46  ;;  %v8177_v48 = vld [vmem:[#allocation2 + $0x120] sm:$0xff]  ;;  %12511 = vst [vmem:[#allocation22_spill] sm:$0xff] %v8215_v3 }
 0x293   :  { %v1932_v45 = vadd.f32 %v1924_v34, %v1875_v13  ;;  %v1907_v36 = vpop.permute.xlu1 %1906  ;;  %12507 = vst [vmem:[#allocation38_spill] sm:$0xff] %v8177_v48  ;;  %v5841_v13 = vld [vmem:[%s12110_s1 + $0x22] ss:$8 sm:$0x3] }
 0x294   :  { %v1927_v53 = vmul.f32 %v1907_v36, %v8027_v20  ;;  %v1911_v29 = vsel %vm1077_vm13, %v1905_v39, %v1907_v36  ;;  %v8132_v7 = vadd.f32 %v1996_v42, %v1933_v40  ;;  %2722 = vrot.lane.b32.xlu1 %v8021_v57, %s5943_s0  ;;  %v2177_v50 = vrot.slane %v5841_v13, %v6955_v27  ;;  %v8217_v40 = vld [vmem:[#allocation2 + $0x158] sm:$0xff]  ;;  %v12515_v39 = vld [vmem:[#allocation28_spill] sm:$0xff] }
 0x295   :  { %v1926_v31 = vmul.f32 %v1911_v29, %v8036_v30  ;;  %2720 = vrot.lane.b32.xlu0 %v8024_v43, %s5943_s0  ;;  %v8140_v4 = vadd.f32 %v1993_v59, %v1932_v45  ;;  %v1998_v30 = vsel %vm1375_vm6, %v1992_v14, %v1997_v8  ;;  %v2173_v54 = vrot.slane %v5841_v13, %v6957_v28  ;;  %v8219_v8 = vld [vmem:[#allocation2 + $0x150] sm:$0xff]  ;;  %v12514_v45 = vld [vmem:[#allocation31_spill] sm:$0xff]  ;;  %v12516_v42 = vld [vmem:[#allocation13_spill] sm:$0xff] }
 0x296   :  { %v1935_v17 = vadd.f32 %v1927_v53, %v1878_v1  ;;  %v8144_v20 = vpop.permute.xlu0 %2058  ;;  %12512 = vst [vmem:[#allocation27_spill] sm:$0xff] %v8217_v40  ;;  %12513 = vst [vmem:[#allocation14_spill] sm:$0xff] %v8219_v8  ;;  %v12517_v53 = vld [vmem:[#allocation18_spill] sm:$0xff] }
 0x297   :  { %v1934_v61 = vadd.f32 %v1926_v31, %v1877_v62  ;;  %v8142_v58 = vpop.permute.xlu1 %2060  ;;  %v8234_v29 = vmul.f32 %v2177_v50, %v12517_v53  ;;  %v12518_v62 = vld [vmem:[#allocation19_spill] sm:$0xff]  ;;  %v8260_v53 = vld [vmem:[#allocation2 + $0x160] sm:$0xff] }
 0x298   :  { %v8149_v10 = vadd.f32 %v2000_v63, %v1935_v17  ;;  %2726 = vrot.lane.b32.xlu1 %v8051_v38, %s5943_s0  ;;  %v8237_v31 = vmul.f32 %v2173_v54, %v12518_v62  ;;  %v8241_v17 = vrot.slane %v8215_v3, %v6955_v27  ;;  %v8248_v63 = vmul.f32 %v2177_v50, %v12490_v18 }
 0x299   :  { %2724 = vrot.lane.b32.xlu0 %v8054_v44, %s5943_s0  ;;  %v8156_v57 = vadd.f32 %v1998_v30, %v1934_v61  ;;  %v8250_v30 = vld [vmem:[#allocation2 + $0x128] sm:$0xfe]  ;;  %v8263_v62 = vmul.f32 %v2173_v54, %v12491_v5 }
 0x29a   :  { %v8160_v12 = vpop.permute.xlu0 %2062  ;;  %12519 = vst [vmem:[#allocation15_spill] sm:$0xff] %v8241_v17  ;;  %12520 = vst [vmem:[#allocation32_spill] sm:$0xff] %v8250_v30 }
 0x29b   :  { %v8158_v43 = vpop.permute.xlu1 %2064 }
 0x29c   :  { %2730 = vrot.lane.b32.xlu1 %v8076_v21, %s5943_s0 }
 0x29d   :  { %2728 = vrot.lane.b32.xlu0 %v2655_v15, %s5943_s0  ;;  %v5844_v15 = vld [vmem:[%s12110_s1 + $0x25] ss:$8 sm:$0x3] }
 0x29e   :  { %v8167_v14 = vpop.permute.xlu0 %2066  ;;  %v2336_v9 = vrot.slane %v5844_v15, %v6955_v27 }
 0x29f   :  { %v8165_v47 = vpop.permute.xlu1 %2068 }
 0x2a0   :  { %2734 = vrot.lane.b32.xlu1 %v2662_v16, %s5943_s0  ;;  %v2340_v34 = vmul.f32 %v2336_v9, %v12510_v19  ;;  %v2344_v41 = vmul.f32 %v2336_v9, %v12515_v39  ;;  %v2342_v0 = vmul.f32 %v2336_v9, %v12490_v18  ;;  %v12523_v19 = vld [vmem:[#allocation37_spill] sm:$0xff]  ;;  %v8268_v52 = vmul.f32 %v2336_v9, %v12526_v11 }
 0x2a1   :  { %2732 = vrot.lane.b32.xlu0 %v2660_v35, %s5943_s0  ;;  %v8199_v35 = vrot.slane %v5844_v15, %v6957_v28  ;;  %v12521_v15 = vld [vmem:[#allocation21_spill] sm:$0xff] }
 0x2a2   :  { %v8173_v44 = vpop.permute.xlu0 %2070  ;;  %v8253_v13 = vmul.f32 %v2177_v50, %v12521_v15  ;;  %v2366_v39 = vrot.slane %v2340_v34, 1  ;;  %v2371_v51 = vrot.slane %v2344_v41, 1  ;;  %v2367_v34 = vrot.slane %v2342_v0, 1  ;;  %v8283_v41 = vld [vmem:[#allocation2 + $0x140] sm:$0x1] }
 0x2a3   :  { %v8171_v38 = vpop.permute.xlu1 %2072  ;;  %v2339_v36 = vmul.f32 %v8199_v35, %v12514_v45  ;;  %v2343_v59 = vmul.f32 %v8199_v35, %v12516_v42  ;;  %v2341_v1 = vmul.f32 %v8199_v35, %v12491_v5  ;;  %v8256_v45 = vmul.f32 %v2173_v54, %v12523_v19  ;;  %v8258_v42 = vld [vmem:[#allocation2 + $0x168] sm:$0xff]  ;;  %v12529_v5 = vld [vmem:[#allocation16_spill] sm:$0xff]  ;;  %12532 = vst [vmem:[#allocation42_spill] sm:$0xff] %v8283_v41 }
 0x2a4   :  { %2824 = vrot.lane.b32.xlu1 %v8175_v46, %s5942_s27  ;;  %12522 = vst [vmem:[#allocation33_spill] sm:$0xff] %v8253_v13  ;;  %v12527_v19 = vld [vmem:[#allocation7_spill] sm:$0xff]  ;;  %v8279_v37 = vmul.f32 %v2336_v9, %v12529_v5  ;;  %v3028_v13 = vrot.slane %v8250_v30, 1  ;;  %v3029_v0 = vrot.slane %v8194_v26, 1  ;;  %v8295_v5 = vmul.f32 %v8199_v35, %v7845_v24 }
 0x2a5   :  { %2822 = vrot.lane.b32.xlu0 %v8177_v48, %s5942_s27  ;;  %12524 = vst [vmem:[#allocation35_spill] sm:$0xff] %v8256_v45  ;;  %v2363_v18 = vrot.slane %v2339_v36, 1  ;;  %v2369_v15 = vrot.slane %v2343_v59, 1  ;;  %v8276_v17 = vmul.f32 %v8199_v35, %v12527_v19  ;;  %v8281_v36 = vld [vmem:[#allocation2 + $0x148] sm:$0x1]  ;;  %v2364_v11 = vrot.slane %v2341_v1, 1 }
 0x2a6   :  { %12530 = vst [vmem:[#allocation29_spill] sm:$0xff] %v8279_v37  ;;  %12531 = vst [vmem:[#allocation20_spill] sm:$0xff] %v8281_v36  ;;  %v3025_v59 = vrot.slane %v8265_v6, 1  ;;  %v3026_v19 = vrot.slane %v8196_v25, 1  ;;  %v8301_v37 = vmul.f32 %v2177_v50, %v7637_v56  ;;  %v8307_v30 = vmul.f32 %v2336_v9, %v7637_v56  ;;  %v8317_v50 = vld [vmem:[#allocation2 + $0x178] sm:$0x1] }
 0x2a7   :  { %v8186_v21 = vpop.permute.xlu1 %2117  ;;  %v8188_v16 = vpop.permute.xlu0 %2115  ;;  %12528 = vst [vmem:[#allocation39_spill] sm:$0xff] %v8276_v17  ;;  %12533 = vst [vmem:[#allocation40_spill] sm:$0xff] %v8295_v5  ;;  %v5839_v1 = vld [vmem:[%s12110_s1 + $0x20] ss:$8 sm:$0x3]  ;;  %v8304_v17 = vmul.f32 %v2173_v54, %v7639_v60  ;;  %v3033_v24 = vrot.slane %v8281_v36, 1  ;;  %v8320_v54 = vsel %vm1151_vm4, %v2366_v39, %v2367_v34  ;;  %v8324_v56 = vmul.f32 %v8199_v35, %v7639_v60 }
 0x2a8   :  { %2828 = vrot.lane.b32.xlu1 %v8194_v26, %s5942_s27  ;;  %12534 = vst [vmem:[#allocation17_spill] sm:$0xff] %v8301_v37  ;;  %v3031_v6 = vrot.slane %v8283_v41, 1  ;;  %v8315_v5 = vld [vmem:[#allocation2 + $0x158] sm:$0xfe]  ;;  %12537 = vst [vmem:[#allocation28_spill] sm:$0xff] %v8317_v50  ;;  %v8334_v41 = vsel %vm1151_vm4, %v2367_v34, %v2371_v51  ;;  %v8337_v36 = vsel %vm1151_vm4, %v2364_v11, %v2369_v15 }
 0x2a9   :  { %2826 = vrot.lane.b32.xlu0 %v8196_v25, %s5942_s27  ;;  %12535 = vst [vmem:[#allocation34_spill] sm:$0xff] %v8304_v17  ;;  %12536 = vst [vmem:[#allocation31_spill] sm:$0xff] %v8315_v5  ;;  %v5840_v9 = vld [vmem:[%s12110_s1 + $0x21] ss:$8 sm:$0x3]  ;;  %v2027_v39 = vrot.slane %v5839_v1, %v6955_v27  ;;  %v2023_v60 = vrot.slane %v5839_v1, %v6957_v28  ;;  %v8342_v37 = vsel %vm1151_vm4, %v3028_v13, %v3029_v0 }
 0x2aa   :  { %12538 = vst [vmem:[#allocation13_spill] sm:$0xff] %v8324_v56  ;;  %12539 = vst [vmem:[#allocation18_spill] sm:$0xff] %v8337_v36  ;;  %v8345_v56 = vsel %vm1151_vm4, %v3025_v59, %v3026_v19  ;;  %v2074_v51 = vsel %vm1019_vm12, %v8144_v20, %v8142_v58  ;;  %v3038_v34 = vrot.slane %v8315_v5, 1  ;;  %v8356_v1 = vrot.slane %v5840_v9, %v6955_v27  ;;  %v5842_v13 = vld [vmem:[%s12110_s1 + $0x23] ss:$8 sm:$0x3] }
 0x2ab   :  { %v8207_v22 = vpop.permute.xlu1 %2121  ;;  %v8209_v23 = vpop.permute.xlu0 %2119  ;;  %v8366_v20 = vsel %vm1151_vm4, %v3029_v0, %v3033_v24  ;;  %v8369_v59 = vsel %vm1151_vm4, %v3026_v19, %v3031_v6  ;;  %v2075_v15 = vsel %vm1019_vm12, %v8160_v12, %v8158_v43  ;;  %v2086_v36 = vmul.f32 %v2074_v51, %v2023_v60 }
 0x2ac   :  { %2832 = vrot.lane.b32.xlu1 %v8217_v40, %s5942_s27  ;;  %v2089_v0 = vmul.f32 %v8158_v43, %v2027_v39  ;;  %v2131_v6 = vsel %vm1077_vm13, %v8188_v16, %v8186_v21  ;;  %v2132_v24 = vsel %vm1077_vm13, %v8209_v23, %v8207_v22  ;;  %v2088_v51 = vmul.f32 %v2075_v15, %v2023_v60 }
 0x2ad   :  { %2830 = vrot.lane.b32.xlu0 %v8219_v8, %s5942_s27  ;;  %v2076_v16 = vsel %vm1019_vm12, %v8167_v14, %v8165_v47  ;;  %v2146_v23 = vmul.f32 %v8207_v22, %v8356_v1  ;;  %v8418_v14 = vrot.slane %v5842_v13, %v6957_v28  ;;  %v2094_v15 = vadd.f32 %v2086_v36, %v8094_v49 }
 0x2ae   :  { %v2376_v49 = vrot.slane %v8268_v52, 1 }
 0x2af   :  { %v8243_v61 = vpop.permute.xlu1 %2125  ;;  %v8245_v33 = vpop.permute.xlu0 %2123 }
 0x2b0   :  { %2836 = vrot.lane.b32.xlu1 %v8258_v42, %s5942_s27  ;;  %v2133_v22 = vsel %vm1077_vm13, %v8245_v33, %v8243_v61  ;;  %v2148_v33 = vmul.f32 %v8243_v61, %v8356_v1 }
 0x2b1   :  { %2834 = vrot.lane.b32.xlu0 %v8260_v53, %s5942_s27 }
 0x2b3   :  { %v8285_v3 = vpop.permute.xlu1 %2129  ;;  %v8287_v45 = vpop.permute.xlu0 %2127 }
 0x2b4   :  { %2881 = vrot.lane.b32.xlu1 %v8175_v46, %s5943_s0  ;;  %v8331_v46 = vsel %vm1151_vm4, %v2363_v18, %v2364_v11  ;;  %v8347_v18 = vld [vmem:[#allocation2 + $0x150] sm:$0xfe]  ;;  %v3043_v11 = vrot.slane %v8317_v50, 1  ;;  %v8375_v50 = vrot.slane %v5840_v9, %v6957_v28  ;;  %v8392_v9 = vrot.slane %v5842_v13, %v6955_v27 }
 0x2b5   :  { %2879 = vrot.lane.b32.xlu0 %v8177_v48, %s5943_s0  ;;  %v3039_v48 = vrot.slane %v8258_v42, 1  ;;  %12540 = vst [vmem:[#allocation19_spill] sm:$0xff] %v8347_v18 }
 0x2b7   :  { %v2220_v35 = vpop.permute.xlu1 %2219  ;;  %v2218_v17 = vpop.permute.xlu0 %2217  ;;  %v8378_v5 = vsel %vm1151_vm4, %v3038_v34, %v3039_v48  ;;  %v12541_v34 = vrot.slane %v8260_v53, 1  ;;  %v8400_v43 = vsel %vm1151_vm4, %v3039_v48, %v3043_v11  ;;  %v2143_v48 = vmul.f32 %v2131_v6, %v8375_v50 }
 0x2b8   :  { %2885 = vrot.lane.b32.xlu1 %v8194_v26, %s5943_s0  ;;  %v3035_v26 = vrot.slane %v8347_v18, 1  ;;  %12542 = vst [vmem:[#allocation21_spill] sm:$0xff] %v8400_v43  ;;  %v2144_v18 = vmul.f32 %v8186_v21, %v8356_v1  ;;  %v2097_v11 = vadd.f32 %v2089_v0, %v8112_v32  ;;  %v2090_v43 = vmul.f32 %v2076_v16, %v2023_v60 }
 0x2b9   :  { %2883 = vrot.lane.b32.xlu0 %v8196_v25, %s5943_s0  ;;  %v2087_v25 = vmul.f32 %v8142_v58, %v2027_v39  ;;  %v2093_v6 = vmul.f32 %v8171_v38, %v2027_v39  ;;  %v2096_v32 = vadd.f32 %v2088_v51, %v8119_v2  ;;  %v2147_v0 = vmul.f32 %v2133_v22, %v8375_v50 }
 0x2ba   :  { %v8397_v58 = vsel %vm1151_vm4, %v3035_v26, %v12541_v34  ;;  %v2077_v26 = vsel %vm1019_vm12, %v8173_v44, %v8171_v38  ;;  %v2145_v34 = vmul.f32 %v2132_v24, %v8375_v50  ;;  %v2091_v44 = vmul.f32 %v8165_v47, %v2027_v39 }
 0x2bb   :  { %v8386_v19 = vpop.permute.xlu1 %2223  ;;  %v2222_v12 = vpop.permute.xlu0 %2221  ;;  %v2095_v21 = vadd.f32 %v2087_v25, %v8087_v55  ;;  %v5843_v55 = vld [vmem:[%s12110_s1 + $0x24] ss:$8 sm:$0x3]  ;;  %v2092_v25 = vmul.f32 %v2077_v26, %v2023_v60  ;;  %v2151_v47 = vadd.f32 %v2143_v48, %v2094_v15  ;;  %v2154_v38 = vadd.f32 %v2146_v23, %v2097_v11  ;;  %v8466_v23 = vld [vmem:[#allocation2 + $0x170] sm:$0x1] }
 0x2bc   :  { %2889 = vrot.lane.b32.xlu1 %v8217_v40, %s5943_s0  ;;  %v2233_v39 = vsel %vm1019_vm12, %v2218_v17, %v2220_v35  ;;  %v2153_v13 = vadd.f32 %v2145_v34, %v2096_v32  ;;  %v2246_v2 = vmul.f32 %v2220_v35, %v8392_v9  ;;  %v8446_v24 = vrot.slane %v5843_v55, %v6955_v27 }
 0x2bd   :  { %2887 = vrot.lane.b32.xlu0 %v8219_v8, %s5943_s0  ;;  %v2152_v36 = vadd.f32 %v2144_v18, %v2095_v21  ;;  %v2099_v51 = vadd.f32 %v2091_v44, %v8132_v7  ;;  %v2098_v16 = vadd.f32 %v2090_v43, %v8140_v4  ;;  %v2101_v26 = vadd.f32 %v2093_v6, %v8149_v10 }
 0x2be   :  { %v8452_v61 = vrot.slane %v5843_v55, %v6957_v28  ;;  %v2100_v17 = vadd.f32 %v2092_v25, %v8156_v57  ;;  %v2245_v35 = vmul.f32 %v2233_v39, %v8418_v14  ;;  %v2377_v7 = vrot.slane %v8307_v30, 1 }
 0x2bf   :  { %v2228_v8 = vpop.permute.xlu1 %2227  ;;  %v2226_v40 = vpop.permute.xlu0 %2225  ;;  %v2189_v48 = vadd.f32 %v8234_v29, %v2152_v36  ;;  %v2156_v4 = vadd.f32 %v2148_v33, %v2099_v51  ;;  %v2188_v10 = vadd.f32 %v8237_v31, %v2151_v47  ;;  %v2191_v43 = vadd.f32 %v8248_v63, %v2154_v38  ;;  %v12544_v38 = vld [vmem:[#allocation35_spill] sm:$0xff] }
 0x2c0   :  { %2893 = vrot.lane.b32.xlu1 %v8258_v42, %s5943_s0  ;;  %v2234_v57 = vsel %vm1019_vm12, %v2222_v12, %v8386_v19  ;;  %v2155_v29 = vadd.f32 %v2147_v0, %v2098_v16  ;;  %v2134_v21 = vsel %vm1077_vm13, %v8287_v45, %v8285_v3  ;;  %v2190_v11 = vadd.f32 %v8263_v62, %v2153_v13 }
 0x2c1   :  { %2891 = vrot.lane.b32.xlu0 %v8260_v53, %s5943_s0  ;;  %v2254_v15 = vadd.f32 %v2246_v2, %v2189_v48  ;;  %v2248_v31 = vmul.f32 %v8386_v19, %v8392_v9  ;;  %v2235_v63 = vsel %vm1019_vm12, %v2226_v40, %v2228_v8  ;;  %v2253_v22 = vadd.f32 %v2245_v35, %v2188_v10  ;;  %v12543_v19 = vld [vmem:[#allocation33_spill] sm:$0xff] }
 0x2c2   :  { %v2247_v55 = vmul.f32 %v2234_v57, %v8418_v14  ;;  %v3041_v45 = vrot.slane %v8466_v23, 1  ;;  %v2150_v40 = vmul.f32 %v8285_v3, %v8356_v1  ;;  %v2149_v62 = vmul.f32 %v2134_v21, %v8375_v50  ;;  %v12545_v35 = vld [vmem:[#allocation13_spill] sm:$0xff] }
 0x2c3   :  { %v8443_v60 = vpop.permute.xlu1 %2231  ;;  %v2230_v18 = vpop.permute.xlu0 %2229  ;;  %v2193_v25 = vadd.f32 %v12543_v19, %v2156_v4  ;;  %v2250_v47 = vmul.f32 %v2228_v8, %v8392_v9  ;;  %v2192_v33 = vadd.f32 %v12544_v38, %v2155_v29  ;;  %v2249_v39 = vmul.f32 %v2235_v63, %v8418_v14 }
 0x2c4   :  { %3047 = vrot.lane.b32.xlu1 %v8342_v37, %s5942_s27  ;;  %v2256_v51 = vadd.f32 %v2248_v31, %v2191_v43  ;;  %v2255_v50 = vadd.f32 %v2247_v55, %v2190_v11  ;;  %v2374_v4 = vrot.slane %v12545_v35, 1  ;;  %v2158_v10 = vadd.f32 %v2150_v40, %v2101_v26  ;;  %v12548_v55 = vld [vmem:[#allocation21_spill] sm:$0xff]  ;;  %v12551_v40 = vld [vmem:[#allocation40_spill] sm:$0xff] }
 0x2c5   :  { %3045 = vrot.lane.b32.xlu0 %v8345_v56, %s5942_s27  ;;  %v2236_v43 = vsel %vm1019_vm12, %v2230_v18, %v8443_v60  ;;  %v12546_v57 = vrot.slane %v8260_v53, 1  ;;  %v2157_v21 = vadd.f32 %v2149_v62, %v2100_v17  ;;  %v2257_v11 = vadd.f32 %v2249_v39, %v2192_v33  ;;  %v12552_v62 = vld [vmem:[#allocation17_spill] sm:$0xff] }
 0x2c6   :  { %v2195_v19 = vadd.f32 %v12552_v62, %v2158_v10  ;;  %v2378_v39 = vsel %vm1151_vm4, %v2376_v49, %v2377_v7  ;;  %v12554_v49 = vld [vmem:[#allocation22_spill] sm:$0xff] }
 0x2c7   :  { %v2277_v34 = vpop.permute.xlu1 %2276  ;;  %v2275_v44 = vpop.permute.xlu0 %2274  ;;  %v8510_v29 = vsel %vm1151_vm4, %v12546_v57, %v3041_v45  ;;  %v12555_v57 = vld [vmem:[#allocation11_spill] sm:$0xff] }
 0x2c8   :  { %v2303_v6 = vmul.f32 %v2277_v34, %v8446_v24  ;;  %v2290_v12 = vsel %vm1077_vm13, %v2275_v44, %v2277_v34  ;;  %3051 = vrot.lane.b32.xlu1 %v8366_v20, %s5942_s27 }
 0x2c9   :  { %v2302_v32 = vmul.f32 %v2290_v12, %v8452_v61  ;;  %3049 = vrot.lane.b32.xlu0 %v8369_v59, %s5942_s27 }
 0x2ca   :  { %v2311_v36 = vadd.f32 %v2303_v6, %v2254_v15  ;;  %v2258_v15 = vadd.f32 %v2250_v47, %v2193_v25  ;;  %v12547_v6 = vld [vmem:[#allocation39_spill] sm:$0xff] }
 0x2cb   :  { %v2310_v13 = vadd.f32 %v2302_v32, %v2253_v22  ;;  %v2281_v0 = vpop.permute.xlu1 %2280  ;;  %v2279_v2 = vpop.permute.xlu0 %2278  ;;  %v2373_v12 = vrot.slane %v12547_v6, 1  ;;  %v2251_v22 = vmul.f32 %v2236_v43, %v8418_v14  ;;  %v12550_v32 = vld [vmem:[#allocation29_spill] sm:$0xff]  ;;  %v5845_v6 = vld [vmem:[%s12110_s1 + $0x26] ss:$8 sm:$0x3] }
 0x2cc   :  { %v2305_v16 = vmul.f32 %v2281_v0, %v8446_v24  ;;  %v2291_v48 = vsel %vm1077_vm13, %v2279_v2, %v2281_v0  ;;  %v8494_v3 = vadd.f32 %v8320_v54, %v2311_v36  ;;  %3055 = vrot.lane.b32.xlu1 %v8378_v5, %s5942_s27  ;;  %v2381_v45 = vrot.slane %v12550_v32, 1  ;;  %v12553_v36 = vld [vmem:[#allocation34_spill] sm:$0xff] }
 0x2cd   :  { %v2304_v1 = vmul.f32 %v2291_v48, %v8452_v61  ;;  %3053 = vrot.lane.b32.xlu0 %v8397_v58, %s5942_s27  ;;  %v8502_v8 = vadd.f32 %v8331_v46, %v2310_v13  ;;  %v2252_v46 = vmul.f32 %v8443_v60, %v8392_v9  ;;  %v12549_v9 = vld [vmem:[#allocation18_spill] sm:$0xff]  ;;  %v2194_v14 = vadd.f32 %v12553_v36, %v2157_v21 }
 0x2ce   :  { %v2313_v54 = vadd.f32 %v2305_v16, %v2256_v51  ;;  %v2375_v13 = vsel %vm1151_vm4, %v2373_v12, %v2374_v4 }
 0x2cf   :  { %v2312_v34 = vadd.f32 %v2304_v1, %v2255_v50  ;;  %v2285_v44 = vpop.permute.xlu1 %2284  ;;  %v2283_v31 = vpop.permute.xlu0 %2282  ;;  %v2260_v0 = vadd.f32 %v2252_v46, %v2195_v19  ;;  %v2259_v48 = vadd.f32 %v2251_v22, %v2194_v14  ;;  %v8552_v1 = vrot.slane %v12554_v49, %v6957_v28  ;;  %v8585_v22 = vld [vmem:[#allocation2 + $0x128] sm:$0xfc]  ;;  %v12563_v19 = vld [vmem:[#allocation12_spill] sm:$0xff]  ;;  %v8602_v14 = vld [vmem:[#allocation2 + $0x148] sm:$0x3] }
 0x2d0   :  { %v2307_v26 = vmul.f32 %v2285_v44, %v8446_v24  ;;  %v2292_v63 = vsel %vm1077_vm13, %v2283_v31, %v2285_v44  ;;  %v8517_v18 = vadd.f32 %v8334_v41, %v2313_v54  ;;  %3059 = vrot.lane.b32.xlu1 %v12548_v55, %s5942_s27  ;;  %v2379_v41 = vrot.slane %v12551_v40, 1  ;;  %v5904_v44 = vld [vmem:[#allocation2 + $0xd8] sm:$0xff]  ;;  %12560 = vst [vmem:[#allocation37_spill] sm:$0xff] %v8585_v22 }
 0x2d1   :  { %v2306_v17 = vmul.f32 %v2292_v63, %v8452_v61  ;;  %3057 = vrot.lane.b32.xlu0 %v8510_v29, %s5942_s27  ;;  %v8527_v60 = vadd.f32 %v12549_v9, %v2312_v34  ;;  %v12558_v34 = vld [vmem:[#allocation24_spill] sm:$0xff]  ;;  %v12559_v31 = vld [vmem:[#allocation25_spill] sm:$0xff]  ;;  %12564 = vst [vmem:[#allocation7_spill] sm:$0xff] %v8602_v14 }
 0x2d2   :  { %v2315_v25 = vadd.f32 %v2307_v26, %v2258_v15  ;;  %v2566_v46 = vmul.f32 %v8552_v1, %v12559_v31  ;;  %v5905_v63 = vld [vmem:[#allocation2 + $0xd0] sm:$0xff]  ;;  %v12569_v49 = vld [vmem:[#allocation41_spill] sm:$0xff] }
 0x2d3   :  { %v2314_v47 = vadd.f32 %v2306_v17, %v2257_v11  ;;  %v2289_v38 = vpop.permute.xlu1 %2288  ;;  %v2287_v33 = vpop.permute.xlu0 %2286  ;;  %v12557_v11 = vld [vmem:[#allocation23_spill] sm:$0xff]  ;;  %v8587_v17 = vld [vmem:[#allocation2 + $0x120] sm:$0xfc] }
 0x2d4   :  { %v2309_v2 = vmul.f32 %v2289_v38, %v8446_v24  ;;  %v2293_v51 = vsel %vm1077_vm13, %v2287_v33, %v2289_v38  ;;  %v8541_v16 = vadd.f32 %v2378_v39, %v2315_v25  ;;  %3104 = vrot.lane.b32.xlu1 %v8342_v37, %s5943_s0  ;;  %v2380_v37 = vsel %vm1151_vm4, %v2374_v4, %v2379_v41  ;;  %v12565_v33 = vld [vmem:[#allocation10_spill] sm:$0xff] }
 0x2d5   :  { %v2308_v50 = vmul.f32 %v2293_v51, %v8452_v61  ;;  %3102 = vrot.lane.b32.xlu0 %v8345_v56, %s5943_s0  ;;  %v8548_v52 = vadd.f32 %v2375_v13, %v2314_v47  ;;  %v2382_v61 = vsel %vm1151_vm4, %v2377_v7, %v2381_v45  ;;  %v12556_v56 = vld [vmem:[#allocation15_spill] sm:$0xff]  ;;  %v2562_v30 = vmul.f32 %v8552_v1, %v12557_v11  ;;  %v12562_v45 = vld [vmem:[#allocation26_spill] sm:$0xff] }
 0x2d6   :  { %v2317_v24 = vadd.f32 %v2309_v2, %v2260_v0  ;;  %v2563_v21 = vmul.f32 %v12556_v56, %v12555_v57  ;;  %v2567_v7 = vmul.f32 %v12556_v56, %v12558_v34  ;;  %v2565_v4 = vmul.f32 %v5904_v44, %v12556_v56  ;;  %12561 = vst [vmem:[#allocation8_spill] sm:$0xff] %v8587_v17  ;;  %v12566_v0 = vld [vmem:[#allocation6_spill] sm:$0xff]  ;;  %v5906_v11 = vld [vmem:[#allocation2 + $0x108] sm:$0xff] }
 0x2d7   :  { %v2316_v35 = vadd.f32 %v2308_v50, %v2259_v48  ;;  %v2443_v10 = vpop.permute.xlu1 %2442  ;;  %v2441_v43 = vpop.permute.xlu0 %2440  ;;  %v2586_v9 = vrot.slane %v2562_v30, 2  ;;  %v8591_v40 = vmul.f32 %v12556_v56, %v12562_v45  ;;  %v2592_v62 = vrot.slane %v2566_v46, 2  ;;  %v8608_v51 = vld [vmem:[#allocation2 + $0x140] sm:$0x3]  ;;  %v8653_v46 = vld [vmem:[#allocation2 + $0x150] sm:$0xfc] }
 0x2d8   :  { %v8557_v54 = vadd.f32 %v2382_v61, %v2317_v24  ;;  %3108 = vrot.lane.b32.xlu1 %v8366_v20, %s5943_s0  ;;  %v2589_v12 = vrot.slane %v2563_v21, 2  ;;  %v2594_v32 = vrot.slane %v2567_v7, 2  ;;  %v2590_v41 = vrot.slane %v2565_v4, 2  ;;  %12567 = vst [vmem:[#allocation16_spill] sm:$0xff] %v8608_v51  ;;  %v12568_v48 = vld [vmem:[#allocation30_spill] sm:$0xff]  ;;  %12571 = vst [vmem:[#allocation35_spill] sm:$0xff] %v8653_v46 }
 0x2d9   :  { %3106 = vrot.lane.b32.xlu0 %v8369_v59, %s5943_s0  ;;  %v8566_v15 = vadd.f32 %v2380_v37, %v2316_v35  ;;  %v2564_v59 = vmul.f32 %v5905_v63, %v8552_v1  ;;  %v8595_v25 = vmul.f32 %v8552_v1, %v12563_v19  ;;  %v3251_v38 = vrot.slane %v8585_v22, 2  ;;  %v5846_v61 = vld [vmem:[%s12110_s1 + $0x27] ss:$8 sm:$0x3] }
 0x2da   :  { %v3252_v39 = vrot.slane %v12565_v33, 2  ;;  %v3248_v13 = vrot.slane %v8587_v17, 2  ;;  %v3249_v2 = vrot.slane %v12566_v0, 2  ;;  %v8612_v50 = vmul.f32 %v12556_v56, %v12568_v48 }
 0x2db   :  { %v8575_v26 = vpop.permute.xlu1 %2446  ;;  %v2445_v20 = vpop.permute.xlu0 %2444  ;;  %v2587_v47 = vrot.slane %v2564_v59, 2  ;;  %v8616_v24 = vmul.f32 %v8552_v1, %v12569_v49  ;;  %v8619_v35 = vrot.slane %v5845_v6, %v6957_v28  ;;  %v2456_v37 = vsel %vm1019_vm12, %v2441_v43, %v2443_v10  ;;  %v8682_v49 = vld [vmem:[#allocation2 + $0x178] sm:$0x3] }
 0x2dc   :  { %3112 = vrot.lane.b32.xlu1 %v8378_v5, %s5943_s0  ;;  %v8598_v5 = vrot.slane %v5845_v6, %v6955_v27  ;;  %v3256_v57 = vrot.slane %v8602_v14, 2  ;;  %v2591_v21 = vsel %vm1375_vm6, %v2589_v12, %v2590_v41  ;;  %v8632_v30 = vmul.f32 %v5906_v11, %v12556_v56  ;;  %v5907_v12 = vld [vmem:[#allocation2 + $0x100] sm:$0xff]  ;;  %12572 = vst [vmem:[#allocation13_spill] sm:$0xff] %v8682_v49 }
 0x2dd   :  { %3110 = vrot.lane.b32.xlu0 %v8397_v58, %s5943_s0  ;;  %v2588_v44 = vsel %vm1375_vm6, %v2586_v9, %v2587_v47  ;;  %v8640_v4 = vsel %vm1375_vm6, %v2590_v41, %v2594_v32  ;;  %v8643_v43 = vsel %vm1375_vm6, %v3251_v38, %v3252_v39  ;;  %v8646_v31 = vsel %vm1375_vm6, %v3248_v13, %v3249_v2 }
 0x2de   :  { %v2469_v34 = vmul.f32 %v2443_v10, %v8598_v5  ;;  %v8649_v56 = vrot.slane %v5846_v61, %v6955_v27  ;;  %v8651_v10 = vld [vmem:[#allocation2 + $0x158] sm:$0xfc]  ;;  %v8656_v63 = vsel %vm1375_vm6, %v2587_v47, %v2592_v62  ;;  %v2468_v59 = vmul.f32 %v2456_v37, %v8619_v35  ;;  %v8690_v37 = vld [vmem:[#allocation2 + $0x170] sm:$0x3] }
 0x2df   :  { %v8600_v58 = vpop.permute.xlu1 %2450  ;;  %v2449_v36 = vpop.permute.xlu0 %2448  ;;  %12570 = vst [vmem:[#allocation33_spill] sm:$0xff] %v8651_v10  ;;  %v8664_v6 = vrot.slane %v5846_v61, %v6957_v28  ;;  %v8667_v9 = vmul.f32 %v5907_v12, %v8552_v1  ;;  %v2457_v32 = vsel %vm1019_vm12, %v2445_v20, %v8575_v26  ;;  %v8672_v45 = vsel %vm1375_vm6, %v3252_v39, %v3256_v57 }
 0x2e0   :  { %3116 = vrot.lane.b32.xlu1 %v12548_v55, %s5943_s0  ;;  %v3262_v41 = vrot.slane %v8258_v42, 2  ;;  %v3259_v62 = vrot.slane %v8260_v53, 2  ;;  %v2477_v19 = vadd.f32 %v2469_v34, %v8494_v3  ;;  %v3261_v1 = vrot.slane %v8651_v10, 2  ;;  %12573 = vst [vmem:[#allocation39_spill] sm:$0xff] %v8690_v37 }
 0x2e1   :  { %3114 = vrot.lane.b32.xlu0 %v8510_v29, %s5943_s0  ;;  %v3254_v29 = vrot.slane %v8608_v51, 2  ;;  %v3258_v48 = vrot.slane %v8653_v46, 2  ;;  %v2471_v20 = vmul.f32 %v8575_v26, %v8598_v5  ;;  %v2458_v39 = vsel %vm1019_vm12, %v2449_v36, %v8600_v58 }
 0x2e2   :  { %v2476_v57 = vadd.f32 %v2468_v59, %v8502_v8  ;;  %v2470_v11 = vmul.f32 %v2457_v32, %v8619_v35  ;;  %v8701_v36 = vsel %vm1375_vm6, %v3261_v1, %v3262_v41  ;;  %v2473_v8 = vmul.f32 %v8600_v58, %v8598_v5 }
 0x2e3   :  { %v8635_v55 = vpop.permute.xlu1 %2454  ;;  %v2453_v7 = vpop.permute.xlu0 %2452  ;;  %v8678_v13 = vsel %vm1375_vm6, %v3249_v2, %v3254_v29  ;;  %v2599_v2 = vrot.slane %v8591_v40, 2  ;;  %v8704_v29 = vsel %vm1375_vm6, %v3258_v48, %v3259_v62  ;;  %v3266_v40 = vrot.slane %v8682_v49, 2 }
 0x2e4   :  { %3270 = vrot.lane.b32.xlu1 %v8643_v43, %s5942_s27  ;;  %v2472_v59 = vmul.f32 %v2458_v39, %v8619_v35 }
 0x2e5   :  { %3268 = vrot.lane.b32.xlu0 %v8646_v31, %s5942_s27 }
 0x2e7   :  { %v2500_v47 = vpop.permute.xlu1 %2499  ;;  %v2498_v38 = vpop.permute.xlu0 %2497 }
 0x2e8   :  { %v2526_v61 = vmul.f32 %v2500_v47, %v8649_v56  ;;  %v2513_v3 = vsel %vm1077_vm13, %v2498_v38, %v2500_v47  ;;  %3274 = vrot.lane.b32.xlu1 %v8672_v45, %s5942_s27  ;;  %v3264_v38 = vrot.slane %v8690_v37, 2 }
 0x2e9   :  { %v2525_v34 = vmul.f32 %v2513_v3, %v8664_v6  ;;  %3272 = vrot.lane.b32.xlu0 %v8678_v13, %s5942_s27  ;;  %v2478_v3 = vadd.f32 %v2470_v11, %v8527_v60  ;;  %v2597_v60 = vrot.slane %v8667_v9, 2  ;;  %v2480_v11 = vadd.f32 %v2472_v59, %v8548_v52 }
 0x2ea   :  { %v2534_v26 = vadd.f32 %v2526_v61, %v2477_v19  ;;  %v2479_v19 = vadd.f32 %v2471_v20, %v8517_v18  ;;  %v2600_v18 = vrot.slane %v8632_v30, 2  ;;  %v2459_v20 = vsel %vm1019_vm12, %v2453_v7, %v8635_v55 }
 0x2eb   :  { %v2533_v12 = vadd.f32 %v2525_v34, %v2476_v57  ;;  %v2504_v32 = vpop.permute.xlu1 %2503  ;;  %v2502_v47 = vpop.permute.xlu0 %2501  ;;  %v2481_v57 = vadd.f32 %v2473_v8, %v8541_v16  ;;  %v2475_v30 = vmul.f32 %v8635_v55, %v8598_v5  ;;  %v2596_v9 = vrot.slane %v8595_v25, 2 }
 0x2ec   :  { %v2528_v1 = vmul.f32 %v2504_v32, %v8649_v56  ;;  %v2514_v61 = vsel %vm1077_vm13, %v2502_v47, %v2504_v32  ;;  %v8714_v48 = vadd.f32 %v2591_v21, %v2534_v26  ;;  %3278 = vrot.lane.b32.xlu1 %v8701_v36, %s5942_s27  ;;  %v3267_v21 = vsel %vm1375_vm6, %v3262_v41, %v3266_v40 }
 0x2ed   :  { %v2527_v49 = vmul.f32 %v2514_v61, %v8664_v6  ;;  %3276 = vrot.lane.b32.xlu0 %v8704_v29, %s5942_s27  ;;  %v8722_v58 = vadd.f32 %v2588_v44, %v2533_v12  ;;  %v3265_v44 = vsel %vm1375_vm6, %v3259_v62, %v3264_v38  ;;  %v2474_v16 = vmul.f32 %v2459_v20, %v8619_v35 }
 0x2ee   :  { %v2536_v39 = vadd.f32 %v2528_v1, %v2479_v19  ;;  %v2604_v5 = vrot.slane %v8612_v50, 2  ;;  %v2601_v25 = vsel %vm1375_vm6, %v2599_v2, %v2600_v18  ;;  %v2598_v35 = vsel %vm1375_vm6, %v2596_v9, %v2597_v60  ;;  %v12575_v9 = vld [vmem:[#allocation36_spill] sm:$0xff] }
 0x2ef   :  { %v2535_v34 = vadd.f32 %v2527_v49, %v2478_v3  ;;  %v2508_v26 = vpop.permute.xlu1 %2507  ;;  %v2506_v32 = vpop.permute.xlu0 %2505  ;;  %v2602_v49 = vrot.slane %v8616_v24, 2  ;;  %v2483_v59 = vadd.f32 %v2475_v30, %v8557_v54  ;;  %v2482_v50 = vadd.f32 %v2474_v16, %v8566_v15 }
 0x2f0   :  { %v2530_v12 = vmul.f32 %v2508_v26, %v8649_v56  ;;  %v2515_v7 = vsel %vm1077_vm13, %v2506_v32, %v2508_v26  ;;  %v8737_v41 = vadd.f32 %v8640_v4, %v2536_v39  ;;  %3282 = vrot.lane.b32.xlu1 %v3267_v21, %s5942_s27  ;;  %v2605_v61 = vsel %vm1375_vm6, %v2600_v18, %v2604_v5 }
 0x2f1   :  { %v2529_v52 = vmul.f32 %v2515_v7, %v8664_v6  ;;  %3280 = vrot.lane.b32.xlu0 %v3265_v44, %s5942_s27  ;;  %v8745_v62 = vadd.f32 %v8656_v63, %v2535_v34  ;;  %v2603_v15 = vsel %vm1375_vm6, %v2597_v60, %v2602_v49 }
 0x2f2   :  { %v2538_v55 = vadd.f32 %v2530_v12, %v2481_v57  ;;  %v12574_v12 = vld [vmem:[#allocation32_spill] sm:$0xff] }
 0x2f3   :  { %v2537_v4 = vadd.f32 %v2529_v52, %v2480_v11  ;;  %v2512_v40 = vpop.permute.xlu1 %2511  ;;  %v2510_v8 = vpop.permute.xlu0 %2509  ;;  %v12576_v52 = vld [vmem:[#allocation20_spill] sm:$0xff] }
 0x2f4   :  { %v2532_v47 = vmul.f32 %v2512_v40, %v8649_v56  ;;  %v2516_v38 = vsel %vm1077_vm13, %v2510_v8, %v2512_v40  ;;  %v8754_v63 = vadd.f32 %v2601_v25, %v2538_v55  ;;  %3327 = vrot.lane.b32.xlu1 %v8643_v43, %s5943_s0  ;;  %v12577_v55 = vld [vmem:[#allocation42_spill] sm:$0xff]  ;;  %v12578_v8 = vld [vmem:[#allocation9_spill] sm:$0xff] }
 0x2f5   :  { %v2531_v19 = vmul.f32 %v2516_v38, %v8664_v6  ;;  %3325 = vrot.lane.b32.xlu0 %v8646_v31, %s5943_s0  ;;  %v8762_v24 = vadd.f32 %v2598_v35, %v2537_v4  ;;  %v12579_v35 = vld [vmem:[#allocation31_spill] sm:$0xff]  ;;  %v12580_v38 = vld [vmem:[#allocation38_spill] sm:$0xff] }
 0x2f6   :  { %v2540_v2 = vadd.f32 %v2532_v47, %v2483_v59 }
 0x2f7   :  { %v2539_v54 = vadd.f32 %v2531_v19, %v2482_v50  ;;  %v8764_v1 = vpop.permute.xlu1 %2665  ;;  %v2664_v56 = vpop.permute.xlu0 %2663 }
 0x2f8   :  { %v8767_v3 = vadd.f32 %v2605_v61, %v2540_v2  ;;  %3331 = vrot.lane.b32.xlu1 %v8672_v45, %s5943_s0  ;;  %v5848_v2 = vld [vmem:[%s12110_s1 + $0x31] ss:$8 sm:$0x3] }
 0x2f9   :  { %3329 = vrot.lane.b32.xlu0 %v8678_v13, %s5943_s0  ;;  %v8774_v43 = vadd.f32 %v2603_v15, %v2539_v54  ;;  %v12581_v15 = vld [vmem:[#allocation27_spill] sm:$0xff] }
 0x2fb   :  { %v8776_v31 = vpop.permute.xlu1 %2669  ;;  %v2668_v6 = vpop.permute.xlu0 %2667 }
 0x2fc   :  { %3335 = vrot.lane.b32.xlu1 %v8701_v36, %s5943_s0  ;;  %v5853_v36 = vld [vmem:[%s12110_s1 + $0x36] ss:$8 sm:$0x3] }
 0x2fd   :  { %3333 = vrot.lane.b32.xlu0 %v8704_v29, %s5943_s0  ;;  %v2941_v11 = vrot.slane %v5853_v36, %v6955_v27  ;;  %v2937_v34 = vrot.slane %v5853_v36, %v6957_v28 }
 0x2ff   :  { %v8782_v18 = vpop.permute.xlu1 %2673  ;;  %v8784_v20 = vpop.permute.xlu0 %2671  ;;  %v2945_v7 = vmul.f32 %v2941_v11, %v12574_v12  ;;  %v2944_v16 = vmul.f32 %v2937_v34, %v12575_v9  ;;  %v2949_v5 = vmul.f32 %v2941_v11, %v12576_v52  ;;  %v8816_v49 = vmul.f32 %v2937_v34, %v12577_v55  ;;  %v12583_v9 = vld [vmem:[#allocation19_spill] sm:$0xff] }
 0x300   :  { %3339 = vrot.lane.b32.xlu1 %v3267_v21, %s5943_s0  ;;  %v5850_v21 = vld [vmem:[%s12110_s1 + $0x33] ss:$8 sm:$0x3]  ;;  %v8826_v59 = vmul.f32 %v2941_v11, %v12579_v35  ;;  %v2947_v47 = vmul.f32 %v2941_v11, %v12565_v33  ;;  %v8839_v61 = vmul.f32 %v2937_v34, %v12566_v0  ;;  %v8848_v52 = vmul.f32 %v2937_v34, %v12583_v9  ;;  %v5849_v35 = vld [vmem:[%s12110_s1 + $0x32] ss:$8 sm:$0x3] }
 0x301   :  { %3337 = vrot.lane.b32.xlu0 %v3265_v44, %s5943_s0  ;;  %v2782_v44 = vrot.slane %v5850_v21, %v6955_v27  ;;  %v2778_v30 = vrot.slane %v5850_v21, %v6957_v28  ;;  %v2971_v19 = vrot.slane %v2945_v7, 1  ;;  %v12582_v21 = vld [vmem:[#allocation14_spill] sm:$0xff]  ;;  %v2968_v55 = vrot.slane %v2944_v16, 1  ;;  %v12585_v16 = vld [vmem:[#allocation28_spill] sm:$0xff] }
 0x302   :  { %12584 = vst [vmem:[#allocation21_spill] sm:$0xff] %v8848_v52  ;;  %v8858_v37 = vmul.f32 %v2941_v11, %v8258_v42  ;;  %v2632_v9 = vrot.slane %v5848_v2, %v6955_v27  ;;  %v2972_v46 = vrot.slane %v2947_v47, 1  ;;  %v8870_v51 = vmul.f32 %v2937_v34, %v8260_v53 }
 0x303   :  { %v8788_v45 = vpop.permute.xlu1 %2677  ;;  %v8790_v13 = vpop.permute.xlu0 %2675  ;;  %v8823_v25 = vmul.f32 %v2782_v44, %v12578_v8  ;;  %v8830_v50 = vmul.f32 %v2778_v30, %v12580_v38  ;;  %v8836_v54 = vmul.f32 %v2782_v44, %v12565_v33  ;;  %v8842_v36 = vmul.f32 %v2782_v44, %v12581_v15 }
 0x304   :  { %v8845_v12 = vmul.f32 %v2778_v30, %v12582_v21  ;;  %v8851_v7 = vmul.f32 %v2778_v30, %v12566_v0  ;;  %v2976_v8 = vrot.slane %v2949_v5, 1  ;;  %v2628_v0 = vrot.slane %v5848_v2, %v6957_v28  ;;  %12586 = vst [vmem:[#allocation18_spill] sm:$0xff] %v8870_v51  ;;  %v5852_v51 = vld [vmem:[%s12110_s1 + $0x35] ss:$8 sm:$0x3] }
 0x305   :  { %v8864_v5 = vmul.f32 %v2941_v11, %v12585_v16  ;;  %v2679_v33 = vsel %vm1019_vm12, %v2664_v56, %v8764_v1  ;;  %v8874_v21 = vmul.f32 %v2937_v34, %v8466_v23  ;;  %v8877_v17 = vrot.slane %v5849_v35, %v6955_v27 }
 0x306   :  { %v8880_v47 = vmul.f32 %v2782_v44, %v8258_v42  ;;  %v2680_v11 = vsel %vm1019_vm12, %v2668_v6, %v8776_v31  ;;  %v8885_v56 = vrot.slane %v5849_v35, %v6957_v28  ;;  %v8888_v10 = vmul.f32 %v2778_v30, %v8260_v53  ;;  %v5851_v6 = vld [vmem:[%s12110_s1 + $0x34] ss:$8 sm:$0x3] }
 0x307   :  { %v8792_v39 = vpop.permute.xlu1 %2722  ;;  %v2721_v60 = vpop.permute.xlu0 %2720  ;;  %v2692_v34 = vmul.f32 %v8764_v1, %v2632_v9  ;;  %v2691_v14 = vmul.f32 %v2679_v33, %v2628_v0  ;;  %v8898_v44 = vsel %vm1151_vm4, %v2971_v19, %v2972_v46  ;;  %v2694_v35 = vmul.f32 %v8776_v31, %v2632_v9 }
 0x308   :  { %v2736_v42 = vsel %vm1077_vm13, %v2721_v60, %v8792_v39  ;;  %v12587_v53 = vrot.slane %v8839_v61, 1  ;;  %v8907_v1 = vsel %vm1151_vm4, %v2972_v46, %v2976_v8  ;;  %v2693_v60 = vmul.f32 %v2680_v11, %v2628_v0 }
 0x309   :  { %v2681_v23 = vsel %vm1019_vm12, %v8784_v20, %v8782_v18  ;;  %v2749_v19 = vmul.f32 %v8792_v39, %v8877_v17  ;;  %v2748_v46 = vmul.f32 %v2736_v42, %v8885_v56  ;;  %v8925_v11 = vrot.slane %v5851_v6, %v6955_v27 }
 0x30a   :  { %v8904_v30 = vsel %vm1151_vm4, %v2968_v55, %v12587_v53  ;;  %v2682_v55 = vsel %vm1019_vm12, %v8790_v13, %v8788_v45  ;;  %v2700_v39 = vadd.f32 %v2692_v34, %v8714_v48  ;;  %v2699_v33 = vadd.f32 %v2691_v14, %v8722_v58 }
 0x30b   :  { %v8797_v29 = vpop.permute.xlu1 %2726  ;;  %v8799_v57 = vpop.permute.xlu0 %2724  ;;  %v8931_v22 = vrot.slane %v5851_v6, %v6957_v28  ;;  %v2702_v13 = vadd.f32 %v2694_v35, %v8737_v41  ;;  %v2695_v42 = vmul.f32 %v2681_v23, %v2628_v0  ;;  %v2698_v52 = vmul.f32 %v8788_v45, %v2632_v9 }
 0x30c   :  { %v2737_v31 = vsel %vm1077_vm13, %v8799_v57, %v8797_v29  ;;  %v2751_v8 = vmul.f32 %v8797_v29, %v8877_v17  ;;  %v2696_v57 = vmul.f32 %v8782_v18, %v2632_v9  ;;  %v2701_v48 = vadd.f32 %v2693_v60, %v8745_v62 }
 0x30d   :  { %v2750_v29 = vmul.f32 %v2737_v31, %v8885_v56  ;;  %v2697_v34 = vmul.f32 %v2682_v55, %v2628_v0  ;;  %v2757_v14 = vadd.f32 %v2749_v19, %v2700_v39  ;;  %v2756_v18 = vadd.f32 %v2748_v46, %v2699_v33 }
 0x30e   :  { %v2759_v6 = vadd.f32 %v2751_v8, %v2702_v13  ;;  %v2704_v35 = vadd.f32 %v2696_v57, %v8754_v63  ;;  %v8949_v62 = vrot.slane %v5852_v51, %v6955_v27  ;;  %v2703_v0 = vadd.f32 %v2695_v42, %v8762_v24 }
 0x30f   :  { %v8806_v26 = vpop.permute.xlu1 %2730  ;;  %v8808_v32 = vpop.permute.xlu0 %2728  ;;  %v2706_v33 = vadd.f32 %v2698_v52, %v8767_v3  ;;  %v2758_v60 = vadd.f32 %v2750_v29, %v2701_v48  ;;  %v2794_v63 = vadd.f32 %v8823_v25, %v2757_v14  ;;  %v2793_v24 = vadd.f32 %v8830_v50, %v2756_v18 }
 0x310   :  { %v2753_v41 = vmul.f32 %v8806_v26, %v8877_v17  ;;  %v2738_v45 = vsel %vm1077_vm13, %v8808_v32, %v8806_v26  ;;  %v2705_v26 = vadd.f32 %v2697_v34, %v8774_v43  ;;  %v2796_v3 = vadd.f32 %v8836_v54, %v2759_v6 }
 0x311   :  { %v2752_v32 = vmul.f32 %v2738_v45, %v8885_v56 }
 0x312   :  { %v2761_v55 = vadd.f32 %v2753_v41, %v2704_v35 }
 0x313   :  { %v8818_v4 = vpop.permute.xlu1 %2734  ;;  %v8820_v40 = vpop.permute.xlu0 %2732  ;;  %v2760_v42 = vadd.f32 %v2752_v32, %v2703_v0  ;;  %v12589_v0 = vrot.slane %v8839_v61, 1 }
 0x314   :  { %v2755_v50 = vmul.f32 %v8818_v4, %v8877_v17  ;;  %v2798_v48 = vadd.f32 %v8842_v36, %v2761_v55 }
 0x315   :  { %v2797_v32 = vadd.f32 %v8845_v12, %v2760_v42  ;;  %v2986_v12 = vrot.slane %v8864_v5, 1 }
 0x317   :  { %v2825_v38 = vpop.permute.xlu1 %2824  ;;  %v2823_v15 = vpop.permute.xlu0 %2822 }
 0x318   :  { %v2838_v58 = vsel %vm1019_vm12, %v2823_v15, %v2825_v38  ;;  %v2851_v31 = vmul.f32 %v2825_v38, %v8925_v11  ;;  %v8952_v15 = vrot.slane %v5852_v51, %v6957_v28  ;;  %v2739_v51 = vsel %vm1077_vm13, %v8820_v40, %v8818_v4 }
 0x319   :  { %v2850_v19 = vmul.f32 %v2838_v58, %v8931_v22 }
 0x31a   :  { %v2859_v8 = vadd.f32 %v2851_v31, %v2794_v63  ;;  %v12588_v31 = vrot.slane %v8816_v49, 1 }
 0x31b   :  { %v2829_v2 = vpop.permute.xlu1 %2828  ;;  %v2827_v16 = vpop.permute.xlu0 %2826  ;;  %v2858_v57 = vadd.f32 %v2850_v19, %v2793_v24 }
 0x31c   :  { %v2839_v38 = vsel %vm1019_vm12, %v2827_v16, %v2829_v2  ;;  %v2853_v43 = vmul.f32 %v2829_v2, %v8925_v11  ;;  %v2795_v16 = vadd.f32 %v8851_v7, %v2758_v60  ;;  %v2754_v2 = vmul.f32 %v2739_v51, %v8885_v56 }
 0x31d   :  { %v2852_v13 = vmul.f32 %v2839_v38, %v8931_v22  ;;  %v2975_v60 = vsel %vm1151_vm4, %v12589_v0, %v12588_v31  ;;  %v12599_v0 = vld [vmem:[#allocation8_spill] sm:$0xff] }
 0x31e   :  { %v2861_v18 = vadd.f32 %v2853_v43, %v2796_v3  ;;  %v2984_v3 = vrot.slane %v8874_v21, 1  ;;  %v12590_v43 = vrot.slane %v8858_v37, 1 }
 0x31f   :  { %v2833_v20 = vpop.permute.xlu1 %2832  ;;  %v2831_v53 = vpop.permute.xlu0 %2830  ;;  %v2860_v17 = vadd.f32 %v2852_v13, %v2795_v16  ;;  %v12594_v16 = vld [vmem:[#allocation21_spill] sm:$0xff] }
 0x320   :  { %v2840_v54 = vsel %vm1019_vm12, %v2831_v53, %v2833_v20  ;;  %v2855_v34 = vmul.f32 %v2833_v20, %v8925_v11  ;;  %v2763_v20 = vadd.f32 %v2755_v50, %v2706_v33  ;;  %v12595_v5 = vrot.slane %v12594_v16, 1 }
 0x321   :  { %v2854_v4 = vmul.f32 %v2840_v54, %v8931_v22 }
 0x322   :  { %v2863_v19 = vadd.f32 %v2855_v34, %v2798_v48  ;;  %v12596_v34 = vmov %v12590_v43 }
 0x323   :  { %v2837_v9 = vpop.permute.xlu1 %2836  ;;  %v2835_v23 = vpop.permute.xlu0 %2834  ;;  %v2862_v49 = vadd.f32 %v2854_v4, %v2797_v32  ;;  %v5854_v4 = vld [vmem:[%s12110_s1 + $0x37] ss:$8 sm:$0x3]  ;;  %v12600_v32 = vld [vmem:[#allocation7_spill] sm:$0xff] }
 0x324   :  { %v2841_v53 = vsel %vm1019_vm12, %v2835_v23, %v2837_v9 }
 0x325   :  { %v2856_v61 = vmul.f32 %v2841_v53, %v8931_v22  ;;  %v12591_v22 = vrot.slane %v8826_v59, 1  ;;  %v9045_v53 = vrot.slane %v5854_v4, %v6955_v27 }
 0x327   :  { %v2882_v52 = vpop.permute.xlu1 %2881  ;;  %v2880_v46 = vpop.permute.xlu0 %2879 }
 0x328   :  { %v2908_v39 = vmul.f32 %v2882_v52, %v8949_v62  ;;  %v2895_v25 = vsel %vm1077_vm13, %v2880_v46, %v2882_v52 }
 0x329   :  { %v2907_v40 = vmul.f32 %v2895_v25, %v8952_v15  ;;  %v12592_v25 = vld [vmem:[#allocation18_spill] sm:$0xff] }
 0x32a   :  { %v2916_v29 = vadd.f32 %v2908_v39, %v2859_v8  ;;  %v2983_v39 = vsel %vm1151_vm4, %v12591_v22, %v12590_v43 }
 0x32b   :  { %v2915_v14 = vadd.f32 %v2907_v40, %v2858_v57  ;;  %v2886_v58 = vpop.permute.xlu1 %2885  ;;  %v2884_v7 = vpop.permute.xlu0 %2883  ;;  %v12593_v57 = vrot.slane %v12592_v25, 1 }
 0x32c   :  { %v2910_v6 = vmul.f32 %v2886_v58, %v8949_v62  ;;  %v2896_v41 = vsel %vm1077_vm13, %v2884_v7, %v2886_v58  ;;  %v8981_v45 = vadd.f32 %v8898_v44, %v2916_v29  ;;  %v2762_v44 = vadd.f32 %v2754_v2, %v2705_v26 }
 0x32d   :  { %v2909_v56 = vmul.f32 %v2896_v41, %v8952_v15  ;;  %v8986_v36 = vadd.f32 %v8904_v30, %v2915_v14  ;;  %v2857_v30 = vmul.f32 %v2837_v9, %v8925_v11  ;;  %v2800_v11 = vadd.f32 %v8880_v47, %v2763_v20 }
 0x32e   :  { %v2918_v35 = vadd.f32 %v2910_v6, %v2861_v18  ;;  %v2799_v52 = vadd.f32 %v8888_v10, %v2762_v44  ;;  %v2980_v21 = vsel %vm1151_vm4, %v12595_v5, %v12593_v57  ;;  %v2987_v14 = vsel %vm1151_vm4, %v12596_v34, %v2986_v12 }
 0x32f   :  { %v2917_v63 = vadd.f32 %v2909_v56, %v2860_v17  ;;  %v2890_v38 = vpop.permute.xlu1 %2889  ;;  %v2888_v55 = vpop.permute.xlu0 %2887  ;;  %v2865_v13 = vadd.f32 %v2857_v30, %v2800_v11  ;;  %v9050_v44 = vrot.slane %v5854_v4, %v6957_v28 }
 0x330   :  { %v2912_v33 = vmul.f32 %v2890_v38, %v8949_v62  ;;  %v2897_v23 = vsel %vm1077_vm13, %v2888_v55, %v2890_v38  ;;  %v8999_v51 = vadd.f32 %v8907_v1, %v2918_v35  ;;  %v2864_v42 = vadd.f32 %v2856_v61, %v2799_v52  ;;  %v12598_v35 = vld [vmem:[#allocation37_spill] sm:$0xff]  ;;  %v12601_v38 = vld [vmem:[#allocation16_spill] sm:$0xff] }
 0x331   :  { %v2911_v26 = vmul.f32 %v2897_v23, %v8952_v15  ;;  %v9003_v24 = vadd.f32 %v2975_v60, %v2917_v63 }
 0x332   :  { %v2920_v9 = vadd.f32 %v2912_v33, %v2863_v19  ;;  %v5855_v19 = vld [vmem:[%s12110_s1 + $0x40] ss:$8 sm:$0x3]  ;;  %v5908_v33 = vld [vmem:[#allocation2 + $0x138] sm:$0xff] }
 0x333   :  { %v2919_v46 = vadd.f32 %v2911_v26, %v2862_v49  ;;  %v2894_v8 = vpop.permute.xlu1 %2893  ;;  %v2892_v1 = vpop.permute.xlu0 %2891  ;;  %v12602_v49 = vld [vmem:[#allocation33_spill] sm:$0xff]  ;;  %v12603_v26 = vld [vmem:[#allocation35_spill] sm:$0xff] }
 0x334   :  { %v2914_v47 = vmul.f32 %v2894_v8, %v8949_v62  ;;  %v2898_v10 = vsel %vm1077_vm13, %v2892_v1, %v2894_v8  ;;  %v9021_v40 = vadd.f32 %v2983_v39, %v2920_v9  ;;  %v12597_v62 = vmov %v12593_v57  ;;  %v5909_v9 = vld [vmem:[#allocation2 + $0x130] sm:$0xff] }
 0x335   :  { %v2913_v50 = vmul.f32 %v2898_v10, %v8952_v15  ;;  %v9024_v54 = vadd.f32 %v2980_v21, %v2919_v46  ;;  %v2985_v7 = vsel %vm1151_vm4, %v12597_v62, %v2984_v3  ;;  %v5856_v15 = vld [vmem:[%s12110_s1 + $0x41] ss:$8 sm:$0x3]  ;;  %v9068_v8 = vrot.slane %v5855_v19, %v6955_v27 }
 0x336   :  { %v2922_v59 = vadd.f32 %v2914_v47, %v2865_v13  ;;  %v3164_v17 = vrot.slane %v5856_v15, %v6955_v27  ;;  %v3160_v37 = vrot.slane %v5856_v15, %v6957_v28  ;;  %v9072_v39 = vrot.slane %v5855_v19, %v6957_v28  ;;  %v12604_v47 = vld [vmem:[#allocation13_spill] sm:$0xff] }
 0x337   :  { %v2921_v29 = vadd.f32 %v2913_v50, %v2864_v42  ;;  %v3048_v2 = vpop.permute.xlu1 %3047  ;;  %v3046_v48 = vpop.permute.xlu0 %3045 }
 0x338   :  { %v9029_v58 = vadd.f32 %v2987_v14, %v2922_v59  ;;  %v3168_v31 = vmul.f32 %v3164_v17, %v12598_v35  ;;  %v3167_v60 = vmul.f32 %v3160_v37, %v12599_v0  ;;  %v3172_v63 = vmul.f32 %v3164_v17, %v12600_v32  ;;  %v12605_v14 = vld [vmem:[#allocation39_spill] sm:$0xff] }
 0x339   :  { %v9034_v18 = vadd.f32 %v2985_v7, %v2921_v29  ;;  %v9057_v55 = vmul.f32 %v3160_v37, %v12601_v38  ;;  %v3061_v30 = vsel %vm1019_vm12, %v3046_v48, %v3048_v2  ;;  %v3170_v23 = vmul.f32 %v5908_v33, %v3164_v17  ;;  %v5911_v38 = vld [vmem:[#allocation2 + $0x160] sm:$0xff] }
 0x33a   :  { %v9061_v61 = vmul.f32 %v3164_v17, %v12602_v49  ;;  %v9064_v12 = vmul.f32 %v3160_v37, %v12603_v26  ;;  %v3169_v52 = vmul.f32 %v5909_v9, %v3160_v37  ;;  %v3074_v46 = vmul.f32 %v3048_v2, %v9045_v53 }
 0x33b   :  { %v3052_v6 = vpop.permute.xlu1 %3051  ;;  %v3050_v41 = vpop.permute.xlu0 %3049  ;;  %v3194_v1 = vrot.slane %v3168_v31, 2  ;;  %v3191_v43 = vrot.slane %v3167_v60, 2  ;;  %v3073_v22 = vmul.f32 %v3061_v30, %v9050_v44  ;;  %v3199_v25 = vrot.slane %v3172_v63, 2  ;;  %v5910_v31 = vld [vmem:[#allocation2 + $0x168] sm:$0xff] }
 0x33c   :  { %v3197_v57 = vrot.slane %v9057_v55, 2  ;;  %v3062_v16 = vsel %vm1019_vm12, %v3050_v41, %v3052_v6  ;;  %v3195_v5 = vrot.slane %v3170_v23, 2  ;;  %v3204_v21 = vrot.slane %v9061_v61, 2 }
 0x33d   :  { %v3201_v13 = vrot.slane %v9064_v12, 2  ;;  %v9079_v10 = vmul.f32 %v3164_v17, %v12604_v47  ;;  %v3192_v59 = vrot.slane %v3169_v52, 2  ;;  %v3082_v29 = vadd.f32 %v3074_v46, %v8981_v45 }
 0x33e   :  { %v3076_v2 = vmul.f32 %v3052_v6, %v9045_v53  ;;  %v9086_v62 = vmul.f32 %v3160_v37, %v12605_v14  ;;  %v3081_v7 = vadd.f32 %v3073_v22, %v8986_v36  ;;  %v3075_v15 = vmul.f32 %v3062_v16, %v9050_v44 }
 0x33f   :  { %v3056_v56 = vpop.permute.xlu1 %3055  ;;  %v3054_v20 = vpop.permute.xlu0 %3053  ;;  %v3196_v45 = vsel %vm1375_vm6, %v3194_v1, %v3195_v5  ;;  %v3176_v6 = vmul.f32 %v5910_v31, %v3164_v17  ;;  %v3193_v63 = vsel %vm1375_vm6, %v3191_v43, %v3192_v59  ;;  %v3175_v36 = vmul.f32 %v5911_v38, %v3160_v37 }
 0x340   :  { %v3063_v4 = vsel %vm1019_vm12, %v3054_v20, %v3056_v56  ;;  %v3078_v0 = vmul.f32 %v3056_v56, %v9045_v53  ;;  %v3084_v55 = vadd.f32 %v3076_v2, %v8999_v51  ;;  %v3083_v23 = vadd.f32 %v3075_v15, %v9003_v24 }
 0x341   :  { %v3077_v17 = vmul.f32 %v3063_v4, %v9050_v44  ;;  %v3200_v37 = vsel %vm1375_vm6, %v3195_v5, %v3199_v25  ;;  %v3205_v12 = vrot.slane %v3176_v6, 2  ;;  %v3198_v1 = vsel %vm1375_vm6, %v3192_v59, %v3197_v57 }
 0x342   :  { %v3086_v51 = vadd.f32 %v3078_v0, %v9021_v40  ;;  %v3202_v43 = vrot.slane %v3175_v36, 2  ;;  %v3207_v57 = vrot.slane %v9086_v62, 2 }
 0x343   :  { %v3060_v3 = vpop.permute.xlu1 %3059  ;;  %v3058_v11 = vpop.permute.xlu0 %3057 }
 0x344   :  { %v3064_v61 = vsel %vm1019_vm12, %v3058_v11, %v3060_v3  ;;  %v3080_v24 = vmul.f32 %v3060_v3, %v9045_v53  ;;  %v3085_v11 = vadd.f32 %v3077_v17, %v9024_v54  ;;  %v3203_v2 = vsel %vm1375_vm6, %v3201_v13, %v3202_v43 }
 0x345   :  { %v3079_v25 = vmul.f32 %v3064_v61, %v9050_v44 }
 0x347   :  { %v3105_v42 = vpop.permute.xlu1 %3104  ;;  %v3103_v50 = vpop.permute.xlu0 %3102 }
 0x348   :  { %v3131_v48 = vmul.f32 %v3105_v42, %v9068_v8  ;;  %v3118_v34 = vsel %vm1077_vm13, %v3103_v50, %v3105_v42  ;;  %v3209_v42 = vrot.slane %v9079_v10, 2  ;;  %v3087_v10 = vadd.f32 %v3079_v25, %v9034_v18  ;;  %v9137_v18 = vld [vmem:[%s12110_s1 + $0x42] ss:$8 sm:$0x3] }
 0x349   :  { %v3130_v41 = vmul.f32 %v3118_v34, %v9072_v39  ;;  %v3233_v6 = vrot.slane %v9137_v18, %v6957_v28 }
 0x34a   :  { %v3139_v35 = vadd.f32 %v3131_v48, %v3082_v29  ;;  %v3206_v29 = vsel %vm1375_vm6, %v3204_v21, %v3205_v12  ;;  %v3088_v48 = vadd.f32 %v3080_v24, %v9029_v58  ;;  %v3210_v13 = vsel %vm1375_vm6, %v3205_v12, %v3209_v42 }
 0x34b   :  { %v3138_v60 = vadd.f32 %v3130_v41, %v3081_v7  ;;  %v3109_v19 = vpop.permute.xlu1 %3108  ;;  %v3107_v32 = vpop.permute.xlu0 %3106  ;;  %v3208_v58 = vsel %vm1375_vm6, %v3202_v43, %v3207_v57 }
 0x34c   :  { %v3133_v30 = vmul.f32 %v3109_v19, %v9068_v8  ;;  %v3119_v20 = vsel %vm1077_vm13, %v3107_v32, %v3109_v19  ;;  %v9098_v33 = vadd.f32 %v3196_v45, %v3139_v35 }
 0x34d   :  { %v3132_v56 = vmul.f32 %v3119_v20, %v9072_v39  ;;  %v3219_v49 = vadd.f32 %v3193_v63, %v3138_v60  ;;  %v9148_v60 = vld [vmem:[%s12110_s1 + $0x43] ss:$8 sm:$0x3]  ;;  %s5944_s1 = smov 110  }
 0x34e   :  { %v3141_v26 = vadd.f32 %v3133_v30, %v3084_v55  ;;  %v3318_v38 = vrot.slane %v9148_v60, %v6957_v28 }
 0x34f   :  { %v3140_v9 = vadd.f32 %v3132_v56, %v3083_v23  ;;  %v3113_v52 = vpop.permute.xlu1 %3112  ;;  %v3111_v46 = vpop.permute.xlu0 %3110 }
 0x350   :  { %v3135_v22 = vmul.f32 %v3113_v52, %v9068_v8  ;;  %v3120_v16 = vsel %vm1077_vm13, %v3111_v46, %v3113_v52  ;;  %v9110_v47 = vadd.f32 %v3200_v37, %v3141_v26 }
 0x351   :  { %v3134_v40 = vmul.f32 %v3120_v16, %v9072_v39  ;;  %v3221_v5 = vadd.f32 %v3198_v1, %v3140_v9 }
 0x352   :  { %v3143_v50 = vadd.f32 %v3135_v22, %v3086_v51 }
 0x353   :  { %v3142_v59 = vadd.f32 %v3134_v40, %v3085_v11  ;;  %v3117_v53 = vpop.permute.xlu1 %3116  ;;  %v3115_v3 = vpop.permute.xlu0 %3114 }
 0x354   :  { %v3137_v54 = vmul.f32 %v3117_v53, %v9068_v8  ;;  %v3121_v44 = vsel %vm1077_vm13, %v3115_v3, %v3117_v53  ;;  %v9122_v34 = vadd.f32 %v3206_v29, %v3143_v50  ;;  %v3237_v53 = vrot.slane %v9137_v18, %v6955_v27 }
 0x355   :  { %v3136_v14 = vmul.f32 %v3121_v44, %v9072_v39  ;;  %v3223_v62 = vadd.f32 %v3203_v2, %v3142_v59  ;;  %v3322_v3 = vrot.slane %v9148_v60, %v6955_v27 }
 0x356   :  { %v3145_v7 = vadd.f32 %v3137_v54, %v3088_v48 }
 0x357   :  { %v3144_v15 = vadd.f32 %v3136_v14, %v3087_v10  ;;  %v9126_v41 = vpop.permute.xlu1 %3270  ;;  %v3269_v21 = vpop.permute.xlu0 %3268 }
 0x358   :  { %v9129_v4 = vadd.f32 %v3210_v13, %v3145_v7  ;;  %v3284_v0 = vsel %vm1019_vm12, %v3269_v21, %v9126_v41  ;;  %v3297_v29 = vmul.f32 %v9126_v41, %v3237_v53 }
 0x359   :  { %v3225_v8 = vadd.f32 %v3208_v58, %v3144_v15  ;;  %v3296_v63 = vmul.f32 %v3284_v0, %v3233_v6 }
 0x35a   :  { %v3305_v48 = vadd.f32 %v3297_v29, %v9098_v33 }
 0x35b   :  { %v9132_v35 = vpop.permute.xlu1 %3274  ;;  %v3273_v45 = vpop.permute.xlu0 %3272  ;;  %v3304_v23 = vadd.f32 %v3296_v63, %v3219_v49 }
 0x35c   :  { %v3285_v36 = vsel %vm1019_vm12, %v3273_v45, %v9132_v35  ;;  %v3299_v54 = vmul.f32 %v9132_v35, %v3237_v53 }
 0x35d   :  { %v3298_v17 = vmul.f32 %v3285_v36, %v3233_v6 }
 0x35e   :  { %v3307_v10 = vadd.f32 %v3299_v54, %v9110_v47 }
 0x35f   :  { %v9139_v39 = vpop.permute.xlu1 %3278  ;;  %v3277_v31 = vpop.permute.xlu0 %3276  ;;  %v3306_v51 = vadd.f32 %v3298_v17, %v3221_v5 }
 0x360   :  { %v3286_v61 = vsel %vm1019_vm12, %v3277_v31, %v9139_v39  ;;  %v3301_v14 = vmul.f32 %v9139_v39, %v3237_v53 }
 0x361   :  { %v3300_v9 = vmul.f32 %v3286_v61, %v3233_v6 }
 0x362   :  { %v3309_v33 = vadd.f32 %v3301_v14, %v9122_v34 }
 0x363   :  { %v9150_v19 = vpop.permute.xlu1 %3282  ;;  %v3281_v32 = vpop.permute.xlu0 %3280  ;;  %v3308_v22 = vadd.f32 %v3300_v9, %v3223_v62 }
 0x364   :  { %v3287_v52 = vsel %vm1019_vm12, %v3281_v32, %v9150_v19  ;;  %v3303_v15 = vmul.f32 %v9150_v19, %v3237_v53  ;;  %vm5138_vm12 = vcmask 65536  }
 0x365   :  { %v3302_v16 = vmul.f32 %v3287_v52, %v3233_v6 }
 0x366   :  { %v3311_v13 = vadd.f32 %v3303_v15, %v9129_v4 }
 0x367   :  { %v9156_v55 = vpop.permute.xlu1 %3327  ;;  %v3326_v30 = vpop.permute.xlu0 %3325  ;;  %v3310_v50 = vadd.f32 %v3302_v16, %v3225_v8 }
 0x368   :  { %v3341_v20 = vsel %vm1077_vm13, %v3326_v30, %v9156_v55  ;;  %v3354_v2 = vmul.f32 %v9156_v55, %v3322_v3 }
 0x369   :  { %v3353_v56 = vmul.f32 %v3341_v20, %v3318_v38 }
 0x36a   :  { %v3362_v44 = vadd.f32 %v3354_v2, %v3305_v48 }
 0x36b   :  { %v9162_v26 = vadd.f32 %v3353_v56, %v3304_v23  ;;  %v9164_v37 = vpop.permute.xlu1 %3331  ;;  %v3330_v28 = vpop.permute.xlu0 %3329 }
 0x36c   :  { %v3342_v12 = vsel %vm1077_vm13, %v3330_v28, %v9164_v37  ;;  %v3356_v27 = vmul.f32 %v9164_v37, %v3322_v3 }
 0x36d   :  { %3475 = vst.msk [vmem:[#allocation3] sm:$0xff] %vm3474_vm14, %v9162_v26  ;;  %v3355_v49 = vmul.f32 %v3342_v12, %v3318_v38  ;;  %3373 = vrot.lane.b32.xlu0 %v9162_v26, %s5944_s1 }
 0x36e   :  { %v3364_v62 = vadd.f32 %v3356_v27, %v3307_v10 }
 0x36f   :  { %v9173_v46 = vadd.f32 %v3355_v49, %v3306_v51  ;;  %v3336_v1 = vpop.permute.xlu1 %3335  ;;  %v3334_v43 = vpop.permute.xlu0 %3333 }
 0x370   :  { %v3343_v24 = vsel %vm1077_vm13, %v3334_v43, %v3336_v1  ;;  %v3358_v7 = vmul.f32 %v3336_v1, %v3322_v3 }
 0x371   :  { %3476 = vst.msk [vmem:[#allocation3 + $0x8] sm:$0xff] %vm3474_vm14, %v9173_v46  ;;  %v3357_v11 = vmul.f32 %v3343_v24, %v3318_v38  ;;  %3375 = vrot.lane.b32.xlu1 %v9173_v46, %s5944_s1 }
 0x372   :  { %v3366_v41 = vadd.f32 %v3358_v7, %v3309_v33 }
 0x373   :  { %v9179_v25 = vadd.f32 %v3357_v11, %v3308_v22  ;;  %v3340_v40 = vpop.permute.xlu1 %3339  ;;  %v3338_v5 = vpop.permute.xlu0 %3337 }
 0x374   :  { %v3344_v42 = vsel %vm1077_vm13, %v3338_v5, %v3340_v40  ;;  %v3360_v21 = vmul.f32 %v3340_v40, %v3322_v3  ;;  %vm5068_vm13 = vcmask 1043456  }
 0x375   :  { %3491 = vst.msk [vmem:[#allocation3 + $0x80] sm:$0xff] %vm3474_vm14, %v9179_v25  ;;  %v3359_v57 = vmul.f32 %v3344_v42, %v3318_v38  ;;  %3377 = vrot.lane.b32.xlu0 %v9179_v25, %s5944_s1 }
 0x376   :  { %v3368_v47 = vadd.f32 %v3360_v21, %v3311_v13 }
 0x377   :  { %v9185_v59 = vadd.f32 %v3359_v57, %v3310_v50 }
 0x379   :  { %3492 = vst.msk [vmem:[#allocation3 + $0x88] sm:$0xff] %vm3474_vm14, %v9185_v59  ;;  %3379 = vrot.lane.b32.xlu1 %v9185_v59, %s5944_s1  ;;  %3385 = vrot.lane.b32.xlu0 %v9162_v26, %s5945_s19 }
 0x37d   :  { %3387 = vrot.lane.b32.xlu1 %v9173_v46, %s5945_s19  ;;  %3389 = vrot.lane.b32.xlu0 %v9179_v25, %s5945_s19 }
 0x381   :  { %3391 = vrot.lane.b32.xlu1 %v9185_v59, %s5945_s19  ;;  %3397 = vrot.lane.b32.xlu0 %v9162_v26, %s5946_s28 }
 0x385   :  { %3399 = vrot.lane.b32.xlu1 %v9173_v46, %s5946_s28  ;;  %3401 = vrot.lane.b32.xlu0 %v9179_v25, %s5946_s28 }
 0x389   :  { %3403 = vrot.lane.b32.xlu1 %v9185_v59, %s5946_s28  ;;  %3409 = vrot.lane.b32.xlu0 %v9162_v26, %s5947_s29 }
 0x38d   :  { %3411 = vrot.lane.b32.xlu1 %v9173_v46, %s5947_s29  ;;  %3413 = vrot.lane.b32.xlu0 %v9179_v25, %s5947_s29 }
 0x391   :  { %3415 = vrot.lane.b32.xlu1 %v9185_v59, %s5947_s29  ;;  %3421 = vrot.lane.b32.xlu0 %v9162_v26, %s5948_s30 }
 0x395   :  { %3423 = vrot.lane.b32.xlu1 %v9173_v46, %s5948_s30  ;;  %3425 = vrot.lane.b32.xlu0 %v9179_v25, %s5948_s30 }
 0x399   :  { %3427 = vrot.lane.b32.xlu1 %v9185_v59, %s5948_s30  ;;  %3433 = vrot.lane.b32.xlu0 %v9162_v26, %s5949_s4 }
 0x39d   :  { %3435 = vrot.lane.b32.xlu1 %v9173_v46, %s5949_s4  ;;  %3437 = vrot.lane.b32.xlu0 %v9179_v25, %s5949_s4 }
 0x3a1   :  { %3439 = vrot.lane.b32.xlu1 %v9185_v59, %s5949_s4  ;;  %3449 = vrot.lane.b32.xlu0 %v9162_v26, %s5950_s5 }
 0x3a5   :  { %3451 = vrot.lane.b32.xlu1 %v3362_v44, %s5950_s5  ;;  %3453 = vrot.lane.b32.xlu0 %v9173_v46, %s5950_s5 }
 0x3a9   :  { %3455 = vrot.lane.b32.xlu1 %v3364_v62, %s5950_s5  ;;  %3457 = vrot.lane.b32.xlu0 %v9179_v25, %s5950_s5 }
 0x3ad   :  { %3459 = vrot.lane.b32.xlu1 %v3366_v41, %s5950_s5  ;;  %3461 = vrot.lane.b32.xlu0 %v9185_v59, %s5950_s5 }
 0x3b1   :  { %3463 = vrot.lane.b32.xlu1 %v3368_v47, %s5950_s5  ;;  %3507 = vrot.lane.b32.xlu0 %v9162_v26, %s5942_s27 }
 0x3b5   :  { %3509 = vrot.lane.b32.xlu1 %v9173_v46, %s5942_s27 }
 0x3df   :  { %v9232_v34 = vpop.permute.xlu0 %3373 }
 0x3e0   :  { %3477 = vst.msk [vmem:[#allocation3 + $0x10] sm:$0xff] %vm3474_vm14, %v9232_v34  ;;  %3511 = vrot.lane.b32.xlu0 %v9232_v34, %s5942_s27 }
 0x3e3   :  { %v9238_v4 = vpop.permute.xlu1 %3375 }
 0x3e4   :  { %3478 = vst.msk [vmem:[#allocation3 + $0x18] sm:$0xff] %vm3474_vm14, %v9238_v4  ;;  %3513 = vrot.lane.b32.xlu1 %v9238_v4, %s5942_s27 }
 0x3e7   :  { %v9244_v58 = vpop.permute.xlu0 %3377 }
 0x3e8   :  { %3493 = vst.msk [vmem:[#allocation3 + $0x90] sm:$0xff] %vm3474_vm14, %v9244_v58 }
 0x3eb   :  { %v9248_v8 = vpop.permute.xlu1 %3379  ;;  %v9250_v35 = vpop.permute.xlu0 %3385 }
 0x3ec   :  { %3494 = vst.msk [vmem:[#allocation3 + $0x98] sm:$0xff] %vm3474_vm14, %v9248_v8  ;;  %3479 = vst.msk [vmem:[#allocation3 + $0x20] sm:$0xff] %vm3474_vm14, %v9250_v35  ;;  %3515 = vrot.lane.b32.xlu0 %v9250_v35, %s5942_s27 }
 0x3ef   :  { %v9258_v45 = vpop.permute.xlu1 %3387  ;;  %v9260_v18 = vpop.permute.xlu0 %3389 }
 0x3f0   :  { %3480 = vst.msk [vmem:[#allocation3 + $0x28] sm:$0xff] %vm3474_vm14, %v9258_v45  ;;  %3495 = vst.msk [vmem:[#allocation3 + $0xa0] sm:$0xff] %vm3474_vm14, %v9260_v18  ;;  %3517 = vrot.lane.b32.xlu1 %v9258_v45, %s5942_s27 }
 0x3f3   :  { %v9268_v39 = vpop.permute.xlu1 %3391  ;;  %v9270_v31 = vpop.permute.xlu0 %3397 }
 0x3f4   :  { %12606 = vst [vmem:[#allocation29_spill] sm:$0xff] %v9268_v39  ;;  %3496 = vst.msk [vmem:[#allocation3 + $0xa8] sm:$0xff] %vm3474_vm14, %v9268_v39  ;;  %3519 = vrot.lane.b32.xlu0 %v9270_v31, %s5942_s27 }
 0x3f5   :  { %3481 = vst.msk [vmem:[#allocation3 + $0x30] sm:$0xff] %vm3474_vm14, %v9270_v31 }
 0x3f7   :  { %v9278_v6 = vpop.permute.xlu1 %3399  ;;  %v9280_v0 = vpop.permute.xlu0 %3401 }
 0x3f8   :  { %3482 = vst.msk [vmem:[#allocation3 + $0x38] sm:$0xff] %vm3474_vm14, %v9278_v6  ;;  %3497 = vst.msk [vmem:[#allocation3 + $0xb0] sm:$0xff] %vm3474_vm14, %v9280_v0  ;;  %3521 = vrot.lane.b32.xlu1 %v9278_v6, %s5942_s27 }
 0x3fb   :  { %v9288_v60 = vpop.permute.xlu1 %3403  ;;  %v9290_v19 = vpop.permute.xlu0 %3409 }
 0x3fc   :  { %12607 = vst [vmem:[#allocation40_spill] sm:$0xff] %v9288_v60  ;;  %3498 = vst.msk [vmem:[#allocation3 + $0xb8] sm:$0xff] %vm3474_vm14, %v9288_v60  ;;  %3523 = vrot.lane.b32.xlu0 %v9290_v19, %s5942_s27 }
 0x3fd   :  { %3483 = vst.msk [vmem:[#allocation3 + $0x40] sm:$0xff] %vm3474_vm14, %v9290_v19 }
 0x3ff   :  { %v9298_v32 = vpop.permute.xlu1 %3411  ;;  %v9300_v63 = vpop.permute.xlu0 %3413 }
 0x400   :  { %3484 = vst.msk [vmem:[#allocation3 + $0x48] sm:$0xff] %vm3474_vm14, %v9298_v32  ;;  %3499 = vst.msk [vmem:[#allocation3 + $0xc0] sm:$0xff] %vm3474_vm14, %v9300_v63  ;;  %3525 = vrot.lane.b32.xlu1 %v9298_v32, %s5942_s27 }
 0x403   :  { %v9308_v38 = vpop.permute.xlu1 %3415  ;;  %v9310_v36 = vpop.permute.xlu0 %3421 }
 0x404   :  { %12608 = vst [vmem:[#allocation17_spill] sm:$0xff] %v9308_v38  ;;  %3500 = vst.msk [vmem:[#allocation3 + $0xc8] sm:$0xff] %vm3474_vm14, %v9308_v38  ;;  %3527 = vrot.lane.b32.xlu0 %v9310_v36, %s5942_s27 }
 0x405   :  { %3485 = vst.msk [vmem:[#allocation3 + $0x50] sm:$0xff] %vm3474_vm14, %v9310_v36 }
 0x407   :  { %v9318_v55 = vpop.permute.xlu1 %3423  ;;  %v9320_v30 = vpop.permute.xlu0 %3425 }
 0x408   :  { %3486 = vst.msk [vmem:[#allocation3 + $0x58] sm:$0xff] %vm3474_vm14, %v9318_v55  ;;  %3501 = vst.msk [vmem:[#allocation3 + $0xd0] sm:$0xff] %vm3474_vm14, %v9320_v30  ;;  %3529 = vrot.lane.b32.xlu1 %v9318_v55, %s5942_s27 }
 0x40b   :  { %v9328_v20 = vpop.permute.xlu1 %3427  ;;  %v9330_v23 = vpop.permute.xlu0 %3433 }
 0x40c   :  { %3502 = vst.msk [vmem:[#allocation3 + $0xd8] sm:$0xff] %vm3474_vm14, %v9328_v20  ;;  %3487 = vst.msk [vmem:[#allocation3 + $0x60] sm:$0xff] %vm3474_vm14, %v9330_v23  ;;  %3531 = vrot.lane.b32.xlu0 %v9330_v23, %s5942_s27 }
 0x40f   :  { %v9338_v17 = vpop.permute.xlu1 %3435  ;;  %v9340_v56 = vpop.permute.xlu0 %3437 }
 0x410   :  { %12609 = vst [vmem:[#allocation34_spill] sm:$0xff] %v9340_v56  ;;  %3488 = vst.msk [vmem:[#allocation3 + $0x68] sm:$0xff] %vm3474_vm14, %v9338_v17  ;;  %3533 = vrot.lane.b32.xlu1 %v9338_v17, %s5942_s27 }
 0x411   :  { %3503 = vst.msk [vmem:[#allocation3 + $0xe0] sm:$0xff] %vm3474_vm14, %v9340_v56 }
 0x413   :  { %v9348_v61 = vpop.permute.xlu1 %3439  ;;  %v3450_v37 = vpop.permute.xlu0 %3449 }
 0x414   :  { %12610 = vst [vmem:[#allocation22_spill] sm:$0xff] %v9348_v61  ;;  %3504 = vst.msk [vmem:[#allocation3 + $0xe8] sm:$0xff] %vm3474_vm14, %v9348_v61 }
 0x417   :  { %v3452_v28 = vpop.permute.xlu1 %3451  ;;  %v3454_v12 = vpop.permute.xlu0 %3453 }
 0x418   :  { %v9353_v51 = vsel %vm3465_vm15, %v3450_v37, %v3452_v28 }
 0x419   :  { %3489 = vst.msk [vmem:[#allocation3 + $0x70] sm:$0xff] %vm3474_vm14, %v9353_v51  ;;  %3535 = vrot.lane.b32.xlu0 %v9353_v51, %s5942_s27 }
 0x41b   :  { %v3456_v9 = vpop.permute.xlu1 %3455  ;;  %v3458_v52 = vpop.permute.xlu0 %3457 }
 0x41c   :  { %v9360_v49 = vsel %vm3465_vm15, %v3454_v12, %v3456_v9 }
 0x41d   :  { %3490 = vst.msk [vmem:[#allocation3 + $0x78] sm:$0xff] %vm3474_vm14, %v9360_v49  ;;  %3539 = vrot.lane.b32.xlu0 %v9179_v25, %s5942_s27  ;;  %3537 = vrot.lane.b32.xlu1 %v9360_v49, %s5942_s27 }
 0x41f   :  { %v3460_v1 = vpop.permute.xlu1 %3459  ;;  %v3462_v24 = vpop.permute.xlu0 %3461 }
 0x420   :  { %v9369_v43 = vsel %vm3465_vm15, %v3458_v52, %v3460_v1 }
 0x421   :  { %12611 = vst [vmem:[#allocation11_spill] sm:$0xff] %v9369_v43  ;;  %3505 = vst.msk [vmem:[#allocation3 + $0xf0] sm:$0xff] %vm3474_vm14, %v9369_v43  ;;  %3543 = vrot.lane.b32.xlu0 %v9244_v58, %s5942_s27  ;;  %3541 = vrot.lane.b32.xlu1 %v9185_v59, %s5942_s27 }
 0x423   :  { %v3464_v22 = vpop.permute.xlu1 %3463  ;;  %v3508_v11 = vpop.permute.xlu0 %3507 }
 0x424   :  { %v9378_v16 = vsel %vm3465_vm15, %v3462_v24, %v3464_v22  ;;  %v9407_v40 = vmax.f32 %v9162_v26, %v3508_v11 }
 0x425   :  { %12612 = vst [vmem:[#allocation15_spill] sm:$0xff] %v9378_v16  ;;  %3506 = vst.msk [vmem:[#allocation3 + $0xf8] sm:$0xff] %vm3474_vm14, %v9378_v16  ;;  %3547 = vrot.lane.b32.xlu0 %v9260_v18, %s5942_s27  ;;  %3545 = vrot.lane.b32.xlu1 %v9248_v8, %s5942_s27  ;;  %vm5085_vm14 = vcmask 1044480  }
 0x427   :  { %v3510_v5 = vpop.permute.xlu1 %3509 }
 0x428   :  { %v9414_v42 = vmax.f32 %v9173_v46, %v3510_v5 }
 0x429   :  { %3551 = vrot.lane.b32.xlu0 %v9280_v0, %s5942_s27  ;;  %3549 = vrot.lane.b32.xlu1 %v9268_v39, %s5942_s27 }
 0x42d   :  { %3555 = vrot.lane.b32.xlu0 %v9300_v63, %s5942_s27  ;;  %3553 = vrot.lane.b32.xlu1 %v9288_v60, %s5942_s27 }
 0x431   :  { %3559 = vrot.lane.b32.xlu0 %v9320_v30, %s5942_s27  ;;  %3557 = vrot.lane.b32.xlu1 %v9308_v38, %s5942_s27 }
 0x435   :  { %3563 = vrot.lane.b32.xlu0 %v9340_v56, %s5942_s27  ;;  %3561 = vrot.lane.b32.xlu1 %v9328_v20, %s5942_s27 }
 0x439   :  { %3565 = vrot.lane.b32.xlu1 %v9348_v61, %s5942_s27  ;;  %3567 = vrot.lane.b32.xlu0 %v9369_v43, %s5942_s27 }
 0x43d   :  { %3569 = vrot.lane.b32.xlu1 %v9378_v16, %s5942_s27  ;;  %3667 = vrot.lane.b32.xlu0 %v9407_v40, %s5942_s27 }
 0x441   :  { %3669 = vrot.lane.b32.xlu1 %v9414_v42, %s5942_s27 }
 0x452   :  { %v3512_v50 = vpop.permute.xlu0 %3511 }
 0x453   :  { %v9419_v57 = vmax.f32 %v9232_v34, %v3512_v50 }
 0x455   :  { %3671 = vrot.lane.b32.xlu0 %v9419_v57, %s5942_s27 }
 0x456   :  { %v3514_v53 = vpop.permute.xlu1 %3513 }
 0x457   :  { %v9424_v3 = vmax.f32 %v9238_v4, %v3514_v53 }
 0x459   :  { %3673 = vrot.lane.b32.xlu1 %v9424_v3, %s5942_s27 }
 0x45e   :  { %v3516_v29 = vpop.permute.xlu0 %3515 }
 0x45f   :  { %v9429_v2 = vmax.f32 %v9250_v35, %v3516_v29 }
 0x461   :  { %3675 = vrot.lane.b32.xlu0 %v9429_v2, %s5942_s27 }
 0x462   :  { %v3518_v48 = vpop.permute.xlu1 %3517 }
 0x463   :  { %v9434_v54 = vmax.f32 %v9258_v45, %v3518_v48 }
 0x465   :  { %3677 = vrot.lane.b32.xlu1 %v9434_v54, %s5942_s27 }
 0x466   :  { %v3520_v44 = vpop.permute.xlu0 %3519 }
 0x467   :  { %v9439_v27 = vmax.f32 %v9270_v31, %v3520_v44 }
 0x469   :  { %3679 = vrot.lane.b32.xlu0 %v9439_v27, %s5942_s27 }
 0x46a   :  { %v3522_v10 = vpop.permute.xlu1 %3521 }
 0x46b   :  { %v9444_v14 = vmax.f32 %v9278_v6, %v3522_v10 }
 0x46d   :  { %3681 = vrot.lane.b32.xlu1 %v9444_v14, %s5942_s27 }
 0x46e   :  { %v3524_v62 = vpop.permute.xlu0 %3523 }
 0x46f   :  { %v9449_v7 = vmax.f32 %v9290_v19, %v3524_v62 }
 0x471   :  { %3683 = vrot.lane.b32.xlu0 %v9449_v7, %s5942_s27 }
 0x472   :  { %v3526_v33 = vpop.permute.xlu1 %3525 }
 0x473   :  { %v9454_v15 = vmax.f32 %v9298_v32, %v3526_v33 }
 0x475   :  { %3685 = vrot.lane.b32.xlu1 %v9454_v15, %s5942_s27 }
 0x476   :  { %v3528_v41 = vpop.permute.xlu0 %3527 }
 0x477   :  { %v9459_v21 = vmax.f32 %v9310_v36, %v3528_v41 }
 0x479   :  { %3687 = vrot.lane.b32.xlu0 %v9459_v21, %s5942_s27 }
 0x47a   :  { %v3530_v13 = vpop.permute.xlu1 %3529 }
 0x47b   :  { %v9464_v47 = vmax.f32 %v9318_v55, %v3530_v13 }
 0x47d   :  { %3689 = vrot.lane.b32.xlu1 %v9464_v47, %s5942_s27 }
 0x47e   :  { %v3532_v37 = vpop.permute.xlu0 %3531 }
 0x47f   :  { %v9469_v28 = vmax.f32 %v9330_v23, %v3532_v37 }
 0x481   :  { %3691 = vrot.lane.b32.xlu0 %v9469_v28, %s5942_s27 }
 0x482   :  { %v3534_v12 = vpop.permute.xlu1 %3533 }
 0x483   :  { %v9474_v9 = vmax.f32 %v9338_v17, %v3534_v12 }
 0x485   :  { %3693 = vrot.lane.b32.xlu1 %v9474_v9, %s5942_s27 }
 0x48b   :  { %v3536_v52 = vpop.permute.xlu0 %3535 }
 0x48c   :  { %v9479_v1 = vmax.f32 %v9353_v51, %v3536_v52 }
 0x48e   :  { %3695 = vrot.lane.b32.xlu0 %v9479_v1, %s5942_s27 }
 0x48f   :  { %v3538_v24 = vpop.permute.xlu1 %3537  ;;  %v3540_v22 = vpop.permute.xlu0 %3539 }
 0x490   :  { %v9484_v11 = vmax.f32 %v9360_v49, %v3538_v24  ;;  %v9487_v5 = vmax.f32 %v9179_v25, %v3540_v22 }
 0x492   :  { %3697 = vrot.lane.b32.xlu1 %v9484_v11, %s5942_s27  ;;  %3699 = vrot.lane.b32.xlu0 %v9487_v5, %s5942_s27 }
 0x493   :  { %v3542_v50 = vpop.permute.xlu1 %3541  ;;  %v3544_v53 = vpop.permute.xlu0 %3543 }
 0x494   :  { %v9494_v29 = vmax.f32 %v9185_v59, %v3542_v50  ;;  %v9497_v48 = vmax.f32 %v9244_v58, %v3544_v53 }
 0x496   :  { %3701 = vrot.lane.b32.xlu1 %v9494_v29, %s5942_s27  ;;  %3703 = vrot.lane.b32.xlu0 %v9497_v48, %s5942_s27 }
 0x497   :  { %v3546_v44 = vpop.permute.xlu1 %3545  ;;  %v3548_v10 = vpop.permute.xlu0 %3547 }
 0x498   :  { %v9504_v62 = vmax.f32 %v9248_v8, %v3546_v44  ;;  %v9507_v33 = vmax.f32 %v9260_v18, %v3548_v10 }
 0x49a   :  { %3705 = vrot.lane.b32.xlu1 %v9504_v62, %s5942_s27  ;;  %3707 = vrot.lane.b32.xlu0 %v9507_v33, %s5942_s27 }
 0x49b   :  { %v3550_v41 = vpop.permute.xlu1 %3549  ;;  %v3552_v13 = vpop.permute.xlu0 %3551 }
 0x49c   :  { %v9514_v37 = vmax.f32 %v9268_v39, %v3550_v41  ;;  %v9517_v12 = vmax.f32 %v9280_v0, %v3552_v13 }
 0x49e   :  { %3709 = vrot.lane.b32.xlu1 %v9514_v37, %s5942_s27  ;;  %3711 = vrot.lane.b32.xlu0 %v9517_v12, %s5942_s27 }
 0x49f   :  { %v3554_v52 = vpop.permute.xlu1 %3553  ;;  %v3556_v24 = vpop.permute.xlu0 %3555 }
 0x4a0   :  { %v9524_v22 = vmax.f32 %v9288_v60, %v3554_v52  ;;  %v9527_v50 = vmax.f32 %v9300_v63, %v3556_v24 }
 0x4a2   :  { %3713 = vrot.lane.b32.xlu1 %v9524_v22, %s5942_s27  ;;  %3715 = vrot.lane.b32.xlu0 %v9527_v50, %s5942_s27 }
 0x4a3   :  { %v3558_v53 = vpop.permute.xlu1 %3557  ;;  %v3560_v44 = vpop.permute.xlu0 %3559 }
 0x4a4   :  { %v9534_v10 = vmax.f32 %v9308_v38, %v3558_v53  ;;  %v9537_v41 = vmax.f32 %v9320_v30, %v3560_v44 }
 0x4a6   :  { %3717 = vrot.lane.b32.xlu1 %v9534_v10, %s5942_s27  ;;  %3719 = vrot.lane.b32.xlu0 %v9537_v41, %s5942_s27 }
 0x4a7   :  { %v3562_v13 = vpop.permute.xlu1 %3561  ;;  %v3564_v52 = vpop.permute.xlu0 %3563 }
 0x4a8   :  { %v9544_v24 = vmax.f32 %v9328_v20, %v3562_v13  ;;  %v9547_v60 = vmax.f32 %v9340_v56, %v3564_v52 }
 0x4aa   :  { %12613 = vst [vmem:[#allocation23_spill] sm:$0xff] %v9547_v60  ;;  %3721 = vrot.lane.b32.xlu1 %v9544_v24, %s5942_s27  ;;  %3723 = vrot.lane.b32.xlu0 %v9547_v60, %s5942_s27 }
 0x4ab   :  { %v3566_v53 = vpop.permute.xlu1 %3565  ;;  %v3568_v44 = vpop.permute.xlu0 %3567 }
 0x4ac   :  { %v9554_v38 = vmax.f32 %v9348_v61, %v3566_v53  ;;  %v9557_v39 = vmax.f32 %v9369_v43, %v3568_v44 }
 0x4ae   :  { %12614 = vst [vmem:[#allocation24_spill] sm:$0xff] %v9554_v38  ;;  %12615 = vst [vmem:[#allocation25_spill] sm:$0xff] %v9557_v39  ;;  %3725 = vrot.lane.b32.xlu1 %v9554_v38, %s5942_s27  ;;  %3727 = vrot.lane.b32.xlu0 %v9557_v39, %s5942_s27 }
 0x4af   :  { %v3570_v13 = vpop.permute.xlu1 %3569  ;;  %v9618_v53 = vpop.permute.xlu0 %3667 }
 0x4b0   :  { %v9564_v52 = vmax.f32 %v9378_v16, %v3570_v13  ;;  %12617 = vst [vmem:[#allocation12_spill] sm:$0xff] %v9618_v53 }
 0x4b2   :  { %12616 = vst [vmem:[#allocation26_spill] sm:$0xff] %v9564_v52  ;;  %3729 = vrot.lane.b32.xlu1 %v9564_v52, %s5942_s27  ;;  %3763 = vrot.lane.b32.xlu0 %v9407_v40, %s5943_s0  ;;  %s5951_s27 = smov 125  }
 0x4b3   :  { %v9624_v44 = vpop.permute.xlu1 %3669 }
 0x4b4   :  { %12618 = vst [vmem:[#allocation10_spill] sm:$0xff] %v9624_v44 }
 0x4b6   :  { %3765 = vrot.lane.b32.xlu1 %v9414_v42, %s5943_s0  ;;  %3767 = vrot.lane.b32.xlu0 %v9419_v57, %s5943_s0 }
 0x4ba   :  { %3769 = vrot.lane.b32.xlu1 %v9424_v3, %s5943_s0  ;;  %3771 = vrot.lane.b32.xlu0 %v9429_v2, %s5943_s0 }
 0x4be   :  { %3773 = vrot.lane.b32.xlu1 %v9434_v54, %s5943_s0  ;;  %3775 = vrot.lane.b32.xlu0 %v9439_v27, %s5943_s0 }
 0x4c2   :  { %3777 = vrot.lane.b32.xlu1 %v9444_v14, %s5943_s0  ;;  %3779 = vrot.lane.b32.xlu0 %v9449_v7, %s5943_s0 }
 0x4c6   :  { %3781 = vrot.lane.b32.xlu1 %v9454_v15, %s5943_s0  ;;  %3783 = vrot.lane.b32.xlu0 %v9459_v21, %s5943_s0 }
 0x4c7   :  { %v9626_v13 = vpop.permute.xlu0 %3671 }
 0x4c8   :  { %12619 = vst [vmem:[#allocation6_spill] sm:$0xff] %v9626_v13 }
 0x4ca   :  { %3785 = vrot.lane.b32.xlu1 %v9464_v47, %s5943_s0  ;;  %3787 = vrot.lane.b32.xlu0 %v9469_v28, %s5943_s0 }
 0x4cb   :  { %v9632_v16 = vpop.permute.xlu1 %3673 }
 0x4cc   :  { %12620 = vst [vmem:[#allocation30_spill] sm:$0xff] %v9632_v16 }
 0x4ce   :  { %3789 = vrot.lane.b32.xlu1 %v9474_v9, %s5943_s0  ;;  %3791 = vrot.lane.b32.xlu0 %v9479_v1, %s5943_s0 }
 0x4d2   :  { %3793 = vrot.lane.b32.xlu1 %v9484_v11, %s5943_s0  ;;  %3795 = vrot.lane.b32.xlu0 %v9487_v5, %s5943_s0 }
 0x4d3   :  { %v9634_v61 = vpop.permute.xlu0 %3675 }
 0x4d4   :  { %12621 = vst [vmem:[#allocation41_spill] sm:$0xff] %v9634_v61 }
 0x4d6   :  { %3797 = vrot.lane.b32.xlu1 %v9494_v29, %s5943_s0  ;;  %3799 = vrot.lane.b32.xlu0 %v9497_v48, %s5943_s0 }
 0x4d7   :  { %v9640_v53 = vpop.permute.xlu1 %3677 }
 0x4d8   :  { %12622 = vst [vmem:[#allocation32_spill] sm:$0xff] %v9640_v53 }
 0x4da   :  { %3801 = vrot.lane.b32.xlu1 %v9504_v62, %s5943_s0  ;;  %3803 = vrot.lane.b32.xlu0 %v9507_v33, %s5943_s0 }
 0x4db   :  { %v9642_v44 = vpop.permute.xlu0 %3679 }
 0x4dc   :  { %12623 = vst [vmem:[#allocation36_spill] sm:$0xff] %v9642_v44 }
 0x4de   :  { %3805 = vrot.lane.b32.xlu1 %v9514_v37, %s5943_s0  ;;  %3807 = vrot.lane.b32.xlu0 %v9517_v12, %s5943_s0 }
 0x4df   :  { %v9648_v16 = vpop.permute.xlu1 %3681 }
 0x4e0   :  { %12624 = vst [vmem:[#allocation20_spill] sm:$0xff] %v9648_v16 }
 0x4e2   :  { %3809 = vrot.lane.b32.xlu1 %v9524_v22, %s5943_s0  ;;  %3811 = vrot.lane.b32.xlu0 %v9527_v50, %s5943_s0 }
 0x4e3   :  { %v9650_v61 = vpop.permute.xlu0 %3683 }
 0x4e4   :  { %12625 = vst [vmem:[#allocation42_spill] sm:$0xff] %v9650_v61 }
 0x4e6   :  { %3813 = vrot.lane.b32.xlu1 %v9534_v10, %s5943_s0  ;;  %3815 = vrot.lane.b32.xlu0 %v9537_v41, %s5943_s0 }
 0x4e7   :  { %v9656_v53 = vpop.permute.xlu1 %3685 }
 0x4e8   :  { %12626 = vst [vmem:[#allocation9_spill] sm:$0xff] %v9656_v53 }
 0x4ea   :  { %3817 = vrot.lane.b32.xlu1 %v9544_v24, %s5943_s0  ;;  %3819 = vrot.lane.b32.xlu0 %v9547_v60, %s5943_s0 }
 0x4eb   :  { %v9658_v44 = vpop.permute.xlu0 %3687 }
 0x4ec   :  { %12627 = vst [vmem:[#allocation31_spill] sm:$0xff] %v9658_v44 }
 0x4ee   :  { %3821 = vrot.lane.b32.xlu1 %v9554_v38, %s5943_s0  ;;  %3823 = vrot.lane.b32.xlu0 %v9557_v39, %s5943_s0 }
 0x4ef   :  { %v9664_v13 = vpop.permute.xlu1 %3689 }
 0x4f0   :  { %12628 = vst [vmem:[#allocation38_spill] sm:$0xff] %v9664_v13 }
 0x4f2   :  { %3825 = vrot.lane.b32.xlu1 %v9564_v52, %s5943_s0  ;;  %3859 = vrot.lane.b32.xlu0 %v9407_v40, %s5951_s27  ;;  %s5952_s0 = smov 124  }
 0x4f3   :  { %v9666_v16 = vpop.permute.xlu0 %3691 }
 0x4f4   :  { %12629 = vst [vmem:[#allocation27_spill] sm:$0xff] %v9666_v16 }
 0x4f6   :  { %3861 = vrot.lane.b32.xlu1 %v9414_v42, %s5951_s27  ;;  %3863 = vrot.lane.b32.xlu0 %v9419_v57, %s5951_s27 }
 0x4f7   :  { %v9672_v61 = vpop.permute.xlu1 %3693 }
 0x4f8   :  { %12630 = vst [vmem:[#allocation14_spill] sm:$0xff] %v9672_v61 }
 0x4fa   :  { %3865 = vrot.lane.b32.xlu1 %v9424_v3, %s5951_s27  ;;  %3867 = vrot.lane.b32.xlu0 %v9429_v2, %s5951_s27 }
 0x4fe   :  { %3869 = vrot.lane.b32.xlu1 %v9434_v54, %s5951_s27  ;;  %3871 = vrot.lane.b32.xlu0 %v9439_v27, %s5951_s27 }
 0x500   :  { %v9674_v53 = vpop.permute.xlu0 %3695 }
 0x501   :  { %12631 = vst [vmem:[#allocation19_spill] sm:$0xff] %v9674_v53 }
 0x502   :  { %3873 = vrot.lane.b32.xlu1 %v9444_v14, %s5951_s27  ;;  %3875 = vrot.lane.b32.xlu0 %v9449_v7, %s5951_s27 }
 0x504   :  { %v9680_v44 = vpop.permute.xlu1 %3697  ;;  %v9682_v13 = vpop.permute.xlu0 %3699 }
 0x505   :  { %12632 = vst [vmem:[#allocation28_spill] sm:$0xff] %v9680_v44  ;;  %12633 = vst [vmem:[#allocation18_spill] sm:$0xff] %v9682_v13 }
 0x506   :  { %3877 = vrot.lane.b32.xlu1 %v9454_v15, %s5951_s27  ;;  %3879 = vrot.lane.b32.xlu0 %v9459_v21, %s5951_s27 }
 0x508   :  { %v9688_v16 = vpop.permute.xlu1 %3701  ;;  %v9690_v61 = vpop.permute.xlu0 %3703 }
 0x509   :  { %12634 = vst [vmem:[#allocation21_spill] sm:$0xff] %v9688_v16  ;;  %12635 = vst [vmem:[#allocation37_spill] sm:$0xff] %v9690_v61 }
 0x50a   :  { %3881 = vrot.lane.b32.xlu1 %v9464_v47, %s5951_s27  ;;  %3883 = vrot.lane.b32.xlu0 %v9469_v28, %s5951_s27 }
 0x50c   :  { %v9696_v53 = vpop.permute.xlu1 %3705  ;;  %v9698_v44 = vpop.permute.xlu0 %3707 }
 0x50d   :  { %12636 = vst [vmem:[#allocation8_spill] sm:$0xff] %v9696_v53  ;;  %12637 = vst [vmem:[#allocation7_spill] sm:$0xff] %v9698_v44 }
 0x50e   :  { %3885 = vrot.lane.b32.xlu1 %v9474_v9, %s5951_s27  ;;  %3887 = vrot.lane.b32.xlu0 %v9479_v1, %s5951_s27 }
 0x510   :  { %v9704_v13 = vpop.permute.xlu1 %3709  ;;  %v9706_v16 = vpop.permute.xlu0 %3711 }
 0x511   :  { %12638 = vst [vmem:[#allocation16_spill] sm:$0xff] %v9704_v13  ;;  %12639 = vst [vmem:[#allocation33_spill] sm:$0xff] %v9706_v16 }
 0x512   :  { %3889 = vrot.lane.b32.xlu1 %v9484_v11, %s5951_s27  ;;  %3891 = vrot.lane.b32.xlu0 %v9487_v5, %s5951_s27 }
 0x514   :  { %v9712_v61 = vpop.permute.xlu1 %3713  ;;  %v9714_v53 = vpop.permute.xlu0 %3715 }
 0x515   :  { %12640 = vst [vmem:[#allocation35_spill] sm:$0xff] %v9712_v61  ;;  %12641 = vst [vmem:[#allocation13_spill] sm:$0xff] %v9714_v53 }
 0x516   :  { %3893 = vrot.lane.b32.xlu1 %v9494_v29, %s5951_s27  ;;  %3895 = vrot.lane.b32.xlu0 %v9497_v48, %s5951_s27 }
 0x518   :  { %v9720_v44 = vpop.permute.xlu1 %3717  ;;  %v9722_v13 = vpop.permute.xlu0 %3719 }
 0x519   :  { %12642 = vst [vmem:[#allocation39_spill] sm:$0xff] %v9720_v44  ;;  %12643 = vst [vmem:[#allocation43_spill] sm:$0xff] %v9722_v13 }
 0x51a   :  { %3897 = vrot.lane.b32.xlu1 %v9504_v62, %s5951_s27  ;;  %3899 = vrot.lane.b32.xlu0 %v9507_v33, %s5951_s27 }
 0x51c   :  { %v9728_v16 = vpop.permute.xlu1 %3721  ;;  %v9730_v61 = vpop.permute.xlu0 %3723 }
 0x51d   :  { %12644 = vst [vmem:[#allocation44_spill] sm:$0xff] %v9728_v16  ;;  %12645 = vst [vmem:[#allocation45_spill] sm:$0xff] %v9730_v61 }
 0x51e   :  { %3901 = vrot.lane.b32.xlu1 %v9514_v37, %s5951_s27  ;;  %3903 = vrot.lane.b32.xlu0 %v9517_v12, %s5951_s27 }
 0x520   :  { %v9736_v53 = vpop.permute.xlu1 %3725  ;;  %v9738_v44 = vpop.permute.xlu0 %3727 }
 0x521   :  { %12646 = vst [vmem:[#allocation46_spill] sm:$0xff] %v9736_v53  ;;  %12647 = vst [vmem:[#allocation47_spill] sm:$0xff] %v9738_v44 }
 0x522   :  { %3905 = vrot.lane.b32.xlu1 %v9524_v22, %s5951_s27  ;;  %3907 = vrot.lane.b32.xlu0 %v9527_v50, %s5951_s27 }
 0x524   :  { %v9744_v13 = vpop.permute.xlu1 %3729  ;;  %v9746_v16 = vpop.permute.xlu0 %3763 }
 0x525   :  { %12648 = vst [vmem:[#allocation48_spill] sm:$0xff] %v9744_v13  ;;  %12649 = vst [vmem:[#allocation49_spill] sm:$0xff] %v9746_v16 }
 0x526   :  { %3909 = vrot.lane.b32.xlu1 %v9534_v10, %s5951_s27  ;;  %3911 = vrot.lane.b32.xlu0 %v9537_v41, %s5951_s27 }
 0x528   :  { %v9752_v61 = vpop.permute.xlu1 %3765  ;;  %v9754_v53 = vpop.permute.xlu0 %3767 }
 0x529   :  { %12650 = vst [vmem:[#allocation50_spill] sm:$0xff] %v9752_v61  ;;  %12651 = vst [vmem:[#allocation51_spill] sm:$0xff] %v9754_v53 }
 0x52a   :  { %3913 = vrot.lane.b32.xlu1 %v9544_v24, %s5951_s27  ;;  %3915 = vrot.lane.b32.xlu0 %v9547_v60, %s5951_s27 }
 0x52c   :  { %v9760_v44 = vpop.permute.xlu1 %3769  ;;  %v9762_v13 = vpop.permute.xlu0 %3771 }
 0x52d   :  { %12652 = vst [vmem:[#allocation52_spill] sm:$0xff] %v9760_v44  ;;  %12653 = vst [vmem:[#allocation53_spill] sm:$0xff] %v9762_v13 }
 0x52e   :  { %3917 = vrot.lane.b32.xlu1 %v9554_v38, %s5951_s27  ;;  %3919 = vrot.lane.b32.xlu0 %v9557_v39, %s5951_s27 }
 0x530   :  { %v9768_v16 = vpop.permute.xlu1 %3773  ;;  %v9770_v61 = vpop.permute.xlu0 %3775 }
 0x531   :  { %12654 = vst [vmem:[#allocation54_spill] sm:$0xff] %v9768_v16  ;;  %12655 = vst [vmem:[#allocation55_spill] sm:$0xff] %v9770_v61 }
 0x532   :  { %3921 = vrot.lane.b32.xlu1 %v9564_v52, %s5951_s27  ;;  %3955 = vrot.lane.b32.xlu0 %v9407_v40, %s5952_s0 }
 0x534   :  { %v9776_v44 = vpop.permute.xlu1 %3777  ;;  %v9778_v13 = vpop.permute.xlu0 %3779 }
 0x535   :  { %12656 = vst [vmem:[#allocation56_spill] sm:$0xff] %v9776_v44  ;;  %12657 = vst [vmem:[#allocation57_spill] sm:$0xff] %v9778_v13 }
 0x536   :  { %3957 = vrot.lane.b32.xlu1 %v9414_v42, %s5952_s0  ;;  %3959 = vrot.lane.b32.xlu0 %v9419_v57, %s5952_s0 }
 0x538   :  { %v9784_v16 = vpop.permute.xlu1 %3781  ;;  %v9786_v61 = vpop.permute.xlu0 %3783 }
 0x539   :  { %12658 = vst [vmem:[#allocation58_spill] sm:$0xff] %v9784_v16  ;;  %12659 = vst [vmem:[#allocation59_spill] sm:$0xff] %v9786_v61 }
 0x53a   :  { %3961 = vrot.lane.b32.xlu1 %v9424_v3, %s5952_s0  ;;  %3963 = vrot.lane.b32.xlu0 %v9429_v2, %s5952_s0 }
 0x53c   :  { %v9792_v53 = vpop.permute.xlu1 %3785  ;;  %v9794_v44 = vpop.permute.xlu0 %3787 }
 0x53d   :  { %12660 = vst [vmem:[#allocation60_spill] sm:$0xff] %v9792_v53  ;;  %12661 = vst [vmem:[#allocation61_spill] sm:$0xff] %v9794_v44 }
 0x53e   :  { %3965 = vrot.lane.b32.xlu1 %v9434_v54, %s5952_s0  ;;  %3967 = vrot.lane.b32.xlu0 %v9439_v27, %s5952_s0 }
 0x540   :  { %v9800_v13 = vpop.permute.xlu1 %3789  ;;  %v9802_v16 = vpop.permute.xlu0 %3791 }
 0x541   :  { %12662 = vst [vmem:[#allocation62_spill] sm:$0xff] %v9800_v13  ;;  %12663 = vst [vmem:[#allocation63_spill] sm:$0xff] %v9802_v16 }
 0x542   :  { %3969 = vrot.lane.b32.xlu1 %v9444_v14, %s5952_s0  ;;  %3971 = vrot.lane.b32.xlu0 %v9449_v7, %s5952_s0 }
 0x544   :  { %v9808_v61 = vpop.permute.xlu1 %3793  ;;  %v9810_v53 = vpop.permute.xlu0 %3795 }
 0x545   :  { %12664 = vst [vmem:[#allocation64_spill] sm:$0xff] %v9808_v61  ;;  %12665 = vst [vmem:[#allocation65_spill] sm:$0xff] %v9810_v53 }
 0x546   :  { %3973 = vrot.lane.b32.xlu1 %v9454_v15, %s5952_s0  ;;  %3975 = vrot.lane.b32.xlu0 %v9459_v21, %s5952_s0 }
 0x548   :  { %v9816_v44 = vpop.permute.xlu1 %3797  ;;  %v9818_v13 = vpop.permute.xlu0 %3799 }
 0x549   :  { %12666 = vst [vmem:[#allocation66_spill] sm:$0xff] %v9816_v44  ;;  %12667 = vst [vmem:[#allocation67_spill] sm:$0xff] %v9818_v13 }
 0x54a   :  { %3977 = vrot.lane.b32.xlu1 %v9464_v47, %s5952_s0  ;;  %3979 = vrot.lane.b32.xlu0 %v9469_v28, %s5952_s0 }
 0x54c   :  { %v9824_v16 = vpop.permute.xlu1 %3801  ;;  %v9826_v61 = vpop.permute.xlu0 %3803 }
 0x54d   :  { %12668 = vst [vmem:[#allocation68_spill] sm:$0xff] %v9824_v16  ;;  %12669 = vst [vmem:[#allocation69_spill] sm:$0xff] %v9826_v61 }
 0x54e   :  { %3981 = vrot.lane.b32.xlu1 %v9474_v9, %s5952_s0  ;;  %3983 = vrot.lane.b32.xlu0 %v9479_v1, %s5952_s0 }
 0x550   :  { %v9832_v53 = vpop.permute.xlu1 %3805  ;;  %v9834_v44 = vpop.permute.xlu0 %3807 }
 0x551   :  { %12670 = vst [vmem:[#allocation70_spill] sm:$0xff] %v9832_v53  ;;  %12671 = vst [vmem:[#allocation71_spill] sm:$0xff] %v9834_v44 }
 0x552   :  { %3985 = vrot.lane.b32.xlu1 %v9484_v11, %s5952_s0  ;;  %3987 = vrot.lane.b32.xlu0 %v9487_v5, %s5952_s0 }
 0x554   :  { %v9840_v13 = vpop.permute.xlu1 %3809  ;;  %v9842_v16 = vpop.permute.xlu0 %3811 }
 0x555   :  { %12672 = vst [vmem:[#allocation72_spill] sm:$0xff] %v9840_v13  ;;  %12673 = vst [vmem:[#allocation73_spill] sm:$0xff] %v9842_v16 }
 0x556   :  { %3989 = vrot.lane.b32.xlu1 %v9494_v29, %s5952_s0  ;;  %3991 = vrot.lane.b32.xlu0 %v9497_v48, %s5952_s0 }
 0x558   :  { %v9848_v61 = vpop.permute.xlu1 %3813  ;;  %v9850_v53 = vpop.permute.xlu0 %3815 }
 0x559   :  { %12674 = vst [vmem:[#allocation74_spill] sm:$0xff] %v9848_v61  ;;  %12675 = vst [vmem:[#allocation75_spill] sm:$0xff] %v9850_v53 }
 0x55a   :  { %3993 = vrot.lane.b32.xlu1 %v9504_v62, %s5952_s0  ;;  %3995 = vrot.lane.b32.xlu0 %v9507_v33, %s5952_s0 }
 0x55c   :  { %v9856_v44 = vpop.permute.xlu1 %3817  ;;  %v9858_v13 = vpop.permute.xlu0 %3819 }
 0x55d   :  { %12676 = vst [vmem:[#allocation76_spill] sm:$0xff] %v9856_v44  ;;  %12677 = vst [vmem:[#allocation77_spill] sm:$0xff] %v9858_v13 }
 0x55e   :  { %3997 = vrot.lane.b32.xlu1 %v9514_v37, %s5952_s0  ;;  %3999 = vrot.lane.b32.xlu0 %v9517_v12, %s5952_s0 }
 0x560   :  { %v9864_v16 = vpop.permute.xlu1 %3821  ;;  %v9866_v61 = vpop.permute.xlu0 %3823 }
 0x561   :  { %12678 = vst [vmem:[#allocation78_spill] sm:$0xff] %v9864_v16  ;;  %12679 = vst [vmem:[#allocation79_spill] sm:$0xff] %v9866_v61 }
 0x562   :  { %4001 = vrot.lane.b32.xlu1 %v9524_v22, %s5952_s0  ;;  %4003 = vrot.lane.b32.xlu0 %v9527_v50, %s5952_s0 }
 0x564   :  { %v9872_v53 = vpop.permute.xlu1 %3825  ;;  %v9874_v44 = vpop.permute.xlu0 %3859 }
 0x565   :  { %12680 = vst [vmem:[#allocation80_spill] sm:$0xff] %v9872_v53  ;;  %12681 = vst [vmem:[#allocation81_spill] sm:$0xff] %v9874_v44 }
 0x566   :  { %4005 = vrot.lane.b32.xlu1 %v9534_v10, %s5952_s0  ;;  %4007 = vrot.lane.b32.xlu0 %v9537_v41, %s5952_s0 }
 0x568   :  { %v9880_v13 = vpop.permute.xlu1 %3861  ;;  %v9882_v16 = vpop.permute.xlu0 %3863 }
 0x569   :  { %12682 = vst [vmem:[#allocation82_spill] sm:$0xff] %v9880_v13  ;;  %12683 = vst [vmem:[#allocation83_spill] sm:$0xff] %v9882_v16 }
 0x56a   :  { %4009 = vrot.lane.b32.xlu1 %v9544_v24, %s5952_s0  ;;  %4011 = vrot.lane.b32.xlu0 %v9547_v60, %s5952_s0 }
 0x56c   :  { %v9888_v61 = vpop.permute.xlu1 %3865  ;;  %v9890_v53 = vpop.permute.xlu0 %3867 }
 0x56d   :  { %12684 = vst [vmem:[#allocation84_spill] sm:$0xff] %v9888_v61  ;;  %12685 = vst [vmem:[#allocation85_spill] sm:$0xff] %v9890_v53 }
 0x56e   :  { %4013 = vrot.lane.b32.xlu1 %v9554_v38, %s5952_s0  ;;  %4015 = vrot.lane.b32.xlu0 %v9557_v39, %s5952_s0 }
 0x570   :  { %v9896_v44 = vpop.permute.xlu1 %3869  ;;  %v9898_v13 = vpop.permute.xlu0 %3871 }
 0x571   :  { %12686 = vst [vmem:[#allocation86_spill] sm:$0xff] %v9896_v44  ;;  %12687 = vst [vmem:[#allocation87_spill] sm:$0xff] %v9898_v13 }
 0x572   :  { %4017 = vrot.lane.b32.xlu1 %v9564_v52, %s5952_s0  ;;  %4051 = vrot.lane.b32.xlu0 %v9407_v40, %s5953_s20 }
 0x574   :  { %v9904_v61 = vpop.permute.xlu1 %3873  ;;  %v9906_v53 = vpop.permute.xlu0 %3875 }
 0x575   :  { %12688 = vst [vmem:[#allocation88_spill] sm:$0xff] %v9904_v61  ;;  %12689 = vst [vmem:[#allocation89_spill] sm:$0xff] %v9906_v53 }
 0x576   :  { %4053 = vrot.lane.b32.xlu1 %v9414_v42, %s5953_s20  ;;  %4055 = vrot.lane.b32.xlu0 %v9419_v57, %s5953_s20 }
 0x578   :  { %v9912_v44 = vpop.permute.xlu1 %3877  ;;  %v9914_v13 = vpop.permute.xlu0 %3879 }
 0x579   :  { %12690 = vst [vmem:[#allocation90_spill] sm:$0xff] %v9912_v44  ;;  %12691 = vst [vmem:[#allocation91_spill] sm:$0xff] %v9914_v13 }
 0x57a   :  { %4057 = vrot.lane.b32.xlu1 %v9424_v3, %s5953_s20  ;;  %4059 = vrot.lane.b32.xlu0 %v9429_v2, %s5953_s20 }
 0x57c   :  { %v9920_v16 = vpop.permute.xlu1 %3881  ;;  %v9922_v61 = vpop.permute.xlu0 %3883 }
 0x57d   :  { %12692 = vst [vmem:[#allocation92_spill] sm:$0xff] %v9920_v16  ;;  %12693 = vst [vmem:[#allocation93_spill] sm:$0xff] %v9922_v61 }
 0x57e   :  { %4061 = vrot.lane.b32.xlu1 %v9434_v54, %s5953_s20  ;;  %4063 = vrot.lane.b32.xlu0 %v9439_v27, %s5953_s20 }
 0x580   :  { %v9928_v53 = vpop.permute.xlu1 %3885  ;;  %v9930_v44 = vpop.permute.xlu0 %3887 }
 0x581   :  { %12694 = vst [vmem:[#allocation94_spill] sm:$0xff] %v9928_v53  ;;  %12695 = vst [vmem:[#allocation95_spill] sm:$0xff] %v9930_v44 }
 0x582   :  { %4065 = vrot.lane.b32.xlu1 %v9444_v14, %s5953_s20  ;;  %4067 = vrot.lane.b32.xlu0 %v9449_v7, %s5953_s20 }
 0x584   :  { %v9936_v13 = vpop.permute.xlu1 %3889  ;;  %v9938_v16 = vpop.permute.xlu0 %3891 }
 0x585   :  { %12696 = vst [vmem:[#allocation96_spill] sm:$0xff] %v9936_v13  ;;  %12697 = vst [vmem:[#allocation97_spill] sm:$0xff] %v9938_v16 }
 0x586   :  { %4069 = vrot.lane.b32.xlu1 %v9454_v15, %s5953_s20  ;;  %4071 = vrot.lane.b32.xlu0 %v9459_v21, %s5953_s20 }
 0x588   :  { %v9944_v61 = vpop.permute.xlu1 %3893  ;;  %v9946_v53 = vpop.permute.xlu0 %3895 }
 0x589   :  { %12698 = vst [vmem:[#allocation98_spill] sm:$0xff] %v9944_v61  ;;  %12699 = vst [vmem:[#allocation99_spill] sm:$0xff] %v9946_v53 }
 0x58a   :  { %4073 = vrot.lane.b32.xlu1 %v9464_v47, %s5953_s20  ;;  %4075 = vrot.lane.b32.xlu0 %v9469_v28, %s5953_s20 }
 0x58c   :  { %v9952_v44 = vpop.permute.xlu1 %3897  ;;  %v9954_v13 = vpop.permute.xlu0 %3899 }
 0x58d   :  { %12700 = vst [vmem:[#allocation100_spill] sm:$0xff] %v9952_v44  ;;  %12701 = vst [vmem:[#allocation101_spill] sm:$0xff] %v9954_v13 }
 0x58e   :  { %4077 = vrot.lane.b32.xlu1 %v9474_v9, %s5953_s20  ;;  %4079 = vrot.lane.b32.xlu0 %v9479_v1, %s5953_s20 }
 0x590   :  { %v9960_v16 = vpop.permute.xlu1 %3901  ;;  %v9962_v61 = vpop.permute.xlu0 %3903 }
 0x591   :  { %12702 = vst [vmem:[#allocation102_spill] sm:$0xff] %v9960_v16  ;;  %12703 = vst [vmem:[#allocation103_spill] sm:$0xff] %v9962_v61 }
 0x592   :  { %4081 = vrot.lane.b32.xlu1 %v9484_v11, %s5953_s20  ;;  %4083 = vrot.lane.b32.xlu0 %v9487_v5, %s5953_s20 }
 0x594   :  { %v9968_v53 = vpop.permute.xlu1 %3905  ;;  %v9970_v44 = vpop.permute.xlu0 %3907 }
 0x595   :  { %12704 = vst [vmem:[#allocation104_spill] sm:$0xff] %v9968_v53  ;;  %12705 = vst [vmem:[#allocation105_spill] sm:$0xff] %v9970_v44 }
 0x596   :  { %4085 = vrot.lane.b32.xlu1 %v9494_v29, %s5953_s20  ;;  %4087 = vrot.lane.b32.xlu0 %v9497_v48, %s5953_s20 }
 0x598   :  { %v9976_v13 = vpop.permute.xlu1 %3909  ;;  %v9978_v16 = vpop.permute.xlu0 %3911 }
 0x599   :  { %12706 = vst [vmem:[#allocation106_spill] sm:$0xff] %v9976_v13  ;;  %12707 = vst [vmem:[#allocation107_spill] sm:$0xff] %v9978_v16 }
 0x59a   :  { %4089 = vrot.lane.b32.xlu1 %v9504_v62, %s5953_s20  ;;  %4091 = vrot.lane.b32.xlu0 %v9507_v33, %s5953_s20 }
 0x59c   :  { %v9984_v61 = vpop.permute.xlu1 %3913  ;;  %v9986_v53 = vpop.permute.xlu0 %3915 }
 0x59d   :  { %12708 = vst [vmem:[#allocation108_spill] sm:$0xff] %v9984_v61  ;;  %12709 = vst [vmem:[#allocation109_spill] sm:$0xff] %v9986_v53 }
 0x59e   :  { %4093 = vrot.lane.b32.xlu1 %v9514_v37, %s5953_s20  ;;  %4095 = vrot.lane.b32.xlu0 %v9517_v12, %s5953_s20 }
 0x5a0   :  { %v9992_v44 = vpop.permute.xlu1 %3917  ;;  %v9994_v13 = vpop.permute.xlu0 %3919 }
 0x5a1   :  { %12710 = vst [vmem:[#allocation110_spill] sm:$0xff] %v9992_v44  ;;  %12711 = vst [vmem:[#allocation111_spill] sm:$0xff] %v9994_v13 }
 0x5a2   :  { %4097 = vrot.lane.b32.xlu1 %v9524_v22, %s5953_s20  ;;  %4099 = vrot.lane.b32.xlu0 %v9527_v50, %s5953_s20 }
 0x5a4   :  { %v10000_v16 = vpop.permute.xlu1 %3921  ;;  %v10002_v61 = vpop.permute.xlu0 %3955 }
 0x5a5   :  { %12712 = vst [vmem:[#allocation112_spill] sm:$0xff] %v10000_v16  ;;  %12713 = vst [vmem:[#allocation113_spill] sm:$0xff] %v10002_v61 }
 0x5a6   :  { %4101 = vrot.lane.b32.xlu1 %v9534_v10, %s5953_s20  ;;  %4103 = vrot.lane.b32.xlu0 %v9537_v41, %s5953_s20 }
 0x5a8   :  { %v10008_v53 = vpop.permute.xlu1 %3957  ;;  %v10010_v44 = vpop.permute.xlu0 %3959 }
 0x5a9   :  { %12714 = vst [vmem:[#allocation114_spill] sm:$0xff] %v10008_v53  ;;  %12715 = vst [vmem:[#allocation115_spill] sm:$0xff] %v10010_v44 }
 0x5aa   :  { %4105 = vrot.lane.b32.xlu1 %v9544_v24, %s5953_s20  ;;  %4107 = vrot.lane.b32.xlu0 %v9547_v60, %s5953_s20 }
 0x5ac   :  { %v10016_v13 = vpop.permute.xlu1 %3961  ;;  %v10018_v16 = vpop.permute.xlu0 %3963 }
 0x5ad   :  { %12716 = vst [vmem:[#allocation116_spill] sm:$0xff] %v10016_v13  ;;  %12717 = vst [vmem:[#allocation117_spill] sm:$0xff] %v10018_v16 }
 0x5ae   :  { %4111 = vrot.lane.b32.xlu1 %v9557_v39, %s5953_s20  ;;  %4147 = vrot.lane.b32.xlu0 %v9407_v40, %s5954_s21 }
 0x5b0   :  { %v10024_v53 = vpop.permute.xlu1 %3965  ;;  %v10026_v44 = vpop.permute.xlu0 %3967 }
 0x5b1   :  { %12718 = vst [vmem:[#allocation118_spill] sm:$0xff] %v10024_v53  ;;  %12719 = vst [vmem:[#allocation119_spill] sm:$0xff] %v10026_v44 }
 0x5b2   :  { %4151 = vrot.lane.b32.xlu1 %v9419_v57, %s5954_s21  ;;  %4155 = vrot.lane.b32.xlu0 %v9429_v2, %s5954_s21 }
 0x5b4   :  { %v10032_v13 = vpop.permute.xlu1 %3969  ;;  %v10034_v16 = vpop.permute.xlu0 %3971 }
 0x5b5   :  { %12720 = vst [vmem:[#allocation120_spill] sm:$0xff] %v10032_v13  ;;  %12721 = vst [vmem:[#allocation121_spill] sm:$0xff] %v10034_v16 }
 0x5b6   :  { %4159 = vrot.lane.b32.xlu1 %v9439_v27, %s5954_s21  ;;  %4163 = vrot.lane.b32.xlu0 %v9449_v7, %s5954_s21 }
 0x5b8   :  { %v10040_v61 = vpop.permute.xlu1 %3973  ;;  %v10042_v53 = vpop.permute.xlu0 %3975 }
 0x5b9   :  { %12722 = vst [vmem:[#allocation122_spill] sm:$0xff] %v10040_v61  ;;  %12723 = vst [vmem:[#allocation123_spill] sm:$0xff] %v10042_v53 }
 0x5ba   :  { %4167 = vrot.lane.b32.xlu1 %v9459_v21, %s5954_s21  ;;  %4171 = vrot.lane.b32.xlu0 %v9469_v28, %s5954_s21 }
 0x5bc   :  { %v10048_v44 = vpop.permute.xlu1 %3977  ;;  %v10050_v13 = vpop.permute.xlu0 %3979 }
 0x5bd   :  { %12724 = vst [vmem:[#allocation124_spill] sm:$0xff] %v10048_v44  ;;  %12725 = vst [vmem:[#allocation125_spill] sm:$0xff] %v10050_v13 }
 0x5be   :  { %4175 = vrot.lane.b32.xlu1 %v9479_v1, %s5954_s21  ;;  %4179 = vrot.lane.b32.xlu0 %v9487_v5, %s5954_s21 }
 0x5c0   :  { %v10056_v16 = vpop.permute.xlu1 %3981  ;;  %v10058_v61 = vpop.permute.xlu0 %3983 }
 0x5c1   :  { %12726 = vst [vmem:[#allocation126_spill] sm:$0xff] %v10056_v16  ;;  %12727 = vst [vmem:[#allocation127_spill] sm:$0xff] %v10058_v61 }
 0x5c2   :  { %4183 = vrot.lane.b32.xlu1 %v9497_v48, %s5954_s21  ;;  %4187 = vrot.lane.b32.xlu0 %v9507_v33, %s5954_s21 }
 0x5c4   :  { %v10064_v53 = vpop.permute.xlu1 %3985  ;;  %v10066_v44 = vpop.permute.xlu0 %3987 }
 0x5c5   :  { %12728 = vst [vmem:[#allocation128_spill] sm:$0xff] %v10064_v53  ;;  %12729 = vst [vmem:[#allocation129_spill] sm:$0xff] %v10066_v44 }
 0x5c6   :  { %4191 = vrot.lane.b32.xlu1 %v9517_v12, %s5954_s21  ;;  %4195 = vrot.lane.b32.xlu0 %v9527_v50, %s5954_s21 }
 0x5c8   :  { %v10072_v13 = vpop.permute.xlu1 %3989  ;;  %v10074_v16 = vpop.permute.xlu0 %3991 }
 0x5c9   :  { %12730 = vst [vmem:[#allocation130_spill] sm:$0xff] %v10072_v13  ;;  %12731 = vst [vmem:[#allocation131_spill] sm:$0xff] %v10074_v16 }
 0x5ca   :  { %4199 = vrot.lane.b32.xlu1 %v9537_v41, %s5954_s21  ;;  %4203 = vrot.lane.b32.xlu0 %v9547_v60, %s5954_s21 }
 0x5cc   :  { %v10080_v61 = vpop.permute.xlu1 %3993  ;;  %v10082_v53 = vpop.permute.xlu0 %3995 }
 0x5cd   :  { %12732 = vst [vmem:[#allocation132_spill] sm:$0xff] %v10080_v61  ;;  %12733 = vst [vmem:[#allocation133_spill] sm:$0xff] %v10082_v53 }
 0x5ce   :  { %4207 = vrot.lane.b32.xlu1 %v9557_v39, %s5954_s21  ;;  %4109 = vrot.lane.b32.xlu0 %v9554_v38, %s5953_s20 }
 0x5d0   :  { %v10088_v44 = vpop.permute.xlu1 %3997  ;;  %v10090_v13 = vpop.permute.xlu0 %3999 }
 0x5d1   :  { %12734 = vst [vmem:[#allocation134_spill] sm:$0xff] %v10088_v44  ;;  %12735 = vst [vmem:[#allocation135_spill] sm:$0xff] %v10090_v13 }
 0x5d2   :  { %4113 = vrot.lane.b32.xlu1 %v9564_v52, %s5953_s20  ;;  %4243 = vrot.lane.b32.xlu0 %v9162_v26, %s5955_s22 }
 0x5d4   :  { %v10096_v61 = vpop.permute.xlu1 %4001  ;;  %v10098_v53 = vpop.permute.xlu0 %4003 }
 0x5d5   :  { %12736 = vst [vmem:[#allocation136_spill] sm:$0xff] %v10096_v61  ;;  %12737 = vst [vmem:[#allocation137_spill] sm:$0xff] %v10098_v53 }
 0x5d6   :  { %4247 = vrot.lane.b32.xlu1 %v9232_v34, %s5955_s22  ;;  %4251 = vrot.lane.b32.xlu0 %v9250_v35, %s5955_s22 }
 0x5d8   :  { %v10104_v44 = vpop.permute.xlu1 %4005  ;;  %v10106_v13 = vpop.permute.xlu0 %4007 }
 0x5d9   :  { %12738 = vst [vmem:[#allocation138_spill] sm:$0xff] %v10104_v44  ;;  %12739 = vst [vmem:[#allocation139_spill] sm:$0xff] %v10106_v13 }
 0x5da   :  { %4255 = vrot.lane.b32.xlu1 %v9270_v31, %s5955_s22  ;;  %4259 = vrot.lane.b32.xlu0 %v9290_v19, %s5955_s22 }
 0x5dc   :  { %v10112_v16 = vpop.permute.xlu1 %4009  ;;  %v10114_v61 = vpop.permute.xlu0 %4011 }
 0x5dd   :  { %12740 = vst [vmem:[#allocation140_spill] sm:$0xff] %v10112_v16  ;;  %12741 = vst [vmem:[#allocation141_spill] sm:$0xff] %v10114_v61 }
 0x5de   :  { %4263 = vrot.lane.b32.xlu1 %v9310_v36, %s5955_s22  ;;  %4267 = vrot.lane.b32.xlu0 %v9330_v23, %s5955_s22 }
 0x5e0   :  { %v10120_v53 = vpop.permute.xlu1 %4013  ;;  %v10122_v44 = vpop.permute.xlu0 %4015 }
 0x5e1   :  { %12742 = vst [vmem:[#allocation142_spill] sm:$0xff] %v10120_v53  ;;  %12743 = vst [vmem:[#allocation143_spill] sm:$0xff] %v10122_v44 }
 0x5e2   :  { %4271 = vrot.lane.b32.xlu1 %v9353_v51, %s5955_s22  ;;  %4275 = vrot.lane.b32.xlu0 %v9179_v25, %s5955_s22 }
 0x5e4   :  { %v10128_v13 = vpop.permute.xlu1 %4017  ;;  %v10130_v16 = vpop.permute.xlu0 %4051 }
 0x5e5   :  { %12744 = vst [vmem:[#allocation144_spill] sm:$0xff] %v10128_v13  ;;  %12745 = vst [vmem:[#allocation145_spill] sm:$0xff] %v10130_v16 }
 0x5e6   :  { %4279 = vrot.lane.b32.xlu1 %v9244_v58, %s5955_s22  ;;  %4283 = vrot.lane.b32.xlu0 %v9260_v18, %s5955_s22 }
 0x5e8   :  { %v10136_v61 = vpop.permute.xlu1 %4053  ;;  %v10138_v53 = vpop.permute.xlu0 %4055 }
 0x5e9   :  { %12746 = vst [vmem:[#allocation146_spill] sm:$0xff] %v10136_v61  ;;  %12747 = vst [vmem:[#allocation147_spill] sm:$0xff] %v10138_v53 }
 0x5ea   :  { %4287 = vrot.lane.b32.xlu1 %v9280_v0, %s5955_s22  ;;  %4291 = vrot.lane.b32.xlu0 %v9300_v63, %s5955_s22 }
 0x5ec   :  { %v10144_v44 = vpop.permute.xlu1 %4057  ;;  %v10146_v13 = vpop.permute.xlu0 %4059 }
 0x5ed   :  { %12748 = vst [vmem:[#allocation148_spill] sm:$0xff] %v10144_v44  ;;  %12749 = vst [vmem:[#allocation149_spill] sm:$0xff] %v10146_v13 }
 0x5ee   :  { %4295 = vrot.lane.b32.xlu1 %v9320_v30, %s5955_s22  ;;  %4299 = vrot.lane.b32.xlu0 %v9340_v56, %s5955_s22 }
 0x5f0   :  { %v10152_v16 = vpop.permute.xlu1 %4061  ;;  %v10154_v61 = vpop.permute.xlu0 %4063 }
 0x5f1   :  { %12750 = vst [vmem:[#allocation150_spill] sm:$0xff] %v10152_v16  ;;  %12751 = vst [vmem:[#allocation151_spill] sm:$0xff] %v10154_v61 }
 0x5f2   :  { %4303 = vrot.lane.b32.xlu1 %v9369_v43, %s5955_s22  ;;  %4149 = vrot.lane.b32.xlu0 %v9414_v42, %s5954_s21  ;;  %v12782_v43 = vld [vmem:[#allocation17_spill] sm:$0xff] }
 0x5f4   :  { %v10160_v53 = vpop.permute.xlu1 %4065  ;;  %v10162_v44 = vpop.permute.xlu0 %4067 }
 0x5f5   :  { %12752 = vst [vmem:[#allocation152_spill] sm:$0xff] %v10160_v53  ;;  %12753 = vst [vmem:[#allocation153_spill] sm:$0xff] %v10162_v44 }
 0x5f6   :  { %4153 = vrot.lane.b32.xlu1 %v9424_v3, %s5954_s21  ;;  %4157 = vrot.lane.b32.xlu0 %v9434_v54, %s5954_s21 }
 0x5f8   :  { %v10168_v13 = vpop.permute.xlu1 %4069  ;;  %v10170_v16 = vpop.permute.xlu0 %4071 }
 0x5f9   :  { %12754 = vst [vmem:[#allocation154_spill] sm:$0xff] %v10168_v13  ;;  %12755 = vst [vmem:[#allocation155_spill] sm:$0xff] %v10170_v16 }
 0x5fa   :  { %4161 = vrot.lane.b32.xlu1 %v9444_v14, %s5954_s21  ;;  %4165 = vrot.lane.b32.xlu0 %v9454_v15, %s5954_s21 }
 0x5fc   :  { %v10176_v61 = vpop.permute.xlu1 %4073  ;;  %v10178_v53 = vpop.permute.xlu0 %4075 }
 0x5fd   :  { %12756 = vst [vmem:[#allocation156_spill] sm:$0xff] %v10176_v61  ;;  %12757 = vst [vmem:[#allocation157_spill] sm:$0xff] %v10178_v53 }
 0x5fe   :  { %4169 = vrot.lane.b32.xlu1 %v9464_v47, %s5954_s21  ;;  %4173 = vrot.lane.b32.xlu0 %v9474_v9, %s5954_s21 }
 0x600   :  { %v10184_v44 = vpop.permute.xlu1 %4077  ;;  %v10186_v13 = vpop.permute.xlu0 %4079 }
 0x601   :  { %12758 = vst [vmem:[#allocation158_spill] sm:$0xff] %v10184_v44  ;;  %12759 = vst [vmem:[#allocation159_spill] sm:$0xff] %v10186_v13 }
 0x602   :  { %4177 = vrot.lane.b32.xlu1 %v9484_v11, %s5954_s21  ;;  %4181 = vrot.lane.b32.xlu0 %v9494_v29, %s5954_s21 }
 0x604   :  { %v10192_v16 = vpop.permute.xlu1 %4081  ;;  %v10194_v61 = vpop.permute.xlu0 %4083 }
 0x605   :  { %12760 = vst [vmem:[#allocation160_spill] sm:$0xff] %v10192_v16  ;;  %12761 = vst [vmem:[#allocation161_spill] sm:$0xff] %v10194_v61 }
 0x606   :  { %4185 = vrot.lane.b32.xlu1 %v9504_v62, %s5954_s21  ;;  %4189 = vrot.lane.b32.xlu0 %v9514_v37, %s5954_s21 }
 0x608   :  { %v10200_v53 = vpop.permute.xlu1 %4085  ;;  %v10202_v44 = vpop.permute.xlu0 %4087 }
 0x609   :  { %12762 = vst [vmem:[#allocation162_spill] sm:$0xff] %v10200_v53  ;;  %12763 = vst [vmem:[#allocation163_spill] sm:$0xff] %v10202_v44 }
 0x60a   :  { %4193 = vrot.lane.b32.xlu1 %v9524_v22, %s5954_s21  ;;  %4197 = vrot.lane.b32.xlu0 %v9534_v10, %s5954_s21 }
 0x60c   :  { %v10208_v13 = vpop.permute.xlu1 %4089  ;;  %v10210_v16 = vpop.permute.xlu0 %4091 }
 0x60d   :  { %12764 = vst [vmem:[#allocation164_spill] sm:$0xff] %v10208_v13  ;;  %12765 = vst [vmem:[#allocation165_spill] sm:$0xff] %v10210_v16 }
 0x60e   :  { %4201 = vrot.lane.b32.xlu1 %v9544_v24, %s5954_s21  ;;  %4205 = vrot.lane.b32.xlu0 %v9554_v38, %s5954_s21 }
 0x610   :  { %v10216_v61 = vpop.permute.xlu1 %4093  ;;  %v10218_v53 = vpop.permute.xlu0 %4095 }
 0x611   :  { %12766 = vst [vmem:[#allocation166_spill] sm:$0xff] %v10216_v61  ;;  %12767 = vst [vmem:[#allocation167_spill] sm:$0xff] %v10218_v53 }
 0x612   :  { %4209 = vrot.lane.b32.xlu1 %v9564_v52, %s5954_s21  ;;  %4245 = vrot.lane.b32.xlu0 %v9173_v46, %s5955_s22 }
 0x614   :  { %v10224_v44 = vpop.permute.xlu1 %4097  ;;  %v10226_v13 = vpop.permute.xlu0 %4099 }
 0x615   :  { %12768 = vst [vmem:[#allocation168_spill] sm:$0xff] %v10224_v44  ;;  %12769 = vst [vmem:[#allocation169_spill] sm:$0xff] %v10226_v13 }
 0x616   :  { %4249 = vrot.lane.b32.xlu1 %v9238_v4, %s5955_s22  ;;  %4253 = vrot.lane.b32.xlu0 %v9258_v45, %s5955_s22 }
 0x618   :  { %v10232_v16 = vpop.permute.xlu1 %4101  ;;  %v10234_v61 = vpop.permute.xlu0 %4103 }
 0x619   :  { %12770 = vst [vmem:[#allocation170_spill] sm:$0xff] %v10232_v16  ;;  %12771 = vst [vmem:[#allocation171_spill] sm:$0xff] %v10234_v61 }
 0x61a   :  { %4257 = vrot.lane.b32.xlu1 %v9278_v6, %s5955_s22  ;;  %4261 = vrot.lane.b32.xlu0 %v9298_v32, %s5955_s22 }
 0x61c   :  { %v10240_v53 = vpop.permute.xlu1 %4105  ;;  %v10242_v44 = vpop.permute.xlu0 %4107 }
 0x61d   :  { %12772 = vst [vmem:[#allocation172_spill] sm:$0xff] %v10240_v53  ;;  %12773 = vst [vmem:[#allocation173_spill] sm:$0xff] %v10242_v44  ;;  %v12778_v44 = vld [vmem:[#allocation29_spill] sm:$0xff] }
 0x61e   :  { %4265 = vrot.lane.b32.xlu1 %v9318_v55, %s5955_s22  ;;  %4269 = vrot.lane.b32.xlu0 %v9338_v17, %s5955_s22 }
 0x620   :  { %v10248_v13 = vpop.permute.xlu1 %4111  ;;  %v10250_v16 = vpop.permute.xlu0 %4147 }
 0x621   :  { %12774 = vst [vmem:[#allocation174_spill] sm:$0xff] %v10248_v13  ;;  %12775 = vst [vmem:[#allocation175_spill] sm:$0xff] %v10250_v16  ;;  %v12781_v16 = vld [vmem:[#allocation40_spill] sm:$0xff] }
 0x622   :  { %4273 = vrot.lane.b32.xlu1 %v9360_v49, %s5955_s22  ;;  %4277 = vrot.lane.b32.xlu0 %v9185_v59, %s5955_s22 }
 0x624   :  { %v10256_v61 = vpop.permute.xlu1 %4151  ;;  %v10258_v53 = vpop.permute.xlu0 %4155 }
 0x625   :  { %12776 = vst [vmem:[#allocation176_spill] sm:$0xff] %v10256_v61  ;;  %12777 = vst [vmem:[#allocation177_spill] sm:$0xff] %v10258_v53  ;;  %v12785_v53 = vld [vmem:[#allocation22_spill] sm:$0xff] }
 0x626   :  { %4281 = vrot.lane.b32.xlu1 %v9248_v8, %s5955_s22  ;;  %4285 = vrot.lane.b32.xlu0 %v12778_v44, %s5955_s22 }
 0x628   :  { %v10264_v52 = vpop.permute.xlu1 %4159  ;;  %v10266_v13 = vpop.permute.xlu0 %4163 }
 0x629   :  { %12779 = vst [vmem:[#allocation29_spill] sm:$0xff] %v10264_v52  ;;  %12780 = vst [vmem:[#allocation178_spill] sm:$0xff] %v10266_v13  ;;  %v12788_v13 = vld [vmem:[#allocation15_spill] sm:$0xff] }
 0x62a   :  { %4289 = vrot.lane.b32.xlu1 %v12781_v16, %s5955_s22  ;;  %4293 = vrot.lane.b32.xlu0 %v12782_v43, %s5955_s22 }
 0x62c   :  { %v10272_v39 = vpop.permute.xlu1 %4167  ;;  %v10274_v61 = vpop.permute.xlu0 %4171 }
 0x62d   :  { %12783 = vst [vmem:[#allocation40_spill] sm:$0xff] %v10272_v39  ;;  %12784 = vst [vmem:[#allocation17_spill] sm:$0xff] %v10274_v61  ;;  %v4340_v61 = vsel %vm4339_vm1, %v9162_v26, %v9407_v40  ;;  %v4341_v39 = vsel %vm4339_vm1, %v9173_v46, %v9414_v42  ;;  %v4345_v26 = vsel %vm4339_vm1, %v9258_v45, %v9434_v54 }
 0x62e   :  { %4297 = vrot.lane.b32.xlu1 %v9328_v20, %s5955_s22  ;;  %4301 = vrot.lane.b32.xlu0 %v12785_v53, %s5955_s22  ;;  %v4346_v46 = vsel %vm4339_vm1, %v9270_v31, %v9439_v27  ;;  %v4350_v45 = vsel %vm4339_vm1, %v9310_v36, %v9459_v21  ;;  %v4351_v31 = vsel %vm4339_vm1, %v9318_v55, %v9464_v47  ;;  %v12792_v27 = vld [vmem:[#allocation12_spill] sm:$0xff] }
 0x62f   :  { %v4355_v36 = vsel %vm4339_vm1, %v9360_v49, %v9484_v11  ;;  %v4356_v55 = vsel %vm4339_vm1, %v9179_v25, %v9487_v5  ;;  %v4360_v49 = vsel %vm4339_vm1, %v9260_v18, %v9507_v33  ;;  %v4361_v25 = vsel %vm4339_vm1, %v12778_v44, %v9514_v37  ;;  %v12799_v5 = vld [vmem:[#allocation30_spill] sm:$0xff]  ;;  %v12802_v37 = vld [vmem:[#allocation36_spill] sm:$0xff]  ;;  %v12808_v44 = vld [vmem:[#allocation27_spill] sm:$0xff] }
 0x630   :  { %v10280_v38 = vpop.permute.xlu1 %4175  ;;  %v10282_v52 = vpop.permute.xlu0 %4179  ;;  %v4365_v18 = vsel %vm4339_vm1, %v12782_v43, %v9534_v10  ;;  %v12793_v43 = vld [vmem:[#allocation24_spill] sm:$0xff]  ;;  %v12804_v10 = vld [vmem:[#allocation42_spill] sm:$0xff] }
 0x631   :  { %12786 = vst [vmem:[#allocation22_spill] sm:$0xff] %v10280_v38  ;;  %12787 = vst [vmem:[#allocation179_spill] sm:$0xff] %v10282_v52  ;;  %v4342_v52 = vsel %vm4339_vm1, %v9232_v34, %v9419_v57  ;;  %v4343_v38 = vsel %vm4339_vm1, %v9238_v4, %v9424_v3  ;;  %v4347_v34 = vsel %vm4339_vm1, %v9278_v6, %v9444_v14  ;;  %v12790_v3 = vld [vmem:[#allocation23_spill] sm:$0xff] }
 0x632   :  { %4305 = vrot.lane.b32.xlu1 %v12788_v13, %s5955_s22  ;;  %v4348_v4 = vsel %vm4339_vm1, %v9290_v19, %v9449_v7  ;;  %v4352_v6 = vsel %vm4339_vm1, %v9330_v23, %v9469_v28  ;;  %v4353_v19 = vsel %vm4339_vm1, %v9338_v17, %v9474_v9  ;;  %v4357_v23 = vsel %vm4339_vm1, %v9185_v59, %v9494_v29  ;;  %v12797_v28 = vld [vmem:[#allocation10_spill] sm:$0xff]  ;;  %v12800_v29 = vld [vmem:[#allocation41_spill] sm:$0xff] }
 0x633   :  { %v4358_v17 = vsel %vm4339_vm1, %v9244_v58, %v9497_v48  ;;  %v4362_v59 = vsel %vm4339_vm1, %v9280_v0, %v9517_v12  ;;  %v4363_v58 = vsel %vm4339_vm1, %v12781_v16, %v9524_v22  ;;  %v4366_v57 = vsel %vm4339_vm1, %v9320_v30, %v9537_v41  ;;  %v12794_v30 = vld [vmem:[#allocation25_spill] sm:$0xff]  ;;  %v12803_v22 = vld [vmem:[#allocation20_spill] sm:$0xff] }
 0x634   :  { %v10286_v56 = vpop.permute.xlu1 %4183  ;;  %v10288_v60 = vpop.permute.xlu0 %4187  ;;  %v4367_v0 = vsel %vm4339_vm1, %v9328_v20, %v9544_v24  ;;  %v4372_v14 = vsel %vm3465_vm15, %v4340_v61, %v12792_v27  ;;  %v4369_v7 = vsel %vm4339_vm1, %v12785_v53, %v12793_v43  ;;  %v12796_v20 = vld [vmem:[#allocation26_spill] sm:$0xff]  ;;  %v4373_v9 = vsel %vm3465_vm15, %v4341_v39, %v12797_v28  ;;  %v12805_v41 = vld [vmem:[#allocation9_spill] sm:$0xff] }
 0x635   :  { %12789 = vst [vmem:[#allocation15_spill] sm:$0xff] %v10288_v60  ;;  %v4344_v60 = vsel %vm4339_vm1, %v9250_v35, %v9429_v2  ;;  %v4349_v35 = vsel %vm4339_vm1, %v9298_v32, %v9454_v15  ;;  %v4354_v32 = vsel %vm4339_vm1, %v9353_v51, %v9479_v1  ;;  %v4359_v51 = vsel %vm4339_vm1, %v9248_v8, %v9504_v62  ;;  %v12791_v2 = vld [vmem:[#allocation34_spill] sm:$0xff]  ;;  %v12795_v15 = vld [vmem:[#allocation11_spill] sm:$0xff]  ;;  %v12801_v62 = vld [vmem:[#allocation32_spill] sm:$0xff] }
 0x636   :  { %v4364_v8 = vsel %vm4339_vm1, %v9300_v63, %v9527_v50  ;;  %v4368_v16 = vsel %vm4339_vm1, %v12791_v2, %v12790_v3  ;;  %v4370_v21 = vsel %vm4339_vm1, %v12795_v15, %v12794_v30  ;;  %v4371_v47 = vsel %vm4339_vm1, %v12788_v13, %v12796_v20  ;;  %v12798_v1 = vld [vmem:[#allocation6_spill] sm:$0xff]  ;;  %v12815_v20 = vld [vmem:[#allocation8_spill] sm:$0xff] }
 0x637   :  { %v4374_v11 = vsel %vm3465_vm15, %v4342_v52, %v12798_v1  ;;  %v4375_v61 = vsel %vm3465_vm15, %v4343_v38, %v12799_v5  ;;  %v4376_v48 = vsel %vm3465_vm15, %v4344_v60, %v12800_v29  ;;  %v4377_v33 = vsel %vm3465_vm15, %v4345_v26, %v12801_v62  ;;  %v12806_v52 = vld [vmem:[#allocation31_spill] sm:$0xff]  ;;  %v12807_v53 = vld [vmem:[#allocation38_spill] sm:$0xff] }
 0x638   :  { %v10332_v40 = vpop.permute.xlu1 %4191  ;;  %v10334_v42 = vpop.permute.xlu0 %4195  ;;  %v4378_v12 = vsel %vm3465_vm15, %v4346_v46, %v12802_v37  ;;  %v4379_v50 = vsel %vm3465_vm15, %v4347_v34, %v12803_v22  ;;  %v4380_v39 = vsel %vm3465_vm15, %v4348_v4, %v12804_v10  ;;  %v4381_v24 = vsel %vm3465_vm15, %v4349_v35, %v12805_v41  ;;  %v12809_v34 = vld [vmem:[#allocation14_spill] sm:$0xff]  ;;  %v12810_v4 = vld [vmem:[#allocation19_spill] sm:$0xff]  ;;  %v12811_v35 = vld [vmem:[#allocation28_spill] sm:$0xff] }
 0x639   :  { %v4382_v38 = vsel %vm3465_vm15, %v4350_v45, %v12806_v52  ;;  %v4383_v60 = vsel %vm3465_vm15, %v4351_v31, %v12807_v53  ;;  %v4384_v13 = vsel %vm3465_vm15, %v4352_v6, %v12808_v44  ;;  %v4385_v3 = vsel %vm3465_vm15, %v4353_v19, %v12809_v34  ;;  %v12812_v45 = vld [vmem:[#allocation18_spill] sm:$0xff]  ;;  %v12813_v31 = vld [vmem:[#allocation21_spill] sm:$0xff]  ;;  %v12816_v1 = vld [vmem:[#allocation7_spill] sm:$0xff] }
 0x63a   :  { %v4386_v2 = vsel %vm3465_vm15, %v4354_v32, %v12810_v4  ;;  %v4387_v27 = vsel %vm3465_vm15, %v4355_v36, %v12811_v35  ;;  %v4388_v43 = vsel %vm3465_vm15, %v4356_v55, %v12812_v45  ;;  %v4389_v30 = vsel %vm3465_vm15, %v4357_v23, %v12813_v31  ;;  %v12814_v6 = vld [vmem:[#allocation37_spill] sm:$0xff]  ;;  %v12817_v32 = vld [vmem:[#allocation16_spill] sm:$0xff]  ;;  %v12819_v55 = vld [vmem:[#allocation35_spill] sm:$0xff] }
 0x63b   :  { %v4390_v15 = vsel %vm3465_vm15, %v4358_v17, %v12814_v6  ;;  %v4391_v28 = vsel %vm3465_vm15, %v4359_v51, %v12815_v20  ;;  %v4392_v19 = vsel %vm3465_vm15, %v4360_v49, %v12816_v1  ;;  %v4393_v5 = vsel %vm3465_vm15, %v4361_v25, %v12817_v32  ;;  %v12818_v36 = vld [vmem:[#allocation33_spill] sm:$0xff]  ;;  %v12821_v17 = vld [vmem:[#allocation39_spill] sm:$0xff]  ;;  %v12823_v49 = vld [vmem:[#allocation44_spill] sm:$0xff] }
 0x63c   :  { %v10381_v54 = vpop.permute.xlu1 %4199  ;;  %v10383_v63 = vpop.permute.xlu0 %4203  ;;  %v4394_v29 = vsel %vm3465_vm15, %v4362_v59, %v12818_v36  ;;  %v4395_v62 = vsel %vm3465_vm15, %v4363_v58, %v12819_v55  ;;  %v12820_v23 = vld [vmem:[#allocation13_spill] sm:$0xff]  ;;  %v4397_v22 = vsel %vm3465_vm15, %v4365_v18, %v12821_v17  ;;  %v12822_v51 = vld [vmem:[#allocation43_spill] sm:$0xff]  ;;  %v4399_v41 = vsel %vm3465_vm15, %v4367_v0, %v12823_v49  ;;  %v12825_v58 = vld [vmem:[#allocation46_spill] sm:$0xff] }
 0x63d   :  { %v4396_v37 = vsel %vm3465_vm15, %v4364_v8, %v12820_v23  ;;  %v4398_v10 = vsel %vm3465_vm15, %v4366_v57, %v12822_v51  ;;  %v12824_v52 = vld [vmem:[#allocation45_spill] sm:$0xff]  ;;  %v4401_v44 = vsel %vm3465_vm15, %v4369_v7, %v12825_v58  ;;  %v12826_v8 = vld [vmem:[#allocation47_spill] sm:$0xff]  ;;  %v12827_v18 = vld [vmem:[#allocation48_spill] sm:$0xff] }
 0x63e   :  { %v4400_v25 = vsel %vm3465_vm15, %v4368_v16, %v12824_v52  ;;  %v4402_v34 = vsel %vm3465_vm15, %v4370_v21, %v12826_v8  ;;  %v4403_v4 = vsel %vm3465_vm15, %v4371_v47, %v12827_v18  ;;  %v12828_v57 = vld [vmem:[#allocation49_spill] sm:$0xff]  ;;  %v12829_v0 = vld [vmem:[#allocation50_spill] sm:$0xff]  ;;  %v12830_v16 = vld [vmem:[#allocation51_spill] sm:$0xff]  ;;  %vm5134_vm15 = vcmask 72704  }
 0x63f   :  { %v4405_v35 = vsel %vm4404_vm2, %v4372_v14, %v12828_v57  ;;  %v4406_v45 = vsel %vm4404_vm2, %v4373_v9, %v12829_v0  ;;  %v4407_v31 = vsel %vm4404_vm2, %v4374_v11, %v12830_v16  ;;  %v12831_v6 = vld [vmem:[#allocation52_spill] sm:$0xff]  ;;  %v12832_v1 = vld [vmem:[#allocation53_spill] sm:$0xff]  ;;  %v12833_v32 = vld [vmem:[#allocation54_spill] sm:$0xff] }
 0x640   :  { %v10420_v26 = vpop.permute.xlu1 %4207  ;;  %v10422_v46 = vpop.permute.xlu0 %4109  ;;  %v4408_v20 = vsel %vm4404_vm2, %v4375_v61, %v12831_v6  ;;  %v4409_v7 = vsel %vm4404_vm2, %v4376_v48, %v12832_v1  ;;  %v4410_v21 = vsel %vm4404_vm2, %v4377_v33, %v12833_v32  ;;  %v12834_v36 = vld [vmem:[#allocation55_spill] sm:$0xff]  ;;  %v12835_v55 = vld [vmem:[#allocation56_spill] sm:$0xff]  ;;  %v12836_v23 = vld [vmem:[#allocation57_spill] sm:$0xff] }
 0x641   :  { %v4411_v47 = vsel %vm4404_vm2, %v4378_v12, %v12834_v36  ;;  %v4412_v14 = vsel %vm4404_vm2, %v4379_v50, %v12835_v55  ;;  %v4413_v9 = vsel %vm4404_vm2, %v4380_v39, %v12836_v23  ;;  %v12837_v17 = vld [vmem:[#allocation58_spill] sm:$0xff]  ;;  %v12838_v51 = vld [vmem:[#allocation59_spill] sm:$0xff]  ;;  %v12839_v49 = vld [vmem:[#allocation60_spill] sm:$0xff] }
 0x642   :  { %v4414_v11 = vsel %vm4404_vm2, %v4381_v24, %v12837_v17  ;;  %v4415_v61 = vsel %vm4404_vm2, %v4382_v38, %v12838_v51  ;;  %v4416_v48 = vsel %vm4404_vm2, %v4383_v60, %v12839_v49  ;;  %v12840_v52 = vld [vmem:[#allocation61_spill] sm:$0xff]  ;;  %v12841_v50 = vld [vmem:[#allocation62_spill] sm:$0xff]  ;;  %v12842_v39 = vld [vmem:[#allocation63_spill] sm:$0xff] }
 0x643   :  { %v4417_v33 = vsel %vm4404_vm2, %v4384_v13, %v12840_v52  ;;  %v4418_v8 = vsel %vm4404_vm2, %v4385_v3, %v12841_v50  ;;  %v4419_v18 = vsel %vm4404_vm2, %v4386_v2, %v12842_v39  ;;  %v12843_v24 = vld [vmem:[#allocation64_spill] sm:$0xff]  ;;  %v12844_v38 = vld [vmem:[#allocation65_spill] sm:$0xff]  ;;  %v12845_v60 = vld [vmem:[#allocation66_spill] sm:$0xff] }
 0x644   :  { %v10456_v53 = vpop.permute.xlu1 %4113  ;;  %v10458_v59 = vpop.permute.xlu0 %4243  ;;  %v4420_v57 = vsel %vm4404_vm2, %v4387_v27, %v12843_v24  ;;  %v4421_v0 = vsel %vm4404_vm2, %v4388_v43, %v12844_v38  ;;  %v4422_v16 = vsel %vm4404_vm2, %v4389_v30, %v12845_v60  ;;  %v12846_v13 = vld [vmem:[#allocation67_spill] sm:$0xff]  ;;  %v12847_v1 = vld [vmem:[#allocation68_spill] sm:$0xff]  ;;  %v12848_v36 = vld [vmem:[#allocation69_spill] sm:$0xff] }
 0x645   :  { %v4423_v6 = vsel %vm4404_vm2, %v4390_v15, %v12846_v13  ;;  %v4424_v32 = vsel %vm4404_vm2, %v4391_v28, %v12847_v1  ;;  %v4425_v3 = vsel %vm4404_vm2, %v4392_v19, %v12848_v36  ;;  %v12849_v55 = vld [vmem:[#allocation70_spill] sm:$0xff]  ;;  %v12850_v23 = vld [vmem:[#allocation71_spill] sm:$0xff]  ;;  %v12851_v17 = vld [vmem:[#allocation72_spill] sm:$0xff] }
 0x646   :  { %v4426_v2 = vsel %vm4404_vm2, %v4393_v5, %v12849_v55  ;;  %v4427_v27 = vsel %vm4404_vm2, %v4394_v29, %v12850_v23  ;;  %v4428_v43 = vsel %vm4404_vm2, %v4395_v62, %v12851_v17  ;;  %v12852_v51 = vld [vmem:[#allocation73_spill] sm:$0xff]  ;;  %v12853_v15 = vld [vmem:[#allocation74_spill] sm:$0xff]  ;;  %v12854_v28 = vld [vmem:[#allocation75_spill] sm:$0xff] }
 0x647   :  { %v4429_v30 = vsel %vm4404_vm2, %v4396_v37, %v12852_v51  ;;  %v4430_v49 = vsel %vm4404_vm2, %v4397_v22, %v12853_v15  ;;  %v4431_v52 = vsel %vm4404_vm2, %v4398_v10, %v12854_v28  ;;  %v12855_v19 = vld [vmem:[#allocation76_spill] sm:$0xff]  ;;  %v12856_v5 = vld [vmem:[#allocation77_spill] sm:$0xff]  ;;  %v12857_v62 = vld [vmem:[#allocation78_spill] sm:$0xff] }
 0x648   :  { %v10492_v58 = vpop.permute.xlu1 %4247  ;;  %v10494_v12 = vpop.permute.xlu0 %4251  ;;  %v4432_v50 = vsel %vm4404_vm2, %v4399_v41, %v12855_v19  ;;  %v4433_v39 = vsel %vm4404_vm2, %v4400_v25, %v12856_v5  ;;  %v4434_v37 = vsel %vm4404_vm2, %v4401_v44, %v12857_v62  ;;  %v12858_v38 = vld [vmem:[#allocation79_spill] sm:$0xff]  ;;  %v12859_v22 = vld [vmem:[#allocation80_spill] sm:$0xff]  ;;  %v12860_v10 = vld [vmem:[#allocation81_spill] sm:$0xff] }
 0x649   :  { %v4435_v60 = vsel %vm4404_vm2, %v4402_v34, %v12858_v38  ;;  %v4436_v13 = vsel %vm4404_vm2, %v4403_v4, %v12859_v22  ;;  %v4438_v1 = vsel %vm4437_vm8, %v4405_v35, %v12860_v10  ;;  %v12861_v41 = vld [vmem:[#allocation82_spill] sm:$0xff]  ;;  %v12862_v25 = vld [vmem:[#allocation83_spill] sm:$0xff]  ;;  %v12863_v23 = vld [vmem:[#allocation84_spill] sm:$0xff] }
 0x64a   :  { %v4439_v36 = vsel %vm4437_vm8, %v4406_v45, %v12861_v41  ;;  %v4440_v55 = vsel %vm4437_vm8, %v4407_v31, %v12862_v25  ;;  %v4441_v17 = vsel %vm4437_vm8, %v4408_v20, %v12863_v23  ;;  %v12864_v51 = vld [vmem:[#allocation85_spill] sm:$0xff]  ;;  %v12865_v15 = vld [vmem:[#allocation86_spill] sm:$0xff]  ;;  %v12866_v28 = vld [vmem:[#allocation87_spill] sm:$0xff] }
 0x64b   :  { %v4442_v44 = vsel %vm4437_vm8, %v4409_v7, %v12864_v51  ;;  %v4443_v34 = vsel %vm4437_vm8, %v4410_v21, %v12865_v15  ;;  %v4444_v4 = vsel %vm4437_vm8, %v4411_v47, %v12866_v28  ;;  %v12867_v19 = vld [vmem:[#allocation88_spill] sm:$0xff]  ;;  %v12868_v5 = vld [vmem:[#allocation89_spill] sm:$0xff]  ;;  %v12869_v62 = vld [vmem:[#allocation90_spill] sm:$0xff] }
 0x64c   :  { %v10528_v29 = vpop.permute.xlu1 %4255  ;;  %v10530_v24 = vpop.permute.xlu0 %4259  ;;  %v4445_v35 = vsel %vm4437_vm8, %v4412_v14, %v12867_v19  ;;  %v4446_v45 = vsel %vm4437_vm8, %v4413_v9, %v12868_v5  ;;  %v4447_v31 = vsel %vm4437_vm8, %v4414_v11, %v12869_v62  ;;  %v12870_v38 = vld [vmem:[#allocation91_spill] sm:$0xff]  ;;  %v12871_v22 = vld [vmem:[#allocation92_spill] sm:$0xff]  ;;  %v12872_v10 = vld [vmem:[#allocation93_spill] sm:$0xff] }
 0x64d   :  { %v4448_v20 = vsel %vm4437_vm8, %v4415_v61, %v12870_v38  ;;  %v4449_v7 = vsel %vm4437_vm8, %v4416_v48, %v12871_v22  ;;  %v4450_v21 = vsel %vm4437_vm8, %v4417_v33, %v12872_v10  ;;  %v12873_v14 = vld [vmem:[#allocation94_spill] sm:$0xff]  ;;  %v12874_v9 = vld [vmem:[#allocation95_spill] sm:$0xff]  ;;  %v12875_v11 = vld [vmem:[#allocation96_spill] sm:$0xff] }
 0x64e   :  { %v4451_v25 = vsel %vm4437_vm8, %v4418_v8, %v12873_v14  ;;  %v4452_v23 = vsel %vm4437_vm8, %v4419_v18, %v12874_v9  ;;  %v4453_v51 = vsel %vm4437_vm8, %v4420_v57, %v12875_v11  ;;  %v12876_v61 = vld [vmem:[#allocation97_spill] sm:$0xff]  ;;  %v12877_v48 = vld [vmem:[#allocation98_spill] sm:$0xff]  ;;  %v12878_v33 = vld [vmem:[#allocation99_spill] sm:$0xff] }
 0x64f   :  { %v4454_v15 = vsel %vm4437_vm8, %v4421_v0, %v12876_v61  ;;  %v4455_v28 = vsel %vm4437_vm8, %v4422_v16, %v12877_v48  ;;  %v4456_v19 = vsel %vm4437_vm8, %v4423_v6, %v12878_v33  ;;  %v12879_v5 = vld [vmem:[#allocation100_spill] sm:$0xff]  ;;  %v12880_v38 = vld [vmem:[#allocation101_spill] sm:$0xff]  ;;  %v12881_v22 = vld [vmem:[#allocation102_spill] sm:$0xff] }
 0x650   :  { %v10564_v41 = vpop.permute.xlu1 %4263  ;;  %v10566_v47 = vpop.permute.xlu0 %4267  ;;  %v4457_v62 = vsel %vm4437_vm8, %v4424_v32, %v12879_v5  ;;  %v4458_v8 = vsel %vm4437_vm8, %v4425_v3, %v12880_v38  ;;  %v4459_v18 = vsel %vm4437_vm8, %v4426_v2, %v12881_v22  ;;  %v12882_v10 = vld [vmem:[#allocation103_spill] sm:$0xff]  ;;  %v12883_v14 = vld [vmem:[#allocation104_spill] sm:$0xff]  ;;  %v12884_v9 = vld [vmem:[#allocation105_spill] sm:$0xff] }
 0x651   :  { %v4460_v57 = vsel %vm4437_vm8, %v4427_v27, %v12882_v10  ;;  %v4461_v0 = vsel %vm4437_vm8, %v4428_v43, %v12883_v14  ;;  %v4462_v16 = vsel %vm4437_vm8, %v4429_v30, %v12884_v9  ;;  %v12885_v6 = vld [vmem:[#allocation106_spill] sm:$0xff]  ;;  %v12886_v32 = vld [vmem:[#allocation107_spill] sm:$0xff]  ;;  %v12887_v3 = vld [vmem:[#allocation108_spill] sm:$0xff] }
 0x652   :  { %v4463_v11 = vsel %vm4437_vm8, %v4430_v49, %v12885_v6  ;;  %v4464_v61 = vsel %vm4437_vm8, %v4431_v52, %v12886_v32  ;;  %v4465_v48 = vsel %vm4437_vm8, %v4432_v50, %v12887_v3  ;;  %v12888_v2 = vld [vmem:[#allocation109_spill] sm:$0xff]  ;;  %v12889_v43 = vld [vmem:[#allocation110_spill] sm:$0xff]  ;;  %v12890_v38 = vld [vmem:[#allocation111_spill] sm:$0xff] }
 0x653   :  { %v4466_v33 = vsel %vm4437_vm8, %v4433_v39, %v12888_v2  ;;  %v4467_v30 = vsel %vm4437_vm8, %v4434_v37, %v12889_v43  ;;  %v4468_v22 = vsel %vm4437_vm8, %v4435_v60, %v12890_v38  ;;  %v12891_v49 = vld [vmem:[#allocation112_spill] sm:$0xff]  ;;  %v12892_v52 = vld [vmem:[#allocation113_spill] sm:$0xff]  ;;  %v12893_v14 = vld [vmem:[#allocation114_spill] sm:$0xff] }
 0x654   :  { %v10600_v27 = vpop.permute.xlu1 %4271  ;;  %v10602_v5 = vpop.permute.xlu0 %4275  ;;  %v4469_v10 = vsel %vm4437_vm8, %v4436_v13, %v12891_v49  ;;  %v4471_v50 = vsel %vm4470_vm10, %v4438_v1, %v12892_v52  ;;  %v4472_v39 = vsel %vm4470_vm10, %v4439_v36, %v12893_v14  ;;  %v12894_v9 = vld [vmem:[#allocation115_spill] sm:$0xff]  ;;  %v12895_v32 = vld [vmem:[#allocation116_spill] sm:$0xff]  ;;  %v12896_v37 = vld [vmem:[#allocation117_spill] sm:$0xff] }
 0x655   :  { %v4473_v6 = vsel %vm4470_vm10, %v4440_v55, %v12894_v9  ;;  %v4474_v3 = vsel %vm4470_vm10, %v4441_v17, %v12895_v32  ;;  %v4475_v2 = vsel %vm4470_vm10, %v4442_v44, %v12896_v37  ;;  %v12897_v60 = vld [vmem:[#allocation118_spill] sm:$0xff]  ;;  %v12898_v13 = vld [vmem:[#allocation119_spill] sm:$0xff]  ;;  %v12899_v49 = vld [vmem:[#allocation120_spill] sm:$0xff] }
 0x656   :  { %v4476_v43 = vsel %vm4470_vm10, %v4443_v34, %v12897_v60  ;;  %v4477_v38 = vsel %vm4470_vm10, %v4444_v4, %v12898_v13  ;;  %v4478_v1 = vsel %vm4470_vm10, %v4445_v35, %v12899_v49  ;;  %v12900_v52 = vld [vmem:[#allocation121_spill] sm:$0xff]  ;;  %v12901_v14 = vld [vmem:[#allocation122_spill] sm:$0xff]  ;;  %v12902_v9 = vld [vmem:[#allocation123_spill] sm:$0xff] }
 0x657   :  { %v4479_v36 = vsel %vm4470_vm10, %v4446_v45, %v12900_v52  ;;  %v4480_v55 = vsel %vm4470_vm10, %v4447_v31, %v12901_v14  ;;  %v4481_v17 = vsel %vm4470_vm10, %v4448_v20, %v12902_v9  ;;  %v12903_v32 = vld [vmem:[#allocation124_spill] sm:$0xff]  ;;  %v12906_v4 = vld [vmem:[#allocation125_spill] sm:$0xff]  ;;  %v12907_v35 = vld [vmem:[#allocation126_spill] sm:$0xff] }
 0x658   :  { %v4482_v44 = vsel %vm4470_vm10, %v4449_v7, %v12903_v32  ;;  %v10634_v37 = vpop.permute.xlu1 %4279  ;;  %v10636_v34 = vpop.permute.xlu0 %4283  ;;  %v4483_v60 = vsel %vm4470_vm10, %v4450_v21, %v12906_v4  ;;  %v4484_v13 = vsel %vm4470_vm10, %v4451_v25, %v12907_v35  ;;  %v12908_v45 = vld [vmem:[#allocation127_spill] sm:$0xff]  ;;  %v12909_v31 = vld [vmem:[#allocation128_spill] sm:$0xff]  ;;  %v12910_v20 = vld [vmem:[#allocation129_spill] sm:$0xff] }
 0x659   :  { %12904 = vst [vmem:[#allocation23_spill] sm:$0xff] %v10634_v37  ;;  %12905 = vst [vmem:[#allocation34_spill] sm:$0xff] %v10636_v34  ;;  %v4485_v49 = vsel %vm4470_vm10, %v4452_v23, %v12908_v45  ;;  %v4486_v52 = vsel %vm4470_vm10, %v4453_v51, %v12909_v31  ;;  %v4487_v14 = vsel %vm4470_vm10, %v4454_v15, %v12910_v20  ;;  %v12911_v7 = vld [vmem:[#allocation130_spill] sm:$0xff]  ;;  %v12912_v32 = vld [vmem:[#allocation131_spill] sm:$0xff] }
 0x65a   :  { %v4488_v9 = vsel %vm4470_vm10, %v4455_v28, %v12911_v7  ;;  %v4489_v34 = vsel %vm4470_vm10, %v4456_v19, %v12912_v32  ;;  %v12913_v21 = vld [vmem:[#allocation132_spill] sm:$0xff]  ;;  %v12914_v25 = vld [vmem:[#allocation133_spill] sm:$0xff]  ;;  %v12915_v23 = vld [vmem:[#allocation134_spill] sm:$0xff] }
 0x65b   :  { %v4490_v4 = vsel %vm4470_vm10, %v4457_v62, %v12913_v21  ;;  %v4491_v35 = vsel %vm4470_vm10, %v4458_v8, %v12914_v25  ;;  %v4492_v45 = vsel %vm4470_vm10, %v4459_v18, %v12915_v23  ;;  %v12916_v51 = vld [vmem:[#allocation135_spill] sm:$0xff]  ;;  %v12917_v15 = vld [vmem:[#allocation136_spill] sm:$0xff]  ;;  %v12918_v28 = vld [vmem:[#allocation137_spill] sm:$0xff] }
 0x65c   :  { %v4493_v31 = vsel %vm4470_vm10, %v4460_v57, %v12916_v51  ;;  %v4494_v20 = vsel %vm4470_vm10, %v4461_v0, %v12917_v15  ;;  %v4495_v7 = vsel %vm4470_vm10, %v4462_v16, %v12918_v28  ;;  %v12919_v19 = vld [vmem:[#allocation138_spill] sm:$0xff]  ;;  %v12920_v37 = vld [vmem:[#allocation139_spill] sm:$0xff]  ;;  %v10668_v21 = vpop.permute.xlu1 %4287  ;;  %v10670_v8 = vpop.permute.xlu0 %4291  ;;  %v12921_v18 = vld [vmem:[#allocation140_spill] sm:$0xff] }
 0x65d   :  { %v4496_v32 = vsel %vm4470_vm10, %v4463_v11, %v12919_v19  ;;  %v4497_v62 = vsel %vm4470_vm10, %v4464_v61, %v12920_v37  ;;  %v4498_v25 = vsel %vm4470_vm10, %v4465_v48, %v12921_v18  ;;  %v12922_v57 = vld [vmem:[#allocation141_spill] sm:$0xff]  ;;  %v12923_v0 = vld [vmem:[#allocation142_spill] sm:$0xff]  ;;  %v12924_v16 = vld [vmem:[#allocation143_spill] sm:$0xff] }
 0x65e   :  { %v4499_v23 = vsel %vm4470_vm10, %v4466_v33, %v12922_v57  ;;  %v10678_v51 = vsel %vm4470_vm10, %v4467_v30, %v12923_v0  ;;  %v4501_v11 = vsel %vm4470_vm10, %v4468_v22, %v12924_v16  ;;  %v12925_v15 = vld [vmem:[#allocation144_spill] sm:$0xff]  ;;  %v12926_v37 = vld [vmem:[#allocation145_spill] sm:$0xff]  ;;  %v12927_v19 = vld [vmem:[#allocation146_spill] sm:$0xff] }
 0x65f   :  { %v10684_v61 = vsel %vm4470_vm10, %v4469_v10, %v12925_v15  ;;  %v4504_v28 = vsel %vm4503_vm9, %v4471_v50, %v12926_v37  ;;  %v10690_v48 = vsel %vm4503_vm9, %v4472_v39, %v12927_v19  ;;  %v12928_v18 = vld [vmem:[#allocation147_spill] sm:$0xff]  ;;  %v12929_v57 = vld [vmem:[#allocation148_spill] sm:$0xff]  ;;  %v12930_v0 = vld [vmem:[#allocation149_spill] sm:$0xff] }
 0x660   :  { %v4506_v33 = vsel %vm4503_vm9, %v4473_v6, %v12928_v18  ;;  %v10696_v30 = vsel %vm4503_vm9, %v4474_v3, %v12929_v57  ;;  %v4508_v22 = vsel %vm4503_vm9, %v4475_v2, %v12930_v0  ;;  %v12931_v16 = vld [vmem:[#allocation150_spill] sm:$0xff]  ;;  %v12932_v15 = vld [vmem:[#allocation151_spill] sm:$0xff]  ;;  %v12933_v37 = vld [vmem:[#allocation152_spill] sm:$0xff]  ;;  %v10718_v0 = vpop.permute.xlu1 %4295 }
 0x661   :  { %v10702_v10 = vsel %vm4503_vm9, %v4476_v43, %v12931_v16  ;;  %v4510_v50 = vsel %vm4503_vm9, %v4477_v38, %v12932_v15  ;;  %v10708_v39 = vsel %vm4503_vm9, %v4478_v1, %v12933_v37  ;;  %v12934_v19 = vld [vmem:[#allocation153_spill] sm:$0xff]  ;;  %v12935_v18 = vld [vmem:[#allocation154_spill] sm:$0xff]  ;;  %v12937_v57 = vld [vmem:[#allocation175_spill] sm:$0xff]  ;;  %v10720_v43 = vpop.permute.xlu0 %4299 }
 0x662   :  { %v4512_v6 = vsel %vm4503_vm9, %v4479_v36, %v12934_v19  ;;  %v10714_v3 = vsel %vm4503_vm9, %v4480_v55, %v12935_v18  ;;  %v4537_v2 = vsel %vm4536_vm11, %v4504_v28, %v12937_v57  ;;  %v12938_v16 = vld [vmem:[#allocation155_spill] sm:$0xff]  ;;  %v12939_v15 = vld [vmem:[#allocation156_spill] sm:$0xff]  ;;  %v12941_v19 = vld [vmem:[#allocation157_spill] sm:$0xff] }
 0x663   :  { %12936 = vst [vmem:[#allocation12_spill] sm:$0xff] %v10714_v3  ;;  %v4514_v38 = vsel %vm4503_vm9, %v4481_v17, %v12938_v16  ;;  %v10726_v1 = vsel %vm4503_vm9, %v4482_v44, %v12939_v15  ;;  %v12940_v37 = vld [vmem:[#allocation176_spill] sm:$0xff]  ;;  %v10732_v55 = vsel %vm4569_vm3, %v4537_v2, %v10458_v59  ;;  %v4516_v28 = vsel %vm4503_vm9, %v4483_v60, %v12941_v19  ;;  %v12942_v18 = vld [vmem:[#allocation158_spill] sm:$0xff]  ;;  %v12943_v3 = vld [vmem:[#allocation177_spill] sm:$0xff] }
 0x664   :  { %v4539_v36 = vsel %vm4536_vm11, %v4506_v33, %v12940_v37  ;;  %v10738_v57 = vsel %vm4503_vm9, %v4484_v13, %v12942_v18  ;;  %v4541_v17 = vsel %vm4536_vm11, %v4508_v22, %v12943_v3  ;;  %v12944_v16 = vld [vmem:[#allocation159_spill] sm:$0xff]  ;;  %v12945_v15 = vld [vmem:[#allocation160_spill] sm:$0xff]  ;;  %v12946_v2 = vld [vmem:[#allocation161_spill] sm:$0xff]  ;;  %v10767_v19 = vpop.permute.xlu1 %4303 }
 0x665   :  { %v10744_v44 = vsel %vm4569_vm3, %v4539_v36, %v10492_v58  ;;  %v4518_v33 = vsel %vm4503_vm9, %v4485_v49, %v12944_v16  ;;  %v10750_v59 = vsel %vm4503_vm9, %v4486_v52, %v12945_v15  ;;  %v4520_v60 = vsel %vm4503_vm9, %v4487_v14, %v12946_v2  ;;  %v12947_v37 = vld [vmem:[#allocation162_spill] sm:$0xff]  ;;  %v12948_v58 = vld [vmem:[#allocation163_spill] sm:$0xff]  ;;  %v12949_v36 = vld [vmem:[#allocation29_spill] sm:$0xff]  ;;  %v10769_v18 = vpop.permute.xlu0 %4149 }
 0x666   :  { %v10756_v13 = vsel %vm4569_vm3, %v4541_v17, %v10494_v12  ;;  %v10760_v22 = vsel %vm4503_vm9, %v4488_v9, %v12947_v37  ;;  %v4522_v3 = vsel %vm4503_vm9, %v4489_v34, %v12948_v58  ;;  %v4543_v49 = vsel %vm4536_vm11, %v4510_v50, %v12949_v36  ;;  %v12950_v14 = vld [vmem:[#allocation164_spill] sm:$0xff]  ;;  %v12951_v17 = vld [vmem:[#allocation165_spill] sm:$0xff]  ;;  %v12952_v50 = vld [vmem:[#allocation166_spill] sm:$0xff] }
 0x667   :  { %v4618_v52 = vrot.slane %v10732_v55, 1  ;;  %v10773_v12 = vsel %vm4503_vm9, %v4490_v4, %v12950_v14  ;;  %v4524_v9 = vsel %vm4503_vm9, %v4491_v35, %v12951_v17  ;;  %v4619_v16 = vrot.slane %v10744_v44, 1  ;;  %v12954_v2 = vld [vmem:[#allocation167_spill] sm:$0xff]  ;;  %v12955_v58 = vld [vmem:[#allocation168_spill] sm:$0xff]  ;;  %v12957_v36 = vld [vmem:[#allocation169_spill] sm:$0xff] }
 0x668   :  { %v10780_v34 = vsel %vm4569_vm3, %v4543_v49, %v10528_v29  ;;  %v10784_v15 = vsel %vm4503_vm9, %v4492_v45, %v12952_v50  ;;  %v4526_v37 = vsel %vm4503_vm9, %v4493_v31, %v12954_v2  ;;  %v10790_v4 = vsel %vm4503_vm9, %v4494_v20, %v12955_v58  ;;  %v12958_v17 = vld [vmem:[#allocation170_spill] sm:$0xff]  ;;  %v12960_v49 = vld [vmem:[#allocation171_spill] sm:$0xff]  ;;  %v12961_v50 = vld [vmem:[#allocation172_spill] sm:$0xff] }
 0x669   :  { %12953 = vst [vmem:[#allocation24_spill] sm:$0xff] %v10784_v15  ;;  %12956 = vst [vmem:[#allocation25_spill] sm:$0xff] %v10790_v4  ;;  %v4620_v35 = vrot.slane %v10756_v13, 1  ;;  %v4528_v14 = vsel %vm4503_vm9, %v4495_v7, %v12957_v36  ;;  %v10797_v29 = vsel %vm4503_vm9, %v4496_v32, %v12958_v17  ;;  %v4530_v45 = vsel %vm4503_vm9, %v4497_v62, %v12960_v49  ;;  %v12963_v31 = vld [vmem:[#allocation173_spill] sm:$0xff]  ;;  %v12964_v2 = vld [vmem:[#allocation174_spill] sm:$0xff]  ;;  %v10811_v36 = vpop.permute.xlu1 %4153  ;;  %v10813_v32 = vpop.permute.xlu0 %4157 }
 0x66a   :  { %12959 = vst [vmem:[#allocation11_spill] sm:$0xff] %v10797_v29  ;;  %v10803_v15 = vsel %vm4503_vm9, %v4498_v25, %v12961_v50  ;;  %v4532_v20 = vsel %vm4503_vm9, %v4499_v23, %v12963_v31  ;;  %v4534_v58 = vsel %vm4503_vm9, %v4501_v11, %v12964_v2  ;;  %v4650_v4 = vmax.f32 %v10732_v55, %v4618_v52  ;;  %v12965_v17 = vld [vmem:[#allocation178_spill] sm:$0xff]  ;;  %v12966_v49 = vld [vmem:[#allocation40_spill] sm:$0xff]  ;;  %v12967_v50 = vld [vmem:[#allocation17_spill] sm:$0xff] }
 0x66b   :  { %12962 = vst [vmem:[#allocation26_spill] sm:$0xff] %v10803_v15  ;;  %v4621_v7 = vrot.slane %v10780_v34, 1  ;;  %v4545_v62 = vsel %vm4536_vm11, %v4512_v6, %v12965_v17  ;;  %v4547_v25 = vsel %vm4536_vm11, %v4514_v38, %v12966_v49  ;;  %v4549_v23 = vsel %vm4536_vm11, %v4516_v28, %v12967_v50  ;;  %v12968_v31 = vld [vmem:[#allocation22_spill] sm:$0xff]  ;;  %v12969_v2 = vld [vmem:[#allocation179_spill] sm:$0xff] }
 0x66c   :  { %v4651_v11 = vmax.f32 %v10744_v44, %v4619_v16  ;;  %v4551_v52 = vsel %vm4536_vm11, %v4518_v33, %v12968_v31  ;;  %v4553_v15 = vsel %vm4536_vm11, %v4520_v60, %v12969_v2  ;;  %v4555_v29 = vsel %vm4536_vm11, %v4522_v3, %v10286_v56  ;;  %v12970_v17 = vld [vmem:[#allocation15_spill] sm:$0xff] }
 0x66d   :  { %v4652_v6 = vmax.f32 %v10756_v13, %v4620_v35  ;;  %v4557_v38 = vsel %vm4536_vm11, %v4524_v9, %v12970_v17  ;;  %v4559_v28 = vsel %vm4536_vm11, %v4526_v37, %v10332_v40  ;;  %v4561_v16 = vsel %vm4536_vm11, %v4528_v14, %v10334_v42  ;;  %v10846_v9 = vpop.permute.xlu1 %4161  ;;  %v10848_v40 = vpop.permute.xlu0 %4165 }
 0x66e   :  { %v10837_v33 = vsel %vm4569_vm3, %v4545_v62, %v10530_v24  ;;  %v4563_v60 = vsel %vm4536_vm11, %v4530_v45, %v10381_v54  ;;  %v4762_v49 = vrot.slane %v4650_v4, 1  ;;  %v4653_v56 = vmax.f32 %v10780_v34, %v4621_v7 }
 0x66f   :  { %12971 = vst [vmem:[#allocation10_spill] sm:$0xff] %v10837_v33  ;;  %v10844_v3 = vsel %vm4569_vm3, %v4547_v25, %v10564_v41  ;;  %v4565_v42 = vsel %vm4536_vm11, %v4532_v20, %v10383_v63  ;;  %v5018_v24 = vsel %vm72_vm0, %v10732_v55, %v4650_v4  ;;  %v4763_v37 = vrot.slane %v4651_v11, 1 }
 0x670   :  { %12972 = vst [vmem:[#allocation6_spill] sm:$0xff] %v10844_v3  ;;  %v10856_v54 = vsel %vm4569_vm3, %v4549_v23, %v10566_v47  ;;  %v5019_v35 = vsel %vm72_vm0, %v10744_v44, %v4651_v11  ;;  %v4764_v41 = vrot.slane %v4652_v6, 1  ;;  %v4622_v14 = vrot.slane %v10837_v33, 1 }
 0x671   :  { %12973 = vst [vmem:[#allocation30_spill] sm:$0xff] %v10856_v54  ;;  %v10863_v45 = vsel %vm4569_vm3, %v4551_v52, %v10600_v27  ;;  %v10867_v63 = vsel %vm4536_vm11, %v4534_v58, %v10420_v26  ;;  %v4794_v20 = vrot.slane %v4650_v4, 2  ;;  %v5020_v7 = vsel %vm72_vm0, %v10756_v13, %v4652_v6  ;;  %v10874_v31 = vpop.permute.xlu1 %4169  ;;  %v10876_v27 = vpop.permute.xlu0 %4173 }
 0x672   :  { %12974 = vst [vmem:[#allocation41_spill] sm:$0xff] %v10863_v45  ;;  %v4623_v47 = vrot.slane %v10844_v3, 1  ;;  %v5035_v62 = vsel %vm5034_vm5, %v5018_v24, %v4762_v49  ;;  %v4795_v25 = vrot.slane %v4651_v11, 2  ;;  %v4765_v50 = vrot.slane %v4653_v56, 1 }
 0x673   :  { %v4624_v23 = vrot.slane %v10856_v54, 1  ;;  %v5036_v52 = vsel %vm5034_vm5, %v5019_v35, %v4763_v37  ;;  %v4796_v26 = vrot.slane %v4652_v6, 2  ;;  %v5021_v4 = vsel %vm72_vm0, %v10780_v34, %v4653_v56  ;;  %v12975_v35 = vld [vmem:[#allocation23_spill] sm:$0xff] }
 0x674   :  { %v4625_v58 = vrot.slane %v10863_v45, 1  ;;  %v10885_v2 = vsel %vm4503_vm9, %v10678_v51, %v10422_v46  ;;  %v5037_v11 = vsel %vm5034_vm5, %v5020_v7, %v4764_v41  ;;  %v4654_v17 = vmax.f32 %v10837_v33, %v4622_v14 }
 0x675   :  { %v10891_v49 = vsel %vm4569_vm3, %v4553_v15, %v10602_v5  ;;  %v10896_v6 = vsel %vm4503_vm9, %v10684_v61, %v10456_v53  ;;  %v4797_v24 = vrot.slane %v4653_v56, 2  ;;  %v4655_v37 = vmax.f32 %v10844_v3, %v4623_v47  ;;  %v10911_v14 = vpop.permute.xlu1 %4177  ;;  %v10913_v53 = vpop.permute.xlu0 %4181 }
 0x676   :  { %v10901_v46 = vsel %vm4569_vm3, %v4555_v29, %v12975_v35  ;;  %v10904_v51 = vsel %vm5051_vm7, %v5035_v62, %v4794_v20  ;;  %v10907_v41 = vsel %vm5051_vm7, %v5036_v52, %v4795_v25  ;;  %v5038_v5 = vsel %vm5034_vm5, %v5021_v4, %v4765_v50  ;;  %v12978_v20 = vld [vmem:[#allocation34_spill] sm:$0xff] }
 0x677   :  { %12976 = vst [vmem:[#allocation32_spill] sm:$0xff] %v10907_v41  ;;  %v4656_v15 = vmax.f32 %v10856_v54, %v4624_v23  ;;  %v10916_v61 = vsel %vm5051_vm7, %v5037_v11, %v4796_v26  ;;  %v4657_v29 = vmax.f32 %v10863_v45, %v4625_v58  ;;  %v4626_v56 = vrot.slane %v10891_v49, 1 }
 0x678   :  { %12977 = vst [vmem:[#allocation36_spill] sm:$0xff] %v10916_v61  ;;  %v10922_v7 = vsel %vm4569_vm3, %v4557_v38, %v12978_v20  ;;  %v4766_v47 = vrot.slane %v4654_v17, 1  ;;  %v4798_v62 = vrot.slane %v4654_v17, 2  ;;  %v5022_v25 = vsel %vm72_vm0, %v10837_v33, %v4654_v17 }
 0x679   :  { %12979 = vst [vmem:[#allocation20_spill] sm:$0xff] %v10922_v7  ;;  %v4627_v50 = vrot.slane %v10901_v46, 1  ;;  %v10928_v23 = vsel %vm5051_vm7, %v5038_v5, %v4797_v24  ;;  %v4767_v52 = vrot.slane %v4655_v37, 1  ;;  %v10932_v26 = vsel %vm4569_vm3, %v4559_v28, %v10668_v21  ;;  %v10945_v24 = vpop.permute.xlu1 %4185  ;;  %v10947_v35 = vpop.permute.xlu0 %4189 }
 0x67a   :  { %12980 = vst [vmem:[#allocation42_spill] sm:$0xff] %v10928_v23  ;;  %12981 = vst [vmem:[#allocation9_spill] sm:$0xff] %v10932_v26  ;;  %v10936_v4 = vsel %vm4569_vm3, %v4561_v16, %v10670_v8  ;;  %v5023_v38 = vsel %vm72_vm0, %v10844_v3, %v4655_v37  ;;  %v4768_v58 = vrot.slane %v4656_v15, 1  ;;  %v4628_v11 = vrot.slane %v10922_v7, 1 }
 0x67b   :  { %12982 = vst [vmem:[#allocation31_spill] sm:$0xff] %v10936_v4  ;;  %v10943_v17 = vsel %vm4569_vm3, %v4563_v60, %v10718_v0  ;;  %v5024_v21 = vsel %vm72_vm0, %v10856_v54, %v4656_v15  ;;  %v4769_v28 = vrot.slane %v4657_v29, 1  ;;  %v10952_v8 = vmax.f32 %v10891_v49, %v4626_v56 }
 0x67c   :  { %12983 = vst [vmem:[#allocation38_spill] sm:$0xff] %v10943_v17  ;;  %v10956_v16 = vsel %vm4569_vm3, %v4565_v42, %v10720_v43  ;;  %v5025_v5 = vsel %vm72_vm0, %v10863_v45, %v4657_v29  ;;  %v10961_v0 = vmax.f32 %v10901_v46, %v4627_v50  ;;  %v4629_v60 = vrot.slane %v10932_v26, 1 }
 0x67d   :  { %12984 = vst [vmem:[#allocation27_spill] sm:$0xff] %v10956_v16  ;;  %v4630_v20 = vrot.slane %v10936_v4, 1  ;;  %v5039_v23 = vsel %vm5034_vm5, %v5022_v25, %v4766_v47  ;;  %v4799_v61 = vrot.slane %v4655_v37, 2  ;;  %v5040_v56 = vsel %vm5034_vm5, %v5023_v38, %v4767_v52  ;;  %v10973_v45 = vpop.permute.xlu1 %4193  ;;  %v10975_v3 = vpop.permute.xlu0 %4197 }
 0x67e   :  { %v4631_v41 = vrot.slane %v10943_v17, 1  ;;  %v4800_v54 = vrot.slane %v4656_v15, 2  ;;  %v5041_v43 = vsel %vm5034_vm5, %v5024_v21, %v4768_v58  ;;  %v10970_v42 = vmax.f32 %v10922_v7, %v4628_v11 }
 0x67f   :  { %v4632_v50 = vrot.slane %v10956_v16, 1  ;;  %v4801_v33 = vrot.slane %v4657_v29, 2  ;;  %v5042_v47 = vsel %vm5034_vm5, %v5025_v5, %v4769_v28  ;;  %v4770_v37 = vrot.slane %v10952_v8, 1 }
 0x680   :  { %v5026_v15 = vsel %vm72_vm0, %v10891_v49, %v10952_v8  ;;  %v4771_v25 = vrot.slane %v10961_v0, 1  ;;  %v4661_v52 = vmax.f32 %v10932_v26, %v4629_v60  ;;  %v4662_v38 = vmax.f32 %v10936_v4, %v4630_v20 }
 0x681   :  { %v10988_v58 = vsel %vm4569_vm3, %v10867_v63, %v10767_v19  ;;  %v10991_v29 = vsel %vm5051_vm7, %v5039_v23, %v4798_v62  ;;  %v10994_v11 = vsel %vm5051_vm7, %v5040_v56, %v4799_v61  ;;  %v5027_v21 = vsel %vm72_vm0, %v10901_v46, %v10961_v0  ;;  %v11006_v62 = vpop.permute.xlu1 %4201  ;;  %v11008_v23 = vpop.permute.xlu0 %4205 }
 0x682   :  { %12985 = vst [vmem:[#allocation14_spill] sm:$0xff] %v10991_v29  ;;  %12986 = vst [vmem:[#allocation19_spill] sm:$0xff] %v10994_v11  ;;  %v4663_v28 = vmax.f32 %v10943_v17, %v4631_v41  ;;  %v11001_v5 = vsel %vm5051_vm7, %v5041_v43, %v4800_v54  ;;  %v4802_v60 = vrot.slane %v10952_v8, 2  ;;  %v4772_v19 = vrot.slane %v10970_v42, 1 }
 0x683   :  { %12987 = vst [vmem:[#allocation28_spill] sm:$0xff] %v11001_v5  ;;  %v4664_v63 = vmax.f32 %v10956_v16, %v4632_v50  ;;  %v11011_v61 = vsel %vm5051_vm7, %v5042_v47, %v4801_v33  ;;  %v5043_v20 = vsel %vm5034_vm5, %v5026_v15, %v4770_v37  ;;  %v5028_v54 = vsel %vm72_vm0, %v10922_v7, %v10970_v42 }
 0x684   :  { %12988 = vst [vmem:[#allocation18_spill] sm:$0xff] %v11011_v61  ;;  %v4633_v41 = vrot.slane %v10988_v58, 1  ;;  %v4803_v8 = vrot.slane %v10961_v0, 2  ;;  %v5044_v56 = vsel %vm5034_vm5, %v5027_v21, %v4771_v25  ;;  %v4773_v43 = vrot.slane %v4661_v52, 1 }
 0x685   :  { %v4774_v50 = vrot.slane %v4662_v38, 1  ;;  %v4804_v5 = vrot.slane %v10970_v42, 2  ;;  %v5029_v33 = vsel %vm72_vm0, %v10932_v26, %v4661_v52  ;;  %v5030_v47 = vsel %vm72_vm0, %v10936_v4, %v4662_v38  ;;  %v11031_v25 = vpop.permute.xlu1 %4209  ;;  %v4246_v42 = vpop.permute.xlu0 %4245 }
 0x686   :  { %v4775_v37 = vrot.slane %v4663_v28, 1  ;;  %v5045_v15 = vsel %vm5034_vm5, %v5028_v54, %v4772_v19  ;;  %v5031_v61 = vsel %vm72_vm0, %v10943_v17, %v4663_v28  ;;  %v4776_v11 = vrot.slane %v4664_v63, 1 }
 0x687   :  { %v4538_v0 = vsel %vm4536_vm11, %v10690_v48, %v10769_v18  ;;  %v4805_v21 = vrot.slane %v4661_v52, 2  ;;  %v5032_v29 = vsel %vm72_vm0, %v10956_v16, %v4664_v63  ;;  %v11036_v4 = vmax.f32 %v10988_v58, %v4633_v41 }
 0x688   :  { %v11039_v19 = vsel %vm4569_vm3, %v4538_v0, %v4246_v42  ;;  %v5046_v54 = vsel %vm5034_vm5, %v5029_v33, %v4773_v43  ;;  %v4806_v17 = vrot.slane %v4662_v38, 2  ;;  %v5047_v26 = vsel %vm5034_vm5, %v5030_v47, %v4774_v50 }
 0x689   :  { %v12243_v48 = vrot.slane %v11039_v19, 7  ;;  %v4807_v18 = vrot.slane %v4663_v28, 2  ;;  %v5048_v7 = vsel %vm5034_vm5, %v5031_v61, %v4775_v37  ;;  %v4808_v52 = vrot.slane %v4664_v63, 2  ;;  %v4250_v43 = vpop.permute.xlu1 %4249  ;;  %v4254_v50 = vpop.permute.xlu0 %4253 }
 0x68a   :  { %v4540_v16 = vsel %vm4536_vm11, %v10696_v30, %v10811_v36  ;;  %v5049_v41 = vsel %vm5034_vm5, %v5032_v29, %v4776_v11  ;;  %v4542_v0 = vsel %vm4536_vm11, %v10702_v10, %v10813_v32  ;;  %v4682_v38 = vrot.slane %v11039_v19, 1 }
 0x68b   :  { %v5139_v28 = vsel %vm5138_vm12, %v12243_v48, 0.0  ;;  %v11057_v63 = vsel %vm5051_vm7, %v5043_v20, %v4802_v60  ;;  %v4777_v61 = vrot.slane %v11036_v4, 1  ;;  %v11061_v30 = vsel %vm4569_vm3, %v4540_v16, %v4250_v43 }
 0x68c   :  { %v11064_v36 = vsel %vm4569_vm3, %v4542_v0, %v4254_v50  ;;  %5140 = vadd.xlane.f32.xlu0 %v5139_v28  ;;  %v11067_v10 = vsel %vm5051_vm7, %v5044_v56, %v4803_v8  ;;  %v11070_v32 = vsel %vm5051_vm7, %v5045_v15, %v4804_v5  ;;  %v11073_v29 = vsel %vm5051_vm7, %v5046_v54, %v4805_v21  ;;  %v12989_v8 = vld [vmem:[#allocation12_spill] sm:$0xff] }
 0x68d   :  { %v5033_v11 = vsel %vm72_vm0, %v10988_v58, %v11036_v4  ;;  %v11079_v16 = vsel %vm5051_vm7, %v5047_v26, %v4806_v17  ;;  %v11082_v60 = vsel %vm5051_vm7, %v5048_v7, %v4807_v18  ;;  %v11085_v20 = vsel %vm5051_vm7, %v5049_v41, %v4808_v52  ;;  %v4258_v47 = vpop.permute.xlu1 %4257  ;;  %v4262_v37 = vpop.permute.xlu0 %4261  ;;  %v12992_v18 = vld [vmem:[#allocation11_spill] sm:$0xff]  ;;  %v12993_v52 = vld [vmem:[#allocation26_spill] sm:$0xff] }
 0x68e   :  { %v4544_v5 = vsel %vm4536_vm11, %v10708_v39, %v10846_v9  ;;  %v4546_v56 = vsel %vm4536_vm11, %v12989_v8, %v10848_v40  ;;  %v4714_v33 = vmax.f32 %v10732_v55, %v4682_v38  ;;  %v12241_v26 = vrot.slane %v11061_v30, 7 }
 0x68f   :  { %v12242_v7 = vrot.slane %v11064_v36, 7  ;;  %v11098_v15 = vsel %vm5034_vm5, %v5033_v11, %v4777_v61  ;;  %v4548_v39 = vsel %vm4536_vm11, %v10726_v1, %v10874_v31  ;;  %v4550_v9 = vsel %vm4536_vm11, %v10738_v57, %v10876_v27  ;;  %v12990_v57 = vld [vmem:[#allocation24_spill] sm:$0xff] }
 0x690   :  { %v4552_v55 = vsel %vm4536_vm11, %v10750_v59, %v10911_v14  ;;  %v11112_v40 = vsel %vm4536_vm11, %v10760_v22, %v10913_v53  ;;  %v4683_v42 = vrot.slane %v11061_v30, 1  ;;  %v11116_v21 = vsel %vm4569_vm3, %v4544_v5, %v4258_v47  ;;  %v12991_v59 = vld [vmem:[#allocation25_spill] sm:$0xff] }
 0x691   :  { %v11121_v1 = vsel %vm4536_vm11, %v10773_v12, %v10945_v24  ;;  %v11126_v31 = vsel %vm4536_vm11, %v12990_v57, %v10947_v35  ;;  %v11131_v22 = vsel %vm4536_vm11, %v12991_v59, %v10973_v45  ;;  %v11134_v27 = vmax.f32 %v11039_v19, %v4682_v38  ;;  %v4266_v35 = vpop.permute.xlu1 %4265  ;;  %v4270_v54 = vpop.permute.xlu0 %4269 }
 0x692   :  { %v4842_v14 = vrot.slane %v4714_v33, 3  ;;  %v4684_v53 = vrot.slane %v11064_v36, 1  ;;  %v5145_v12 = vsel %vm5138_vm12, %v12241_v26, 0.0  ;;  %v5151_v24 = vsel %vm5138_vm12, %v12242_v7, 0.0  ;;  %v12997_v7 = vld [vmem:[#allocation41_spill] sm:$0xff] }
 0x693   :  { %v11146_v45 = vsel %vm4536_vm11, %v12992_v18, %v10975_v3  ;;  %v11151_v41 = vsel %vm4536_vm11, %v12993_v52, %v11006_v62  ;;  %v11156_v0 = vsel %vm4536_vm11, %v10885_v2, %v11008_v23  ;;  %5146 = vadd.xlane.f32.xlu1 %v5145_v12  ;;  %5152 = vadd.xlane.f32.xlu0 %v5151_v24  ;;  %v12239_v38 = vrot.slane %v11116_v21, 7  ;;  %v12994_v18 = vld [vmem:[#allocation10_spill] sm:$0xff] }
 0x694   :  { %v11162_v43 = vsel %vm4536_vm11, %v10896_v6, %v11031_v25  ;;  %v11165_v3 = vmax.f32 %v10744_v44, %v4683_v42  ;;  %v11168_v62 = vsel %vm4569_vm3, %v4546_v56, %v4262_v37  ;;  %v11171_v50 = vsel %vm4569_vm3, %v4548_v39, %v4266_v35  ;;  %v13000_v37 = vld [vmem:[#allocation9_spill] sm:$0xff] }
 0x695   :  { %v4890_v2 = vrot.slane %v11134_v27, 4  ;;  %v11176_v28 = vmax.f32 %v11061_v30, %v4683_v42  ;;  %v4685_v61 = vrot.slane %v11116_v21, 1  ;;  %v11180_v6 = vmax.f32 %v10756_v13, %v4684_v53  ;;  %v4274_v25 = vpop.permute.xlu1 %4273  ;;  %v4278_v11 = vpop.permute.xlu0 %4277 }
 0x696   :  { %v5157_v44 = vsel %vm5138_vm12, %v12239_v38, 0.0  ;;  %v11188_v8 = vsel %vm5068_vm13, %v10904_v51, %v4842_v14  ;;  %v4686_v56 = vrot.slane %v11168_v62, 1  ;;  %v11192_v33 = vsel %vm4569_vm3, %v4550_v9, %v4270_v54 }
 0x697   :  { %5158 = vadd.xlane.f32.xlu0 %v5157_v44  ;;  %v12240_v13 = vrot.slane %v11168_v62, 7  ;;  %v12238_v47 = vrot.slane %v11171_v50, 7  ;;  %v11198_v39 = vmax.f32 %v11064_v36, %v4684_v53  ;;  %v4687_v42 = vrot.slane %v11171_v50, 1 }
 0x698   :  { %v11202_v51 = vsel %vm4569_vm3, %v4552_v55, %v4274_v25  ;;  %v11207_v59 = vmax.f32 %v10780_v34, %v4685_v61  ;;  %v11213_v12 = vmax.f32 %v11116_v21, %v4685_v61  ;;  %v4688_v53 = vrot.slane %v11192_v33, 1 }
 0x699   :  { %v5163_v14 = vsel %vm5138_vm12, %v12240_v13, 0.0  ;;  %v5169_v55 = vsel %vm5138_vm12, %v12238_v47, 0.0  ;;  %v12244_v24 = vrot.slane %v11192_v33, 7  ;;  %v4282_v35 = vpop.permute.xlu1 %4281  ;;  %v4286_v54 = vpop.permute.xlu0 %4285  ;;  %v11222_v52 = vmax.f32 %v12994_v18, %v4686_v56  ;;  %v12995_v47 = vld [vmem:[#allocation6_spill] sm:$0xff] }
 0x69a   :  { %5164 = vadd.xlane.f32.xlu1 %v5163_v14  ;;  %v11225_v44 = vmax.f32 %v11168_v62, %v4686_v56  ;;  %v12245_v61 = vrot.slane %v11202_v51, 7  ;;  %v11231_v38 = vmax.f32 %v12995_v47, %v4687_v42  ;;  %v11237_v18 = vmax.f32 %v11171_v50, %v4687_v42 }
 0x69b   :  { %5170 = vadd.xlane.f32.xlu0 %v5169_v55  ;;  %v5175_v13 = vsel %vm5138_vm12, %v12244_v24, 0.0  ;;  %v4689_v56 = vrot.slane %v11202_v51, 1  ;;  %v11242_v55 = vsel %vm4569_vm3, %v11112_v40, %v4278_v11  ;;  %v11246_v26 = vsel %vm4569_vm3, %v11121_v1, %v4282_v35  ;;  %v12996_v24 = vld [vmem:[#allocation30_spill] sm:$0xff] }
 0x69c   :  { %v11252_v17 = vmax.f32 %v12996_v24, %v4688_v53  ;;  %v11257_v11 = vmax.f32 %v11192_v33, %v4688_v53  ;;  %v5181_v1 = vsel %vm5138_vm12, %v12245_v61, 0.0  ;;  %v4690_v35 = vrot.slane %v11242_v55, 1 }
 0x69d   :  { %v4290_v42 = vpop.permute.xlu1 %4289  ;;  %v4294_v14 = vpop.permute.xlu0 %4293  ;;  %v11265_v24 = vsel %vm4569_vm3, %v11126_v31, %v4286_v54  ;;  %v12247_v48 = vrot.slane %v11246_v26, 7  ;;  %v11273_v47 = vmax.f32 %v12997_v7, %v4689_v56  ;;  %v4691_v31 = vrot.slane %v11246_v26, 1 }
 0x69e   :  { %5176 = vadd.xlane.f32.xlu1 %v5175_v13  ;;  %v12246_v13 = vrot.slane %v11242_v55, 7  ;;  %v11282_v40 = vmax.f32 %v11202_v51, %v4689_v56  ;;  %v4692_v25 = vrot.slane %v11265_v24, 1  ;;  %v12248_v61 = vrot.slane %v11265_v24, 7 }
 0x69f   :  { %5182 = vadd.xlane.f32.xlu0 %v5181_v1  ;;  %v5193_v7 = vsel %vm5138_vm12, %v12247_v48, 0.0  ;;  %v11296_v56 = vsel %vm4569_vm3, %v11131_v22, %v4290_v42  ;;  %v11300_v57 = vmax.f32 %v11242_v55, %v4690_v35  ;;  %v11304_v48 = vsel %vm4569_vm3, %v11146_v45, %v4294_v14 }
 0x6a0   :  { %v5187_v54 = vsel %vm5138_vm12, %v12246_v13, 0.0  ;;  %v11292_v13 = vmax.f32 %v10891_v49, %v4690_v35  ;;  %12998 = vst [vmem:[#allocation21_spill] sm:$0xff] %v11296_v56  ;;  %v5199_v34 = vsel %vm5138_vm12, %v12248_v61, 0.0  ;;  %v11310_v49 = vmax.f32 %v10901_v46, %v4691_v31 }
 0x6a1   :  { %v4298_v1 = vpop.permute.xlu1 %4297  ;;  %v4302_v9 = vpop.permute.xlu0 %4301  ;;  %v11313_v22 = vmax.f32 %v11246_v26, %v4691_v31  ;;  %v4693_v46 = vrot.slane %v11296_v56, 1  ;;  %v5086_v53 = vsel %vm5085_vm14, %v11188_v8, %v4890_v2 }
 0x6a2   :  { %5188 = vadd.xlane.f32.xlu1 %v5187_v54  ;;  %v11317_v42 = vsel %vm4569_vm3, %v11151_v41, %v4298_v1  ;;  %v11321_v35 = vsel %vm4569_vm3, %v11156_v0, %v4302_v9  ;;  %v11330_v54 = vmax.f32 %v11265_v24, %v4692_v25  ;;  %v4694_v41 = vrot.slane %v11304_v48, 1 }
 0x6a3   :  { %5194 = vadd.xlane.f32.xlu0 %v5193_v7  ;;  %v12999_v7 = vld [vmem:[#allocation20_spill] sm:$0xff]  ;;  %v12249_v1 = vrot.slane %v11296_v56, 7  ;;  %v12250_v0 = vrot.slane %v11304_v48, 7  ;;  %v12252_v45 = vrot.slane %v11321_v35, 7  ;;  %v11347_v23 = vmax.f32 %v13000_v37, %v4693_v46 }
 0x6a4   :  { %v11326_v61 = vmax.f32 %v12999_v7, %v4692_v25  ;;  %v12251_v7 = vrot.slane %v11317_v42, 7  ;;  %v11350_v9 = vmax.f32 %v11296_v56, %v4693_v46  ;;  %v13004_v25 = vld [vmem:[#allocation32_spill] sm:$0xff]  ;;  %v4695_v8 = vrot.slane %v11317_v42, 1 }
 0x6a5   :  { %v4306_v31 = vpop.permute.xlu1 %4305  ;;  %v5205_v14 = vsel %vm5138_vm12, %v12249_v1, 0.0  ;;  %v5223_v1 = vsel %vm5138_vm12, %v12252_v45, 0.0 }
 0x6a6   :  { %5200 = vadd.xlane.f32.xlu1 %v5199_v34  ;;  %v11344_v5 = vsel %vm4569_vm3, %v11162_v43, %v4306_v31  ;;  %v5211_v34 = vsel %vm5138_vm12, %v12250_v0, 0.0  ;;  %v13001_v31 = vld [vmem:[#allocation31_spill] sm:$0xff]  ;;  %v5217_v46 = vsel %vm5138_vm12, %v12251_v7, 0.0  ;;  %v13003_v43 = vrot.slane %v11165_v3, 3 }
 0x6a7   :  { %v11362_v37 = vmax.f32 %v13001_v31, %v4694_v41  ;;  %5206 = vadd.xlane.f32.xlu0 %v5205_v14  ;;  %v11377_v14 = vmax.f32 %v11304_v48, %v4694_v41  ;;  %v13005_v31 = vrot.slane %v11134_v27, 6  ;;  %v13006_v3 = vrot.slane %v11176_v28, 4 }
 0x6a8   :  { %v5070_v45 = vsel %vm5068_vm13, %v13004_v25, %v13003_v43  ;;  %v13007_v43 = vrot.slane %v11180_v6, 3  ;;  %v13009_v56 = vrot.slane %v11344_v5, 7  ;;  %v13015_v0 = vrot.slane %v11213_v12, 4 }
 0x6a9   :  { %v5087_v25 = vsel %vm5085_vm14, %v5070_v45, %v13006_v3  ;;  %v13013_v45 = vld [vmem:[#allocation42_spill] sm:$0xff]  ;;  %v4955_v3 = vrot.slane %v11176_v28, 6 }
 0x6aa   :  { %5212 = vadd.xlane.f32.xlu1 %v5211_v34  ;;  %v13002_v34 = vrot.slane %v11134_v27, 5  ;;  %v5229_v41 = vsel %vm5138_vm12, %v13009_v56, 0.0 }
 0x6ab   :  { %5218 = vadd.xlane.f32.xlu0 %v5217_v46 }
 0x6ac   :  { %v5102_v7 = vsel %vm1375_vm6, %v5086_v53, %v13002_v34  ;;  %v13008_v34 = vld [vmem:[#allocation36_spill] sm:$0xff] }
 0x6ad   :  { %v11394_v53 = vsel %vm1151_vm4, %v5102_v7, %v13005_v31  ;;  %v5071_v2 = vsel %vm5068_vm13, %v13008_v34, %v13007_v43  ;;  %v13011_v7 = vrot.slane %v11198_v39, 4  ;;  %v13012_v31 = vrot.slane %v11207_v59, 3 }
 0x6ae   :  { %5224 = vadd.xlane.f32.xlu1 %v5223_v1  ;;  %v13010_v1 = vrot.slane %v11176_v28, 5  ;;  %v4956_v43 = vrot.slane %v11198_v39, 6  ;;  %v13014_v34 = vrot.slane %v11198_v39, 5  ;;  %v5135_v59 = vsel %vm5134_vm15, %v11394_v53, 0.0 }
 0x6af   :  { %v5088_v46 = vsel %vm5085_vm14, %v5071_v2, %v13011_v7  ;;  %v5072_v6 = vsel %vm5068_vm13, %v13013_v45, %v13012_v31  ;;  %v13016_v2 = vld [vmem:[#allocation38_spill] sm:$0xff]  ;;  %v13017_v28 = vrot.slane %v11222_v52, 3  ;;  %v4696_v39 = vrot.slane %v11321_v35, 1  ;;  %5230 = vadd.xlane.f32.xlu0 %v5229_v41 }
 0x6b0   :  { %v5103_v27 = vsel %vm1375_vm6, %v5087_v25, %v13010_v1  ;;  %v5104_v56 = vsel %vm1375_vm6, %v5088_v46, %v13014_v34  ;;  %v5089_v25 = vsel %vm5085_vm14, %v5072_v6, %v13015_v0  ;;  %v11426_v7 = vmax.f32 %v13016_v2, %v4695_v8  ;;  %v13018_v31 = vld [vmem:[#allocation14_spill] sm:$0xff] }
 0x6b1   :  { %v5073_v45 = vsel %vm5068_vm13, %v13018_v31, %v13017_v28  ;;  %v11436_v46 = vsel %vm1151_vm4, %v5103_v27, %v4955_v3  ;;  %v11439_v0 = vsel %vm1151_vm4, %v5104_v56, %v4956_v43  ;;  %v13019_v6 = vrot.slane %v11225_v44, 4  ;;  %v13023_v3 = vld [vmem:[#allocation19_spill] sm:$0xff] }
 0x6b2   :  { %5136 = vadd.xlane.f32.xlu1 %v5135_v59  ;;  %v11445_v2 = vmax.f32 %v11317_v42, %v4695_v8  ;;  %v13020_v52 = vrot.slane %v11213_v12, 5  ;;  %v13021_v41 = vrot.slane %v11225_v44, 5  ;;  %v13022_v27 = vrot.slane %v11231_v38, 3 }
 0x6b3   :  { %v5090_v34 = vsel %vm5085_vm14, %v5073_v45, %v13019_v6  ;;  %v4957_v56 = vrot.slane %v11213_v12, 6  ;;  %v4958_v31 = vrot.slane %v11225_v44, 6  ;;  %v13024_v8 = vrot.slane %v11237_v18, 4 }
 0x6b4   :  { %v5105_v28 = vsel %vm1375_vm6, %v5089_v25, %v13020_v52  ;;  %v5106_v59 = vsel %vm1375_vm6, %v5090_v34, %v13021_v41  ;;  %v5074_v43 = vsel %vm5068_vm13, %v13023_v3, %v13022_v27  ;;  %v13025_v6 = vrot.slane %v11252_v17, 3  ;;  %v13026_v25 = vld [vmem:[#allocation28_spill] sm:$0xff]  ;;  %v13029_v27 = vld [vmem:[#allocation18_spill] sm:$0xff] }
 0x6b5   :  { %v5091_v45 = vsel %vm5085_vm14, %v5074_v43, %v13024_v8  ;;  %v5142_v34 = vsel %vm5134_vm15, %v11436_v46, 0.0  ;;  %v5148_v38 = vsel %vm5134_vm15, %v11439_v0, 0.0  ;;  %v13027_v41 = vrot.slane %v11257_v11, 4  ;;  %v13030_v43 = vld [vmem:[#allocation27_spill] sm:$0xff] }
 0x6b6   :  { %v5075_v52 = vsel %vm5068_vm13, %v13026_v25, %v13025_v6  ;;  %v13028_v44 = vrot.slane %v11273_v47, 3  ;;  %v4934_v17 = vrot.slane %v11377_v14, 5  ;;  %v4728_v8 = vmax.f32 %v13030_v43, %v4696_v39  ;;  %5143 = vadd.xlane.f32.xlu0 %v5142_v34  ;;  %5149 = vadd.xlane.f32.xlu1 %v5148_v38 }
 0x6b7   :  { %v5092_v12 = vsel %vm5085_vm14, %v5075_v52, %v13027_v41  ;;  %v11480_v6 = vsel %vm1151_vm4, %v5105_v28, %v4957_v56  ;;  %v11483_v25 = vsel %vm1151_vm4, %v5106_v59, %v4958_v31  ;;  %v4697_v1 = vrot.slane %v11344_v5, 1 }
 0x6b8   :  { %v5076_v3 = vsel %vm5068_vm13, %v13029_v27, %v13028_v44  ;;  %v13031_v52 = vrot.slane %v11237_v18, 5  ;;  %v13032_v41 = vrot.slane %v11257_v11, 5  ;;  %v13033_v27 = vrot.slane %v11292_v13, 3 }
 0x6b9   :  { %v4959_v28 = vrot.slane %v11237_v18, 6  ;;  %v4960_v59 = vrot.slane %v11257_v11, 6  ;;  %v13034_v56 = vrot.slane %v11282_v40, 4  ;;  %v13035_v38 = vrot.slane %v11300_v57, 4 }
 0x6ba   :  { %v5107_v47 = vsel %vm1375_vm6, %v5091_v45, %v13031_v52  ;;  %v5108_v44 = vsel %vm1375_vm6, %v5092_v12, %v13032_v41  ;;  %v5077_v34 = vsel %vm5068_vm13, %v11057_v63, %v13033_v27  ;;  %v11505_v43 = vmax.f32 %v11321_v35, %v4696_v39 }
 0x6bb   :  { %v5093_v31 = vsel %vm5085_vm14, %v5076_v3, %v13034_v56  ;;  %v5094_v45 = vsel %vm5085_vm14, %v5077_v34, %v13035_v38  ;;  %v5154_v13 = vsel %vm5134_vm15, %v11480_v6, 0.0  ;;  %v5160_v63 = vsel %vm5134_vm15, %v11483_v25, 0.0 }
 0x6bc   :  { %v13036_v18 = vrot.slane %v11310_v49, 3  ;;  %v4855_v12 = vrot.slane %v11426_v7, 3  ;;  %5155 = vadd.xlane.f32.xlu0 %v5154_v13  ;;  %5161 = vadd.xlane.f32.xlu1 %v5160_v63  ;;  %v11517_v3 = vsel %vm1151_vm4, %v5107_v47, %v4959_v28  ;;  %v11520_v39 = vsel %vm1151_vm4, %v5108_v44, %v4960_v59 }
 0x6bd   :  { %13037 = vst [vmem:[#allocation37_spill] sm:$0xff] %v11517_v3  ;;  %13038 = vst [vmem:[#allocation8_spill] sm:$0xff] %v11520_v39  ;;  %v13039_v52 = vrot.slane %v11326_v61, 3  ;;  %v4856_v27 = vrot.slane %v4728_v8, 3  ;;  %v4729_v49 = vmax.f32 %v10988_v58, %v4697_v1  ;;  %v13041_v34 = vrot.slane %v11300_v57, 5 }
 0x6be   :  { %v5078_v11 = vsel %vm5068_vm13, %v11067_v10, %v13036_v18  ;;  %v13040_v10 = vrot.slane %v11282_v40, 5  ;;  %v4961_v28 = vrot.slane %v11282_v40, 6  ;;  %v4962_v44 = vrot.slane %v11300_v57, 6 }
 0x6bf   :  { %v5079_v41 = vsel %vm5068_vm13, %v11070_v32, %v13039_v52  ;;  %v5110_v47 = vsel %vm1375_vm6, %v5094_v45, %v13041_v34  ;;  %v13042_v61 = vrot.slane %v11313_v22, 4  ;;  %v13043_v32 = vrot.slane %v11330_v54, 4 }
 0x6c0   :  { %v5109_v7 = vsel %vm1375_vm6, %v5093_v31, %v13040_v10  ;;  %v5166_v8 = vsel %vm5134_vm15, %v11517_v3, 0.0  ;;  %v5172_v56 = vsel %vm5134_vm15, %v11520_v39, 0.0  ;;  %v13044_v31 = vrot.slane %v11347_v23, 3 }
 0x6c1   :  { %v5095_v59 = vsel %vm5085_vm14, %v5078_v11, %v13042_v61  ;;  %v5096_v58 = vsel %vm5085_vm14, %v5079_v41, %v13043_v32  ;;  %v13045_v57 = vrot.slane %v11362_v37, 3  ;;  %v4903_v45 = vrot.slane %v11445_v2, 4  ;;  %5167 = vadd.xlane.f32.xlu0 %v5166_v8  ;;  %5173 = vadd.xlane.f32.xlu1 %v5172_v56 }
 0x6c2   :  { %v5080_v40 = vsel %vm5068_vm13, %v11073_v29, %v13044_v31  ;;  %v4904_v13 = vrot.slane %v11505_v43, 4  ;;  %v11556_v63 = vsel %vm1151_vm4, %v5109_v7, %v4961_v28  ;;  %v11559_v18 = vsel %vm1151_vm4, %v5110_v47, %v4962_v44 }
 0x6c3   :  { %v5081_v38 = vsel %vm5068_vm13, %v11079_v16, %v13045_v57  ;;  %13046 = vst [vmem:[#allocation7_spill] sm:$0xff] %v11556_v63  ;;  %13047 = vst [vmem:[#allocation16_spill] sm:$0xff] %v11559_v18  ;;  %v4745_v23 = vmax.f32 %v11344_v5, %v4697_v1  ;;  %v4857_v29 = vrot.slane %v4729_v49, 3  ;;  %v13048_v37 = vrot.slane %v11313_v22, 5 }
 0x6c4   :  { %v13049_v16 = vrot.slane %v11330_v54, 5  ;;  %v4963_v41 = vrot.slane %v11313_v22, 6  ;;  %v4964_v10 = vrot.slane %v11330_v54, 6  ;;  %v13050_v7 = vrot.slane %v11350_v9, 4 }
 0x6c5   :  { %v5111_v11 = vsel %vm1375_vm6, %v5095_v59, %v13048_v37  ;;  %v13051_v47 = vrot.slane %v11377_v14, 4  ;;  %v5178_v49 = vsel %vm5134_vm15, %v11556_v63, 0.0  ;;  %v5184_v28 = vsel %vm5134_vm15, %v11559_v18, 0.0 }
 0x6c6   :  { %v5112_v52 = vsel %vm1375_vm6, %v5096_v58, %v13049_v16  ;;  %v5097_v34 = vsel %vm5085_vm14, %v5080_v40, %v13050_v7  ;;  %v5082_v44 = vsel %vm5068_vm13, %v11082_v60, %v4855_v12  ;;  %v5083_v54 = vsel %vm5068_vm13, %v11085_v20, %v4856_v27  ;;  %5179 = vadd.xlane.f32.xlu0 %v5178_v49 }
 0x6c7   :  { %v5098_v1 = vsel %vm5085_vm14, %v5081_v38, %v13051_v47  ;;  %v13052_v22 = vrot.slane %v11036_v4, 2  ;;  %5185 = vadd.xlane.f32.xlu1 %v5184_v28  ;;  %v11589_v59 = vsel %vm1151_vm4, %v5111_v11, %v4963_v41  ;;  %v11592_v32 = vsel %vm1151_vm4, %v5112_v52, %v4964_v10 }
 0x6c8   :  { %13053 = vst [vmem:[#allocation33_spill] sm:$0xff] %v11589_v59  ;;  %13054 = vst [vmem:[#allocation35_spill] sm:$0xff] %v11592_v32  ;;  %v4935_v58 = vrot.slane %v11445_v2, 5  ;;  %v4905_v8 = vrot.slane %v4745_v23, 4  ;;  %v13055_v60 = vrot.slane %v11350_v9, 5  ;;  %v5114_v4 = vsel %vm1375_vm6, %v5098_v1, %v4934_v17 }
 0x6c9   :  { %v5067_v61 = vsel %vm5051_vm7, %v11098_v15, %v13052_v22  ;;  %v4965_v15 = vrot.slane %v11350_v9, 6  ;;  %v4966_v12 = vrot.slane %v11377_v14, 6  ;;  %v5099_v27 = vsel %vm5085_vm14, %v5082_v44, %v4903_v45 }
 0x6ca   :  { %v5113_v20 = vsel %vm1375_vm6, %v5097_v34, %v13055_v60  ;;  %v5100_v56 = vsel %vm5085_vm14, %v5083_v54, %v4904_v13  ;;  %v4936_v31 = vrot.slane %v11505_v43, 5  ;;  %v5190_v40 = vsel %vm5134_vm15, %v11589_v59, 0.0 }
 0x6cb   :  { %v5196_v57 = vsel %vm5134_vm15, %v11592_v32, 0.0  ;;  %v5084_v38 = vsel %vm5068_vm13, %v5067_v61, %v4857_v29  ;;  %5191 = vadd.xlane.f32.xlu0 %v5190_v40  ;;  %v11612_v9 = vsel %vm1151_vm4, %v5113_v20, %v4965_v15  ;;  %v11615_v14 = vsel %vm1151_vm4, %v5114_v4, %v4966_v12 }
 0x6cc   :  { %5197 = vadd.xlane.f32.xlu1 %v5196_v57  ;;  %13056 = vst [vmem:[#allocation13_spill] sm:$0xff] %v11612_v9  ;;  %13057 = vst [vmem:[#allocation39_spill] sm:$0xff] %v11615_v14  ;;  %v5115_v17 = vsel %vm1375_vm6, %v5099_v27, %v4935_v58  ;;  %v5116_v45 = vsel %vm1375_vm6, %v5100_v56, %v4936_v31  ;;  %v4967_v13 = vrot.slane %v11445_v2, 6  ;;  %v4968_v37 = vrot.slane %v11505_v43, 6 }
 0x6cd   :  { %v5101_v11 = vsel %vm5085_vm14, %v5084_v38, %v4905_v8  ;;  %v4937_v16 = vrot.slane %v4745_v23, 5  ;;  %v5202_v29 = vsel %vm5134_vm15, %v11612_v9, 0.0  ;;  %v5208_v52 = vsel %vm5134_vm15, %v11615_v14, 0.0 }
 0x6ce   :  { %v11627_v41 = vsel %vm1151_vm4, %v5115_v17, %v4967_v13  ;;  %v11630_v10 = vsel %vm1151_vm4, %v5116_v45, %v4968_v37  ;;  %v4969_v43 = vrot.slane %v4745_v23, 6 }
 0x6cf   :  { %5203 = vadd.xlane.f32.xlu0 %v5202_v29  ;;  %13058 = vst [vmem:[#allocation43_spill] sm:$0xff] %v11627_v41  ;;  %13059 = vst [vmem:[#allocation44_spill] sm:$0xff] %v11630_v10  ;;  %v5117_v2 = vsel %vm1375_vm6, %v5101_v11, %v4937_v16  ;;  %v5214_v7 = vsel %vm5134_vm15, %v11627_v41, 0.0  ;;  %v5220_v34 = vsel %vm5134_vm15, %v11630_v10, 0.0 }
 0x6d0   :  { %5209 = vadd.xlane.f32.xlu1 %v5208_v52  ;;  %v11638_v47 = vsel %vm1151_vm4, %v5117_v2, %v4969_v43 }
 0x6d1   :  { %13060 = vst [vmem:[#allocation45_spill] sm:$0xff] %v11638_v47  ;;  %v5226_v1 = vsel %vm5134_vm15, %v11638_v47, 0.0 }
 0x6d3   :  { %5215 = vadd.xlane.f32.xlu0 %v5214_v7 }
 0x6d4   :  { %5221 = vadd.xlane.f32.xlu1 %v5220_v34 }
 0x6d7   :  { %5227 = vadd.xlane.f32.xlu0 %v5226_v1 }
 0x715   :  { %v5141_v49 = vpop.xlane.xlu0 %5140 }
 0x716   :  { %v5232_v56 = vsel %vm72_vm0, %v5141_v49, 0.0 }
 0x71c   :  { %v5153_v28 = vpop.xlane.xlu0 %5152  ;;  %v5147_v44 = vpop.xlane.xlu1 %5146 }
 0x71d   :  { %v5240_v17 = vsel %vm72_vm0, %v5147_v44, 0.0  ;;  %v5248_v45 = vsel %vm72_vm0, %v5153_v28, 0.0 }
 0x720   :  { %v5159_v54 = vpop.xlane.xlu0 %5158 }
 0x721   :  { %v5256_v1 = vsel %vm72_vm0, %v5159_v54, 0.0 }
 0x723   :  { %v5165_v23 = vpop.xlane.xlu1 %5164 }
 0x724   :  { %v5171_v22 = vpop.xlane.xlu0 %5170  ;;  %v5264_v43 = vsel %vm72_vm0, %v5165_v23, 0.0 }
 0x727   :  { %v5177_v61 = vpop.xlane.xlu1 %5176 }
 0x728   :  { %v5183_v58 = vpop.xlane.xlu0 %5182  ;;  %v5280_v10 = vsel %vm72_vm0, %v5177_v61, 0.0 }
 0x72b   :  { %v5189_v8 = vpop.xlane.xlu1 %5188 }
 0x72c   :  { %v5195_v60 = vpop.xlane.xlu0 %5194  ;;  %v5296_v23 = vsel %vm72_vm0, %v5189_v8, 0.0 }
 0x72f   :  { %v5201_v20 = vpop.xlane.xlu1 %5200 }
 0x730   :  { %v5207_v15 = vpop.xlane.xlu0 %5206 }
 0x733   :  { %v5213_v4 = vpop.xlane.xlu1 %5212 }
 0x734   :  { %v5219_v27 = vpop.xlane.xlu0 %5218 }
 0x737   :  { %v5225_v12 = vpop.xlane.xlu1 %5224 }
 0x738   :  { %v11643_v40 = vpop.xlane.xlu0 %5230 }
 0x73b   :  { %v5137_v31 = vpop.xlane.xlu1 %5136 }
 0x73c   :  { %v5233_v57 = vadd.f32 %v5232_v56, %v5137_v31 }
 0x73e   :  { %v5234_v38 = vrot.slane %v5233_v57, 4 }
 0x73f   :  { %v5150_v13 = vpop.xlane.xlu1 %5149  ;;  %v5144_v37 = vpop.xlane.xlu0 %5143 }
 0x740   :  { %v5249_v11 = vadd.f32 %v5248_v45, %v5150_v13  ;;  %v5241_v16 = vadd.f32 %v5240_v17, %v5144_v37  ;;  %v5235_v29 = vadd.f32 %v5234_v38, %v5233_v57  ;;  %v5272_v17 = vsel %vm72_vm0, %v5171_v22, 0.0 }
 0x741   :  { %v5288_v13 = vsel %vm72_vm0, %v5183_v58, 0.0  ;;  %v5328_v22 = vsel %vm72_vm0, %v5213_v4, 0.0  ;;  %v5320_v58 = vsel %vm72_vm0, %v5207_v15, 0.0  ;;  %v5352_v15 = vsel %vm72_vm0, %v11643_v40, 0.0 }
 0x742   :  { %v5250_v52 = vrot.slane %v5249_v11, 4  ;;  %v5242_v2 = vrot.slane %v5241_v16, 4  ;;  %v5236_v44 = vrot.slane %v5235_v29, 2 }
 0x744   :  { %v5251_v49 = vadd.f32 %v5250_v52, %v5249_v11  ;;  %v5243_v56 = vadd.f32 %v5242_v2, %v5241_v16  ;;  %v5304_v11 = vsel %vm72_vm0, %v5195_v60, 0.0 }
 0x745   :  { %v5162_v7 = vpop.xlane.xlu1 %5161  ;;  %v5156_v34 = vpop.xlane.xlu0 %5155 }
 0x746   :  { %v5265_v31 = vadd.f32 %v5264_v43, %v5162_v7  ;;  %v5257_v47 = vadd.f32 %v5256_v1, %v5156_v34  ;;  %v5252_v41 = vrot.slane %v5251_v49, 2  ;;  %v5244_v37 = vrot.slane %v5243_v56, 2 }
 0x747   :  { %v5312_v43 = vsel %vm72_vm0, %v5201_v20, 0.0  ;;  %v5237_v7 = vadd.f32 %v5236_v44, %v5235_v29 }
 0x748   :  { %v5266_v28 = vrot.slane %v5265_v31, 4  ;;  %v5258_v57 = vrot.slane %v5257_v47, 4  ;;  %v5253_v61 = vadd.f32 %v5252_v41, %v5251_v49  ;;  %v5245_v60 = vadd.f32 %v5244_v37, %v5243_v56 }
 0x749   :  { %v5336_v41 = vsel %vm72_vm0, %v5219_v27, 0.0  ;;  %v5238_v29 = vrot.slane %v5237_v7, 1 }
 0x74a   :  { %v5174_v38 = vpop.xlane.xlu1 %5173  ;;  %v5168_v45 = vpop.xlane.xlu0 %5167  ;;  %v5267_v54 = vadd.f32 %v5266_v28, %v5265_v31  ;;  %v5259_v16 = vadd.f32 %v5258_v57, %v5257_v47  ;;  %v5344_v31 = vsel %vm72_vm0, %v5225_v12, 0.0  ;;  %v5254_v49 = vrot.slane %v5253_v61, 1 }
 0x74b   :  { %v5281_v52 = vadd.f32 %v5280_v10, %v5174_v38  ;;  %v5273_v2 = vadd.f32 %v5272_v17, %v5168_v45  ;;  %v5239_v27 = vadd.f32 %v5238_v29, %v5237_v7 }
 0x74c   :  { %v5268_v34 = vrot.slane %v5267_v54, 2  ;;  %v5260_v1 = vrot.slane %v5259_v16, 2 }
 0x74d   :  { %v5282_v9 = vrot.slane %v5281_v52, 4  ;;  %v5274_v14 = vrot.slane %v5273_v2, 4 }
 0x74e   :  { %v5269_v10 = vadd.f32 %v5268_v34, %v5267_v54  ;;  %v5261_v44 = vadd.f32 %v5260_v1, %v5259_v16  ;;  %v5255_v16 = vadd.f32 %v5254_v49, %v5253_v61 }
 0x74f   :  { %v5180_v59 = vpop.xlane.xlu0 %5179  ;;  %v5283_v28 = vadd.f32 %v5282_v9, %v5281_v52  ;;  %v5275_v17 = vadd.f32 %v5274_v14, %v5273_v2  ;;  %v5246_v9 = vrot.slane %v5245_v60, 1 }
 0x750   :  { %v5186_v8 = vpop.xlane.xlu1 %5185  ;;  %v5289_v20 = vadd.f32 %v5288_v13, %v5180_v59  ;;  %v5270_v14 = vrot.slane %v5269_v10, 1  ;;  %v5262_v2 = vrot.slane %v5261_v44, 1 }
 0x751   :  { %v5297_v47 = vadd.f32 %v5296_v23, %v5186_v8  ;;  %v5284_v57 = vrot.slane %v5283_v28, 2  ;;  %v5276_v38 = vrot.slane %v5275_v17, 2 }
 0x752   :  { %v5290_v45 = vrot.slane %v5289_v20, 4 }
 0x753   :  { %v5298_v4 = vrot.slane %v5297_v47, 4  ;;  %v5285_v59 = vadd.f32 %v5284_v57, %v5283_v28  ;;  %v5277_v13 = vadd.f32 %v5276_v38, %v5275_v17 }
 0x754   :  { %v5192_v63 = vpop.xlane.xlu0 %5191  ;;  %v5291_v1 = vadd.f32 %v5290_v45, %v5289_v20 }
 0x755   :  { %v5198_v32 = vpop.xlane.xlu1 %5197  ;;  %v5299_v12 = vadd.f32 %v5298_v4, %v5297_v47  ;;  %v5305_v23 = vadd.f32 %v5304_v11, %v5192_v63  ;;  %v5286_v34 = vrot.slane %v5285_v59, 1  ;;  %v5271_v63 = vadd.f32 %v5270_v14, %v5269_v10 }
 0x756   :  { %v5313_v56 = vadd.f32 %v5312_v43, %v5198_v32  ;;  %v5247_v32 = vadd.f32 %v5246_v9, %v5245_v60  ;;  %v5278_v11 = vrot.slane %v5277_v13, 1  ;;  %v5263_v4 = vadd.f32 %v5262_v2, %v5261_v44 }
 0x757   :  { %v5300_v37 = vrot.slane %v5299_v12, 2  ;;  %v5306_v52 = vrot.slane %v5305_v23, 4  ;;  %v11661_v57 = vadd.f32 %v5286_v34, %v5285_v59  ;;  %v5292_v61 = vrot.slane %v5291_v1, 2 }
 0x758   :  { %v5314_v54 = vrot.slane %v5313_v56, 4  ;;  %v5204_v18 = vpop.xlane.xlu0 %5203 }
 0x759   :  { %v5210_v8 = vpop.xlane.xlu1 %5209  ;;  %v5301_v3 = vadd.f32 %v5300_v37, %v5299_v12  ;;  %v5307_v40 = vadd.f32 %v5306_v52, %v5305_v23  ;;  %v5321_v43 = vadd.f32 %v5320_v58, %v5204_v18 }
 0x75a   :  { %v5315_v39 = vadd.f32 %v5314_v54, %v5313_v56  ;;  %v5329_v47 = vadd.f32 %v5328_v22, %v5210_v8  ;;  %v5279_v22 = vadd.f32 %v5278_v11, %v5277_v13  ;;  %v5293_v54 = vadd.f32 %v5292_v61, %v5291_v1 }
 0x75b   :  { %v5302_v28 = vrot.slane %v5301_v3, 1  ;;  %v5308_v7 = vrot.slane %v5307_v40, 2  ;;  %v5322_v49 = vrot.slane %v5321_v43, 4 }
 0x75c   :  { %v5316_v17 = vrot.slane %v5315_v39, 2  ;;  %v5330_v29 = vrot.slane %v5329_v47, 4  ;;  %v5216_v38 = vpop.xlane.xlu0 %5215 }
 0x75d   :  { %v5222_v20 = vpop.xlane.xlu1 %5221  ;;  %v5303_v45 = vadd.f32 %v5302_v28, %v5301_v3  ;;  %v5309_v56 = vadd.f32 %v5308_v7, %v5307_v40  ;;  %v5323_v60 = vadd.f32 %v5322_v49, %v5321_v43  ;;  %v5337_v9 = vadd.f32 %v5336_v41, %v5216_v38 }
 0x75e   :  { %v5317_v12 = vadd.f32 %v5316_v17, %v5315_v39  ;;  %v5331_v23 = vadd.f32 %v5330_v29, %v5329_v47  ;;  %v5345_v10 = vadd.f32 %v5344_v31, %v5222_v20  ;;  %v13061_v43 = vrot.slane %v11039_v19, 7 }
 0x75f   :  { %v5360_v18 = vadd.f32 %v5303_v45, %v5239_v27  ;;  %v5310_v14 = vrot.slane %v5309_v56, 1  ;;  %v5324_v44 = vrot.slane %v5323_v60, 2  ;;  %v5338_v52 = vrot.slane %v5337_v9, 4 }
 0x760   :  { %v5318_v58 = vrot.slane %v5317_v12, 1  ;;  %v5332_v37 = vrot.slane %v5331_v23, 2  ;;  %v5346_v59 = vrot.slane %v5345_v10, 4  ;;  %v5228_v2 = vpop.xlane.xlu0 %5227 }
 0x761   :  { %v11663_v34 = vmul.f32 0.0061728396, %v5360_v18  ;;  %v5311_v3 = vadd.f32 %v5310_v14, %v5309_v56  ;;  %v5325_v40 = vadd.f32 %v5324_v44, %v5323_v60  ;;  %v5339_v13 = vadd.f32 %v5338_v52, %v5337_v9 }
 0x762   :  { %v5319_v8 = vadd.f32 %v5318_v58, %v5317_v12  ;;  %v5333_v39 = vadd.f32 %v5332_v37, %v5331_v23  ;;  %v5347_v47 = vadd.f32 %v5346_v59, %v5345_v10  ;;  %v5353_v11 = vadd.f32 %v5352_v15, %v5228_v2 }
 0x763   :  { %v5361_v41 = vadd.f32 %v5311_v3, %v5247_v32  ;;  %v11668_v1 = vsub.f32 %v13061_v43, %v11663_v34  ;;  %v5326_v28 = vrot.slane %v5325_v40, 1  ;;  %v5340_v7 = vrot.slane %v5339_v13, 2 }
 0x764   :  { %v5362_v31 = vadd.f32 %v5319_v8, %v5255_v16  ;;  %v5334_v27 = vrot.slane %v5333_v39, 1  ;;  %v5348_v17 = vrot.slane %v5347_v47, 2  ;;  %v5354_v29 = vrot.slane %v5353_v11, 4 }
 0x765   :  { %v11672_v49 = vmul.f32 0.0061728396, %v5361_v41  ;;  %v5409_v15 = vmul.f32 %v11668_v1, %v11668_v1  ;;  %v5327_v16 = vadd.f32 %v5326_v28, %v5325_v40  ;;  %v5341_v38 = vadd.f32 %v5340_v7, %v5339_v13 }
 0x766   :  { %v11670_v61 = vmul.f32 0.0061728396, %v5362_v31  ;;  %v5335_v20 = vadd.f32 %v5334_v27, %v5333_v39  ;;  %v5349_v32 = vadd.f32 %v5348_v17, %v5347_v47  ;;  %v5355_v45 = vadd.f32 %v5354_v29, %v5353_v11 }
 0x767   :  { %v5443_v19 = vsel %vm5138_vm12, %v5409_v15, 0.0  ;;  %v13062_v56 = vrot.slane %v11064_v36, 7  ;;  %v13063_v60 = vrot.slane %v11061_v30, 7  ;;  %v5363_v9 = vadd.f32 %v5327_v16, %v5263_v4 }
 0x768   :  { %v5364_v12 = vadd.f32 %v5335_v20, %v5271_v63  ;;  %v5350_v18 = vrot.slane %v5349_v32, 1  ;;  %v5342_v58 = vrot.slane %v5341_v38, 1  ;;  %v5356_v14 = vrot.slane %v5355_v45, 2  ;;  %5444 = vadd.xlane.f32.xlu1 %v5443_v19 }
 0x769   :  { %v11680_v23 = vsub.f32 %v13062_v56, %v11670_v61  ;;  %v11685_v10 = vsub.f32 %v13063_v60, %v11672_v49  ;;  %v5294_v37 = vrot.slane %v5293_v54, 1  ;;  %v11693_v59 = vmul.f32 0.0061728396, %v5363_v9 }
 0x76a   :  { %v11687_v44 = vmul.f32 0.0061728396, %v5364_v12  ;;  %v5351_v52 = vadd.f32 %v5350_v18, %v5349_v32  ;;  %v5343_v30 = vadd.f32 %v5342_v58, %v5341_v38  ;;  %v5357_v2 = vadd.f32 %v5356_v14, %v5355_v45 }
 0x76b   :  { %v5413_v63 = vmul.f32 %v11680_v23, %v11680_v23  ;;  %v5411_v36 = vmul.f32 %v11685_v10, %v11685_v10  ;;  %v13064_v3 = vrot.slane %v11168_v62, 7  ;;  %v13065_v11 = vrot.slane %v11116_v21, 7 }
 0x76c   :  { %v5366_v40 = vadd.f32 %v5351_v52, %v11661_v57  ;;  %v5365_v47 = vadd.f32 %v5343_v30, %v5279_v22  ;;  %v5358_v13 = vrot.slane %v5357_v2, 1  ;;  %v5295_v41 = vadd.f32 %v5294_v37, %v5293_v54 }
 0x76d   :  { %v5455_v4 = vsel %vm5138_vm12, %v5413_v63, 0.0  ;;  %v5449_v8 = vsel %vm5138_vm12, %v5411_v36, 0.0  ;;  %v11700_v39 = vsub.f32 %v13064_v3, %v11687_v44  ;;  %v11706_v31 = vsub.f32 %v13065_v11, %v11693_v59  ;;  %v13076_v36 = vld [vmem:[#allocation21_spill] sm:$0xff] }
 0x76e   :  { %5456 = vadd.xlane.f32.xlu1 %v5455_v4  ;;  %5450 = vadd.xlane.f32.xlu0 %v5449_v8  ;;  %v11710_v43 = vmul.f32 0.0061728396, %v5366_v40  ;;  %v11712_v62 = vmul.f32 0.0061728396, %v5365_v47  ;;  %v5359_v28 = vadd.f32 %v5358_v13, %v5357_v2  ;;  %v13066_v17 = vrot.slane %v11242_v55, 7 }
 0x76f   :  { %v5417_v27 = vmul.f32 %v11700_v39, %v11700_v39  ;;  %v5415_v57 = vmul.f32 %v11706_v31, %v11706_v31  ;;  %v13067_v29 = vrot.slane %v11192_v33, 7  ;;  %v13069_v15 = vrot.slane %v11171_v50, 7 }
 0x770   :  { %v11720_v21 = vsub.f32 %v13066_v17, %v11663_v34  ;;  %v5367_v7 = vadd.f32 %v5359_v28, %v5295_v41  ;;  %v13071_v33 = vrot.slane %v11265_v24, 7  ;;  %v13072_v56 = vrot.slane %v11202_v51, 7 }
 0x771   :  { %v5467_v22 = vsel %vm5138_vm12, %v5417_v27, 0.0  ;;  %v5461_v54 = vsel %vm5138_vm12, %v5415_v57, 0.0  ;;  %v11726_v20 = vsub.f32 %v13067_v29, %v11710_v43  ;;  %v11731_v16 = vsub.f32 %v13069_v15, %v11712_v62 }
 0x772   :  { %5468 = vadd.xlane.f32.xlu1 %v5467_v22  ;;  %5462 = vadd.xlane.f32.xlu0 %v5461_v54  ;;  %v11733_v32 = vmul.f32 0.0061728396, %v5367_v7  ;;  %v5425_v45 = vmul.f32 %v11720_v21, %v11720_v21  ;;  %v11744_v12 = vsub.f32 %v13071_v33, %v11670_v61  ;;  %v13074_v9 = vrot.slane %v11246_v26, 7 }
 0x773   :  { %13068 = vst [vmem:[#allocation46_spill] sm:$0xff] %v11726_v20  ;;  %13070 = vst [vmem:[#allocation47_spill] sm:$0xff] %v11731_v16  ;;  %v5421_v55 = vmul.f32 %v11726_v20, %v11726_v20  ;;  %v5419_v38 = vmul.f32 %v11731_v16, %v11731_v16  ;;  %v13075_v26 = vrot.slane %v11304_v48, 7  ;;  %v13077_v52 = vrot.slane %v13076_v36, 7  ;;  %v13090_v36 = vld [vmem:[#allocation7_spill] sm:$0xff] }
 0x774   :  { %v11751_v60 = vsub.f32 %v13072_v56, %v11733_v32  ;;  %v11756_v18 = vsub.f32 %v13074_v9, %v11672_v49  ;;  %v5491_v58 = vsel %vm5138_vm12, %v5425_v45, 0.0  ;;  %v5429_v14 = vmul.f32 %v11744_v12, %v11744_v12  ;;  %v13087_v9 = vld [vmem:[#allocation37_spill] sm:$0xff] }
 0x775   :  { %v5479_v50 = vsel %vm5138_vm12, %v5421_v55, 0.0  ;;  %v5473_v19 = vsel %vm5138_vm12, %v5419_v38, 0.0  ;;  %v11769_v63 = vsub.f32 %v13075_v26, %v11687_v44  ;;  %v11774_v30 = vsub.f32 %v13077_v52, %v11693_v59 }
 0x776   :  { %13073 = vst [vmem:[#allocation48_spill] sm:$0xff] %v11751_v60  ;;  %5480 = vadd.xlane.f32.xlu1 %v5479_v50  ;;  %5474 = vadd.xlane.f32.xlu0 %v5473_v19  ;;  %v5423_v24 = vmul.f32 %v11751_v60, %v11751_v60  ;;  %v5427_v51 = vmul.f32 %v11756_v18, %v11756_v18  ;;  %v5503_v2 = vsel %vm5138_vm12, %v5429_v14, 0.0  ;;  %v13079_v4 = vrot.slane %v11321_v35, 7 }
 0x777   :  { %13078 = vst [vmem:[#allocation49_spill] sm:$0xff] %v11774_v30  ;;  %v5433_v48 = vmul.f32 %v11769_v63, %v11769_v63  ;;  %v5431_v40 = vmul.f32 %v11774_v30, %v11774_v30  ;;  %v13081_v47 = vrot.slane %v11317_v42, 7  ;;  %v11796_v11 = vsub.f32 %v11394_v53, %v11663_v34 }
 0x778   :  { %v5485_v37 = vsel %vm5138_vm12, %v5423_v24, 0.0  ;;  %v11780_v8 = vsub.f32 %v13079_v4, %v11710_v43  ;;  %v5497_v3 = vsel %vm5138_vm12, %v5427_v51, 0.0  ;;  %v13083_v42 = vrot.slane %v11344_v5, 7 }
 0x779   :  { %v11790_v13 = vsub.f32 %v13081_v47, %v11712_v62  ;;  %v5515_v41 = vsel %vm5138_vm12, %v5433_v48, 0.0  ;;  %v5509_v27 = vsel %vm5138_vm12, %v5431_v40, 0.0  ;;  %v5408_v53 = vmul.f32 %v11796_v11, %v11796_v11  ;;  %v13093_v47 = vld [vmem:[#allocation33_spill] sm:$0xff] }
 0x77a   :  { %5492 = vadd.xlane.f32.xlu1 %v5491_v58  ;;  %5486 = vadd.xlane.f32.xlu0 %v5485_v37  ;;  %13080 = vst [vmem:[#allocation50_spill] sm:$0xff] %v11780_v8  ;;  %v5437_v35 = vmul.f32 %v11780_v8, %v11780_v8  ;;  %v11805_v57 = vsub.f32 %v13083_v42, %v11733_v32  ;;  %v13089_v58 = vld [vmem:[#allocation16_spill] sm:$0xff] }
 0x77b   :  { %13082 = vst [vmem:[#allocation51_spill] sm:$0xff] %v11790_v13  ;;  %v5435_v28 = vmul.f32 %v11790_v13, %v11790_v13  ;;  %v11815_v54 = vsub.f32 %v11439_v0, %v11670_v61  ;;  %v11819_v5 = vsub.f32 %v11436_v46, %v11672_v49  ;;  %v5440_v29 = vsel %vm5134_vm15, %v5408_v53, 0.0  ;;  %v13095_v53 = vld [vmem:[#allocation13_spill] sm:$0xff] }
 0x77c   :  { %13084 = vst [vmem:[#allocation52_spill] sm:$0xff] %v11805_v57  ;;  %v5527_v22 = vsel %vm5138_vm12, %v5437_v35, 0.0  ;;  %v5439_v7 = vmul.f32 %v11805_v57, %v11805_v57  ;;  %v11824_v15 = vsub.f32 %v11483_v25, %v11687_v44  ;;  %v11833_v46 = vsub.f32 %v11480_v6, %v11693_v59  ;;  %v13085_v25 = vld [vmem:[#allocation8_spill] sm:$0xff] }
 0x77d   :  { %v5521_v17 = vsel %vm5138_vm12, %v5435_v28, 0.0  ;;  %v5412_v38 = vmul.f32 %v11815_v54, %v11815_v54  ;;  %v5410_v0 = vmul.f32 %v11819_v5, %v11819_v5  ;;  %v11839_v33 = vsub.f32 %v13085_v25, %v11710_v43 }
 0x77e   :  { %5504 = vadd.xlane.f32.xlu1 %v5503_v2  ;;  %5498 = vadd.xlane.f32.xlu0 %v5497_v3  ;;  %v5533_v55 = vsel %vm5138_vm12, %v5439_v7, 0.0  ;;  %v5416_v45 = vmul.f32 %v11824_v15, %v11824_v15  ;;  %v5414_v56 = vmul.f32 %v11833_v46, %v11833_v46  ;;  %v11847_v6 = vsub.f32 %v13087_v9, %v11712_v62 }
 0x77f   :  { %13086 = vst [vmem:[#allocation53_spill] sm:$0xff] %v11839_v33  ;;  %v5452_v50 = vsel %vm5134_vm15, %v5412_v38, 0.0  ;;  %v5446_v19 = vsel %vm5134_vm15, %v5410_v0, 0.0  ;;  %v11852_v14 = vsub.f32 %v13089_v58, %v11663_v34  ;;  %v5420_v51 = vmul.f32 %v11839_v33, %v11839_v33  ;;  %v13092_v34 = vld [vmem:[#allocation35_spill] sm:$0xff] }
 0x780   :  { %13088 = vst [vmem:[#allocation54_spill] sm:$0xff] %v11847_v6  ;;  %v5464_v24 = vsel %vm5134_vm15, %v5416_v45, 0.0  ;;  %v5458_v37 = vsel %vm5134_vm15, %v5414_v56, 0.0  ;;  %v5418_v26 = vmul.f32 %v11847_v6, %v11847_v6  ;;  %v11861_v52 = vsub.f32 %v13090_v36, %v11733_v32  ;;  %v13098_v0 = vld [vmem:[#allocation43_spill] sm:$0xff]  ;;  %v13100_v45 = vld [vmem:[#allocation45_spill] sm:$0xff] }
 0x781   :  { %v5424_v2 = vmul.f32 %v11852_v14, %v11852_v14  ;;  %v11867_v4 = vsub.f32 %v13092_v34, %v11670_v61  ;;  %v5476_v3 = vsel %vm5134_vm15, %v5420_v51, 0.0  ;;  %v11875_v35 = vsub.f32 %v13093_v47, %v11672_v49 }
 0x782   :  { %5516 = vadd.xlane.f32.xlu1 %v5515_v41  ;;  %5510 = vadd.xlane.f32.xlu0 %v5509_v27  ;;  %13091 = vst [vmem:[#allocation55_spill] sm:$0xff] %v11861_v52  ;;  %v5470_v48 = vsel %vm5134_vm15, %v5418_v26, 0.0  ;;  %v5422_v40 = vmul.f32 %v11861_v52, %v11861_v52  ;;  %v13094_v27 = vld [vmem:[#allocation39_spill] sm:$0xff]  ;;  %v11889_v49 = vsub.f32 %v13095_v53, %v11693_v59 }
 0x783   :  { %v5488_v41 = vsel %vm5134_vm15, %v5424_v2, 0.0  ;;  %v11880_v28 = vsub.f32 %v13094_v27, %v11687_v44  ;;  %v5428_v42 = vmul.f32 %v11867_v4, %v11867_v4  ;;  %v13096_v44 = vld [vmem:[#allocation44_spill] sm:$0xff]  ;;  %v11903_v59 = vsub.f32 %v13098_v0, %v11712_v62 }
 0x784   :  { %v5482_v61 = vsel %vm5134_vm15, %v5422_v40, 0.0  ;;  %v11895_v7 = vsub.f32 %v13096_v44, %v11710_v43  ;;  %v5430_v38 = vmul.f32 %v11889_v49, %v11889_v49  ;;  %v11907_v25 = vsub.f32 %v13100_v45, %v11733_v32 }
 0x785   :  { %13099 = vst [vmem:[#allocation57_spill] sm:$0xff] %v11903_v59  ;;  %v5434_v56 = vmul.f32 %v11903_v59, %v11903_v59 }
 0x786   :  { %5528 = vadd.xlane.f32.xlu1 %v5527_v22  ;;  %5522 = vadd.xlane.f32.xlu0 %v5521_v17  ;;  %v5426_v22 = vmul.f32 %v11875_v35, %v11875_v35  ;;  %v5432_v17 = vmul.f32 %v11880_v28, %v11880_v28  ;;  %13097 = vst [vmem:[#allocation56_spill] sm:$0xff] %v11895_v7  ;;  %13101 = vst [vmem:[#allocation58_spill] sm:$0xff] %v11907_v25 }
 0x787   :  { %v5518_v9 = vsel %vm5134_vm15, %v5434_v56, 0.0  ;;  %v5438_v32 = vmul.f32 %v11907_v25, %v11907_v25 }
 0x788   :  { %v5512_v43 = vsel %vm5134_vm15, %v5432_v17, 0.0 }
 0x78a   :  { %5441 = vadd.xlane.f32.xlu1 %v5440_v29  ;;  %5534 = vadd.xlane.f32.xlu0 %v5533_v55  ;;  %v5500_v29 = vsel %vm5134_vm15, %v5428_v42, 0.0  ;;  %v5494_v55 = vsel %vm5134_vm15, %v5426_v22, 0.0 }
 0x78e   :  { %5453 = vadd.xlane.f32.xlu1 %v5452_v50  ;;  %5447 = vadd.xlane.f32.xlu0 %v5446_v19  ;;  %v5506_v50 = vsel %vm5134_vm15, %v5430_v38, 0.0  ;;  %v5436_v19 = vmul.f32 %v11895_v7, %v11895_v7 }
 0x790   :  { %v5524_v62 = vsel %vm5134_vm15, %v5436_v19, 0.0 }
 0x792   :  { %5465 = vadd.xlane.f32.xlu1 %v5464_v24  ;;  %5459 = vadd.xlane.f32.xlu0 %v5458_v37  ;;  %v5530_v24 = vsel %vm5134_vm15, %v5438_v32, 0.0 }
 0x796   :  { %5477 = vadd.xlane.f32.xlu1 %v5476_v3  ;;  %5471 = vadd.xlane.f32.xlu0 %v5470_v48 }
 0x79a   :  { %5489 = vadd.xlane.f32.xlu1 %v5488_v41  ;;  %5483 = vadd.xlane.f32.xlu0 %v5482_v61 }
 0x79e   :  { %5501 = vadd.xlane.f32.xlu1 %v5500_v29  ;;  %5495 = vadd.xlane.f32.xlu0 %v5494_v55 }
 0x7a2   :  { %5513 = vadd.xlane.f32.xlu1 %v5512_v43  ;;  %5507 = vadd.xlane.f32.xlu0 %v5506_v50 }
 0x7a6   :  { %5525 = vadd.xlane.f32.xlu1 %v5524_v62  ;;  %5519 = vadd.xlane.f32.xlu0 %v5518_v9 }
 0x7aa   :  { %5531 = vadd.xlane.f32.xlu0 %v5530_v24 }
 0x7ab   :  { %5923 = shalt.err (!%p5920_p4)
}
 0x7ac   :  { %s5957_s26 = smov 128   ;;  %s5958_s6 = smov 8  }
 0x7ad   :  { %5803 = dma.vmem_to_hbm [thread:$0]  %s5798_s24, 4096, %s12111_s2, [#allocation4], %s5957_s26, %s5957_s26, %s5958_s6  }
 0x7f1   :  { %v5445_v58 = vpop.xlane.xlu1 %5444 }
 0x7f2   :  { %v5536_v22 = vsel %vm72_vm0, %v5445_v58, 0.0 }
 0x7f7   :  { %v5457_v37 = vpop.xlane.xlu1 %5456  ;;  %v5451_v51 = vpop.xlane.xlu0 %5450 }
 0x7f8   :  { %v5552_v55 = vsel %vm72_vm0, %v5457_v37, 0.0  ;;  %v5544_v38 = vsel %vm72_vm0, %v5451_v51, 0.0 }
 0x7fb   :  { %v5469_v26 = vpop.xlane.xlu1 %5468  ;;  %v5463_v36 = vpop.xlane.xlu0 %5462 }
 0x7fc   :  { %v5568_v9 = vsel %vm72_vm0, %v5469_v26, 0.0  ;;  %v5560_v58 = vsel %vm72_vm0, %v5463_v36, 0.0 }
 0x7ff   :  { %v5481_v2 = vpop.xlane.xlu1 %5480  ;;  %v5475_v34 = vpop.xlane.xlu0 %5474 }
 0x803   :  { %v5493_v3 = vpop.xlane.xlu1 %5492  ;;  %v5487_v48 = vpop.xlane.xlu0 %5486 }
 0x804   :  { %v5600_v36 = vsel %vm72_vm0, %v5493_v3, 0.0 }
 0x807   :  { %v5505_v40 = vpop.xlane.xlu1 %5504  ;;  %v5499_v47 = vpop.xlane.xlu0 %5498 }
 0x80b   :  { %v5517_v41 = vpop.xlane.xlu1 %5516  ;;  %v5511_v27 = vpop.xlane.xlu0 %5510 }
 0x80f   :  { %v5529_v61 = vpop.xlane.xlu1 %5528  ;;  %v11923_v42 = vpop.xlane.xlu0 %5522 }
 0x813   :  { %v5442_v53 = vpop.xlane.xlu1 %5441  ;;  %v11926_v17 = vpop.xlane.xlu0 %5534 }
 0x814   :  { %v5537_v44 = vadd.f32 %v5536_v22, %v5442_v53 }
 0x816   :  { %v5538_v29 = vrot.slane %v5537_v44, 4 }
 0x817   :  { %v5454_v0 = vpop.xlane.xlu1 %5453  ;;  %v5448_v45 = vpop.xlane.xlu0 %5447 }
 0x818   :  { %v5553_v43 = vadd.f32 %v5552_v55, %v5454_v0  ;;  %v5545_v50 = vadd.f32 %v5544_v38, %v5448_v45  ;;  %v5539_v19 = vadd.f32 %v5538_v29, %v5537_v44  ;;  %v5584_v44 = vsel %vm72_vm0, %v5481_v2, 0.0 }
 0x819   :  { %v5576_v29 = vsel %vm72_vm0, %v5475_v34, 0.0  ;;  %v5616_v2 = vsel %vm72_vm0, %v5505_v40, 0.0 }
 0x81a   :  { %v5554_v56 = vrot.slane %v5553_v43, 4  ;;  %v5546_v62 = vrot.slane %v5545_v50, 4  ;;  %v5540_v37 = vrot.slane %v5539_v19, 2 }
 0x81b   :  { %v5466_v32 = vpop.xlane.xlu1 %5465  ;;  %v5460_v24 = vpop.xlane.xlu0 %5459 }
 0x81c   :  { %v5555_v57 = vadd.f32 %v5554_v56, %v5553_v43  ;;  %v5569_v22 = vadd.f32 %v5568_v9, %v5466_v32  ;;  %v5547_v53 = vadd.f32 %v5546_v62, %v5545_v50  ;;  %v5561_v25 = vadd.f32 %v5560_v58, %v5460_v24 }
 0x81d   :  { %v5592_v43 = vsel %vm72_vm0, %v5487_v48, 0.0  ;;  %v5541_v50 = vadd.f32 %v5540_v37, %v5539_v19  ;;  %v5624_v48 = vsel %vm72_vm0, %v5511_v27, 0.0 }
 0x81e   :  { %v5570_v60 = vrot.slane %v5569_v22, 4  ;;  %v5556_v51 = vrot.slane %v5555_v57, 2  ;;  %v5562_v52 = vrot.slane %v5561_v25, 4  ;;  %v5548_v26 = vrot.slane %v5547_v53, 2 }
 0x81f   :  { %v5478_v13 = vpop.xlane.xlu1 %5477  ;;  %v5472_v55 = vpop.xlane.xlu0 %5471  ;;  %v5542_v19 = vrot.slane %v5541_v50, 1 }
 0x820   :  { %v5571_v38 = vadd.f32 %v5570_v60, %v5569_v22  ;;  %v5563_v0 = vadd.f32 %v5562_v52, %v5561_v25  ;;  %v5585_v45 = vadd.f32 %v5584_v44, %v5478_v13  ;;  %v5577_v59 = vadd.f32 %v5576_v29, %v5472_v55 }
 0x821   :  { %v5557_v62 = vadd.f32 %v5556_v51, %v5555_v57  ;;  %v5608_v60 = vsel %vm72_vm0, %v5499_v47, 0.0  ;;  %v5632_v52 = vsel %vm72_vm0, %v5517_v41, 0.0  ;;  %v5549_v25 = vadd.f32 %v5548_v26, %v5547_v53 }
 0x822   :  { %v5572_v56 = vrot.slane %v5571_v38, 2  ;;  %v5564_v9 = vrot.slane %v5563_v0, 2  ;;  %v5586_v32 = vrot.slane %v5585_v45, 4  ;;  %v5578_v24 = vrot.slane %v5577_v59, 4 }
 0x823   :  { %v5490_v58 = vpop.xlane.xlu1 %5489  ;;  %v5484_v16 = vpop.xlane.xlu0 %5483  ;;  %v5648_v57 = vsel %vm72_vm0, %v5529_v61, 0.0  ;;  %v5558_v51 = vrot.slane %v5557_v62, 1  ;;  %v5640_v47 = vsel %vm72_vm0, %v11923_v42, 0.0  ;;  %v5550_v27 = vrot.slane %v5549_v25, 1 }
 0x824   :  { %v5601_v13 = vadd.f32 %v5600_v36, %v5490_v58  ;;  %v5573_v34 = vadd.f32 %v5572_v56, %v5571_v38  ;;  %v5587_v3 = vadd.f32 %v5586_v32, %v5585_v45  ;;  %v5579_v22 = vadd.f32 %v5578_v24, %v5577_v59 }
 0x825   :  { %v5565_v55 = vadd.f32 %v5564_v9, %v5563_v0  ;;  %v5593_v29 = vadd.f32 %v5592_v43, %v5484_v16  ;;  %v5656_v59 = vsel %vm72_vm0, %v11926_v17, 0.0  ;;  %v5543_v45 = vadd.f32 %v5542_v19, %v5541_v50 }
 0x826   :  { %v5602_v37 = vrot.slane %v5601_v13, 4  ;;  %v5588_v44 = vrot.slane %v5587_v3, 2  ;;  %v5574_v26 = vrot.slane %v5573_v34, 1  ;;  %v5580_v61 = vrot.slane %v5579_v22, 2 }
 0x827   :  { %v5502_v40 = vpop.xlane.xlu1 %5501  ;;  %v5496_v6 = vpop.xlane.xlu0 %5495  ;;  %v5559_v9 = vadd.f32 %v5558_v51, %v5557_v62  ;;  %v5566_v16 = vrot.slane %v5565_v55, 1  ;;  %v5594_v32 = vrot.slane %v5593_v29, 4 }
 0x828   :  { %v5603_v41 = vadd.f32 %v5602_v37, %v5601_v13  ;;  %v5617_v53 = vadd.f32 %v5616_v2, %v5502_v40  ;;  %v5609_v38 = vadd.f32 %v5608_v60, %v5496_v6  ;;  %v11945_v43 = vadd.f32 %v5588_v44, %v5587_v3 }
 0x829   :  { %v5551_v13 = vadd.f32 %v5550_v27, %v5549_v25  ;;  %v5575_v17 = vadd.f32 %v5574_v26, %v5573_v34  ;;  %v5581_v37 = vadd.f32 %v5580_v61, %v5579_v22  ;;  %v5567_v20 = vadd.f32 %v5566_v16, %v5565_v55 }
 0x82a   :  { %v5604_v36 = vrot.slane %v5603_v41, 2  ;;  %v5618_v56 = vrot.slane %v5617_v53, 4  ;;  %v5610_v0 = vrot.slane %v5609_v38, 4  ;;  %v5590_v62 = vrot.slane %v11945_v43, 1 }
 0x82b   :  { %v5514_v24 = vpop.xlane.xlu1 %5513  ;;  %v5508_v42 = vpop.xlane.xlu0 %5507  ;;  %v5595_v3 = vadd.f32 %v5594_v32, %v5593_v29 }
 0x82c   :  { %v5605_v58 = vadd.f32 %v5604_v36, %v5603_v41  ;;  %v5619_v2 = vadd.f32 %v5618_v56, %v5617_v53  ;;  %v5611_v6 = vadd.f32 %v5610_v0, %v5609_v38  ;;  %v5633_v60 = vadd.f32 %v5632_v52, %v5514_v24 }
 0x82d   :  { %v5625_v40 = vadd.f32 %v5624_v48, %v5508_v42  ;;  %v5582_v52 = vrot.slane %v5581_v37, 1  ;;  %v5596_v36 = vrot.slane %v5595_v3, 2 }
 0x82e   :  { %v5606_v8 = vrot.slane %v5605_v58, 1  ;;  %v5620_v50 = vrot.slane %v5619_v2, 2  ;;  %v5612_v19 = vrot.slane %v5611_v6, 2  ;;  %v5634_v7 = vrot.slane %v5633_v60, 4 }
 0x82f   :  { %v5626_v51 = vrot.slane %v5625_v40, 4  ;;  %v5526_v44 = vpop.xlane.xlu1 %5525  ;;  %v5520_v33 = vpop.xlane.xlu0 %5519 }
 0x830   :  { %v5607_v30 = vadd.f32 %v5606_v8, %v5605_v58  ;;  %v5621_v41 = vadd.f32 %v5620_v50, %v5619_v2  ;;  %v5613_v53 = vadd.f32 %v5612_v19, %v5611_v6  ;;  %v5635_v38 = vadd.f32 %v5634_v7, %v5633_v60 }
 0x831   :  { %v5627_v25 = vadd.f32 %v5626_v51, %v5625_v40  ;;  %v5649_v34 = vadd.f32 %v5648_v57, %v5526_v44  ;;  %v5641_v22 = vadd.f32 %v5640_v47, %v5520_v33 }
 0x832   :  { %v5664_v48 = vadd.f32 %v5607_v30, %v5543_v45  ;;  %v5622_v27 = vrot.slane %v5621_v41, 1  ;;  %v5614_v26 = vrot.slane %v5613_v53, 1  ;;  %v5636_v61 = vrot.slane %v5635_v38, 2 }
 0x833   :  { %v5628_v55 = vrot.slane %v5627_v25, 2  ;;  %v5650_v56 = vrot.slane %v5649_v34, 4  ;;  %v5642_v0 = vrot.slane %v5641_v22, 4  ;;  %v5532_v29 = vpop.xlane.xlu0 %5531 }
 0x834   :  { %v5672_v16 = vmul.f32 0.0061728396, %v5664_v48  ;;  %v5623_v32 = vadd.f32 %v5622_v27, %v5621_v41  ;;  %v5615_v24 = vadd.f32 %v5614_v26, %v5613_v53  ;;  %v5637_v8 = vadd.f32 %v5636_v61, %v5635_v38 }
 0x835   :  { %v5629_v42 = vadd.f32 %v5628_v55, %v5627_v25  ;;  %v5651_v58 = vadd.f32 %v5650_v56, %v5649_v34  ;;  %v5643_v7 = vadd.f32 %v5642_v0, %v5641_v22  ;;  %v5657_v2 = vadd.f32 %v5656_v59, %v5532_v29 }
 0x836   :  { %v5680_v6 = vadd.f32 1e-05, %v5672_v16  ;;  %v5666_v57 = vadd.f32 %v5623_v32, %v5559_v9  ;;  %v5665_v33 = vadd.f32 %v5615_v24, %v5551_v13  ;;  %v5638_v30 = vrot.slane %v5637_v8, 1 }
 0x837   :  { %v5630_v47 = vrot.slane %v5629_v42, 1  ;;  %v5652_v45 = vrot.slane %v5651_v58, 2  ;;  %v5644_v60 = vrot.slane %v5643_v7, 2  ;;  %v5658_v40 = vrot.slane %v5657_v2, 4 }
 0x838   :  { %5884 = vrsqrt.f32 %v5680_v6  ;;  %v5674_v50 = vmul.f32 0.0061728396, %v5666_v57  ;;  %v5673_v19 = vmul.f32 0.0061728396, %v5665_v33  ;;  %v5639_v51 = vadd.f32 %v5638_v30, %v5637_v8 }
 0x839   :  { %v5631_v44 = vadd.f32 %v5630_v47, %v5629_v42  ;;  %v5653_v41 = vadd.f32 %v5652_v45, %v5651_v58  ;;  %v5645_v53 = vadd.f32 %v5644_v60, %v5643_v7  ;;  %v5659_v38 = vadd.f32 %v5658_v40, %v5657_v2 }
 0x83a   :  { %v5597_v25 = vadd.f32 %v5596_v36, %v5595_v3  ;;  %v5682_v34 = vadd.f32 1e-05, %v5674_v50  ;;  %v5681_v22 = vadd.f32 1e-05, %v5673_v19  ;;  %v5668_v59 = vadd.f32 %v5639_v51, %v5575_v17 }
 0x83b   :  { %v5667_v48 = vadd.f32 %v5631_v44, %v5567_v20  ;;  %v5654_v9 = vrot.slane %v5653_v41, 1  ;;  %v5646_v13 = vrot.slane %v5645_v53, 1  ;;  %v5660_v27 = vrot.slane %v5659_v38, 2 }
 0x83c   :  { %v5591_v26 = vadd.f32 %v5590_v62, %v11945_v43  ;;  %v5583_v61 = vadd.f32 %v5582_v52, %v5581_v37  ;;  %5886 = vrsqrt.f32 %v5682_v34  ;;  %v5676_v55 = vmul.f32 0.0061728396, %v5668_v59 }
 0x83d   :  { %5888 = vrsqrt.f32 %v5681_v22  ;;  %v5675_v56 = vmul.f32 0.0061728396, %v5667_v48  ;;  %v5655_v0 = vadd.f32 %v5654_v9, %v5653_v41  ;;  %v5647_v29 = vadd.f32 %v5646_v13, %v5645_v53 }
 0x83e   :  { %v5598_v16 = vrot.slane %v5597_v25, 1  ;;  %v5684_v32 = vadd.f32 1e-05, %v5676_v55  ;;  %v5661_v24 = vadd.f32 %v5660_v27, %v5659_v38 }
 0x83f   :  { %v5683_v3 = vadd.f32 1e-05, %v5675_v56  ;;  %v5670_v36 = vadd.f32 %v5655_v0, %v5591_v26  ;;  %v5669_v8 = vadd.f32 %v5647_v29, %v5583_v61 }
 0x840   :  { %5890 = vrsqrt.f32 %v5684_v32  ;;  %v5662_v20 = vrot.slane %v5661_v24, 1  ;;  %v5599_v58 = vadd.f32 %v5598_v16, %v5597_v25 }
 0x841   :  { %5892 = vrsqrt.f32 %v5683_v3  ;;  %v5678_v17 = vmul.f32 0.0061728396, %v5670_v36  ;;  %v5677_v42 = vmul.f32 0.0061728396, %v5669_v8  ;;  %v13105_v3 = vld [vmem:[#allocation56_spill] sm:$0xff]  ;;  %v13106_v8 = vld [vmem:[#allocation50_spill] sm:$0xff] }
 0x842   :  { %v5663_v43 = vadd.f32 %v5662_v20, %v5661_v24 }
 0x843   :  { %v5686_v37 = vadd.f32 1e-05, %v5678_v17  ;;  %v5685_v62 = vadd.f32 1e-05, %v5677_v42 }
 0x844   :  { %v5671_v52 = vadd.f32 %v5663_v43, %v5599_v58 }
 0x845   :  { %v5885_v7 = vpop.eup %5884  ;;  %5894 = vrsqrt.f32 %v5686_v37 }
 0x846   :  { %v5696_v2 = vmul.f32 %v5885_v7, %v11796_v11  ;;  %v5697_v6 = vmul.f32 %v5885_v7, %v11668_v1  ;;  %v5712_v57 = vmul.f32 %v5885_v7, %v11852_v14  ;;  %v5713_v33 = vmul.f32 %v5885_v7, %v11720_v21  ;;  %v13108_v7 = vld [vmem:[#allocation47_spill] sm:$0xff] }
 0x847   :  { %5896 = vrsqrt.f32 %v5685_v62  ;;  %v5679_v30 = vmul.f32 0.0061728396, %v5671_v52  ;;  %v13107_v62 = vld [vmem:[#allocation54_spill] sm:$0xff] }
 0x848   :  { %v5728_v47 = vmax.f32 %v5696_v2, 0.0  ;;  %v5729_v45 = vmax.f32 %v5697_v6, 0.0  ;;  %v5744_v60 = vmax.f32 %v5712_v57, 0.0  ;;  %v5745_v40 = vmax.f32 %v5713_v33, 0.0  ;;  %v13109_v6 = vld [vmem:[#allocation57_spill] sm:$0xff]  ;;  %v13110_v33 = vld [vmem:[#allocation51_spill] sm:$0xff] }
 0x849   :  { %v5887_v50 = vpop.eup %5886  ;;  %v5687_v19 = vadd.f32 1e-05, %v5679_v30 }
 0x84a   :  { %v5889_v51 = vpop.eup %5888  ;;  %5760 = vst.msk [vmem:[%s12112_s3] sm:$0xff] %vm5134_vm15, %v5728_v47  ;;  %5776 = vst.msk [vmem:[%s12112_s3 + $0x80] sm:$0xff] %vm5134_vm15, %v5744_v60  ;;  %v5700_v1 = vmul.f32 %v5887_v50, %v11815_v54  ;;  %v5701_v21 = vmul.f32 %v5887_v50, %v11680_v23  ;;  %v5716_v11 = vmul.f32 %v5887_v50, %v11867_v4 }
 0x84b   :  { %5761 = vst.msk [vmem:[%s12112_s3 + $0x8] sm:$0x1] %vm5138_vm12, %v5729_v45  ;;  %5777 = vst.msk [vmem:[%s12112_s3 + $0x88] sm:$0x1] %vm5138_vm12, %v5745_v40  ;;  %v5717_v14 = vmul.f32 %v5887_v50, %v11744_v12  ;;  %v5698_v44 = vmul.f32 %v5889_v51, %v11819_v5  ;;  %v5699_v41 = vmul.f32 %v5889_v51, %v11685_v10  ;;  %5898 = vrsqrt.f32 %v5687_v19  ;;  %v13111_v19 = vld [vmem:[#allocation55_spill] sm:$0xff] }
 0x84c   :  { %v5714_v53 = vmul.f32 %v5889_v51, %v11875_v35  ;;  %v5715_v38 = vmul.f32 %v5889_v51, %v11756_v18  ;;  %v5732_v25 = vmax.f32 %v5700_v1, 0.0  ;;  %v5733_v34 = vmax.f32 %v5701_v21, 0.0  ;;  %v13102_v35 = vld [vmem:[#allocation49_spill] sm:$0xff]  ;;  %v13112_v1 = vld [vmem:[#allocation48_spill] sm:$0xff] }
 0x84d   :  { %v5748_v22 = vmax.f32 %v5716_v11, 0.0  ;;  %v5749_v59 = vmax.f32 %v5717_v14, 0.0  ;;  %v5891_v48 = vpop.eup %5890  ;;  %v5730_v54 = vmax.f32 %v5698_v44, 0.0  ;;  %v5731_v9 = vmax.f32 %v5699_v41, 0.0  ;;  %v13113_v11 = vld [vmem:[#allocation58_spill] sm:$0xff]  ;;  %v13114_v44 = vld [vmem:[#allocation52_spill] sm:$0xff] }
 0x84e   :  { %v5746_v23 = vmax.f32 %v5714_v53, 0.0  ;;  %v5747_v13 = vmax.f32 %v5715_v38, 0.0  ;;  %v5893_v4 = vpop.eup %5892  ;;  %5764 = vst.msk [vmem:[%s12112_s3 + $0x20] sm:$0xff] %vm5134_vm15, %v5732_v25  ;;  %v5704_v10 = vmul.f32 %v5891_v48, %v11824_v15  ;;  %v5705_v12 = vmul.f32 %v5891_v48, %v11700_v39 }
 0x84f   :  { %5765 = vst.msk [vmem:[%s12112_s3 + $0x28] sm:$0x1] %vm5138_vm12, %v5733_v34  ;;  %5781 = vst.msk [vmem:[%s12112_s3 + $0xa8] sm:$0x1] %vm5138_vm12, %v5749_v59  ;;  %v5720_v18 = vmul.f32 %v5891_v48, %v11880_v28  ;;  %v5721_v5 = vmul.f32 %v5891_v48, %v11769_v63  ;;  %v5702_v39 = vmul.f32 %v5893_v4, %v11833_v46 }
 0x850   :  { %5780 = vst.msk [vmem:[%s12112_s3 + $0xa0] sm:$0xff] %vm5134_vm15, %v5748_v22  ;;  %5762 = vst.msk [vmem:[%s12112_s3 + $0x10] sm:$0xff] %vm5134_vm15, %v5730_v54  ;;  %v5703_v63 = vmul.f32 %v5893_v4, %v11706_v31  ;;  %v5718_v15 = vmul.f32 %v5893_v4, %v11889_v49  ;;  %v5719_v28 = vmul.f32 %v5893_v4, %v13102_v35  ;;  %v5736_v27 = vmax.f32 %v5704_v10, 0.0  ;;  %v13103_v31 = vld [vmem:[#allocation53_spill] sm:$0xff]  ;;  %v13104_v49 = vld [vmem:[#allocation46_spill] sm:$0xff] }
 0x851   :  { %5763 = vst.msk [vmem:[%s12112_s3 + $0x18] sm:$0x1] %vm5138_vm12, %v5731_v9  ;;  %5779 = vst.msk [vmem:[%s12112_s3 + $0x98] sm:$0x1] %vm5138_vm12, %v5747_v13  ;;  %v5737_v26 = vmax.f32 %v5705_v12, 0.0  ;;  %v5752_v61 = vmax.f32 %v5720_v18, 0.0 }
 0x852   :  { %5778 = vst.msk [vmem:[%s12112_s3 + $0x90] sm:$0xff] %vm5134_vm15, %v5746_v23  ;;  %v5753_v55 = vmax.f32 %v5721_v5, 0.0  ;;  %v5734_v56 = vmax.f32 %v5702_v39, 0.0  ;;  %v5735_v0 = vmax.f32 %v5703_v63, 0.0  ;;  %v5750_v29 = vmax.f32 %v5718_v15, 0.0  ;;  %v5895_v32 = vpop.eup %5894  ;;  %5768 = vst.msk [vmem:[%s12112_s3 + $0x40] sm:$0xff] %vm5134_vm15, %v5736_v27 }
 0x853   :  { %v5751_v16 = vmax.f32 %v5719_v28, 0.0  ;;  %5769 = vst.msk [vmem:[%s12112_s3 + $0x48] sm:$0x1] %vm5138_vm12, %v5737_v26  ;;  %v5708_v46 = vmul.f32 %v5895_v32, %v13103_v31  ;;  %v5709_v24 = vmul.f32 %v5895_v32, %v13104_v49  ;;  %v5724_v36 = vmul.f32 %v5895_v32, %v13105_v3 }
 0x854   :  { %5784 = vst.msk [vmem:[%s12112_s3 + $0xc0] sm:$0xff] %vm5134_vm15, %v5752_v61  ;;  %5766 = vst.msk [vmem:[%s12112_s3 + $0x30] sm:$0xff] %vm5134_vm15, %v5734_v56  ;;  %v5725_v20 = vmul.f32 %v5895_v32, %v13106_v8  ;;  %v5897_v17 = vpop.eup %5896 }
 0x855   :  { %5785 = vst.msk [vmem:[%s12112_s3 + $0xc8] sm:$0x1] %vm5138_vm12, %v5753_v55  ;;  %5767 = vst.msk [vmem:[%s12112_s3 + $0x38] sm:$0x1] %vm5138_vm12, %v5735_v0  ;;  %v5740_v42 = vmax.f32 %v5708_v46, 0.0  ;;  %v5741_v58 = vmax.f32 %v5709_v24, 0.0  ;;  %v5706_v52 = vmul.f32 %v5897_v17, %v13107_v62  ;;  %v5707_v2 = vmul.f32 %v5897_v17, %v13108_v7 }
 0x856   :  { %5782 = vst.msk [vmem:[%s12112_s3 + $0xb0] sm:$0xff] %vm5134_vm15, %v5750_v29  ;;  %v5756_v43 = vmax.f32 %v5724_v36, 0.0  ;;  %v5757_v37 = vmax.f32 %v5725_v20, 0.0  ;;  %v5722_v57 = vmul.f32 %v5897_v17, %v13109_v6  ;;  %v5723_v30 = vmul.f32 %v5897_v17, %v13110_v33 }
 0x857   :  { %5783 = vst.msk [vmem:[%s12112_s3 + $0xb8] sm:$0x1] %vm5138_vm12, %v5751_v16  ;;  %5773 = vst.msk [vmem:[%s12112_s3 + $0x68] sm:$0x1] %vm5138_vm12, %v5741_v58  ;;  %v5738_v47 = vmax.f32 %v5706_v52, 0.0  ;;  %v5739_v45 = vmax.f32 %v5707_v2, 0.0 }
 0x858   :  { %5772 = vst.msk [vmem:[%s12112_s3 + $0x60] sm:$0xff] %vm5134_vm15, %v5740_v42  ;;  %5788 = vst.msk [vmem:[%s12112_s3 + $0xe0] sm:$0xff] %vm5134_vm15, %v5756_v43  ;;  %v5754_v60 = vmax.f32 %v5722_v57, 0.0  ;;  %v5755_v40 = vmax.f32 %v5723_v30, 0.0  ;;  %v5899_v50 = vpop.eup %5898 }
 0x859   :  { %5789 = vst.msk [vmem:[%s12112_s3 + $0xe8] sm:$0x1] %vm5138_vm12, %v5757_v37  ;;  %5771 = vst.msk [vmem:[%s12112_s3 + $0x58] sm:$0x1] %vm5138_vm12, %v5739_v45  ;;  %v5710_v51 = vmul.f32 %v5899_v50, %v13111_v19  ;;  %v5711_v21 = vmul.f32 %v5899_v50, %v13112_v1  ;;  %v5726_v14 = vmul.f32 %v5899_v50, %v13113_v11 }
 0x85a   :  { %5770 = vst.msk [vmem:[%s12112_s3 + $0x50] sm:$0xff] %vm5134_vm15, %v5738_v47  ;;  %5786 = vst.msk [vmem:[%s12112_s3 + $0xd0] sm:$0xff] %vm5134_vm15, %v5754_v60  ;;  %v5727_v41 = vmul.f32 %v5899_v50, %v13114_v44 }
 0x85b   :  { %5787 = vst.msk [vmem:[%s12112_s3 + $0xd8] sm:$0x1] %vm5138_vm12, %v5755_v40  ;;  %v5742_v53 = vmax.f32 %v5710_v51, 0.0  ;;  %v5743_v38 = vmax.f32 %v5711_v21, 0.0  ;;  %v5758_v25 = vmax.f32 %v5726_v14, 0.0 }
 0x85c   :  { %v5759_v34 = vmax.f32 %v5727_v41, 0.0 }
 0x85d   :  { %5774 = vst.msk [vmem:[%s12112_s3 + $0x70] sm:$0xff] %vm5134_vm15, %v5742_v53  ;;  %5790 = vst.msk [vmem:[%s12112_s3 + $0xf0] sm:$0xff] %vm5134_vm15, %v5758_v25 }
 0x85e   :  { %5775 = vst.msk [vmem:[%s12112_s3 + $0x78] sm:$0x1] %vm5138_vm12, %v5743_v38  ;;  %5791 = vst.msk [vmem:[%s12112_s3 + $0xf8] sm:$0x1] %vm5138_vm12, %v5759_v34 }
 0x85f   :  { %5932 = dma.done.wait [#allocation4], 4096  }
 0x860   :  { %5933 = vsyncadd [#allocation4], 4294963200 }
 0x861   :  { %5811 = vsyncpa [#allocation4], 1 }

</bundles_post_ra>
